<compile_context>
chip_gen: v7x
topology: tpu7x:2x2x1
jax: 0.10.0
libtpu: 0.0.40
codegen_flags: <defaults>
</compile_context>

<pallas_src>
import functools

import jax
import jax.numpy as jnp
from jax.experimental import pallas as pl
from jax.experimental.pallas import tpu as pltpu

NUM_EDGE_TYPES = 3
TIMESTEPS = 2
LANE = 128
MXU_ROWS = 256  # pad node dim to this (v6e/v7x tile width; superset of v5e's 128)


def _round_up(x, m):
    return ((x + m - 1) // m) * m


def _vmem_spec():
    return pl.BlockSpec(memory_space=pltpu.MemorySpace.VMEM)


def _vmem_limit_bytes():
    # Generation-aware scoped-VMEM limit: defaults are only 16/32/32 MiB on
    # v5e/v6e/v7x despite 128/128/64 MiB physical. Leave ~25% headroom.
    phys = 64 * 1024 * 1024
    try:
        info = pltpu.get_tpu_info()
        phys = int(getattr(info, "vmem_capacity_bytes", phys) or phys)
    except Exception:
        pass
    return int(phys * 3 // 4)


# ----------------------------------------------------------------------------
# Fused kernel: T GGNN steps + gated readout + segment-sum + aux readout
# ----------------------------------------------------------------------------
def fused_ggnn_kernel(raw_in_ref, adj_ref, graph_ids_ref, aux_ref,
                      wmsg_ref, bmsg_ref, wih_ref, bih_ref, whh_ref, bhh_ref,
                      wg_out_ref, wg_in_ref, bg_ref, wt_ref, bt_ref,
                      aw1_logit_ref, aw1_aux_ref, ab1_ref, aw2_ref, ab2_ref,
                      nodewise_ref, graphwise_ref, logits_ref,
                      *, hidden, num_graphs, timesteps, num_edge_types):
    D = hidden
    f32 = jnp.float32
    bf16 = jnp.bfloat16

    h_in = raw_in_ref[...]                                   # [Np, D] f32
    num_nodes = h_in.shape[0]

    # Packed weights arrive in bf16 (MXU-native, half the VMEM footprint).
    wmsg = wmsg_ref[...]                                     # [D, E*D] bf16
    wih = wih_ref[...]                                       # [D, 3D]  bf16
    whh = whh_ref[...]                                       # [D, 3D]  bf16
    # Bias broadcasts hoisted out of the unrolled timestep loop (no CSE of
    # broadcast_in_dim in JAX); kept in f32.
    bmsg = jnp.broadcast_to(bmsg_ref[...], (num_nodes, num_edge_types * D))
    bih = jnp.broadcast_to(bih_ref[...], (num_nodes, 3 * D))
    bhh = jnp.broadcast_to(bhh_ref[...], (num_nodes, 3 * D))

    # ---- T propagation steps: message passing + PyTorch-order GRUCell ----
    # TODO(synk): switch to lax.fori_loop(..., unroll=True) carrying h if
    # TIMESTEPS grows beyond ~4 (a static Python loop does not bound live ranges).
    h = h_in
    for _ in range(timesteps):
        h_bf = h.astype(bf16)
        transformed = jnp.dot(h_bf, wmsg, preferred_element_type=f32) + bmsg   # [Np, E*D]
        tr_bf = transformed.astype(bf16)
        # bf16 adjacency goes straight to the MXU — no f32 upcast copies.
        msg = jnp.dot(adj_ref[0], tr_bf[:, 0:D], preferred_element_type=f32)
        for e in range(1, num_edge_types):
            msg = msg + jnp.dot(adj_ref[e], tr_bf[:, e * D:(e + 1) * D],
                                preferred_element_type=f32)
        i_all = jnp.dot(msg.astype(bf16), wih, preferred_element_type=f32) + bih  # [Np, 3D]
        h_all = jnp.dot(h_bf, whh, preferred_element_type=f32) + bhh              # [Np, 3D]
        # Gate nonlinearity kept in f32 (v5e has no bf16 VPU/EUP).
        r = jax.nn.sigmoid(i_all[:, 0:D] + h_all[:, 0:D])
        z = jax.nn.sigmoid(i_all[:, D:2 * D] + h_all[:, D:2 * D])
        n = jnp.tanh(i_all[:, 2 * D:3 * D] + r * h_all[:, 2 * D:3 * D])
        h = (1.0 - z) * n + z * h
    h_out = h

    # ---- gated readout (concat avoided: wg pre-split into out/in halves) ----
    h_out_bf = h_out.astype(bf16)
    h_in_bf = h_in.astype(bf16)
    gate = jax.nn.sigmoid(
        jnp.dot(h_out_bf, wg_out_ref[...], preferred_element_type=f32)
        + jnp.dot(h_in_bf, wg_in_ref[...], preferred_element_type=f32)
        + bg_ref[...])
    tx = jnp.dot(h_out_bf, wt_ref[...], preferred_element_type=f32) + bt_ref[...]
    nodewise = gate * tx                                                     # [Np, C_pad]
    nodewise_ref[...] = nodewise

    # ---- graph-wise segment sum: one-hot built in-kernel from graph ids ----
    # Padding nodes carry graph_id == -1, so they match no graph row.
    seg = jax.lax.broadcasted_iota(jnp.int32, (num_graphs, num_nodes), 0)
    onehot = (graph_ids_ref[...] == seg).astype(f32)                         # [G, Np]
    graphwise = jnp.dot(onehot, nodewise, preferred_element_type=f32)        # [G, C_pad]
    graphwise_ref[...] = graphwise

    # ---- auxiliary readout: Linear -> ReLU -> Linear (dropout = eval identity) ----
    hid = jnp.maximum(
        jnp.dot(graphwise, aw1_logit_ref[...], preferred_element_type=f32)
        + jnp.dot(aux_ref[...], aw1_aux_ref[...], preferred_element_type=f32)
        + ab1_ref[...], 0.0)
    logits_ref[...] = (jnp.dot(hid, aw2_ref[...], preferred_element_type=f32)
                       + ab2_ref[...])


# ----------------------------------------------------------------------------
# Parameter init (PyTorch-module-shaped params; fusion/padding done at call time)
# ----------------------------------------------------------------------------
def init_params(key, vocab_size, emb_dim, hidden, num_classes, aux_len, aux_hidden):
    assert hidden == emb_dim + 2, "hidden must be emb_dim + selector(2)"
    ks = jax.random.split(key, 12)
    scale = 0.1
    # Embedding table zero-padded to the lane-dense hidden width; selector
    # embedding stored as a padded [2, hidden] row with its values in the last
    # two columns, so raw_in = gather(emb) + gather(sel) (no misaligned concat).
    emb_core = scale * jax.random.normal(ks[0], (vocab_size, emb_dim), jnp.float32)
    emb_table = jnp.pad(emb_core, ((0, 0), (0, hidden - emb_dim)))
    sel_core = jnp.array([[0.0, 50.0], [50.0, 0.0]], jnp.float32)  # ProGraML, scaled by 50
    sel_table = jnp.pad(sel_core, ((0, 0), (emb_dim, hidden - emb_dim - 2)))
    params = {
        "emb_table": emb_table,
        "sel_table": sel_table,
        "wmsg": scale * jax.random.normal(ks[1], (NUM_EDGE_TYPES, hidden, hidden), jnp.float32),
        "bmsg": scale * jax.random.normal(ks[2], (NUM_EDGE_TYPES, 1, hidden), jnp.float32),
        "wih": scale * jax.random.normal(ks[3], (3, hidden, hidden), jnp.float32),
        "whh": scale * jax.random.normal(ks[4], (3, hidden, hidden), jnp.float32),
        "bih": scale * jax.random.normal(ks[5], (3, 1, hidden), jnp.float32),
        "bhh": scale * jax.random.normal(ks[6], (3, 1, hidden), jnp.float32),
        "wg": scale * jax.random.normal(ks[7], (2 * hidden, num_classes), jnp.float32),
        "bg": jnp.zeros((1, num_classes), jnp.float32),
        "wt": scale * jax.random.normal(ks[8], (hidden, num_classes), jnp.float32),
        "bt": jnp.zeros((1, num_classes), jnp.float32),
        "aux_w1": scale * jax.random.normal(ks[9], (num_classes + aux_len, aux_hidden), jnp.float32),
        "aux_b1": jnp.zeros((1, aux_hidden), jnp.float32),
        "aux_w2": scale * jax.random.normal(ks[10], (aux_hidden, num_classes), jnp.float32),
        "aux_b2": jnp.zeros((1, num_classes), jnp.float32),
    }
    return params


def build_dense_adjacency(edge_lists, num_nodes):
    """edge_lists: list (len=NUM_EDGE_TYPES) of int32 [num_edges, 2] (src, dst)."""
    adjs = []
    for el in edge_lists:
        adj = jnp.zeros((num_nodes, num_nodes), jnp.float32)
        adj = adj.at[el[:, 1], el[:, 0]].add(1.0)  # adj[dst, src], counts multi-edges
        adjs.append(adj)
    adj = jnp.stack(adjs, axis=0)
    # bf16 shipping of the adjacency is exact only for integer multiplicities <= 256.
    assert float(jnp.max(adj)) <= 256.0, "edge multiplicity > 256: bf16 adj would round"
    return adj


# ----------------------------------------------------------------------------
# Full forward (glue: embedding gather, weight fusion/padding, argmax targets)
# ----------------------------------------------------------------------------
@functools.partial(jax.jit, static_argnames=("num_graphs",))
def ggnn_model_forward(params, vocab_ids, labels, adj, selector_ids,
                       num_graphs, graph_nodes_list, aux_in):
    # node_embeddings(vocab_ids, selector_ids): two lane-aligned 128-wide gathers
    # + add (emb table's last 2 cols are zero; sel table's first emb_dim cols are zero).
    raw_in = (jnp.take(params["emb_table"], vocab_ids, axis=0)
              + jnp.take(params["sel_table"], selector_ids, axis=0))          # [N, hidden]

    num_nodes, hidden = raw_in.shape
    num_classes = params["wt"].shape[1]
    aux_len = aux_in.shape[1]
    aux_hidden = params["aux_w1"].shape[1]
    c_pad = _round_up(num_classes, LANE)                          # lane-dense class dim
    n_pad = _round_up(num_nodes, MXU_ROWS)                        # fill MXU row tiles
    pad_n = n_pad - num_nodes

    def pad_cols(x):
        return jnp.pad(x, ((0, 0), (0, c_pad - x.shape[1])))

    # One-time weight fusion / zero-padding / bf16 casts (tiny XLA ops, under jit).
    wmsg_all = jnp.concatenate(list(params["wmsg"]), axis=1).astype(jnp.bfloat16)  # [D, E*D]
    bmsg_all = jnp.concatenate(list(params["bmsg"]), axis=1)                       # [1, E*D]
    wih_all = jnp.concatenate(list(params["wih"]), axis=1).astype(jnp.bfloat16)    # [D, 3D]
    bih_all = jnp.concatenate(list(params["bih"]), axis=1)                         # [1, 3D]
    whh_all = jnp.concatenate(list(params["whh"]), axis=1).astype(jnp.bfloat16)    # [D, 3D]
    bhh_all = jnp.concatenate(list(params["bhh"]), axis=1)                         # [1, 3D]

    wg_out = pad_cols(params["wg"][:hidden]).astype(jnp.bfloat16)  # [D, C_pad]
    wg_in = pad_cols(params["wg"][hidden:]).astype(jnp.bfloat16)   # [D, C_pad]
    bg = pad_cols(params["bg"])
    wt = pad_cols(params["wt"]).astype(jnp.bfloat16)
    bt = pad_cols(params["bt"])
    aw1_logit = jnp.pad(params["aux_w1"][:num_classes],
                        ((0, c_pad - num_classes), (0, 0)))        # [C_pad, aux_hidden]
    aw1_aux = params["aux_w1"][num_classes:]                       # [aux_len, aux_hidden]
    ab1 = params["aux_b1"]
    aw2 = pad_cols(params["aux_w2"])                               # [aux_hidden, C_pad]
    ab2 = pad_cols(params["aux_b2"])

    # Pad node dim: zero rows for raw_in / adj, graph_id = -1 so padded nodes
    # never enter the segment sum; adj zero rows/cols => no messages flow.
    raw_in_p = jnp.pad(raw_in, ((0, pad_n), (0, 0)))
    adj_p = jnp.pad(adj, ((0, 0), (0, pad_n), (0, pad_n)))
    graph_ids = jnp.pad(graph_nodes_list.astype(jnp.int32), (0, pad_n),
                        constant_values=-1).reshape(1, n_pad)
    adj_bf16 = adj_p.astype(jnp.bfloat16)   # exact for integer edge counts <= 256

    kernel = functools.partial(
        fused_ggnn_kernel, hidden=hidden, num_graphs=num_graphs,
        timesteps=TIMESTEPS, num_edge_types=NUM_EDGE_TYPES)

    # Advisory cost estimate so XLA schedules surrounding glue ops around the call.
    flops = 2 * TIMESTEPS * (n_pad * hidden * (NUM_EDGE_TYPES * hidden)      # h @ wmsg
                             + NUM_EDGE_TYPES * n_pad * n_pad * hidden       # adj GEMMs
                             + 2 * n_pad * hidden * (3 * hidden))            # GRU GEMMs
    flops += 2 * n_pad * hidden * c_pad * 3                                  # readout GEMMs
    flops += 2 * num_graphs * n_pad * c_pad                                  # segment sum
    flops += 2 * num_graphs * (c_pad + aux_len) * aux_hidden                 # aux layer 1
    flops += 2 * num_graphs * aux_hidden * c_pad                             # aux layer 2
    transcendentals = TIMESTEPS * 3 * n_pad * hidden + n_pad * c_pad
    bytes_accessed = (
        raw_in_p.size * 4 + adj_bf16.size * 2 + graph_ids.size * 4 + aux_in.size * 4
        + (wmsg_all.size + wih_all.size + whh_all.size) * 2
        + (bmsg_all.size + bih_all.size + bhh_all.size) * 4
        + (wg_out.size + wg_in.size + wt.size) * 2 + (bg.size + bt.size) * 4
        + (aw1_logit.size + aw1_aux.size + ab1.size + aw2.size + ab2.size) * 4
        + (n_pad * c_pad + 2 * num_graphs * c_pad) * 4)
    cost = pl.CostEstimate(flops=int(flops), transcendentals=int(transcendentals),
                           bytes_accessed=int(bytes_accessed))

    # TODO(synk): for large graphs, tile adj over (dst_block, src_block) with a
    # BlockSpec grid (>=512-row dst tiles, src/reduction axis last + "arbitrary",
    # accumulator output spec). Thresholds are generation-dependent: ~N>2500 on
    # 128 MiB v5e/v6e, ~N>1700 on 64 MiB v7x with bf16 adj — not needed here.
    # TODO(synk): for batched inference over many graphs, add a leading "parallel"
    # grid axis over graph batches so v7x shards it across its 2 TensorCores.
    nodewise_p, graphwise_p, logits_p = pl.pallas_call(
        kernel,
        out_shape=(jax.ShapeDtypeStruct((n_pad, c_pad), jnp.float32),
                   jax.ShapeDtypeStruct((num_graphs, c_pad), jnp.float32),
                   jax.ShapeDtypeStruct((num_graphs, c_pad), jnp.float32)),
        in_specs=[_vmem_spec() for _ in range(20)],
        out_specs=(_vmem_spec(), _vmem_spec(), _vmem_spec()),
        compiler_params=pltpu.CompilerParams(vmem_limit_bytes=_vmem_limit_bytes()),
        cost_estimate=cost,
    )(raw_in_p, adj_bf16, graph_ids, aux_in,
      wmsg_all, bmsg_all, wih_all, bih_all, whh_all, bhh_all,
      wg_out, wg_in, bg, wt, bt,
      aw1_logit, aw1_aux, ab1, aw2, ab2)

    # Slice back from padded node / lane-dense class dims (pads are not used).
    nodewise = nodewise_p[:num_nodes, :num_classes]
    graphwise = graphwise_p[:, :num_classes]
    logits = logits_p[:, :num_classes]

    targets = jnp.argmax(labels, axis=1)
    return targets, logits, graphwise, nodewise


if __name__ == "__main__":
    key = jax.random.PRNGKey(0)
    num_nodes = 64
    vocab_size = 100
    emb_dim = 126
    hidden = emb_dim + 2          # 128: lane-dense hidden (embedding + 2-dim selector)
    num_classes = 8
    num_graphs = 2
    aux_len = 4
    aux_hidden = 16
    edges_per_type = 96

    k_par, k_vocab, k_sel, k_edge, k_lab, k_aux = jax.random.split(key, 6)
    params = init_params(k_par, vocab_size, emb_dim, hidden,
                         num_classes, aux_len, aux_hidden)

    vocab_ids = jax.random.randint(k_vocab, (num_nodes,), 0, vocab_size, jnp.int32)
    selector_ids = jax.random.randint(k_sel, (num_nodes,), 0, 2, jnp.int32)
    edge_keys = jax.random.split(k_edge, NUM_EDGE_TYPES)
    edge_lists = [jax.random.randint(ek, (edges_per_type, 2), 0, num_nodes, jnp.int32)
                  for ek in edge_keys]
    adj = build_dense_adjacency(edge_lists, num_nodes)
    graph_nodes_list = jnp.concatenate(
        [jnp.zeros((num_nodes // 2,), jnp.int32),
         jnp.ones((num_nodes - num_nodes // 2,), jnp.int32)])
    labels = jax.random.normal(k_lab, (num_graphs, num_classes), jnp.float32)
    aux_in = jax.random.normal(k_aux, (num_graphs, aux_len), jnp.float32)

    targets, logits, graphwise, nodewise = ggnn_model_forward(
        params, vocab_ids, labels, adj, selector_ids,
        num_graphs, graph_nodes_list, aux_in)
    jax.block_until_ready((targets, logits, graphwise, nodewise))

    assert targets.shape == (num_graphs,)
    assert logits.shape == (num_graphs, num_classes)
    assert graphwise.shape == (num_graphs, num_classes)
    assert nodewise.shape == (num_nodes, num_classes)
    assert bool(jnp.isfinite(logits).all())
    assert bool(jnp.isfinite(graphwise).all())
    assert bool(jnp.isfinite(nodewise).all())
    # TODO(synk): Loss / Metrics / optimizer+LR-scheduler machinery is training-only
    # state and not part of the forward compute path, so it is not implemented.
    print("KERNEL_OK")
</pallas_src>

<mosaic_0001>
module attributes {stable_mosaic.version = 11 : i64} {
  func.func @fused_ggnn_kernel(%arg0: memref<256x128xf32, #tpu.memory_space<vmem>>, %arg1: memref<3x256x256xbf16, #tpu.memory_space<vmem>>, %arg2: memref<1x256xi32, #tpu.memory_space<vmem>>, %arg3: memref<2x4xf32, #tpu.memory_space<vmem>>, %arg4: memref<128x384xbf16, #tpu.memory_space<vmem>>, %arg5: memref<1x384xf32, #tpu.memory_space<vmem>>, %arg6: memref<128x384xbf16, #tpu.memory_space<vmem>>, %arg7: memref<1x384xf32, #tpu.memory_space<vmem>>, %arg8: memref<128x384xbf16, #tpu.memory_space<vmem>>, %arg9: memref<1x384xf32, #tpu.memory_space<vmem>>, %arg10: memref<128x128xbf16, #tpu.memory_space<vmem>>, %arg11: memref<128x128xbf16, #tpu.memory_space<vmem>>, %arg12: memref<1x128xf32, #tpu.memory_space<vmem>>, %arg13: memref<128x128xbf16, #tpu.memory_space<vmem>>, %arg14: memref<1x128xf32, #tpu.memory_space<vmem>>, %arg15: memref<128x16xf32, #tpu.memory_space<vmem>>, %arg16: memref<4x16xf32, #tpu.memory_space<vmem>>, %arg17: memref<1x16xf32, #tpu.memory_space<vmem>>, %arg18: memref<16x128xf32, #tpu.memory_space<vmem>>, %arg19: memref<1x128xf32, #tpu.memory_space<vmem>>, %arg20: memref<256x128xf32, #tpu.memory_space<vmem>>, %arg21: memref<2x128xf32, #tpu.memory_space<vmem>>, %arg22: memref<2x128xf32, #tpu.memory_space<vmem>>) attributes {dimension_semantics = [], scalar_prefetch = 0 : i64, scratch_operands = 0 : i64, tpu.core_type = #tpu.core_type<tc>} {
    %c0 = arith.constant 0 : index
    %c0_0 = arith.constant 0 : index
    %0 = vector.load %arg0[%c0, %c0_0] : memref<256x128xf32, #tpu.memory_space<vmem>>, vector<256x128xf32>
    %c0_1 = arith.constant 0 : index
    %c0_2 = arith.constant 0 : index
    %1 = vector.load %arg4[%c0_1, %c0_2] : memref<128x384xbf16, #tpu.memory_space<vmem>>, vector<128x384xbf16>
    %c0_3 = arith.constant 0 : index
    %c0_4 = arith.constant 0 : index
    %2 = vector.load %arg6[%c0_3, %c0_4] : memref<128x384xbf16, #tpu.memory_space<vmem>>, vector<128x384xbf16>
    %c0_5 = arith.constant 0 : index
    %c0_6 = arith.constant 0 : index
    %3 = vector.load %arg8[%c0_5, %c0_6] : memref<128x384xbf16, #tpu.memory_space<vmem>>, vector<128x384xbf16>
    %c0_7 = arith.constant 0 : index
    %c0_8 = arith.constant 0 : index
    %4 = vector.load %arg5[%c0_7, %c0_8] : memref<1x384xf32, #tpu.memory_space<vmem>>, vector<1x384xf32>
    %5 = vector.shape_cast %4 : vector<1x384xf32> to vector<1x384xf32>
    %6 = vector.broadcast %5 : vector<1x384xf32> to vector<256x384xf32>
    %c0_9 = arith.constant 0 : index
    %c0_10 = arith.constant 0 : index
    %7 = vector.load %arg7[%c0_9, %c0_10] : memref<1x384xf32, #tpu.memory_space<vmem>>, vector<1x384xf32>
    %8 = vector.shape_cast %7 : vector<1x384xf32> to vector<1x384xf32>
    %9 = vector.broadcast %8 : vector<1x384xf32> to vector<256x384xf32>
    %c0_11 = arith.constant 0 : index
    %c0_12 = arith.constant 0 : index
    %10 = vector.load %arg9[%c0_11, %c0_12] : memref<1x384xf32, #tpu.memory_space<vmem>>, vector<1x384xf32>
    %11 = vector.shape_cast %10 : vector<1x384xf32> to vector<1x384xf32>
    %12 = vector.broadcast %11 : vector<1x384xf32> to vector<256x384xf32>
    %13 = arith.truncf %0 : vector<256x128xf32> to vector<256x128xbf16>
    %cst = arith.constant dense<0.000000e+00> : vector<256x384xf32>
    %14 = tpu.matmul %13, %1, %cst {dimension_numbers = #tpu.dot_dimension_numbers<[1], [0], [0], [1], [0, 0, 1, 1], [], []>} : vector<256x128xbf16>, vector<128x384xbf16>, vector<256x384xf32> -> vector<256x384xf32>
    %15 = arith.addf %14, %6 : vector<256x384xf32>
    %16 = arith.truncf %15 : vector<256x384xf32> to vector<256x384xbf16>
    %c0_13 = arith.constant 0 : index
    %c0_14 = arith.constant 0 : index
    %c0_15 = arith.constant 0 : index
    %17 = vector.load %arg1[%c0_13, %c0_14, %c0_15] : memref<3x256x256xbf16, #tpu.memory_space<vmem>>, vector<1x256x256xbf16>
    %18 = vector.shape_cast %17 : vector<1x256x256xbf16> to vector<256x256xbf16>
    %19 = vector.extract_strided_slice %16 {offsets = [0, 0], sizes = [256, 128], strides = [1, 1]} : vector<256x384xbf16> to vector<256x128xbf16>
    %cst_16 = arith.constant dense<0.000000e+00> : vector<256x128xf32>
    %20 = tpu.matmul %18, %19, %cst_16 {dimension_numbers = #tpu.dot_dimension_numbers<[1], [0], [0], [1], [0, 0, 1, 1], [], []>} : vector<256x256xbf16>, vector<256x128xbf16>, vector<256x128xf32> -> vector<256x128xf32>
    %c1 = arith.constant 1 : index
    %c0_17 = arith.constant 0 : index
    %c0_18 = arith.constant 0 : index
    %21 = vector.load %arg1[%c1, %c0_17, %c0_18] : memref<3x256x256xbf16, #tpu.memory_space<vmem>>, vector<1x256x256xbf16>
    %22 = vector.shape_cast %21 : vector<1x256x256xbf16> to vector<256x256xbf16>
    %23 = vector.extract_strided_slice %16 {offsets = [0, 128], sizes = [256, 128], strides = [1, 1]} : vector<256x384xbf16> to vector<256x128xbf16>
    %cst_19 = arith.constant dense<0.000000e+00> : vector<256x128xf32>
    %24 = tpu.matmul %22, %23, %cst_19 {dimension_numbers = #tpu.dot_dimension_numbers<[1], [0], [0], [1], [0, 0, 1, 1], [], []>} : vector<256x256xbf16>, vector<256x128xbf16>, vector<256x128xf32> -> vector<256x128xf32>
    %25 = arith.addf %20, %24 : vector<256x128xf32>
    %c2 = arith.constant 2 : index
    %c0_20 = arith.constant 0 : index
    %c0_21 = arith.constant 0 : index
    %26 = vector.load %arg1[%c2, %c0_20, %c0_21] : memref<3x256x256xbf16, #tpu.memory_space<vmem>>, vector<1x256x256xbf16>
    %27 = vector.shape_cast %26 : vector<1x256x256xbf16> to vector<256x256xbf16>
    %28 = vector.extract_strided_slice %16 {offsets = [0, 256], sizes = [256, 128], strides = [1, 1]} : vector<256x384xbf16> to vector<256x128xbf16>
    %cst_22 = arith.constant dense<0.000000e+00> : vector<256x128xf32>
    %29 = tpu.matmul %27, %28, %cst_22 {dimension_numbers = #tpu.dot_dimension_numbers<[1], [0], [0], [1], [0, 0, 1, 1], [], []>} : vector<256x256xbf16>, vector<256x128xbf16>, vector<256x128xf32> -> vector<256x128xf32>
    %30 = arith.addf %25, %29 : vector<256x128xf32>
    %31 = arith.truncf %30 : vector<256x128xf32> to vector<256x128xbf16>
    %cst_23 = arith.constant dense<0.000000e+00> : vector<256x384xf32>
    %32 = tpu.matmul %31, %2, %cst_23 {dimension_numbers = #tpu.dot_dimension_numbers<[1], [0], [0], [1], [0, 0, 1, 1], [], []>} : vector<256x128xbf16>, vector<128x384xbf16>, vector<256x384xf32> -> vector<256x384xf32>
    %33 = arith.addf %32, %9 : vector<256x384xf32>
    %cst_24 = arith.constant dense<0.000000e+00> : vector<256x384xf32>
    %34 = tpu.matmul %13, %3, %cst_24 {dimension_numbers = #tpu.dot_dimension_numbers<[1], [0], [0], [1], [0, 0, 1, 1], [], []>} : vector<256x128xbf16>, vector<128x384xbf16>, vector<256x384xf32> -> vector<256x384xf32>
    %35 = arith.addf %34, %12 : vector<256x384xf32>
    %36 = vector.extract_strided_slice %33 {offsets = [0, 0], sizes = [256, 128], strides = [1, 1]} : vector<256x384xf32> to vector<256x128xf32>
    %37 = vector.extract_strided_slice %35 {offsets = [0, 0], sizes = [256, 128], strides = [1, 1]} : vector<256x384xf32> to vector<256x128xf32>
    %38 = arith.addf %36, %37 : vector<256x128xf32>
    %39 = arith.negf %38 : vector<256x128xf32>
    %40 = math.exp %39 : vector<256x128xf32>
    %cst_25 = arith.constant 1.000000e+00 : f32
    %41 = vector.broadcast %cst_25 : f32 to vector<256x128xf32>
    %42 = arith.addf %41, %40 : vector<256x128xf32>
    %43 = arith.divf %41, %42 : vector<256x128xf32>
    %44 = vector.extract_strided_slice %33 {offsets = [0, 128], sizes = [256, 128], strides = [1, 1]} : vector<256x384xf32> to vector<256x128xf32>
    %45 = vector.extract_strided_slice %35 {offsets = [0, 128], sizes = [256, 128], strides = [1, 1]} : vector<256x384xf32> to vector<256x128xf32>
    %46 = arith.addf %44, %45 : vector<256x128xf32>
    %47 = arith.negf %46 : vector<256x128xf32>
    %48 = math.exp %47 : vector<256x128xf32>
    %cst_26 = arith.constant 1.000000e+00 : f32
    %49 = vector.broadcast %cst_26 : f32 to vector<256x128xf32>
    %50 = arith.addf %49, %48 : vector<256x128xf32>
    %51 = arith.divf %49, %50 : vector<256x128xf32>
    %52 = vector.extract_strided_slice %33 {offsets = [0, 256], sizes = [256, 128], strides = [1, 1]} : vector<256x384xf32> to vector<256x128xf32>
    %53 = vector.extract_strided_slice %35 {offsets = [0, 256], sizes = [256, 128], strides = [1, 1]} : vector<256x384xf32> to vector<256x128xf32>
    %54 = arith.mulf %43, %53 : vector<256x128xf32>
    %55 = arith.addf %52, %54 : vector<256x128xf32>
    %56 = math.tanh %55 : vector<256x128xf32>
    %cst_27 = arith.constant 1.000000e+00 : f32
    %57 = vector.broadcast %cst_27 : f32 to vector<256x128xf32>
    %58 = arith.subf %57, %51 : vector<256x128xf32>
    %59 = arith.mulf %58, %56 : vector<256x128xf32>
    %60 = arith.mulf %51, %0 : vector<256x128xf32>
    %61 = arith.addf %59, %60 : vector<256x128xf32>
    %62 = arith.truncf %61 : vector<256x128xf32> to vector<256x128xbf16>
    %cst_28 = arith.constant dense<0.000000e+00> : vector<256x384xf32>
    %63 = tpu.matmul %62, %1, %cst_28 {dimension_numbers = #tpu.dot_dimension_numbers<[1], [0], [0], [1], [0, 0, 1, 1], [], []>} : vector<256x128xbf16>, vector<128x384xbf16>, vector<256x384xf32> -> vector<256x384xf32>
    %64 = arith.addf %63, %6 : vector<256x384xf32>
    %65 = arith.truncf %64 : vector<256x384xf32> to vector<256x384xbf16>
    %c0_29 = arith.constant 0 : index
    %c0_30 = arith.constant 0 : index
    %c0_31 = arith.constant 0 : index
    %66 = vector.load %arg1[%c0_29, %c0_30, %c0_31] : memref<3x256x256xbf16, #tpu.memory_space<vmem>>, vector<1x256x256xbf16>
    %67 = vector.shape_cast %66 : vector<1x256x256xbf16> to vector<256x256xbf16>
    %68 = vector.extract_strided_slice %65 {offsets = [0, 0], sizes = [256, 128], strides = [1, 1]} : vector<256x384xbf16> to vector<256x128xbf16>
    %cst_32 = arith.constant dense<0.000000e+00> : vector<256x128xf32>
    %69 = tpu.matmul %67, %68, %cst_32 {dimension_numbers = #tpu.dot_dimension_numbers<[1], [0], [0], [1], [0, 0, 1, 1], [], []>} : vector<256x256xbf16>, vector<256x128xbf16>, vector<256x128xf32> -> vector<256x128xf32>
    %c1_33 = arith.constant 1 : index
    %c0_34 = arith.constant 0 : index
    %c0_35 = arith.constant 0 : index
    %70 = vector.load %arg1[%c1_33, %c0_34, %c0_35] : memref<3x256x256xbf16, #tpu.memory_space<vmem>>, vector<1x256x256xbf16>
    %71 = vector.shape_cast %70 : vector<1x256x256xbf16> to vector<256x256xbf16>
    %72 = vector.extract_strided_slice %65 {offsets = [0, 128], sizes = [256, 128], strides = [1, 1]} : vector<256x384xbf16> to vector<256x128xbf16>
    %cst_36 = arith.constant dense<0.000000e+00> : vector<256x128xf32>
    %73 = tpu.matmul %71, %72, %cst_36 {dimension_numbers = #tpu.dot_dimension_numbers<[1], [0], [0], [1], [0, 0, 1, 1], [], []>} : vector<256x256xbf16>, vector<256x128xbf16>, vector<256x128xf32> -> vector<256x128xf32>
    %74 = arith.addf %69, %73 : vector<256x128xf32>
    %c2_37 = arith.constant 2 : index
    %c0_38 = arith.constant 0 : index
    %c0_39 = arith.constant 0 : index
    %75 = vector.load %arg1[%c2_37, %c0_38, %c0_39] : memref<3x256x256xbf16, #tpu.memory_space<vmem>>, vector<1x256x256xbf16>
    %76 = vector.shape_cast %75 : vector<1x256x256xbf16> to vector<256x256xbf16>
    %77 = vector.extract_strided_slice %65 {offsets = [0, 256], sizes = [256, 128], strides = [1, 1]} : vector<256x384xbf16> to vector<256x128xbf16>
    %cst_40 = arith.constant dense<0.000000e+00> : vector<256x128xf32>
    %78 = tpu.matmul %76, %77, %cst_40 {dimension_numbers = #tpu.dot_dimension_numbers<[1], [0], [0], [1], [0, 0, 1, 1], [], []>} : vector<256x256xbf16>, vector<256x128xbf16>, vector<256x128xf32> -> vector<256x128xf32>
    %79 = arith.addf %74, %78 : vector<256x128xf32>
    %80 = arith.truncf %79 : vector<256x128xf32> to vector<256x128xbf16>
    %cst_41 = arith.constant dense<0.000000e+00> : vector<256x384xf32>
    %81 = tpu.matmul %80, %2, %cst_41 {dimension_numbers = #tpu.dot_dimension_numbers<[1], [0], [0], [1], [0, 0, 1, 1], [], []>} : vector<256x128xbf16>, vector<128x384xbf16>, vector<256x384xf32> -> vector<256x384xf32>
    %82 = arith.addf %81, %9 : vector<256x384xf32>
    %cst_42 = arith.constant dense<0.000000e+00> : vector<256x384xf32>
    %83 = tpu.matmul %62, %3, %cst_42 {dimension_numbers = #tpu.dot_dimension_numbers<[1], [0], [0], [1], [0, 0, 1, 1], [], []>} : vector<256x128xbf16>, vector<128x384xbf16>, vector<256x384xf32> -> vector<256x384xf32>
    %84 = arith.addf %83, %12 : vector<256x384xf32>
    %85 = vector.extract_strided_slice %82 {offsets = [0, 0], sizes = [256, 128], strides = [1, 1]} : vector<256x384xf32> to vector<256x128xf32>
    %86 = vector.extract_strided_slice %84 {offsets = [0, 0], sizes = [256, 128], strides = [1, 1]} : vector<256x384xf32> to vector<256x128xf32>
    %87 = arith.addf %85, %86 : vector<256x128xf32>
    %88 = arith.negf %87 : vector<256x128xf32>
    %89 = math.exp %88 : vector<256x128xf32>
    %cst_43 = arith.constant 1.000000e+00 : f32
    %90 = vector.broadcast %cst_43 : f32 to vector<256x128xf32>
    %91 = arith.addf %90, %89 : vector<256x128xf32>
    %92 = arith.divf %90, %91 : vector<256x128xf32>
    %93 = vector.extract_strided_slice %82 {offsets = [0, 128], sizes = [256, 128], strides = [1, 1]} : vector<256x384xf32> to vector<256x128xf32>
    %94 = vector.extract_strided_slice %84 {offsets = [0, 128], sizes = [256, 128], strides = [1, 1]} : vector<256x384xf32> to vector<256x128xf32>
    %95 = arith.addf %93, %94 : vector<256x128xf32>
    %96 = arith.negf %95 : vector<256x128xf32>
    %97 = math.exp %96 : vector<256x128xf32>
    %cst_44 = arith.constant 1.000000e+00 : f32
    %98 = vector.broadcast %cst_44 : f32 to vector<256x128xf32>
    %99 = arith.addf %98, %97 : vector<256x128xf32>
    %100 = arith.divf %98, %99 : vector<256x128xf32>
    %101 = vector.extract_strided_slice %82 {offsets = [0, 256], sizes = [256, 128], strides = [1, 1]} : vector<256x384xf32> to vector<256x128xf32>
    %102 = vector.extract_strided_slice %84 {offsets = [0, 256], sizes = [256, 128], strides = [1, 1]} : vector<256x384xf32> to vector<256x128xf32>
    %103 = arith.mulf %92, %102 : vector<256x128xf32>
    %104 = arith.addf %101, %103 : vector<256x128xf32>
    %105 = math.tanh %104 : vector<256x128xf32>
    %cst_45 = arith.constant 1.000000e+00 : f32
    %106 = vector.broadcast %cst_45 : f32 to vector<256x128xf32>
    %107 = arith.subf %106, %100 : vector<256x128xf32>
    %108 = arith.mulf %107, %105 : vector<256x128xf32>
    %109 = arith.mulf %100, %61 : vector<256x128xf32>
    %110 = arith.addf %108, %109 : vector<256x128xf32>
    %111 = arith.truncf %110 : vector<256x128xf32> to vector<256x128xbf16>
    %112 = arith.truncf %0 : vector<256x128xf32> to vector<256x128xbf16>
    %c0_46 = arith.constant 0 : index
    %c0_47 = arith.constant 0 : index
    %113 = vector.load %arg10[%c0_46, %c0_47] : memref<128x128xbf16, #tpu.memory_space<vmem>>, vector<128x128xbf16>
    %cst_48 = arith.constant dense<0.000000e+00> : vector<256x128xf32>
    %114 = tpu.matmul %111, %113, %cst_48 {dimension_numbers = #tpu.dot_dimension_numbers<[1], [0], [0], [1], [0, 0, 1, 1], [], []>} : vector<256x128xbf16>, vector<128x128xbf16>, vector<256x128xf32> -> vector<256x128xf32>
    %c0_49 = arith.constant 0 : index
    %c0_50 = arith.constant 0 : index
    %115 = vector.load %arg11[%c0_49, %c0_50] : memref<128x128xbf16, #tpu.memory_space<vmem>>, vector<128x128xbf16>
    %cst_51 = arith.constant dense<0.000000e+00> : vector<256x128xf32>
    %116 = tpu.matmul %112, %115, %cst_51 {dimension_numbers = #tpu.dot_dimension_numbers<[1], [0], [0], [1], [0, 0, 1, 1], [], []>} : vector<256x128xbf16>, vector<128x128xbf16>, vector<256x128xf32> -> vector<256x128xf32>
    %117 = arith.addf %114, %116 : vector<256x128xf32>
    %c0_52 = arith.constant 0 : index
    %c0_53 = arith.constant 0 : index
    %118 = vector.load %arg12[%c0_52, %c0_53] : memref<1x128xf32, #tpu.memory_space<vmem>>, vector<1x128xf32>
    %119 = vector.broadcast %118 : vector<1x128xf32> to vector<256x128xf32>
    %120 = arith.addf %117, %119 : vector<256x128xf32>
    %121 = arith.negf %120 : vector<256x128xf32>
    %122 = math.exp %121 : vector<256x128xf32>
    %cst_54 = arith.constant 1.000000e+00 : f32
    %123 = vector.broadcast %cst_54 : f32 to vector<256x128xf32>
    %124 = arith.addf %123, %122 : vector<256x128xf32>
    %125 = arith.divf %123, %124 : vector<256x128xf32>
    %c0_55 = arith.constant 0 : index
    %c0_56 = arith.constant 0 : index
    %126 = vector.load %arg13[%c0_55, %c0_56] : memref<128x128xbf16, #tpu.memory_space<vmem>>, vector<128x128xbf16>
    %cst_57 = arith.constant dense<0.000000e+00> : vector<256x128xf32>
    %127 = tpu.matmul %111, %126, %cst_57 {dimension_numbers = #tpu.dot_dimension_numbers<[1], [0], [0], [1], [0, 0, 1, 1], [], []>} : vector<256x128xbf16>, vector<128x128xbf16>, vector<256x128xf32> -> vector<256x128xf32>
    %c0_58 = arith.constant 0 : index
    %c0_59 = arith.constant 0 : index
    %128 = vector.load %arg14[%c0_58, %c0_59] : memref<1x128xf32, #tpu.memory_space<vmem>>, vector<1x128xf32>
    %129 = vector.broadcast %128 : vector<1x128xf32> to vector<256x128xf32>
    %130 = arith.addf %127, %129 : vector<256x128xf32>
    %131 = arith.mulf %125, %130 : vector<256x128xf32>
    %c0_60 = arith.constant 0 : index
    %c0_61 = arith.constant 0 : index
    %132 = vector.load %arg20[%c0_60, %c0_61] : memref<256x128xf32, #tpu.memory_space<vmem>>, vector<256x128xf32>
    tpu.vector_store %arg20[%c0_60, %c0_61], %131 {strides = array<i32>} : memref<256x128xf32, #tpu.memory_space<vmem>>, vector<256x128xf32>,
    %133 = tpu.iota {dimensions = array<i32: 0>} : vector<2x256xi32>
    %c0_62 = arith.constant 0 : index
    %c0_63 = arith.constant 0 : index
    %134 = vector.load %arg2[%c0_62, %c0_63] : memref<1x256xi32, #tpu.memory_space<vmem>>, vector<1x256xi32>
    %135 = vector.broadcast %134 : vector<1x256xi32> to vector<2x256xi32>
    %136 = arith.cmpi eq, %135, %133 : vector<2x256xi32>
    %137 = arith.extui %136 : vector<2x256xi1> to vector<2x256xi32>
    %138 = arith.sitofp %137 : vector<2x256xi32> to vector<2x256xf32>
    %cst_64 = arith.constant dense<0.000000e+00> : vector<2x128xf32>
    %139 = tpu.matmul %138, %131, %cst_64 {dimension_numbers = #tpu.dot_dimension_numbers<[1], [0], [0], [1], [0, 0, 1, 1], [], []>} : vector<2x256xf32>, vector<256x128xf32>, vector<2x128xf32> -> vector<2x128xf32>
    %c0_65 = arith.constant 0 : index
    %c0_66 = arith.constant 0 : index
    %140 = vector.load %arg21[%c0_65, %c0_66] : memref<2x128xf32, #tpu.memory_space<vmem>>, vector<2x128xf32>
    tpu.vector_store %arg21[%c0_65, %c0_66], %139 {strides = array<i32>} : memref<2x128xf32, #tpu.memory_space<vmem>>, vector<2x128xf32>,
    %c0_67 = arith.constant 0 : index
    %c0_68 = arith.constant 0 : index
    %141 = vector.load %arg15[%c0_67, %c0_68] : memref<128x16xf32, #tpu.memory_space<vmem>>, vector<128x16xf32>
    %cst_69 = arith.constant dense<0.000000e+00> : vector<2x16xf32>
    %142 = tpu.matmul %139, %141, %cst_69 {dimension_numbers = #tpu.dot_dimension_numbers<[1], [0], [0], [1], [0, 0, 1, 1], [], []>} : vector<2x128xf32>, vector<128x16xf32>, vector<2x16xf32> -> vector<2x16xf32>
    %c0_70 = arith.constant 0 : index
    %c0_71 = arith.constant 0 : index
    %143 = vector.load %arg3[%c0_70, %c0_71] : memref<2x4xf32, #tpu.memory_space<vmem>>, vector<2x4xf32>
    %c0_72 = arith.constant 0 : index
    %c0_73 = arith.constant 0 : index
    %144 = vector.load %arg16[%c0_72, %c0_73] : memref<4x16xf32, #tpu.memory_space<vmem>>, vector<4x16xf32>
    %cst_74 = arith.constant dense<0.000000e+00> : vector<2x16xf32>
    %145 = tpu.matmul %143, %144, %cst_74 {dimension_numbers = #tpu.dot_dimension_numbers<[1], [0], [0], [1], [0, 0, 1, 1], [], []>} : vector<2x4xf32>, vector<4x16xf32>, vector<2x16xf32> -> vector<2x16xf32>
    %146 = arith.addf %142, %145 : vector<2x16xf32>
    %c0_75 = arith.constant 0 : index
    %c0_76 = arith.constant 0 : index
    %147 = vector.load %arg17[%c0_75, %c0_76] : memref<1x16xf32, #tpu.memory_space<vmem>>, vector<1x16xf32>
    %148 = vector.broadcast %147 : vector<1x16xf32> to vector<2x16xf32>
    %149 = arith.addf %146, %148 : vector<2x16xf32>
    %cst_77 = arith.constant 0.000000e+00 : f32
    %150 = vector.broadcast %cst_77 : f32 to vector<2x16xf32>
    %151 = arith.maximumf %149, %150 : vector<2x16xf32>
    %c0_78 = arith.constant 0 : index
    %c0_79 = arith.constant 0 : index
    %152 = vector.load %arg18[%c0_78, %c0_79] : memref<16x128xf32, #tpu.memory_space<vmem>>, vector<16x128xf32>
    %cst_80 = arith.constant dense<0.000000e+00> : vector<2x128xf32>
    %153 = tpu.matmul %151, %152, %cst_80 {dimension_numbers = #tpu.dot_dimension_numbers<[1], [0], [0], [1], [0, 0, 1, 1], [], []>} : vector<2x16xf32>, vector<16x128xf32>, vector<2x128xf32> -> vector<2x128xf32>
    %c0_81 = arith.constant 0 : index
    %c0_82 = arith.constant 0 : index
    %154 = vector.load %arg19[%c0_81, %c0_82] : memref<1x128xf32, #tpu.memory_space<vmem>>, vector<1x128xf32>
    %155 = vector.broadcast %154 : vector<1x128xf32> to vector<2x128xf32>
    %156 = arith.addf %153, %155 : vector<2x128xf32>
    %c0_83 = arith.constant 0 : index
    %c0_84 = arith.constant 0 : index
    %157 = vector.load %arg22[%c0_83, %c0_84] : memref<2x128xf32, #tpu.memory_space<vmem>>, vector<2x128xf32>
    tpu.vector_store %arg22[%c0_83, %c0_84], %156 {strides = array<i32>} : memref<2x128xf32, #tpu.memory_space<vmem>>, vector<2x128xf32>,
    return
  }
}

</mosaic_0001>

<bundles_post_ra>
// kernel: ggnn_model_forward.1
= control target key start
LH: loop header
LB: loop body
LE: loop exit
PB: predicated region body
PF: predicated region fallthrough
CT: control target
= control target key end

     0   :  { %s15089_s0 = inlined_call_operand.vmem [shape: f32[256,128], index: 0, kind: input, shape index: {}]   ;;  %s15090_s1 = inlined_call_operand.vmem [shape: bf16[3,256,256], index: 1, kind: input, shape index: {}]   ;;  %s15091_s2 = inlined_call_operand.vmem [shape: s32[1,256], index: 2, kind: input, shape index: {}]   ;;  %s15092_s3 = inlined_call_operand.vmem [shape: f32[2,4], index: 3, kind: input, shape index: {}]   ;;  %s15093_s4 = inlined_call_operand.vmem [shape: bf16[128,384], index: 4, kind: input, shape index: {}]   ;;  %s15094_s5 = inlined_call_operand.vmem [shape: f32[1,384], index: 5, kind: input, shape index: {}]   ;;  %s15095_s6 = inlined_call_operand.vmem [shape: bf16[128,384], index: 6, kind: input, shape index: {}]   ;;  %s15096_s7 = inlined_call_operand.vmem [shape: f32[1,384], index: 7, kind: input, shape index: {}]   ;;  %s15097_s8 = inlined_call_operand.vmem [shape: bf16[128,384], index: 8, kind: input, shape index: {}]   ;;  %s15098_s9 = inlined_call_operand.vmem [shape: f32[1,384], index: 9, kind: input, shape index: {}]   ;;  %s15099_s10 = inlined_call_operand.vmem [shape: bf16[128,128], index: 10, kind: input, shape index: {}]   ;;  %s15100_s11 = inlined_call_operand.vmem [shape: bf16[128,128], index: 11, kind: input, shape index: {}]   ;;  %s15101_s12 = inlined_call_operand.vmem [shape: f32[1,128], index: 12, kind: input, shape index: {}]   ;;  %s15102_s13 = inlined_call_operand.vmem [shape: bf16[128,128], index: 13, kind: input, shape index: {}]   ;;  %s15103_s14 = inlined_call_operand.vmem [shape: f32[1,128], index: 14, kind: input, shape index: {}]   ;;  %s15104_s15 = inlined_call_operand.vmem [shape: f32[128,16], index: 15, kind: input, shape index: {}]   ;;  %s15105_s16 = inlined_call_operand.vmem [shape: f32[4,16], index: 16, kind: input, shape index: {}]   ;;  %s15106_s17 = inlined_call_operand.vmem [shape: f32[1,16], index: 17, kind: input, shape index: {}]   ;;  %s15107_s18 = inlined_call_operand.vmem [shape: f32[16,128], index: 18, kind: input, shape index: {}]   ;;  %s15108_s19 = inlined_call_operand.vmem [shape: f32[1,128], index: 19, kind: input, shape index: {}]   ;;  %s15109_s20 = inlined_call_operand.vmem [shape: f32[256,128], index: 20, kind: output, shape index: {0}]   ;;  %s15110_s21 = inlined_call_operand.hbm [shape: f32[2,128], index: 21, kind: output, shape index: {1}]   ;;  %s15111_s22 = inlined_call_operand.hbm [shape: f32[2,128], index: 22, kind: output, shape index: {2}]  }
   0x1   :  { %15269 = sst [smem:[#allocation82_spill]] %s15089_s0 }
   0x2   :  { %15270 = sst [smem:[#allocation83_spill]] %s15090_s1 }
   0x3   :  { %15271 = sst [smem:[#allocation84_spill]] %s15091_s2 }
   0x4   :  { %15272 = sst [smem:[#allocation85_spill]] %s15092_s3 }
   0x5   :  { %15273 = sst [smem:[#allocation86_spill]] %s15093_s4 }
   0x6   :  { %15274 = sst [smem:[#allocation87_spill]] %s15094_s5 }
   0x7   :  { %15275 = sst [smem:[#allocation88_spill]] %s15095_s6 }
   0x8   :  { %28 = vsyncpa [#allocation3], 0  ;;  %s15276_s29 = sld [smem:[#allocation86_spill]]  ;;  %v15116_v2 = vmov 0   ;;  %s15277_s30 = sld [smem:[#allocation82_spill]] }
   0x9   :  { %426 = vmatprep.mubr.bf16.mxu0 %v15116_v2 }
   0xe   :  { %v9575_v0 = vld [vmem:[%s15276_s29 + $0x4] ss:$12 sps:$4 sm:$0xff]   ;;  %v9577_v1 = vld [vmem:[%s15276_s29] ss:$12 sps:$4 sm:$0xff]   ;;  %v9578_v3 = vld [vmem:[%s15276_s29 + $0x1c] ss:$12 sps:$4 sm:$0xff]  }
   0xf   :  { %394 = vmatprep.subr.bf16.mxu0 %v9575_v0  ;;  %v9580_v4 = vld [vmem:[%s15276_s29 + $0x18] ss:$12 sps:$4 sm:$0xff]   ;;  %v9581_v5 = vld [vmem:[%s15276_s29 + $0x34] ss:$12 sps:$4 sm:$0xff]   ;;  %v9583_v6 = vld [vmem:[%s15276_s29 + $0x30] ss:$12 sps:$4 sm:$0xff]  }
  0x10   :  { %395 = vmatpush1.bf16.msra.mxu0 %v9577_v1  ;;  %v9584_v7 = vld [vmem:[%s15276_s29 + $0x4c] ss:$12 sps:$4 sm:$0xff]   ;;  %v71_v8 = vld [vmem:[%s15277_s30] sm:$0xff]  ;;  %v9586_v9 = vld [vmem:[%s15276_s29 + $0x48] ss:$12 sps:$4 sm:$0xff]  }
  0x11   :  { %396 = vmatprep.subr.bf16.mxu0 %v9578_v3  ;;  %v72_v10 = vld [vmem:[%s15277_s30 + $0x8] sm:$0xff]  ;;  %v9587_v11 = vld [vmem:[%s15276_s29 + $0x64] ss:$12 sps:$4 sm:$0xff]   ;;  %v9593_v18 = vld [vmem:[%s15276_s29 + $0x94] ss:$12 sps:$4 sm:$0xff]  }
  0x12   :  { %v11011_v12 = vpack.c.bf16 %v72_v10, %v71_v8  ;;  %v9589_v13 = vld [vmem:[%s15276_s29 + $0x60] ss:$12 sps:$4 sm:$0xff]   ;;  %v9590_v14 = vld [vmem:[%s15276_s29 + $0x7c] ss:$12 sps:$4 sm:$0xff]   ;;  %v9592_v17 = vld [vmem:[%s15276_s29 + $0x78] ss:$12 sps:$4 sm:$0xff]  }
  0x13   :  { %v9599_v15 = vld [vmem:[%s15276_s29 + $0x8] ss:$12 sps:$4 sm:$0xff]   ;;  %v9600_v16 = vld [vmem:[%s15276_s29 + $0x20] ss:$12 sps:$4 sm:$0xff]   ;;  %v9601_v19 = vld [vmem:[%s15276_s29 + $0x38] ss:$12 sps:$4 sm:$0xff]  }
  0x14   :  { %397 = vmatpush1.bf16.msra.mxu0 %v9580_v4  ;;  %15278 = vst [vmem:[#allocation8_spill] sm:$0xff] %v11011_v12  ;;  %8630 = vmatprep.mubr.bf16.mxu1 %v11011_v12  ;;  %v9595_v20 = vld [vmem:[%s15276_s29 + $0x90] ss:$12 sps:$4 sm:$0xff]   ;;  %v9596_v21 = vld [vmem:[%s15276_s29 + $0xac] ss:$12 sps:$4 sm:$0xff]   ;;  %v75_v31 = vld [vmem:[%s15277_s30 + $0x20] sm:$0xff] }
  0x15   :  { %398 = vmatprep.subr.bf16.mxu0 %v9581_v5  ;;  %8614 = vmatprep.subr.bf16.mxu1 %v9599_v15  ;;  %v9602_v22 = vld [vmem:[%s15276_s29 + $0x50] ss:$12 sps:$4 sm:$0xff]   ;;  %v9598_v23 = vld [vmem:[%s15276_s29 + $0xa8] ss:$12 sps:$4 sm:$0xff]   ;;  %v9604_v25 = vld [vmem:[%s15276_s29 + $0x80] ss:$12 sps:$4 sm:$0xff]  }
  0x16   :  { %8615 = vmatpush3.bf16.msra.mxu1 %v9599_v15  ;;  %v9603_v24 = vld [vmem:[%s15276_s29 + $0x68] ss:$12 sps:$4 sm:$0xff]   ;;  %v74_v27 = vld [vmem:[%s15277_s30 + $0x18] sm:$0xff]  ;;  %v79_v36 = vld [vmem:[%s15277_s30 + $0x40] sm:$0xff] }
  0x17   :  { %8616 = vmatprep.subr.bf16.mxu1 %v9600_v16  ;;  %v73_v26 = vld [vmem:[%s15277_s30 + $0x10] sm:$0xff]  ;;  %v9605_v28 = vld [vmem:[%s15276_s29 + $0x98] ss:$12 sps:$4 sm:$0xff]   ;;  %v76_v32 = vld [vmem:[%s15277_s30 + $0x28] sm:$0xff] }
  0x18   :  { %399 = vmatpush1.bf16.msra.mxu0 %v9583_v6  ;;  %v11064_v29 = vpack.c.bf16 %v74_v27, %v73_v26  ;;  %v9606_v30 = vld [vmem:[%s15276_s29 + $0xb0] ss:$12 sps:$4 sm:$0xff]   ;;  %v11077_v33 = vpack.c.bf16 %v76_v32, %v75_v31  ;;  %v80_v37 = vld [vmem:[%s15277_s30 + $0x48] sm:$0xff]  ;;  %v83_v42 = vld [vmem:[%s15277_s30 + $0x60] sm:$0xff] }
  0x19   :  { %400 = vmatprep.subr.bf16.mxu0 %v9584_v7  ;;  %v77_v34 = vld [vmem:[%s15277_s30 + $0x30] sm:$0xff]  ;;  %v78_v35 = vld [vmem:[%s15277_s30 + $0x38] sm:$0xff]  ;;  %v11097_v39 = vpack.c.bf16 %v80_v37, %v79_v36  ;;  %v84_v43 = vld [vmem:[%s15277_s30 + $0x68] sm:$0xff] }
  0x1a   :  { %8617 = vmatpush3.bf16.msra.mxu1 %v9600_v16  ;;  %15279 = vst [vmem:[#allocation9_spill] sm:$0xff] %v11064_v29  ;;  %15280 = vst [vmem:[#allocation10_spill] sm:$0xff] %v11077_v33  ;;  %v11095_v38 = vpack.c.bf16 %v78_v35, %v77_v34  ;;  %v81_v40 = vld [vmem:[%s15277_s30 + $0x50] sm:$0xff]  ;;  %v82_v41 = vld [vmem:[%s15277_s30 + $0x58] sm:$0xff]  ;;  %v11117_v45 = vpack.c.bf16 %v84_v43, %v83_v42 }
  0x1b   :  { %8618 = vmatprep.subr.bf16.mxu1 %v9601_v19  ;;  %15282 = vst [vmem:[#allocation12_spill] sm:$0xff] %v11097_v39  ;;  %v11115_v44 = vpack.c.bf16 %v82_v41, %v81_v40  ;;  %v85_v46 = vld [vmem:[%s15277_s30 + $0x70] sm:$0xff]  ;;  %v86_v47 = vld [vmem:[%s15277_s30 + $0x78] sm:$0xff]  ;;  %v87_v48 = vld [vmem:[%s15277_s30 + $0x80] sm:$0xff] }
  0x1c   :  { %401 = vmatpush1.bf16.msra.mxu0 %v9586_v9  ;;  %15281 = vst [vmem:[#allocation11_spill] sm:$0xff] %v11095_v38  ;;  %15284 = vst [vmem:[#allocation14_spill] sm:$0xff] %v11117_v45  ;;  %v88_v49 = vld [vmem:[%s15277_s30 + $0x88] sm:$0xff]  ;;  %v11135_v50 = vpack.c.bf16 %v86_v47, %v85_v46  ;;  %v89_v52 = vld [vmem:[%s15277_s30 + $0x90] sm:$0xff] }
  0x1d   :  { %402 = vmatprep.subr.bf16.mxu0 %v9587_v11  ;;  %15283 = vst [vmem:[#allocation13_spill] sm:$0xff] %v11115_v44  ;;  %v11137_v51 = vpack.c.bf16 %v88_v49, %v87_v48  ;;  %v90_v53 = vld [vmem:[%s15277_s30 + $0x98] sm:$0xff]  ;;  %v91_v54 = vld [vmem:[%s15277_s30 + $0xa0] sm:$0xff]  ;;  %v92_v55 = vld [vmem:[%s15277_s30 + $0xa8] sm:$0xff] }
  0x1e   :  { %8619 = vmatpush3.bf16.msra.mxu1 %v9601_v19  ;;  %15285 = vst [vmem:[#allocation15_spill] sm:$0xff] %v11135_v50  ;;  %v11155_v56 = vpack.c.bf16 %v90_v53, %v89_v52  ;;  %v11157_v57 = vpack.c.bf16 %v92_v55, %v91_v54  ;;  %v93_v58 = vld [vmem:[%s15277_s30 + $0xb0] sm:$0xff]  ;;  %v94_v59 = vld [vmem:[%s15277_s30 + $0xb8] sm:$0xff]  ;;  %v95_v60 = vld [vmem:[%s15277_s30 + $0xc0] sm:$0xff] }
  0x1f   :  { %8620 = vmatprep.subr.bf16.mxu1 %v9602_v22  ;;  %15286 = vst [vmem:[#allocation16_spill] sm:$0xff] %v11137_v51  ;;  %v96_v61 = vld [vmem:[%s15277_s30 + $0xc8] sm:$0xff]  ;;  %v11175_v62 = vpack.c.bf16 %v94_v59, %v93_v58  ;;  %v97_v0 = vld [vmem:[%s15277_s30 + $0xd0] sm:$0xff]  ;;  %v98_v1 = vld [vmem:[%s15277_s30 + $0xd8] sm:$0xff] }
  0x20   :  { %403 = vmatpush1.bf16.msra.mxu0 %v9589_v13  ;;  %15287 = vst [vmem:[#allocation17_spill] sm:$0xff] %v11155_v56  ;;  %15288 = vst [vmem:[#allocation18_spill] sm:$0xff] %v11157_v57  ;;  %v11177_v63 = vpack.c.bf16 %v96_v61, %v95_v60  ;;  %v99_v3 = vld [vmem:[%s15277_s30 + $0xe0] sm:$0xff]  ;;  %v100_v4 = vld [vmem:[%s15277_s30 + $0xe8] sm:$0xff]  ;;  %v11195_v5 = vpack.c.bf16 %v98_v1, %v97_v0 }
  0x21   :  { %404 = vmatprep.subr.bf16.mxu0 %v9590_v14  ;;  %15289 = vst [vmem:[#allocation19_spill] sm:$0xff] %v11175_v62  ;;  %v11197_v6 = vpack.c.bf16 %v100_v4, %v99_v3 }
  0x22   :  { %8621 = vmatpush3.bf16.msra.mxu1 %v9602_v22  ;;  %15290 = vst [vmem:[#allocation20_spill] sm:$0xff] %v11177_v63  ;;  %15291 = vst [vmem:[#allocation21_spill] sm:$0xff] %v11195_v5 }
  0x23   :  { %8622 = vmatprep.subr.bf16.mxu1 %v9603_v24  ;;  %15292 = vst [vmem:[#allocation22_spill] sm:$0xff] %v11197_v6 }
  0x24   :  { %405 = vmatpush1.bf16.msra.mxu0 %v9592_v17 }
  0x25   :  { %406 = vmatprep.subr.bf16.mxu0 %v9593_v18 }
  0x26   :  { %8623 = vmatpush3.bf16.msra.mxu1 %v9603_v24 }
  0x27   :  { %8624 = vmatprep.subr.bf16.mxu1 %v9604_v25 }
  0x28   :  { %407 = vmatpush1.bf16.msra.mxu0 %v9595_v20 }
  0x29   :  { %408 = vmatprep.subr.bf16.mxu0 %v9596_v21 }
  0x2a   :  { %8625 = vmatpush3.bf16.msra.mxu1 %v9604_v25 }
  0x2b   :  { %8626 = vmatprep.subr.bf16.mxu1 %v9605_v28 }
  0x2c   :  { %409 = vmatpush1.bf16.msra.mxu0 %v9598_v23 }
  0x2e   :  { %8627 = vmatpush3.bf16.msra.mxu1 %v9605_v28 }
  0x2f   :  { %427 = vmatmul.mubr.bf16.vlgmr.msra.gmra.mrb[0].mxu0 %v11011_v12  ;;  %8628 = vmatprep.subr.bf16.mxu1 %v9606_v30 }
  0x30   :  { %436 = vmatprep.mubr.bf16.mxu0 %v15116_v2 }
  0x32   :  { %8629 = vmatpush3.bf16.msra.mxu1 %v9606_v30 }
  0x35   :  { %8631 = vmatmul.mubr.bf16.vlgmr.msra.gmra.mrb[0].mxu1 %v11064_v29 }
  0x36   :  { %8634 = vmatprep.mubr.bf16.mxu1 %v11077_v33 }
  0x37   :  { %437 = vmatmul.mubr.bf16.gmra.mrb[4].mxu0 %v11064_v29 }
  0x38   :  { %446 = vmatprep.mubr.bf16.mxu0 %v15116_v2 }
  0x3d   :  { %8635 = vmatmul.mubr.bf16.gmra.mrb[4].mxu1 %v11095_v38 }
  0x3e   :  { %8638 = vmatprep.mubr.bf16.mxu1 %v11097_v39 }
  0x3f   :  { %447 = vmatmul.mubr.bf16.gmra.mrb[8].mxu0 %v11077_v33 }
  0x40   :  { %456 = vmatprep.mubr.bf16.mxu0 %v15116_v2 }
  0x45   :  { %8639 = vmatmul.mubr.bf16.gmra.mrb[8].mxu1 %v11115_v44 }
  0x46   :  { %8642 = vmatprep.mubr.bf16.mxu1 %v11117_v45 }
  0x47   :  { %457 = vmatmul.mubr.bf16.gmra.mrb[12].mxu0 %v11095_v38 }
  0x48   :  { %466 = vmatprep.mubr.bf16.mxu0 %v15116_v2 }
  0x4d   :  { %8643 = vmatmul.mubr.bf16.gmra.mrb[12].mxu1 %v11135_v50 }
  0x4e   :  { %8646 = vmatprep.mubr.bf16.mxu1 %v11137_v51 }
  0x4f   :  { %467 = vmatmul.mubr.bf16.gmra.mrb[16].mxu0 %v11097_v39 }
  0x50   :  { %476 = vmatprep.mubr.bf16.mxu0 %v15116_v2 }
  0x55   :  { %8647 = vmatmul.mubr.bf16.gmra.mrb[16].mxu1 %v11155_v56 }
  0x56   :  { %8650 = vmatprep.mubr.bf16.mxu1 %v11157_v57 }
  0x57   :  { %477 = vmatmul.mubr.bf16.gmra.mrb[20].mxu0 %v11115_v44 }
  0x58   :  { %486 = vmatprep.mubr.bf16.mxu0 %v15116_v2 }
  0x5d   :  { %8651 = vmatmul.mubr.bf16.gmra.mrb[20].mxu1 %v11175_v62 }
  0x5e   :  { %8654 = vmatprep.mubr.bf16.mxu1 %v11177_v63 }
  0x5f   :  { %487 = vmatmul.mubr.bf16.gmra.mrb[24].mxu0 %v11117_v45 }
  0x60   :  { %496 = vmatprep.mubr.bf16.mxu0 %v15116_v2 }
  0x65   :  { %8655 = vmatmul.mubr.bf16.gmra.mrb[24].mxu1 %v11195_v5 }
  0x66   :  { %8658 = vmatprep.mubr.bf16.mxu1 %v11197_v6 }
  0x67   :  { %497 = vmatmul.mubr.bf16.gmra.mrb[28].mxu0 %v11135_v50 }
  0x68   :  { %506 = vmatprep.mubr.bf16.mxu0 %v15116_v2 }
  0x6f   :  { %507 = vmatmul.mubr.bf16.gmra.mrb[32].mxu0 %v11137_v51 }
  0x70   :  { %516 = vmatprep.mubr.bf16.mxu0 %v15116_v2 }
  0x71   :  { %29 = vsyncpa [#allocation5], 0  ;;  %v101_v7 = vld [vmem:[%s15277_s30 + $0xf0] sm:$0xff]  ;;  %v102_v8 = vld [vmem:[%s15277_s30 + $0xf8] sm:$0xff]  ;;  %v201_v10 = vlaneseq  ;;  %s15296_s25 = sld [smem:[#allocation87_spill]]  ;;  %s15300_s27 = sld [smem:[#allocation83_spill]] }
  0x72   :  { %v11209_v9 = vpack.c.bf16 %v102_v8, %v101_v7  ;;  %s15358_s6 = sld [smem:[#allocation88_spill]]  ;;  %s15611_s23 = sld [smem:[#allocation84_spill]]  ;;  %vm6973_vm2 = vcmask 1043456   ;;  %vm10858_vm3 = vmmov 0   ;;  %vm6969_vm4 = vcmask 31744  }
  0x73   :  { %v11225_v11 = vshrl.u32 %v201_v10, 7  ;;  %vm7135_vm5 = vcmask 130048   ;;  %s10860_s28 = smov [#allocation2]  }
  0x74   :  { %15293 = vst [vmem:[#allocation23_spill] sm:$0xff] %v11209_v9  ;;  %8659 = vmatmul.mubr.bf16.gmra.mrb[28].mxu1 %v11209_v9  ;;  %s7218_s4 = sshll.u32 %s10860_s28, 4  ;;  %s7219_s4 = int_to_ptr.vmem [resolvable:$true] %s7218_s4 }
  0x75   :  { %15294 = vst [vmem:[#allocation24_spill] sm:$0xff] %v11225_v11  ;;  %v11228_v13 = vsub.s32 0, %v11225_v11  ;;  %v11234_v15 = vsub.s32 1, %v11225_v11  ;;  %v11265_v35 = vsub.s32 2, %v11225_v11  ;;  %s10807_s0 = scalar_lea.vmem %s7219_s4, 32  ;;  %p10812_p1 = scmp.lt.s32.totalorder %s7219_s4, %s7219_s4 }
  0x76   :  { %p10808_p0 = scmp.ne.s32.totalorder %s7219_s4, %s10807_s0  ;;  %p10813_p2 = scmp.lt.s32.totalorder %s10807_s0, %s10807_s0 }
  0x77   :  { %517 = vmatmul.mubr.bf16.gmra.mrb[36].mxu0 %v11155_v56  ;;  %15295 = vst [vmem:[#allocation25_spill] sm:$0xff] %v11228_v13  ;;  %v199_v14 = vld [vmem:[%s15296_s25] sm:$0x7]  ;;  %15297 = vst [vmem:[#allocation26_spill] sm:$0xff] %v11234_v15  ;;  %v9609_v20 = vld [vmem:[%s15300_s27 + $0x104] ss:$8 sps:$4 sm:$0xff]  }
  0x78   :  { %526 = vmatprep.mubr.bf16.mxu0 %v15116_v2  ;;  %v11237_v16 = vrot.slane %v199_v14, %v11228_v13  ;;  %v11240_v18 = vrot.slane %v199_v14, %v11234_v15  ;;  %v9612_v22 = vld [vmem:[%s15300_s27 + $0x4] ss:$8 sps:$4 sm:$0xff]   ;;  %1053 = vmatprep.mubr.bf16.mxu1 %v9609_v20  ;;  %15301 = vst [vmem:[#allocation29_spill] sm:$0xff] %v11265_v35  ;;  %p10814_p3 = por %p10813_p2, %p10812_p1 }
  0x79   :  { %v11284_v47 = vrot.slane %v199_v14, %v11265_v35 }
  0x7a   :  { %15298 = vst [vmem:[#allocation27_spill] sm:$0xff] %v11237_v16  ;;  %15299 = vst [vmem:[#allocation28_spill] sm:$0xff] %v11240_v18  ;;  %p10815_p4 = pnand %p10814_p3, %p10808_p0 }
  0x7b   :  { %15302 = vst [vmem:[#allocation30_spill] sm:$0xff] %v11284_v47 }
  0x7f   :  { %527 = vmatmul.mubr.bf16.gmra.mrb[40].mxu0 %v11157_v57 }
  0x80   :  { %536 = vmatprep.mubr.bf16.mxu0 %v15116_v2 }
  0x87   :  { %537 = vmatmul.mubr.bf16.gmra.mrb[44].mxu0 %v11175_v62 }
  0x88   :  { %546 = vmatprep.mubr.bf16.mxu0 %v15116_v2 }
  0x8f   :  { %547 = vmatmul.mubr.bf16.gmra.mrb[48].mxu0 %v11177_v63 }
  0x90   :  { %556 = vmatprep.mubr.bf16.mxu0 %v15116_v2 }
  0x97   :  { %557 = vmatmul.mubr.bf16.gmra.mrb[52].mxu0 %v11195_v5 }
  0x98   :  { %566 = vmatprep.mubr.bf16.mxu0 %v15116_v2 }
  0x9f   :  { %567 = vmatmul.mubr.bf16.gmra.mrb[56].mxu0 %v11197_v6 }
  0xa0   :  { %576 = vmatprep.mubr.bf16.mxu0 %v15116_v2 }
  0xa7   :  { %577 = vmatmul.mubr.bf16.gmra.mrb[60].mxu0 %v11209_v9 }
  0xa8   :  { %1374 = vmatprep.mubr.bf16.mxu0 %v9612_v22 }
 0x102   :  { %v428_v17 = vpop.f32.mrb[0].mxu0 }
 0x103   :  { %v430_v19 = vpop.f32.mrb[1].mxu0  ;;  %v11249_v23 = vadd.f32 %v428_v17, %v11237_v16 }
 0x104   :  { %v432_v21 = vpop.f32.mrb[2].mxu0  ;;  %v11255_v26 = vadd.f32 %v430_v19, %v11240_v18 }
 0x105   :  { %v11252_v24 = vadd.f32 %v432_v21, %v11237_v16  ;;  %v434_v25 = vpop.f32.mrb[3].mxu0 }
 0x106   :  { %v11258_v27 = vadd.f32 %v434_v25, %v11240_v18 }
 0x108   :  { %v8632_v49 = vpop.f32.mrb[0].mxu1 }
 0x109   :  { %v11287_v53 = vadd.f32 %v8632_v49, %v11284_v47  ;;  %v621_v54 = vpop.f32.mrb[1].mxu1 }
 0x10a   :  { %v438_v31 = vpop.f32.mrb[4].mxu0  ;;  %v11290_v58 = vadd.f32 %v621_v54, %v11284_v47  ;;  %v8633_v59 = vpop.f32.mrb[2].mxu1 }
 0x10b   :  { %v440_v32 = vpop.f32.mrb[5].mxu0  ;;  %v11268_v36 = vadd.f32 %v438_v31, %v11237_v16  ;;  %v11299_v1 = vadd.f32 %v8633_v59, %v11284_v47  ;;  %v624_v3 = vpop.f32.mrb[3].mxu1 }
 0x10c   :  { %v442_v34 = vpop.f32.mrb[6].mxu0  ;;  %v11274_v41 = vadd.f32 %v440_v32, %v11240_v18  ;;  %v11308_v8 = vadd.f32 %v624_v3, %v11284_v47 }
 0x10d   :  { %v11271_v37 = vadd.f32 %v442_v34, %v11237_v16  ;;  %v444_v40 = vpop.f32.mrb[7].mxu0 }
 0x10e   :  { %v11277_v42 = vadd.f32 %v444_v40, %v11240_v18 }
 0x110   :  { %v8636_v21 = vpop.f32.mrb[4].mxu1 }
 0x111   :  { %v11319_v25 = vadd.f32 %v8636_v21, %v11284_v47  ;;  %v637_v31 = vpop.f32.mrb[5].mxu1 }
 0x112   :  { %v448_v48 = vpop.f32.mrb[8].mxu0  ;;  %v11322_v34 = vadd.f32 %v637_v31, %v11284_v47  ;;  %v8637_v40 = vpop.f32.mrb[6].mxu1 }
 0x113   :  { %v450_v52 = vpop.f32.mrb[9].mxu0  ;;  %v11293_v60 = vadd.f32 %v448_v48, %v11237_v16  ;;  %15303 = vst [vmem:[#allocation31_spill] sm:$0xff] %v11319_v25  ;;  %v11331_v54 = vadd.f32 %v8637_v40, %v11284_v47 }
 0x114   :  { %v452_v55 = vpop.f32.mrb[10].mxu0  ;;  %v11302_v4 = vadd.f32 %v450_v52, %v11240_v18 }
 0x115   :  { %v11296_v61 = vadd.f32 %v452_v55, %v11237_v16  ;;  %v454_v0 = vpop.f32.mrb[11].mxu0  ;;  %15304 = vst [vmem:[#allocation32_spill] sm:$0xff] %v11331_v54  ;;  %v640_v55 = vpop.f32.mrb[7].mxu1 }
 0x116   :  { %v11305_v7 = vadd.f32 %v454_v0, %v11240_v18  ;;  %v11340_v3 = vadd.f32 %v640_v55, %v11284_v47 }
 0x118   :  { %v8640_v40 = vpop.f32.mrb[8].mxu1 }
 0x119   :  { %v653_v55 = vpop.f32.mrb[9].mxu1 }
 0x11a   :  { %v458_v20 = vpop.f32.mrb[12].mxu0  ;;  %v11354_v19 = vadd.f32 %v653_v55, %v11284_v47 }
 0x11b   :  { %v460_v22 = vpop.f32.mrb[13].mxu0  ;;  %v11325_v48 = vadd.f32 %v458_v20, %v11237_v16  ;;  %v8641_v20 = vpop.f32.mrb[10].mxu1 }
 0x11c   :  { %v462_v32 = vpop.f32.mrb[14].mxu0  ;;  %v11334_v59 = vadd.f32 %v460_v22, %v11240_v18  ;;  %15306 = vst [vmem:[#allocation34_spill] sm:$0xff] %v11354_v19  ;;  %v656_v10 = vpop.f32.mrb[11].mxu1 }
 0x11d   :  { %v11328_v49 = vadd.f32 %v462_v32, %v11237_v16  ;;  %v464_v52 = vpop.f32.mrb[15].mxu0  ;;  %v11363_v32 = vadd.f32 %v8641_v20, %v11284_v47  ;;  %v11372_v55 = vadd.f32 %v656_v10, %v11284_v47 }
 0x11e   :  { %v11337_v0 = vadd.f32 %v464_v52, %v11240_v18  ;;  %v11351_v52 = vadd.f32 %v8640_v40, %v11284_v47 }
 0x11f   :  { %15307 = vst [vmem:[#allocation35_spill] sm:$0xff] %v11363_v32  ;;  %15308 = vst [vmem:[#allocation36_spill] sm:$0xff] %v11372_v55 }
 0x120   :  { %15305 = vst [vmem:[#allocation33_spill] sm:$0xff] %v11351_v52  ;;  %v8644_v30 = vpop.f32.mrb[12].mxu1 }
 0x121   :  { %v669_v10 = vpop.f32.mrb[13].mxu1 }
 0x122   :  { %v468_v22 = vpop.f32.mrb[16].mxu0  ;;  %v11386_v35 = vadd.f32 %v669_v10, %v11284_v47 }
 0x123   :  { %v470_v2 = vpop.f32.mrb[17].mxu0  ;;  %v11357_v21 = vadd.f32 %v468_v22, %v11237_v16  ;;  %v8645_v22 = vpop.f32.mrb[14].mxu1 }
 0x124   :  { %v472_v14 = vpop.f32.mrb[18].mxu0  ;;  %v11366_v40 = vadd.f32 %v470_v2, %v11240_v18  ;;  %15310 = vst [vmem:[#allocation38_spill] sm:$0xff] %v11386_v35  ;;  %v11395_v43 = vadd.f32 %v8645_v22, %v11284_v47  ;;  %v672_v13 = vpop.f32.mrb[15].mxu1 }
 0x125   :  { %v11360_v31 = vadd.f32 %v472_v14, %v11237_v16  ;;  %v474_v17 = vpop.f32.mrb[19].mxu0  ;;  %v11404_v10 = vadd.f32 %v672_v13, %v11284_v47 }
 0x126   :  { %v11369_v46 = vadd.f32 %v474_v17, %v11240_v18  ;;  %v11383_v17 = vadd.f32 %v8644_v30, %v11284_v47  ;;  %15311 = vst [vmem:[#allocation39_spill] sm:$0xff] %v11395_v43 }
 0x127   :  { %15312 = vst [vmem:[#allocation40_spill] sm:$0xff] %v11404_v10 }
 0x128   :  { %15309 = vst [vmem:[#allocation37_spill] sm:$0xff] %v11383_v17  ;;  %v8648_v5 = vpop.f32.mrb[16].mxu1 }
 0x129   :  { %v685_v13 = vpop.f32.mrb[17].mxu1 }
 0x12a   :  { %v478_v2 = vpop.f32.mrb[20].mxu0  ;;  %v11418_v57 = vadd.f32 %v685_v13, %v11284_v47 }
 0x12b   :  { %v480_v28 = vpop.f32.mrb[21].mxu0  ;;  %v11389_v14 = vadd.f32 %v478_v2, %v11237_v16  ;;  %v8649_v2 = vpop.f32.mrb[18].mxu1 }
 0x12c   :  { %v482_v11 = vpop.f32.mrb[22].mxu0  ;;  %v11398_v30 = vadd.f32 %v480_v28, %v11240_v18  ;;  %v11427_v6 = vadd.f32 %v8649_v2, %v11284_v47  ;;  %v688_v51 = vpop.f32.mrb[19].mxu1 }
 0x12d   :  { %v11392_v20 = vadd.f32 %v482_v11, %v11237_v16  ;;  %v484_v15 = vpop.f32.mrb[23].mxu0  ;;  %v11436_v13 = vadd.f32 %v688_v51, %v11284_v47 }
 0x12e   :  { %v11401_v9 = vadd.f32 %v484_v15, %v11240_v18  ;;  %v11415_v15 = vadd.f32 %v8648_v5, %v11284_v47 }
 0x130   :  { %v8652_v44 = vpop.f32.mrb[20].mxu1 }
 0x131   :  { %v701_v51 = vpop.f32.mrb[21].mxu1 }
 0x132   :  { %v488_v28 = vpop.f32.mrb[24].mxu0  ;;  %v11450_v33 = vadd.f32 %v701_v51, %v11284_v47 }
 0x133   :  { %v490_v63 = vpop.f32.mrb[25].mxu0  ;;  %v11421_v11 = vadd.f32 %v488_v28, %v11237_v16  ;;  %v8653_v28 = vpop.f32.mrb[22].mxu1 }
 0x134   :  { %v492_v62 = vpop.f32.mrb[26].mxu0  ;;  %v11430_v5 = vadd.f32 %v490_v63, %v11240_v18  ;;  %v11459_v45 = vadd.f32 %v8653_v28, %v11284_v47  ;;  %v704_v12 = vpop.f32.mrb[23].mxu1 }
 0x135   :  { %v11424_v22 = vadd.f32 %v492_v62, %v11237_v16  ;;  %v494_v56 = vpop.f32.mrb[27].mxu0  ;;  %v11468_v51 = vadd.f32 %v704_v12, %v11284_v47 }
 0x136   :  { %v11433_v50 = vadd.f32 %v494_v56, %v11240_v18  ;;  %v11447_v56 = vadd.f32 %v8652_v44, %v11284_v47  ;;  %15314 = vst [vmem:[#allocation42_spill] sm:$0xff] %v11459_v45 }
 0x138   :  { %15313 = vst [vmem:[#allocation41_spill] sm:$0xff] %v11447_v56  ;;  %v8656_v35 = vpop.f32.mrb[24].mxu1 }
 0x139   :  { %v717_v12 = vpop.f32.mrb[25].mxu1 }
 0x13a   :  { %v498_v63 = vpop.f32.mrb[28].mxu0  ;;  %v11482_v32 = vadd.f32 %v717_v12, %v11284_v47 }
 0x13b   :  { %v500_v39 = vpop.f32.mrb[29].mxu0  ;;  %v11453_v62 = vadd.f32 %v498_v63, %v11237_v16  ;;  %v8657_v63 = vpop.f32.mrb[26].mxu1 }
 0x13c   :  { %v502_v38 = vpop.f32.mrb[30].mxu0  ;;  %v11462_v44 = vadd.f32 %v500_v39, %v11240_v18  ;;  %v11487_v55 = vadd.f32 %v8657_v63, %v11284_v47  ;;  %v720_v43 = vpop.f32.mrb[27].mxu1  ;;  %v15315_v63 = vpack.c.bf16 %v11252_v24, %v11249_v23 }
 0x13d   :  { %v11456_v2 = vadd.f32 %v502_v38, %v11237_v16  ;;  %v504_v29 = vpop.f32.mrb[31].mxu0  ;;  %v11492_v54 = vadd.f32 %v720_v43, %v11284_v47  ;;  %v15316_v43 = vpack.c.bf16 %v11258_v27, %v11255_v26 }
 0x13e   :  { %v11465_v17 = vadd.f32 %v504_v29, %v11240_v18  ;;  %v11479_v29 = vadd.f32 %v8656_v35, %v11284_v47 }
 0x142   :  { %v508_v39 = vpop.f32.mrb[32].mxu0 }
 0x143   :  { %v510_v10 = vpop.f32.mrb[33].mxu0  ;;  %v509_v38 = vadd.f32 %v508_v39, %v11237_v16 }
 0x144   :  { %v512_v52 = vpop.f32.mrb[34].mxu0  ;;  %v511_v25 = vadd.f32 %v510_v10, %v11240_v18 }
 0x145   :  { %v513_v19 = vadd.f32 %v512_v52, %v11237_v16  ;;  %v514_v28 = vpop.f32.mrb[35].mxu0 }
 0x146   :  { %v515_v35 = vadd.f32 %v514_v28, %v11240_v18 }
 0x147   :  { %v772_v56 = vpack.c.bf16 %v513_v19, %v509_v38  ;;  %v8660_v10 = vpop.f32.mrb[28].mxu1 }
 0x148   :  { %v773_v45 = vpack.c.bf16 %v515_v35, %v511_v25  ;;  %v11505_v19 = vadd.f32 %v8660_v10, %v11284_v47  ;;  %v733_v25 = vpop.f32.mrb[29].mxu1 }
 0x149   :  { %7805 = vmatprep.subr.bf16.mxu0 %v772_v56  ;;  %v11508_v35 = vadd.f32 %v733_v25, %v11284_v47  ;;  %v8661_v56 = vpop.f32.mrb[30].mxu1 }
 0x14a   :  { %v518_v39 = vpop.f32.mrb[36].mxu0  ;;  %7693 = vmatprep.subr.bf16.mxu1 %v773_v45  ;;  %7806 = vmatpush3.bf16.msra.mxu0 %v15315_v63  ;;  %v11513_v63 = vadd.f32 %v8661_v56, %v11284_v47  ;;  %v736_v12 = vpop.f32.mrb[31].mxu1  ;;  %v15317_v56 = vpack.c.bf16 %v11271_v37, %v11268_v36  ;;  %v15319_v37 = vpack.c.bf16 %v11296_v61, %v11293_v60 }
 0x14b   :  { %v520_v28 = vpop.f32.mrb[37].mxu0  ;;  %7694 = vmatpush3.bf16.msra.mxu1 %v15316_v43  ;;  %v519_v45 = vadd.f32 %v518_v39, %v11237_v16  ;;  %v11518_v10 = vadd.f32 %v736_v12, %v11284_v47  ;;  %v15318_v12 = vpack.c.bf16 %v11277_v42, %v11274_v41  ;;  %v15320_v42 = vpack.c.bf16 %v11305_v7, %v11302_v4 }
 0x14c   :  { %v522_v38 = vpop.f32.mrb[38].mxu0  ;;  %v521_v26 = vadd.f32 %v520_v28, %v11240_v18  ;;  %v15321_v61 = vpack.c.bf16 %v11328_v49, %v11325_v48  ;;  %v15322_v7 = vpack.c.bf16 %v11337_v0, %v11334_v59  ;;  %v15323_v49 = vpack.c.bf16 %v11360_v31, %v11357_v21 }
 0x14d   :  { %v523_v23 = vadd.f32 %v522_v38, %v11237_v16  ;;  %v524_v24 = vpop.f32.mrb[39].mxu0  ;;  %v792_v39 = vpack.c.bf16 %v11518_v10, %v11508_v35  ;;  %v15324_v0 = vpack.c.bf16 %v11369_v46, %v11366_v40  ;;  %v15325_v31 = vpack.c.bf16 %v11392_v20, %v11389_v14  ;;  %v9635_v35 = vld [vmem:[%s15300_s27 + $0x140] ss:$8 sps:$4 sm:$0xff]   ;;  %v9639_v10 = vld [vmem:[%s15300_s27 + $0x54] ss:$8 sps:$4 sm:$0xff]  }
 0x14e   :  { %v525_v27 = vadd.f32 %v524_v24, %v11240_v18  ;;  %v15326_v40 = vpack.c.bf16 %v11401_v9, %v11398_v30  ;;  %v15327_v20 = vpack.c.bf16 %v11424_v22, %v11421_v11  ;;  %v15328_v30 = vpack.c.bf16 %v11433_v50, %v11430_v5  ;;  %v9610_v11 = vld [vmem:[%s15300_s27] ss:$8 sps:$4 sm:$0xff]   ;;  %v9615_v5 = vld [vmem:[%s15300_s27 + $0x14] ss:$8 sps:$4 sm:$0xff]  }
 0x14f   :  { %v775_v43 = vpack.c.bf16 %v523_v23, %v519_v45  ;;  %v15329_v50 = vpack.c.bf16 %v11456_v2, %v11453_v62  ;;  %v9607_v22 = vld [vmem:[%s15300_s27 + $0x100] ss:$8 sps:$4 sm:$0xff]   ;;  %v15331_v62 = vpack.c.bf16 %v11436_v13, %v11418_v57  ;;  %v15332_v2 = vpack.c.bf16 %v11308_v8, %v11290_v58  ;;  %v9617_v57 = vld [vmem:[%s15300_s27 + $0x110] ss:$8 sps:$4 sm:$0xff]   ;;  %v9621_v13 = vld [vmem:[%s15300_s27 + $0x24] ss:$8 sps:$4 sm:$0xff]  }
 0x150   :  { %v776_v52 = vpack.c.bf16 %v525_v27, %v521_v26  ;;  %v15334_v58 = vpack.c.bf16 %v11299_v1, %v11287_v53  ;;  %v15335_v8 = vpack.c.bf16 %v11468_v51, %v11450_v33  ;;  %v9624_v1 = vld [vmem:[%s15300_s27 + $0x20] ss:$8 sps:$4 sm:$0xff]   ;;  %v9627_v51 = vld [vmem:[%s15300_s27 + $0x34] ss:$8 sps:$4 sm:$0xff]  }
 0x151   :  { %7807 = vmatprep.subr.bf16.mxu0 %v775_v43  ;;  %v9623_v33 = vld [vmem:[%s15300_s27 + $0x120] ss:$8 sps:$4 sm:$0xff]  }
 0x152   :  { %v528_v38 = vpop.f32.mrb[40].mxu0  ;;  %7695 = vmatprep.subr.bf16.mxu1 %v776_v52  ;;  %7808 = vmatpush3.bf16.msra.mxu0 %v15317_v56 }
 0x153   :  { %v530_v28 = vpop.f32.mrb[41].mxu0  ;;  %7696 = vmatpush3.bf16.msra.mxu1 %v15318_v12  ;;  %v529_v23 = vadd.f32 %v528_v38, %v11237_v16 }
 0x154   :  { %v532_v45 = vpop.f32.mrb[42].mxu0  ;;  %v531_v27 = vadd.f32 %v530_v28, %v11240_v18 }
 0x155   :  { %v533_v24 = vadd.f32 %v532_v45, %v11237_v16  ;;  %v534_v26 = vpop.f32.mrb[43].mxu0 }
 0x156   :  { %v535_v43 = vadd.f32 %v534_v26, %v11240_v18 }
 0x157   :  { %v778_v52 = vpack.c.bf16 %v533_v24, %v529_v23 }
 0x158   :  { %v779_v25 = vpack.c.bf16 %v535_v43, %v531_v27 }
 0x159   :  { %7809 = vmatprep.subr.bf16.mxu0 %v778_v52 }
 0x15a   :  { %v538_v36 = vpop.f32.mrb[44].mxu0  ;;  %7697 = vmatprep.subr.bf16.mxu1 %v779_v25  ;;  %7810 = vmatpush3.bf16.msra.mxu0 %v15319_v37 }
 0x15b   :  { %v540_v41 = vpop.f32.mrb[45].mxu0  ;;  %7698 = vmatpush3.bf16.msra.mxu1 %v15320_v42  ;;  %v539_v56 = vadd.f32 %v538_v36, %v11237_v16 }
 0x15c   :  { %v542_v38 = vpop.f32.mrb[46].mxu0  ;;  %v541_v45 = vadd.f32 %v540_v41, %v11240_v18 }
 0x15d   :  { %v543_v28 = vadd.f32 %v542_v38, %v11237_v16  ;;  %v544_v12 = vpop.f32.mrb[47].mxu0 }
 0x15e   :  { %v545_v23 = vadd.f32 %v544_v12, %v11240_v18 }
 0x15f   :  { %v781_v25 = vpack.c.bf16 %v543_v28, %v539_v56 }
 0x160   :  { %v782_v24 = vpack.c.bf16 %v545_v23, %v541_v45 }
 0x161   :  { %7811 = vmatprep.subr.bf16.mxu0 %v781_v25 }
 0x162   :  { %v548_v60 = vpop.f32.mrb[48].mxu0  ;;  %7699 = vmatprep.subr.bf16.mxu1 %v782_v24  ;;  %7812 = vmatpush3.bf16.msra.mxu0 %v15321_v61 }
 0x163   :  { %v550_v4 = vpop.f32.mrb[49].mxu0  ;;  %7700 = vmatpush3.bf16.msra.mxu1 %v15322_v7  ;;  %v549_v27 = vadd.f32 %v548_v60, %v11237_v16 }
 0x164   :  { %v552_v26 = vpop.f32.mrb[50].mxu0  ;;  %v551_v36 = vadd.f32 %v550_v4, %v11240_v18 }
 0x165   :  { %v553_v43 = vadd.f32 %v552_v26, %v11237_v16  ;;  %v554_v52 = vpop.f32.mrb[51].mxu0 }
 0x166   :  { %v555_v37 = vadd.f32 %v554_v52, %v11240_v18 }
 0x167   :  { %v784_v41 = vpack.c.bf16 %v553_v43, %v549_v27 }
 0x168   :  { %v785_v42 = vpack.c.bf16 %v555_v37, %v551_v36 }
 0x169   :  { %7813 = vmatprep.subr.bf16.mxu0 %v784_v41 }
 0x16a   :  { %v558_v48 = vpop.f32.mrb[52].mxu0  ;;  %7701 = vmatprep.subr.bf16.mxu1 %v785_v42  ;;  %7814 = vmatpush3.bf16.msra.mxu0 %v15323_v49 }
 0x16b   :  { %v560_v59 = vpop.f32.mrb[53].mxu0  ;;  %7702 = vmatpush3.bf16.msra.mxu1 %v15324_v0  ;;  %v559_v56 = vadd.f32 %v558_v48, %v11237_v16 }
 0x16c   :  { %v562_v38 = vpop.f32.mrb[54].mxu0  ;;  %v561_v45 = vadd.f32 %v560_v59, %v11240_v18 }
 0x16d   :  { %v563_v28 = vadd.f32 %v562_v38, %v11237_v16  ;;  %v564_v12 = vpop.f32.mrb[55].mxu0  ;;  %v15330_v38 = vpack.c.bf16 %v11465_v17, %v11462_v44  ;;  %v15333_v17 = vpack.c.bf16 %v11427_v6, %v11415_v15  ;;  %v9618_v44 = vld [vmem:[%s15300_s27 + $0x10] ss:$8 sps:$4 sm:$0xff]   ;;  %v9619_v6 = vld [vmem:[%s15300_s27 + $0x124] ss:$8 sps:$4 sm:$0xff]   ;;  %v15336_v15 = vpack.c.bf16 %v11340_v3, %v11322_v34  ;;  %v15341_v34 = vld [vmem:[#allocation31_spill] sm:$0xff] }
 0x16e   :  { %v565_v23 = vadd.f32 %v564_v12, %v11240_v18  ;;  %v15338_v12 = vld [vmem:[#allocation41_spill] sm:$0xff] }
 0x16f   :  { %v787_v25 = vpack.c.bf16 %v563_v28, %v559_v56  ;;  %v9613_v56 = vld [vmem:[%s15300_s27 + $0x114] ss:$8 sps:$4 sm:$0xff]  }
 0x170   :  { %v788_v24 = vpack.c.bf16 %v565_v23, %v561_v45  ;;  %v15337_v28 = vld [vmem:[#allocation42_spill] sm:$0xff]  ;;  %v15340_v45 = vld [vmem:[#allocation32_spill] sm:$0xff] }
 0x171   :  { %7815 = vmatprep.subr.bf16.mxu0 %v787_v25  ;;  %v15339_v53 = vpack.c.bf16 %v15337_v28, %v15338_v12  ;;  %v15342_v3 = vpack.c.bf16 %v15340_v45, %v15341_v34  ;;  %v9625_v23 = vld [vmem:[%s15300_s27 + $0x134] ss:$8 sps:$4 sm:$0xff]   ;;  %v15343_v25 = vpack.c.bf16 %v11492_v54, %v11482_v32  ;;  %v9629_v54 = vld [vmem:[%s15300_s27 + $0x130] ss:$8 sps:$4 sm:$0xff]   ;;  %v9633_v32 = vld [vmem:[%s15300_s27 + $0x44] ss:$8 sps:$4 sm:$0xff]  }
 0x172   :  { %v568_v21 = vpop.f32.mrb[56].mxu0  ;;  %7703 = vmatprep.subr.bf16.mxu1 %v788_v24  ;;  %7816 = vmatpush3.bf16.msra.mxu0 %v15325_v31  ;;  %v15344_v24 = vld [vmem:[#allocation36_spill] sm:$0xff] }
 0x173   :  { %v570_v46 = vpop.f32.mrb[57].mxu0  ;;  %7704 = vmatpush3.bf16.msra.mxu1 %v15326_v40  ;;  %v569_v61 = vadd.f32 %v568_v21, %v11237_v16  ;;  %v15345_v21 = vld [vmem:[#allocation34_spill] sm:$0xff]  ;;  %v9684_v28 = vld [vmem:[%s15300_s27 + $0xc0] ss:$8 sps:$4 sm:$0xff]   ;;  %v9693_v45 = vld [vmem:[%s15300_s27 + $0xe4] ss:$8 sps:$4 sm:$0xff]  }
 0x174   :  { %v572_v60 = vpop.f32.mrb[58].mxu0  ;;  %v571_v26 = vadd.f32 %v570_v46, %v11240_v18  ;;  %v15346_v31 = vpack.c.bf16 %v15344_v24, %v15345_v21  ;;  %v15347_v46 = vpack.c.bf16 %v11487_v55, %v11479_v29  ;;  %v9630_v40 = vld [vmem:[%s15300_s27 + $0x30] ss:$8 sps:$4 sm:$0xff]   ;;  %v9631_v55 = vld [vmem:[%s15300_s27 + $0x144] ss:$8 sps:$4 sm:$0xff]  }
 0x175   :  { %v573_v4 = vadd.f32 %v572_v60, %v11237_v16  ;;  %v574_v7 = vpop.f32.mrb[59].mxu0  ;;  %v15348_v60 = vld [vmem:[#allocation35_spill] sm:$0xff]  ;;  %v15351_v29 = vld [vmem:[#allocation40_spill] sm:$0xff] }
 0x176   :  { %v575_v27 = vadd.f32 %v574_v7, %v11240_v18  ;;  %v15352_v7 = vld [vmem:[#allocation38_spill] sm:$0xff]  ;;  %v9683_v12 = vld [vmem:[%s15300_s27 + $0x1c0] ss:$8 sps:$4 sm:$0xff]   ;;  %v9691_v34 = vld [vmem:[%s15300_s27 + $0x1e4] ss:$8 sps:$4 sm:$0xff]  }
 0x177   :  { %v790_v43 = vpack.c.bf16 %v573_v4, %v569_v61  ;;  %v15349_v61 = vld [vmem:[#allocation33_spill] sm:$0xff]  ;;  %v9695_v24 = vld [vmem:[%s15300_s27 + $0x1e0] ss:$8 sps:$4 sm:$0xff]   ;;  %v9699_v21 = vld [vmem:[%s15300_s27 + $0xf4] ss:$8 sps:$4 sm:$0xff]  }
 0x178   :  { %v791_v52 = vpack.c.bf16 %v575_v27, %v571_v26  ;;  %v15350_v4 = vpack.c.bf16 %v15348_v60, %v15349_v61  ;;  %v15353_v26 = vpack.c.bf16 %v15351_v29, %v15352_v7  ;;  %v15354_v27 = vpack.c.bf16 %v11513_v63, %v11505_v19  ;;  %v9637_v19 = vld [vmem:[%s15300_s27 + $0x154] ss:$8 sps:$4 sm:$0xff]   ;;  %v9642_v63 = vld [vmem:[%s15300_s27 + $0x50] ss:$8 sps:$4 sm:$0xff]   ;;  %v9709_v7 = vld [vmem:[%s15300_s27 + $0x224] ss:$8 sps:$4 sm:$0xff]  }
 0x179   :  { %7817 = vmatprep.subr.bf16.mxu0 %v790_v43  ;;  %v9636_v43 = vld [vmem:[%s15300_s27 + $0x40] ss:$8 sps:$4 sm:$0xff]   ;;  %v15359_v61 = vmov 0   ;;  %v9708_v29 = vld [vmem:[%s15300_s27 + $0x210] ss:$8 sps:$4 sm:$0xff]  }
 0x17a   :  { %v578_v14 = vpop.f32.mrb[60].mxu0  ;;  %7705 = vmatprep.subr.bf16.mxu1 %v791_v52  ;;  %7818 = vmatpush3.bf16.msra.mxu0 %v15327_v20  ;;  %v15356_v52 = vld [vmem:[#allocation37_spill] sm:$0xff]  ;;  %v9753_v60 = vld [vmem:[%s15358_s6 + $0x1c] ss:$12 sps:$4 sm:$0xff]  }
 0x17b   :  { %v580_v9 = vpop.f32.mrb[61].mxu0  ;;  %7706 = vmatpush3.bf16.msra.mxu1 %v15328_v30  ;;  %v579_v37 = vadd.f32 %v578_v14, %v11237_v16  ;;  %v9641_v20 = vld [vmem:[%s15300_s27 + $0x150] ss:$8 sps:$4 sm:$0xff]   ;;  %v9643_v30 = vld [vmem:[%s15300_s27 + $0x164] ss:$8 sps:$4 sm:$0xff]  }
 0x17c   :  { %v582_v36 = vpop.f32.mrb[62].mxu0  ;;  %v581_v48 = vadd.f32 %v580_v9, %v11240_v18  ;;  %v9645_v9 = vld [vmem:[%s15300_s27 + $0x64] ss:$8 sps:$4 sm:$0xff]  }
 0x17d   :  { %v583_v41 = vadd.f32 %v582_v36, %v11237_v16  ;;  %v584_v42 = vpop.f32.mrb[63].mxu0  ;;  %v9648_v36 = vld [vmem:[%s15300_s27 + $0x60] ss:$8 sps:$4 sm:$0xff]  }
 0x17e   :  { %v585_v49 = vadd.f32 %v584_v42, %v11240_v18  ;;  %v9649_v42 = vld [vmem:[%s15300_s27 + $0x174] ss:$8 sps:$4 sm:$0xff]  }
 0x17f   :  { %v793_v59 = vpack.c.bf16 %v583_v41, %v579_v37  ;;  %v9647_v37 = vld [vmem:[%s15300_s27 + $0x160] ss:$8 sps:$4 sm:$0xff]   ;;  %v9651_v41 = vld [vmem:[%s15300_s27 + $0x74] ss:$8 sps:$4 sm:$0xff]  }
 0x180   :  { %v794_v0 = vpack.c.bf16 %v585_v49, %v581_v48  ;;  %v9654_v48 = vld [vmem:[%s15300_s27 + $0x70] ss:$8 sps:$4 sm:$0xff]  }
 0x181   :  { %7819 = vmatprep.subr.bf16.mxu0 %v793_v59  ;;  %v9653_v49 = vld [vmem:[%s15300_s27 + $0x170] ss:$8 sps:$4 sm:$0xff]   ;;  %v9657_v59 = vld [vmem:[%s15300_s27 + $0x84] ss:$8 sps:$4 sm:$0xff]  }
 0x182   :  { %7707 = vmatprep.subr.bf16.mxu1 %v794_v0  ;;  %7820 = vmatpush3.bf16.msra.mxu0 %v15329_v50  ;;  %v9655_v0 = vld [vmem:[%s15300_s27 + $0x184] ss:$8 sps:$4 sm:$0xff]   ;;  %v9659_v50 = vld [vmem:[%s15300_s27 + $0x180] ss:$8 sps:$4 sm:$0xff]  }
 0x183   :  { %7708 = vmatpush3.bf16.msra.mxu1 %v15330_v38  ;;  %v9666_v38 = vld [vmem:[%s15300_s27 + $0x90] ss:$8 sps:$4 sm:$0xff]  }
 0x184   :  { %7917 = vmatprep.subr.bf16.mxu1 %v15331_v62  ;;  %v9669_v62 = vld [vmem:[%s15300_s27 + $0xa4] ss:$8 sps:$4 sm:$0xff]  }
 0x185   :  { %1375 = vmatmul.mubr.bf16.vlgmr.msra.gmra.mrb[64].mxu0 %v9610_v11  ;;  %v9660_v11 = vld [vmem:[%s15300_s27 + $0x80] ss:$8 sps:$4 sm:$0xff]  }
 0x186   :  { %1054 = vmatmul.mubr.bf16.vlgmr.msra.gmra.mrb[32].mxu1 %v9607_v22  ;;  %1382 = vmatprep.mubr.bf16.mxu0 %v9615_v5  ;;  %v9663_v22 = vld [vmem:[%s15300_s27 + $0x94] ss:$8 sps:$4 sm:$0xff]  }
 0x187   :  { %7918 = vmatpush3.bf16.msra.mxu1 %v15332_v2  ;;  %1061 = vmatprep.mubr.bf16.mxu1 %v9613_v56  ;;  %v9661_v5 = vld [vmem:[%s15300_s27 + $0x194] ss:$8 sps:$4 sm:$0xff]   ;;  %v9665_v56 = vld [vmem:[%s15300_s27 + $0x190] ss:$8 sps:$4 sm:$0xff]   ;;  %v9667_v2 = vld [vmem:[%s15300_s27 + $0x1a4] ss:$8 sps:$4 sm:$0xff]  }
 0x188   :  { %7919 = vmatprep.subr.bf16.mxu1 %v15333_v17  ;;  %v9672_v17 = vld [vmem:[%s15300_s27 + $0xa0] ss:$8 sps:$4 sm:$0xff]  }
 0x18b   :  { %7920 = vmatpush3.bf16.msra.mxu1 %v15334_v58  ;;  %v9678_v58 = vld [vmem:[%s15300_s27 + $0xb0] ss:$8 sps:$4 sm:$0xff]  }
 0x18c   :  { %7921 = vmatprep.subr.bf16.mxu1 %v15335_v8  ;;  %v9681_v8 = vld [vmem:[%s15300_s27 + $0xc4] ss:$8 sps:$4 sm:$0xff]  }
 0x18d   :  { %1383 = vmatmul.mubr.bf16.gmra.mrb[68].mxu0 %v9618_v44  ;;  %v9671_v44 = vld [vmem:[%s15300_s27 + $0x1a0] ss:$8 sps:$4 sm:$0xff]  }
 0x18e   :  { %1062 = vmatmul.mubr.bf16.gmra.mrb[36].mxu1 %v9617_v57  ;;  %1390 = vmatprep.mubr.bf16.mxu0 %v9621_v13  ;;  %v9675_v57 = vld [vmem:[%s15300_s27 + $0xb4] ss:$8 sps:$4 sm:$0xff]  }
 0x18f   :  { %7922 = vmatpush3.bf16.msra.mxu1 %v15336_v15  ;;  %1069 = vmatprep.mubr.bf16.mxu1 %v9619_v6  ;;  %v9673_v13 = vld [vmem:[%s15300_s27 + $0x1b4] ss:$8 sps:$4 sm:$0xff]   ;;  %v9677_v6 = vld [vmem:[%s15300_s27 + $0x1b0] ss:$8 sps:$4 sm:$0xff]   ;;  %v9679_v15 = vld [vmem:[%s15300_s27 + $0x1c4] ss:$8 sps:$4 sm:$0xff]  }
 0x190   :  { %7923 = vmatprep.subr.bf16.mxu1 %v15339_v53  ;;  %v9687_v53 = vld [vmem:[%s15300_s27 + $0xd4] ss:$8 sps:$4 sm:$0xff]  }
 0x193   :  { %7924 = vmatpush3.bf16.msra.mxu1 %v15342_v3  ;;  %v9742_v3 = vld [vmem:[%s15358_s6] ss:$12 sps:$4 sm:$0xff]  }
 0x194   :  { %7925 = vmatprep.subr.bf16.mxu1 %v15343_v25  ;;  %v9696_v25 = vld [vmem:[%s15300_s27 + $0xe0] ss:$8 sps:$4 sm:$0xff]  }
 0x195   :  { %1391 = vmatmul.mubr.bf16.gmra.mrb[72].mxu0 %v9624_v1  ;;  %v9685_v1 = vld [vmem:[%s15300_s27 + $0x1d4] ss:$8 sps:$4 sm:$0xff]  }
 0x196   :  { %1070 = vmatmul.mubr.bf16.gmra.mrb[40].mxu1 %v9623_v33  ;;  %1398 = vmatprep.mubr.bf16.mxu0 %v9627_v51  ;;  %v9690_v33 = vld [vmem:[%s15300_s27 + $0xd0] ss:$8 sps:$4 sm:$0xff]  }
 0x197   :  { %7926 = vmatpush3.bf16.msra.mxu1 %v15346_v31  ;;  %1077 = vmatprep.mubr.bf16.mxu1 %v9625_v23  ;;  %v9689_v51 = vld [vmem:[%s15300_s27 + $0x1d0] ss:$8 sps:$4 sm:$0xff]   ;;  %v9697_v31 = vld [vmem:[%s15300_s27 + $0x1f4] ss:$8 sps:$4 sm:$0xff]  }
 0x198   :  { %7927 = vmatprep.subr.bf16.mxu1 %v15347_v46  ;;  %v9744_v23 = vld [vmem:[%s15358_s6 + $0x4] ss:$12 sps:$4 sm:$0xff]  }
 0x199   :  { %2033 = vmatprep.subr.bf16.mxu0 %v9744_v23  ;;  %v9702_v46 = vld [vmem:[%s15300_s27 + $0xf0] ss:$8 sps:$4 sm:$0xff]  }
 0x19a   :  { %2034 = vmatpush1.bf16.msra.mxu0 %v9742_v3 }
 0x19b   :  { %7928 = vmatpush3.bf16.msra.mxu1 %v15350_v4  ;;  %2035 = vmatprep.subr.bf16.mxu0 %v9753_v60  ;;  %v9703_v4 = vld [vmem:[%s15300_s27 + $0x200] ss:$8 sps:$4 sm:$0xff]   ;;  %v9781_v60 = vld [vmem:[%s15358_s6 + $0x98] ss:$12 sps:$4 sm:$0xff]  }
 0x19c   :  { %7929 = vmatprep.subr.bf16.mxu1 %v792_v39  ;;  %v15355_v39 = vld [vmem:[#allocation39_spill] sm:$0xff] }
 0x19d   :  { %1399 = vmatmul.mubr.bf16.gmra.mrb[76].mxu0 %v9630_v40  ;;  %v15357_v14 = vpack.c.bf16 %v15355_v39, %v15356_v52  ;;  %v9701_v40 = vld [vmem:[%s15300_s27 + $0x1f0] ss:$8 sps:$4 sm:$0xff]   ;;  %v9715_v39 = vld [vmem:[%s15300_s27 + $0x244] ss:$8 sps:$4 sm:$0xff]   ;;  %v9760_v52 = vld [vmem:[%s15358_s6 + $0x48] ss:$12 sps:$4 sm:$0xff]  }
 0x19e   :  { %1078 = vmatmul.mubr.bf16.gmra.mrb[44].mxu1 %v9629_v54  ;;  %1406 = vmatprep.mubr.bf16.mxu0 %v9633_v32  ;;  %v9705_v54 = vld [vmem:[%s15300_s27 + $0x204] ss:$8 sps:$4 sm:$0xff]  }
 0x19f   :  { %7930 = vmatpush3.bf16.msra.mxu1 %v15353_v26  ;;  %1085 = vmatprep.mubr.bf16.mxu1 %v9631_v55  ;;  %v9751_v32 = vld [vmem:[%s15358_s6 + $0x18] ss:$12 sps:$4 sm:$0xff]   ;;  %v9706_v55 = vld [vmem:[%s15300_s27 + $0x214] ss:$8 sps:$4 sm:$0xff]  }
 0x1a0   :  { %7931 = vmatprep.subr.bf16.mxu1 %v15354_v27  ;;  %2036 = vmatpush1.bf16.msra.mxu0 %v9751_v32  ;;  %v9757_v26 = vld [vmem:[%s15358_s6 + $0x30] ss:$12 sps:$4 sm:$0xff]   ;;  %v9759_v27 = vld [vmem:[%s15358_s6 + $0x34] ss:$12 sps:$4 sm:$0xff]  }
 0x1a1   :  { %2037 = vmatprep.subr.bf16.mxu0 %v9759_v27 }
 0x1a3   :  { %7932 = vmatpush3.bf16.msra.mxu1 %v15357_v14  ;;  %v9762_v14 = vld [vmem:[%s15358_s6 + $0x4c] ss:$12 sps:$4 sm:$0xff]  }
 0x1a4   :  { %2038 = vmatpush1.bf16.msra.mxu0 %v9757_v26 }
 0x1a5   :  { %1407 = vmatmul.mubr.bf16.gmra.mrb[80].mxu0 %v9636_v43  ;;  %v9711_v43 = vld [vmem:[%s15300_s27 + $0x220] ss:$8 sps:$4 sm:$0xff]   ;;  %2039 = vmatprep.subr.bf16.mxu0 %v9762_v14 }
 0x1a6   :  { %1086 = vmatmul.mubr.bf16.gmra.mrb[48].mxu1 %v9635_v35  ;;  %1414 = vmatprep.mubr.bf16.mxu0 %v9639_v10  ;;  %v9712_v35 = vld [vmem:[%s15300_s27 + $0x234] ss:$8 sps:$4 sm:$0xff]   ;;  %v9714_v10 = vld [vmem:[%s15300_s27 + $0x230] ss:$8 sps:$4 sm:$0xff]  }
 0x1a7   :  { %1093 = vmatprep.mubr.bf16.mxu1 %v9637_v19  ;;  %v9717_v19 = vld [vmem:[%s15300_s27 + $0x240] ss:$8 sps:$4 sm:$0xff]  }
 0x1a8   :  { %2040 = vmatpush1.bf16.msra.mxu0 %v9760_v52 }
 0x1ad   :  { %1415 = vmatmul.mubr.bf16.gmra.mrb[84].mxu0 %v9642_v63  ;;  %v9718_v63 = vld [vmem:[%s15300_s27 + $0x254] ss:$8 sps:$4 sm:$0xff]  }
 0x1ae   :  { %1094 = vmatmul.mubr.bf16.gmra.mrb[52].mxu1 %v9641_v20  ;;  %1422 = vmatprep.mubr.bf16.mxu0 %v9645_v9  ;;  %v9720_v20 = vld [vmem:[%s15300_s27 + $0x250] ss:$8 sps:$4 sm:$0xff]   ;;  %v9721_v9 = vld [vmem:[%s15300_s27 + $0x264] ss:$8 sps:$4 sm:$0xff]  }
 0x1af   :  { %1101 = vmatprep.mubr.bf16.mxu1 %v9643_v30  ;;  %v9763_v30 = vld [vmem:[%s15358_s6 + $0x60] ss:$12 sps:$4 sm:$0xff]  }
 0x1b5   :  { %1423 = vmatmul.mubr.bf16.gmra.mrb[88].mxu0 %v9648_v36  ;;  %v9765_v36 = vld [vmem:[%s15358_s6 + $0x64] ss:$12 sps:$4 sm:$0xff]  }
 0x1b6   :  { %1102 = vmatmul.mubr.bf16.gmra.mrb[56].mxu1 %v9647_v37  ;;  %1430 = vmatprep.mubr.bf16.mxu0 %v9651_v41  ;;  %v9723_v37 = vld [vmem:[%s15300_s27 + $0x260] ss:$8 sps:$4 sm:$0xff]   ;;  %v9724_v41 = vld [vmem:[%s15300_s27 + $0x274] ss:$8 sps:$4 sm:$0xff]  }
 0x1b7   :  { %1109 = vmatprep.mubr.bf16.mxu1 %v9649_v42  ;;  %2041 = vmatprep.subr.bf16.mxu0 %v9765_v36  ;;  %v9726_v42 = vld [vmem:[%s15300_s27 + $0x270] ss:$8 sps:$4 sm:$0xff]  }
 0x1b8   :  { %2042 = vmatpush1.bf16.msra.mxu0 %v9763_v30 }
 0x1bd   :  { %1431 = vmatmul.mubr.bf16.gmra.mrb[92].mxu0 %v9654_v48  ;;  %v9727_v48 = vld [vmem:[%s15300_s27 + $0x284] ss:$8 sps:$4 sm:$0xff]  }
 0x1be   :  { %1110 = vmatmul.mubr.bf16.gmra.mrb[60].mxu1 %v9653_v49  ;;  %1438 = vmatprep.mubr.bf16.mxu0 %v9657_v59  ;;  %v9766_v49 = vld [vmem:[%s15358_s6 + $0x78] ss:$12 sps:$4 sm:$0xff]   ;;  %v9768_v59 = vld [vmem:[%s15358_s6 + $0x7c] ss:$12 sps:$4 sm:$0xff]  }
 0x1bf   :  { %1117 = vmatprep.mubr.bf16.mxu1 %v9655_v0  ;;  %2043 = vmatprep.subr.bf16.mxu0 %v9768_v59  ;;  %v9729_v0 = vld [vmem:[%s15300_s27 + $0x280] ss:$8 sps:$4 sm:$0xff]  }
 0x1c0   :  { %2044 = vmatpush1.bf16.msra.mxu0 %v9766_v49 }
 0x1c5   :  { %1439 = vmatmul.mubr.bf16.gmra.mrb[96].mxu0 %v9660_v11  ;;  %v9730_v11 = vld [vmem:[%s15300_s27 + $0x294] ss:$8 sps:$4 sm:$0xff]  }
 0x1c6   :  { %1118 = vmatmul.mubr.bf16.gmra.mrb[64].mxu1 %v9659_v50  ;;  %1446 = vmatprep.mubr.bf16.mxu0 %v9663_v22  ;;  %v9769_v50 = vld [vmem:[%s15358_s6 + $0x8] ss:$12 sps:$4 sm:$0xff]   ;;  %v9732_v22 = vld [vmem:[%s15300_s27 + $0x290] ss:$8 sps:$4 sm:$0xff]  }
 0x1c7   :  { %1125 = vmatprep.mubr.bf16.mxu1 %v9661_v5  ;;  %8662 = vmatprep.subr.bf16.mxu1 %v9769_v50  ;;  %v9733_v5 = vld [vmem:[%s15300_s27 + $0x2a4] ss:$8 sps:$4 sm:$0xff]  }
 0x1cd   :  { %1447 = vmatmul.mubr.bf16.gmra.mrb[100].mxu0 %v9666_v38  ;;  %v9770_v38 = vld [vmem:[%s15358_s6 + $0x90] ss:$12 sps:$4 sm:$0xff]  }
 0x1ce   :  { %1126 = vmatmul.mubr.bf16.gmra.mrb[68].mxu1 %v9665_v56  ;;  %1454 = vmatprep.mubr.bf16.mxu0 %v9669_v62  ;;  %v9772_v56 = vld [vmem:[%s15358_s6 + $0x94] ss:$12 sps:$4 sm:$0xff]  }
 0x1cf   :  { %1133 = vmatprep.mubr.bf16.mxu1 %v9667_v2  ;;  %v9773_v62 = vld [vmem:[%s15358_s6 + $0x20] ss:$12 sps:$4 sm:$0xff]   ;;  %2045 = vmatprep.subr.bf16.mxu0 %v9772_v56  ;;  %v9774_v2 = vld [vmem:[%s15358_s6 + $0x38] ss:$12 sps:$4 sm:$0xff]  }
 0x1d0   :  { %2046 = vmatpush1.bf16.msra.mxu0 %v9770_v38 }
 0x1d5   :  { %1455 = vmatmul.mubr.bf16.gmra.mrb[104].mxu0 %v9672_v17  ;;  %v9735_v17 = vld [vmem:[%s15300_s27 + $0x2a0] ss:$8 sps:$4 sm:$0xff]  }
 0x1d6   :  { %1134 = vmatmul.mubr.bf16.gmra.mrb[72].mxu1 %v9671_v44  ;;  %1462 = vmatprep.mubr.bf16.mxu0 %v9675_v57  ;;  %v9736_v44 = vld [vmem:[%s15300_s27 + $0x2b4] ss:$8 sps:$4 sm:$0xff]  }
 0x1d7   :  { %1141 = vmatprep.mubr.bf16.mxu1 %v9673_v13  ;;  %v9775_v57 = vld [vmem:[%s15358_s6 + $0x50] ss:$12 sps:$4 sm:$0xff]  }
 0x1dd   :  { %1463 = vmatmul.mubr.bf16.gmra.mrb[108].mxu0 %v9678_v58 }
 0x1de   :  { %1142 = vmatmul.mubr.bf16.gmra.mrb[76].mxu1 %v9677_v6  ;;  %1470 = vmatprep.mubr.bf16.mxu0 %v9681_v8  ;;  %v9779_v8 = vld [vmem:[%s15358_s6 + $0x68] ss:$12 sps:$4 sm:$0xff]  }
 0x1df   :  { %1149 = vmatprep.mubr.bf16.mxu1 %v9679_v15 }
 0x1e5   :  { %1471 = vmatmul.mubr.bf16.gmra.mrb[112].mxu0 %v9684_v28 }
 0x1e6   :  { %1150 = vmatmul.mubr.bf16.gmra.mrb[80].mxu1 %v9683_v12  ;;  %1478 = vmatprep.mubr.bf16.mxu0 %v9687_v53  ;;  %v9738_v53 = vld [vmem:[%s15300_s27 + $0x2b0] ss:$8 sps:$4 sm:$0xff]  }
 0x1e7   :  { %1157 = vmatprep.mubr.bf16.mxu1 %v9685_v1 }
 0x1ed   :  { %1479 = vmatmul.mubr.bf16.gmra.mrb[116].mxu0 %v9690_v33 }
 0x1ee   :  { %1158 = vmatmul.mubr.bf16.gmra.mrb[84].mxu1 %v9689_v51  ;;  %1486 = vmatprep.mubr.bf16.mxu0 %v9693_v45  ;;  %v9739_v45 = vld [vmem:[%s15300_s27 + $0x2c4] ss:$8 sps:$4 sm:$0xff]  }
 0x1ef   :  { %1165 = vmatprep.mubr.bf16.mxu1 %v9691_v34 }
 0x1f5   :  { %1487 = vmatmul.mubr.bf16.gmra.mrb[120].mxu0 %v9696_v25 }
 0x1f6   :  { %1166 = vmatmul.mubr.bf16.gmra.mrb[88].mxu1 %v9695_v24  ;;  %1494 = vmatprep.mubr.bf16.mxu0 %v9699_v21  ;;  %v9776_v24 = vld [vmem:[%s15358_s6 + $0xa8] ss:$12 sps:$4 sm:$0xff]   ;;  %v9778_v21 = vld [vmem:[%s15358_s6 + $0xac] ss:$12 sps:$4 sm:$0xff]  }
 0x1f7   :  { %1173 = vmatprep.mubr.bf16.mxu1 %v9697_v31  ;;  %v9780_v31 = vld [vmem:[%s15358_s6 + $0x80] ss:$12 sps:$4 sm:$0xff]   ;;  %2047 = vmatprep.subr.bf16.mxu0 %v9778_v21 }
 0x1f8   :  { %2048 = vmatpush1.bf16.msra.mxu0 %v9776_v24 }
 0x1fd   :  { %1495 = vmatmul.mubr.bf16.gmra.mrb[124].mxu0 %v9702_v46 }
 0x1fe   :  { %1174 = vmatmul.mubr.bf16.gmra.mrb[92].mxu1 %v9701_v40  ;;  %2065 = vmatprep.mubr.bf16.mxu0 %v15359_v61 }
 0x1ff   :  { %1728 = vmatprep.mubr.bf16.mxu1 %v9705_v54 }
 0x206   :  { %1729 = vmatmul.mubr.bf16.vlgmr.msra.gmra.mrb[96].mxu1 %v9703_v4 }
 0x207   :  { %1736 = vmatprep.mubr.bf16.mxu1 %v9706_v55  ;;  %8663 = vmatpush3.bf16.msra.mxu1 %v9769_v50 }
 0x208   :  { %8664 = vmatprep.subr.bf16.mxu1 %v9773_v62 }
 0x20b   :  { %8665 = vmatpush3.bf16.msra.mxu1 %v9773_v62 }
 0x20c   :  { %8666 = vmatprep.subr.bf16.mxu1 %v9774_v2 }
 0x20e   :  { %1737 = vmatmul.mubr.bf16.gmra.mrb[100].mxu1 %v9708_v29 }
 0x20f   :  { %1744 = vmatprep.mubr.bf16.mxu1 %v9709_v7  ;;  %8667 = vmatpush3.bf16.msra.mxu1 %v9774_v2  ;;  %v9741_v7 = vld [vmem:[%s15300_s27 + $0x2c0] ss:$8 sps:$4 sm:$0xff]  }
 0x210   :  { %8668 = vmatprep.subr.bf16.mxu1 %v9775_v57 }
 0x213   :  { %8669 = vmatpush3.bf16.msra.mxu1 %v9775_v57 }
 0x214   :  { %8670 = vmatprep.subr.bf16.mxu1 %v9779_v8 }
 0x216   :  { %1745 = vmatmul.mubr.bf16.gmra.mrb[104].mxu1 %v9711_v43 }
 0x217   :  { %1752 = vmatprep.mubr.bf16.mxu1 %v9712_v35  ;;  %8671 = vmatpush3.bf16.msra.mxu1 %v9779_v8  ;;  %v9745_v35 = vld [vmem:[%s15300_s27 + $0x2d4] ss:$8 sps:$4 sm:$0xff]  }
 0x218   :  { %8672 = vmatprep.subr.bf16.mxu1 %v9780_v31 }
 0x21b   :  { %8673 = vmatpush3.bf16.msra.mxu1 %v9780_v31  ;;  %v9756_v31 = vld [vmem:[%s15300_s27 + $0x2f0] ss:$8 sps:$4 sm:$0xff]  }
 0x21c   :  { %8674 = vmatprep.subr.bf16.mxu1 %v9781_v60 }
 0x21e   :  { %1753 = vmatmul.mubr.bf16.gmra.mrb[108].mxu1 %v9714_v10 }
 0x21f   :  { %1760 = vmatprep.mubr.bf16.mxu1 %v9715_v39  ;;  %8675 = vmatpush3.bf16.msra.mxu1 %v9781_v60 }
 0x226   :  { %1761 = vmatmul.mubr.bf16.gmra.mrb[112].mxu1 %v9717_v19  ;;  %v9782_v19 = vld [vmem:[%s15358_s6 + $0xb0] ss:$12 sps:$4 sm:$0xff]  }
 0x227   :  { %1768 = vmatprep.mubr.bf16.mxu1 %v9718_v63  ;;  %8676 = vmatprep.subr.bf16.mxu1 %v9782_v19 }
 0x228   :  { %8677 = vmatpush3.bf16.msra.mxu1 %v9782_v19 }
 0x22e   :  { %1769 = vmatmul.mubr.bf16.gmra.mrb[116].mxu1 %v9720_v20 }
 0x22f   :  { %1776 = vmatprep.mubr.bf16.mxu1 %v9721_v9 }
 0x236   :  { %1777 = vmatmul.mubr.bf16.gmra.mrb[120].mxu1 %v9723_v37 }
 0x237   :  { %1784 = vmatprep.mubr.bf16.mxu1 %v9724_v41 }
 0x23e   :  { %1785 = vmatmul.mubr.bf16.gmra.mrb[124].mxu1 %v9726_v42  ;;  %v9747_v42 = vld [vmem:[%s15300_s27 + $0x2d0] ss:$8 sps:$4 sm:$0xff]  }
 0x23f   :  { %1792 = vmatprep.mubr.bf16.mxu1 %v9727_v48 }
 0x246   :  { %1793 = vmatmul.mubr.bf16.gmra.mrb[128].mxu1 %v9729_v0  ;;  %v9748_v0 = vld [vmem:[%s15300_s27 + $0x2e4] ss:$8 sps:$4 sm:$0xff]  }
 0x247   :  { %1800 = vmatprep.mubr.bf16.mxu1 %v9730_v11  ;;  %v9785_v11 = vld [vmem:[%s15097_s8 + $0x4] ss:$12 sps:$4 sm:$0xff]  }
 0x248   :  { %2515 = vmatprep.subr.bf16.mxu0 %v9785_v11 }
 0x24e   :  { %1801 = vmatmul.mubr.bf16.gmra.mrb[132].mxu1 %v9732_v22 }
 0x24f   :  { %1808 = vmatprep.mubr.bf16.mxu1 %v9733_v5 }
 0x256   :  { %1809 = vmatmul.mubr.bf16.gmra.mrb[136].mxu1 %v9735_v17 }
 0x257   :  { %1816 = vmatprep.mubr.bf16.mxu1 %v9736_v44 }
 0x258   :  { %v7821_v13 = vpop.f32.mrb[64].mxu0 }
 0x259   :  { %v7709_v58 = vpop.f32.mrb[32].mxu1  ;;  %v7822_v6 = vpop.f32.mrb[65].mxu0 }
 0x25a   :  { %v7710_v15 = vpop.f32.mrb[33].mxu1  ;;  %v7823_v28 = vadd.f32 %v7822_v6, %v7821_v13  ;;  %v7824_v12 = vpop.f32.mrb[66].mxu0 }
 0x25b   :  { %v7711_v1 = vadd.f32 %v7710_v15, %v7709_v58  ;;  %v7712_v33 = vpop.f32.mrb[34].mxu1  ;;  %v7825_v51 = vpop.f32.mrb[67].mxu0  ;;  %v9750_v58 = vld [vmem:[%s15300_s27 + $0x2e0] ss:$8 sps:$4 sm:$0xff]  }
 0x25c   :  { %v7713_v34 = vpop.f32.mrb[35].mxu1  ;;  %v7826_v3 = vadd.f32 %v7825_v51, %v7824_v12 }
 0x25d   :  { %v11957_v23 = vadd.f32 %v7823_v28, %v7711_v1  ;;  %v7714_v25 = vadd.f32 %v7713_v34, %v7712_v33  ;;  %v9754_v28 = vld [vmem:[%s15300_s27 + $0x2f4] ss:$8 sps:$4 sm:$0xff]  }
 0x25e   :  { %1817 = vmatmul.mubr.bf16.gmra.mrb[140].mxu1 %v9738_v53 }
 0x25f   :  { %v11968_v46 = vadd.f32 %v7826_v3, %v7714_v25  ;;  %1824 = vmatprep.mubr.bf16.mxu1 %v9739_v45 }
 0x260   :  { %v7827_v40 = vpop.f32.mrb[68].mxu0 }
 0x261   :  { %v7715_v54 = vpop.f32.mrb[36].mxu1  ;;  %v7828_v32 = vpop.f32.mrb[69].mxu0 }
 0x262   :  { %v7716_v4 = vpop.f32.mrb[37].mxu1  ;;  %v7829_v55 = vadd.f32 %v7828_v32, %v7827_v40  ;;  %v7830_v29 = vpop.f32.mrb[70].mxu0 }
 0x263   :  { %v7717_v26 = vadd.f32 %v7716_v4, %v7715_v54  ;;  %v7718_v27 = vpop.f32.mrb[38].mxu1  ;;  %v7831_v43 = vpop.f32.mrb[71].mxu0 }
 0x264   :  { %v7719_v10 = vpop.f32.mrb[39].mxu1  ;;  %v7832_v39 = vadd.f32 %v7831_v43, %v7830_v29 }
 0x265   :  { %v11979_v52 = vadd.f32 %v7829_v55, %v7717_v26  ;;  %v7720_v14 = vadd.f32 %v7719_v10, %v7718_v27 }
 0x266   :  { %1825 = vmatmul.mubr.bf16.gmra.mrb[144].mxu1 %v9741_v7 }
 0x267   :  { %v11984_v63 = vadd.f32 %v7832_v39, %v7720_v14  ;;  %1832 = vmatprep.mubr.bf16.mxu1 %v9745_v35 }
 0x268   :  { %v7833_v20 = vpop.f32.mrb[72].mxu0 }
 0x269   :  { %v7721_v9 = vpop.f32.mrb[40].mxu1  ;;  %v7834_v30 = vpop.f32.mrb[73].mxu0 }
 0x26a   :  { %v7722_v36 = vpop.f32.mrb[41].mxu1  ;;  %v7835_v37 = vadd.f32 %v7834_v30, %v7833_v20  ;;  %v7836_v41 = vpop.f32.mrb[74].mxu0 }
 0x26b   :  { %v7723_v48 = vadd.f32 %v7722_v36, %v7721_v9  ;;  %v7724_v49 = vpop.f32.mrb[42].mxu1  ;;  %v7837_v59 = vpop.f32.mrb[75].mxu0 }
 0x26c   :  { %v7725_v50 = vpop.f32.mrb[43].mxu1  ;;  %v7838_v22 = vadd.f32 %v7837_v59, %v7836_v41 }
 0x26d   :  { %v11995_v5 = vadd.f32 %v7835_v37, %v7723_v48  ;;  %v7726_v38 = vadd.f32 %v7725_v50, %v7724_v49 }
 0x26e   :  { %1833 = vmatmul.mubr.bf16.gmra.mrb[148].mxu1 %v9747_v42 }
 0x26f   :  { %v11997_v56 = vadd.f32 %v7838_v22, %v7726_v38  ;;  %1840 = vmatprep.mubr.bf16.mxu1 %v9748_v0 }
 0x270   :  { %v7839_v62 = vpop.f32.mrb[76].mxu0 }
 0x271   :  { %v7727_v2 = vpop.f32.mrb[44].mxu1  ;;  %v7840_v17 = vpop.f32.mrb[77].mxu0 }
 0x272   :  { %v7728_v44 = vpop.f32.mrb[45].mxu1  ;;  %v7841_v57 = vadd.f32 %v7840_v17, %v7839_v62  ;;  %v7842_v13 = vpop.f32.mrb[78].mxu0 }
 0x273   :  { %v7729_v6 = vadd.f32 %v7728_v44, %v7727_v2  ;;  %v7730_v8 = vpop.f32.mrb[46].mxu1  ;;  %v7843_v15 = vpop.f32.mrb[79].mxu0 }
 0x274   :  { %v7731_v12 = vpop.f32.mrb[47].mxu1  ;;  %v7844_v53 = vadd.f32 %v7843_v15, %v7842_v13 }
 0x275   :  { %v12005_v1 = vadd.f32 %v7841_v57, %v7729_v6  ;;  %v7732_v33 = vadd.f32 %v7731_v12, %v7730_v8 }
 0x276   :  { %1841 = vmatmul.mubr.bf16.gmra.mrb[152].mxu1 %v9750_v58 }
 0x277   :  { %v12007_v51 = vadd.f32 %v7844_v53, %v7732_v33  ;;  %1848 = vmatprep.mubr.bf16.mxu1 %v9754_v28 }
 0x278   :  { %v7845_v45 = vpop.f32.mrb[80].mxu0 }
 0x279   :  { %v7733_v34 = vpop.f32.mrb[48].mxu1  ;;  %v7846_v3 = vpop.f32.mrb[81].mxu0 }
 0x27a   :  { %v7734_v25 = vpop.f32.mrb[49].mxu1  ;;  %v7847_v24 = vadd.f32 %v7846_v3, %v7845_v45  ;;  %v7848_v21 = vpop.f32.mrb[82].mxu0 }
 0x27b   :  { %v7735_v40 = vadd.f32 %v7734_v25, %v7733_v34  ;;  %v7736_v54 = vpop.f32.mrb[50].mxu1  ;;  %v7849_v32 = vpop.f32.mrb[83].mxu0 }
 0x27c   :  { %v7737_v60 = vpop.f32.mrb[51].mxu1  ;;  %v7850_v4 = vadd.f32 %v7849_v32, %v7848_v21 }
 0x27d   :  { %v12012_v55 = vadd.f32 %v7847_v24, %v7735_v40  ;;  %v7738_v29 = vadd.f32 %v7737_v60, %v7736_v54 }
 0x27e   :  { %1849 = vmatmul.mubr.bf16.gmra.mrb[156].mxu1 %v9756_v31 }
 0x27f   :  { %v12014_v7 = vadd.f32 %v7850_v4, %v7738_v29 }
 0x280   :  { %v7851_v26 = vpop.f32.mrb[84].mxu0 }
 0x281   :  { %v7739_v27 = vpop.f32.mrb[52].mxu1  ;;  %v7852_v43 = vpop.f32.mrb[85].mxu0 }
 0x282   :  { %v7740_v35 = vpop.f32.mrb[53].mxu1  ;;  %v7853_v10 = vadd.f32 %v7852_v43, %v7851_v26  ;;  %v7854_v39 = vpop.f32.mrb[86].mxu0 }
 0x283   :  { %v7741_v14 = vadd.f32 %v7740_v35, %v7739_v27  ;;  %v7742_v19 = vpop.f32.mrb[54].mxu1  ;;  %v7855_v20 = vpop.f32.mrb[87].mxu0 }
 0x284   :  { %v7743_v9 = vpop.f32.mrb[55].mxu1  ;;  %v7856_v30 = vadd.f32 %v7855_v20, %v7854_v39 }
 0x285   :  { %v12016_v36 = vadd.f32 %v7853_v10, %v7741_v14  ;;  %v7744_v37 = vadd.f32 %v7743_v9, %v7742_v19 }
 0x287   :  { %v12018_v41 = vadd.f32 %v7856_v30, %v7744_v37 }
 0x288   :  { %v7857_v42 = vpop.f32.mrb[88].mxu0 }
 0x289   :  { %v7745_v48 = vpop.f32.mrb[56].mxu1  ;;  %v7858_v49 = vpop.f32.mrb[89].mxu0 }
 0x28a   :  { %v7746_v59 = vpop.f32.mrb[57].mxu1  ;;  %v7859_v0 = vadd.f32 %v7858_v49, %v7857_v42  ;;  %v7860_v11 = vpop.f32.mrb[90].mxu0 }
 0x28b   :  { %v7747_v50 = vadd.f32 %v7746_v59, %v7745_v48  ;;  %v7748_v22 = vpop.f32.mrb[58].mxu1  ;;  %v7861_v38 = vpop.f32.mrb[91].mxu0 }
 0x28c   :  { %v7749_v62 = vpop.f32.mrb[59].mxu1  ;;  %v7862_v2 = vadd.f32 %v7861_v38, %v7860_v11 }
 0x28d   :  { %v12020_v17 = vadd.f32 %v7859_v0, %v7747_v50  ;;  %v7750_v44 = vadd.f32 %v7749_v62, %v7748_v22 }
 0x28f   :  { %v12022_v57 = vadd.f32 %v7862_v2, %v7750_v44 }
 0x290   :  { %v7863_v13 = vpop.f32.mrb[92].mxu0 }
 0x291   :  { %v7751_v58 = vpop.f32.mrb[60].mxu1  ;;  %v7864_v6 = vpop.f32.mrb[93].mxu0 }
 0x292   :  { %v7752_v8 = vpop.f32.mrb[61].mxu1  ;;  %v7865_v15 = vadd.f32 %v7864_v6, %v7863_v13  ;;  %v7866_v28 = vpop.f32.mrb[94].mxu0 }
 0x293   :  { %v7753_v12 = vadd.f32 %v7752_v8, %v7751_v58  ;;  %v7754_v53 = vpop.f32.mrb[62].mxu1  ;;  %v7867_v33 = vpop.f32.mrb[95].mxu0 }
 0x294   :  { %v7755_v45 = vpop.f32.mrb[63].mxu1  ;;  %v7868_v34 = vadd.f32 %v7867_v33, %v7866_v28 }
 0x295   :  { %v12024_v3 = vadd.f32 %v7865_v15, %v7753_v12  ;;  %v7756_v25 = vadd.f32 %v7755_v45, %v7754_v53 }
 0x297   :  { %v12026_v24 = vadd.f32 %v7868_v34, %v7756_v25 }
 0x298   :  { %v7869_v21 = vpop.f32.mrb[96].mxu0 }
 0x299   :  { %v7757_v31 = vpop.f32.mrb[64].mxu1  ;;  %v7870_v40 = vpop.f32.mrb[97].mxu0 }
 0x29a   :  { %v7758_v54 = vpop.f32.mrb[65].mxu1  ;;  %v7871_v32 = vadd.f32 %v7870_v40, %v7869_v21  ;;  %v7872_v60 = vpop.f32.mrb[98].mxu0 }
 0x29b   :  { %v7759_v4 = vadd.f32 %v7758_v54, %v7757_v31  ;;  %v7760_v29 = vpop.f32.mrb[66].mxu1  ;;  %v7873_v26 = vpop.f32.mrb[99].mxu0 }
 0x29c   :  { %v7761_v27 = vpop.f32.mrb[67].mxu1  ;;  %v7874_v43 = vadd.f32 %v7873_v26, %v7872_v60 }
 0x29d   :  { %v12028_v35 = vadd.f32 %v7871_v32, %v7759_v4  ;;  %v7762_v10 = vadd.f32 %v7761_v27, %v7760_v29 }
 0x29f   :  { %v12030_v39 = vadd.f32 %v7874_v43, %v7762_v10 }
 0x2a0   :  { %v7875_v14 = vpop.f32.mrb[100].mxu0 }
 0x2a1   :  { %v7763_v19 = vpop.f32.mrb[68].mxu1  ;;  %v7876_v20 = vpop.f32.mrb[101].mxu0 }
 0x2a2   :  { %v7764_v9 = vpop.f32.mrb[69].mxu1  ;;  %v7877_v30 = vadd.f32 %v7876_v20, %v7875_v14  ;;  %v7878_v37 = vpop.f32.mrb[102].mxu0 }
 0x2a3   :  { %v7765_v42 = vadd.f32 %v7764_v9, %v7763_v19  ;;  %v7766_v48 = vpop.f32.mrb[70].mxu1  ;;  %v7879_v49 = vpop.f32.mrb[103].mxu0 }
 0x2a4   :  { %v7767_v59 = vpop.f32.mrb[71].mxu1  ;;  %v7880_v0 = vadd.f32 %v7879_v49, %v7878_v37 }
 0x2a5   :  { %v12032_v11 = vadd.f32 %v7877_v30, %v7765_v42  ;;  %v7768_v50 = vadd.f32 %v7767_v59, %v7766_v48 }
 0x2a7   :  { %v12034_v22 = vadd.f32 %v7880_v0, %v7768_v50 }
 0x2a8   :  { %v7881_v38 = vpop.f32.mrb[104].mxu0 }
 0x2a9   :  { %v7769_v62 = vpop.f32.mrb[72].mxu1  ;;  %v7882_v2 = vpop.f32.mrb[105].mxu0 }
 0x2aa   :  { %v7770_v44 = vpop.f32.mrb[73].mxu1  ;;  %v7883_v13 = vadd.f32 %v7882_v2, %v7881_v38  ;;  %v7884_v58 = vpop.f32.mrb[106].mxu0 }
 0x2ab   :  { %v7771_v6 = vadd.f32 %v7770_v44, %v7769_v62  ;;  %v7772_v8 = vpop.f32.mrb[74].mxu1  ;;  %v7885_v15 = vpop.f32.mrb[107].mxu0 }
 0x2ac   :  { %v7773_v28 = vpop.f32.mrb[75].mxu1  ;;  %v7886_v12 = vadd.f32 %v7885_v15, %v7884_v58 }
 0x2ad   :  { %v12036_v53 = vadd.f32 %v7883_v13, %v7771_v6  ;;  %v7774_v33 = vadd.f32 %v7773_v28, %v7772_v8 }
 0x2af   :  { %v12038_v45 = vadd.f32 %v7886_v12, %v7774_v33 }
 0x2b0   :  { %v7887_v34 = vpop.f32.mrb[108].mxu0 }
 0x2b1   :  { %v7775_v25 = vpop.f32.mrb[76].mxu1  ;;  %v7888_v21 = vpop.f32.mrb[109].mxu0 }
 0x2b2   :  { %v7776_v31 = vpop.f32.mrb[77].mxu1  ;;  %v7889_v40 = vadd.f32 %v7888_v21, %v7887_v34  ;;  %v7890_v54 = vpop.f32.mrb[110].mxu0 }
 0x2b3   :  { %v7777_v32 = vadd.f32 %v7776_v31, %v7775_v25  ;;  %v7778_v60 = vpop.f32.mrb[78].mxu1  ;;  %v7891_v4 = vpop.f32.mrb[111].mxu0  ;;  %v12053_v31 = vld [vmem:[%s15097_s8 + $0x8] ss:$12 sps:$4 sm:$0xff]  }
 0x2b4   :  { %v7779_v29 = vpop.f32.mrb[79].mxu1  ;;  %v7892_v26 = vadd.f32 %v7891_v4, %v7890_v54  ;;  %8710 = vmatprep.subr.bf16.mxu1 %v12053_v31 }
 0x2b5   :  { %v12040_v27 = vadd.f32 %v7889_v40, %v7777_v32  ;;  %v7780_v43 = vadd.f32 %v7779_v29, %v7778_v60 }
 0x2b7   :  { %v12042_v10 = vadd.f32 %v7892_v26, %v7780_v43 }
 0x2b8   :  { %v7893_v14 = vpop.f32.mrb[112].mxu0 }
 0x2b9   :  { %v7781_v19 = vpop.f32.mrb[80].mxu1  ;;  %v7894_v20 = vpop.f32.mrb[113].mxu0 }
 0x2ba   :  { %v7782_v9 = vpop.f32.mrb[81].mxu1  ;;  %v7895_v30 = vadd.f32 %v7894_v20, %v7893_v14  ;;  %v7896_v37 = vpop.f32.mrb[114].mxu0 }
 0x2bb   :  { %v7783_v42 = vadd.f32 %v7782_v9, %v7781_v19  ;;  %v7784_v48 = vpop.f32.mrb[82].mxu1  ;;  %v7897_v49 = vpop.f32.mrb[115].mxu0 }
 0x2bc   :  { %v7785_v59 = vpop.f32.mrb[83].mxu1  ;;  %v7898_v0 = vadd.f32 %v7897_v49, %v7896_v37 }
 0x2bd   :  { %v12044_v50 = vadd.f32 %v7895_v30, %v7783_v42  ;;  %v7786_v38 = vadd.f32 %v7785_v59, %v7784_v48 }
 0x2bf   :  { %v12046_v62 = vadd.f32 %v7898_v0, %v7786_v38 }
 0x2c0   :  { %v7899_v2 = vpop.f32.mrb[116].mxu0 }
 0x2c1   :  { %v7787_v44 = vpop.f32.mrb[84].mxu1  ;;  %v7900_v13 = vpop.f32.mrb[117].mxu0 }
 0x2c2   :  { %v7788_v58 = vpop.f32.mrb[85].mxu1  ;;  %v7901_v6 = vadd.f32 %v7900_v13, %v7899_v2  ;;  %v7902_v8 = vpop.f32.mrb[118].mxu0 }
 0x2c3   :  { %v7789_v15 = vadd.f32 %v7788_v58, %v7787_v44  ;;  %v7790_v28 = vpop.f32.mrb[86].mxu1  ;;  %v7903_v12 = vpop.f32.mrb[119].mxu0 }
 0x2c4   :  { %v7791_v33 = vpop.f32.mrb[87].mxu1  ;;  %v7904_v34 = vadd.f32 %v7903_v12, %v7902_v8 }
 0x2c5   :  { %v12048_v25 = vadd.f32 %v7901_v6, %v7789_v15  ;;  %v7792_v21 = vadd.f32 %v7791_v33, %v7790_v28 }
 0x2c7   :  { %v12055_v40 = vadd.f32 %v7904_v34, %v7792_v21 }
 0x2c8   :  { %v7905_v54 = vpop.f32.mrb[120].mxu0 }
 0x2c9   :  { %v7793_v32 = vpop.f32.mrb[88].mxu1  ;;  %v7906_v60 = vpop.f32.mrb[121].mxu0 }
 0x2ca   :  { %v7794_v4 = vpop.f32.mrb[89].mxu1  ;;  %v7907_v29 = vadd.f32 %v7906_v60, %v7905_v54  ;;  %v7908_v26 = vpop.f32.mrb[122].mxu0 }
 0x2cb   :  { %v7795_v43 = vadd.f32 %v7794_v4, %v7793_v32  ;;  %v7796_v14 = vpop.f32.mrb[90].mxu1  ;;  %v7909_v19 = vpop.f32.mrb[123].mxu0 }
 0x2cc   :  { %v7797_v20 = vpop.f32.mrb[91].mxu1  ;;  %v7910_v9 = vadd.f32 %v7909_v19, %v7908_v26  ;;  %v9783_v26 = vld [vmem:[%s15097_s8] ss:$12 sps:$4 sm:$0xff]   ;;  %v9788_v19 = vld [vmem:[%s15097_s8 + $0x1c] ss:$12 sps:$4 sm:$0xff]  }
 0x2cd   :  { %v12058_v30 = vadd.f32 %v7907_v29, %v7795_v43  ;;  %v7798_v37 = vadd.f32 %v7797_v20, %v7796_v14 }
 0x2cf   :  { %v12060_v42 = vadd.f32 %v7910_v9, %v7798_v37 }
 0x2d0   :  { %v7911_v48 = vpop.f32.mrb[124].mxu0 }
 0x2d1   :  { %v7799_v49 = vpop.f32.mrb[92].mxu1  ;;  %v7912_v59 = vpop.f32.mrb[125].mxu0 }
 0x2d2   :  { %v7800_v0 = vpop.f32.mrb[93].mxu1  ;;  %v7913_v38 = vadd.f32 %v7912_v59, %v7911_v48  ;;  %v7914_v2 = vpop.f32.mrb[126].mxu0  ;;  %v9791_v59 = vld [vmem:[%s15097_s8 + $0x34] ss:$12 sps:$4 sm:$0xff]  }
 0x2d3   :  { %v7801_v44 = vadd.f32 %v7800_v0, %v7799_v49  ;;  %v7802_v13 = vpop.f32.mrb[94].mxu1  ;;  %v7915_v58 = vpop.f32.mrb[127].mxu0 }
 0x2d4   :  { %v7803_v6 = vpop.f32.mrb[95].mxu1  ;;  %v7916_v8 = vadd.f32 %v7915_v58, %v7914_v2  ;;  %v9805_v58 = vld [vmem:[%s15097_s8 + $0x20] ss:$12 sps:$4 sm:$0xff]  }
 0x2d5   :  { %v12062_v15 = vadd.f32 %v7913_v38, %v7801_v44  ;;  %v7804_v28 = vadd.f32 %v7803_v6, %v7802_v13  ;;  %v9789_v38 = vld [vmem:[%s15097_s8 + $0x30] ss:$12 sps:$4 sm:$0xff]   ;;  %v9794_v13 = vld [vmem:[%s15097_s8 + $0x4c] ss:$12 sps:$4 sm:$0xff]  }
 0x2d7   :  { %v12064_v12 = vadd.f32 %v7916_v8, %v7804_v28  ;;  %v9792_v28 = vld [vmem:[%s15097_s8 + $0x48] ss:$12 sps:$4 sm:$0xff]  }
 0x2d9   :  { %v7933_v33 = vpop.f32.mrb[96].mxu1 }
 0x2da   :  { %v7934_v34 = vpop.f32.mrb[97].mxu1 }
 0x2db   :  { %v7935_v21 = vadd.f32 %v7934_v34, %v7933_v33  ;;  %v7936_v54 = vpop.f32.mrb[98].mxu1 }
 0x2dc   :  { %v7937_v32 = vpop.f32.mrb[99].mxu1 }
 0x2dd   :  { %v1857_v60 = vadd.f32 %v7935_v21, %v11957_v23  ;;  %v7938_v4 = vadd.f32 %v7937_v32, %v7936_v54  ;;  %v9786_v23 = vld [vmem:[%s15097_s8 + $0x18] ss:$12 sps:$4 sm:$0xff]  }
 0x2de   :  { %v9797_v21 = vld [vmem:[%s15097_s8 + $0x64] ss:$12 sps:$4 sm:$0xff]  }
 0x2df   :  { %v1858_v29 = vadd.f32 %v7938_v4, %v11968_v46  ;;  %v9806_v54 = vld [vmem:[%s15097_s8 + $0x38] ss:$12 sps:$4 sm:$0xff]  }
 0x2e1   :  { %v1889_v43 = vpack.c.bf16 %v1858_v29, %v1857_v60  ;;  %v7939_v14 = vpop.f32.mrb[100].mxu1  ;;  %v9795_v60 = vld [vmem:[%s15097_s8 + $0x60] ss:$12 sps:$4 sm:$0xff]   ;;  %v9800_v29 = vld [vmem:[%s15097_s8 + $0x7c] ss:$12 sps:$4 sm:$0xff]  }
 0x2e2   :  { %v7940_v20 = vpop.f32.mrb[101].mxu1 }
 0x2e3   :  { %v7941_v9 = vadd.f32 %v7940_v20, %v7939_v14  ;;  %v7942_v37 = vpop.f32.mrb[102].mxu1  ;;  %2066 = vmatmul.mubr.bf16.vlgmr.msra.gmra.mrb[128].mxu0 %v1889_v43  ;;  %8678 = vmatprep.mubr.bf16.mxu1 %v1889_v43 }
 0x2e4   :  { %v7943_v48 = vpop.f32.mrb[103].mxu1  ;;  %2075 = vmatprep.mubr.bf16.mxu0 %v15359_v61  ;;  %2516 = vmatpush1.bf16.msra.mxu0 %v9783_v26  ;;  %v9810_v26 = vld [vmem:[%s15097_s8 + $0x50] ss:$12 sps:$4 sm:$0xff]  }
 0x2e5   :  { %v7944_v46 = vadd.f32 %v7943_v48, %v7942_v37  ;;  %v1859_v49 = vadd.f32 %v7941_v9, %v11979_v52  ;;  %2517 = vmatprep.subr.bf16.mxu0 %v9788_v19  ;;  %v9798_v19 = vld [vmem:[%s15097_s8 + $0x78] ss:$12 sps:$4 sm:$0xff]   ;;  %v9804_v37 = vld [vmem:[%s15097_s8 + $0x94] ss:$12 sps:$4 sm:$0xff]  }
 0x2e6   :  { %v9811_v48 = vld [vmem:[%s15097_s8 + $0x68] ss:$12 sps:$4 sm:$0xff]  }
 0x2e7   :  { %v1860_v0 = vadd.f32 %v7944_v46, %v11984_v63  ;;  %v9802_v46 = vld [vmem:[%s15097_s8 + $0x90] ss:$12 sps:$4 sm:$0xff]  }
 0x2e8   :  { %2518 = vmatpush1.bf16.msra.mxu0 %v9786_v23 }
 0x2e9   :  { %v7945_v2 = vpop.f32.mrb[104].mxu1  ;;  %v1890_v44 = vpack.c.bf16 %v1860_v0, %v1859_v49  ;;  %2519 = vmatprep.subr.bf16.mxu0 %v9791_v59  ;;  %v9809_v59 = vld [vmem:[%s15097_s8 + $0xac] ss:$12 sps:$4 sm:$0xff]  }
 0x2ea   :  { %v7946_v52 = vpop.f32.mrb[105].mxu1 }
 0x2eb   :  { %v7947_v6 = vadd.f32 %v7946_v52, %v7945_v2  ;;  %v7948_v8 = vpop.f32.mrb[106].mxu1  ;;  %2076 = vmatmul.mubr.bf16.gmra.mrb[132].mxu0 %v1890_v44  ;;  %8679 = vmatmul.mubr.bf16.vlgmr.msra.gmra.mrb[160].mxu1 %v1890_v44 }
 0x2ec   :  { %v7949_v63 = vpop.f32.mrb[107].mxu1  ;;  %2085 = vmatprep.mubr.bf16.mxu0 %v15359_v61  ;;  %2520 = vmatpush1.bf16.msra.mxu0 %v9789_v38  ;;  %v9812_v38 = vld [vmem:[%s15097_s8 + $0x80] ss:$12 sps:$4 sm:$0xff]  }
 0x2ed   :  { %v7950_v33 = vadd.f32 %v7949_v63, %v7948_v8  ;;  %v1861_v34 = vadd.f32 %v7947_v6, %v11995_v5  ;;  %2521 = vmatprep.subr.bf16.mxu0 %v9794_v13  ;;  %8711 = vmatpush3.bf16.msra.mxu1 %v12053_v31  ;;  %v9807_v13 = vld [vmem:[%s15097_s8 + $0xa8] ss:$12 sps:$4 sm:$0xff]   ;;  %v9813_v6 = vld [vmem:[%s15097_s8 + $0x98] ss:$12 sps:$4 sm:$0xff]  }
 0x2ee   :  { %8712 = vmatprep.subr.bf16.mxu1 %v9805_v58 }
 0x2ef   :  { %v1862_v32 = vadd.f32 %v7950_v33, %v11997_v56  ;;  %v12147_v33 = vld [vmem:[%s15276_s29 + $0x8] ss:$12 sps:$4 sm:$0xff]  }
 0x2f0   :  { %2522 = vmatpush1.bf16.msra.mxu0 %v9792_v28 }
 0x2f1   :  { %v7951_v5 = vpop.f32.mrb[108].mxu1  ;;  %v1891_v4 = vpack.c.bf16 %v1862_v32, %v1861_v34  ;;  %2523 = vmatprep.subr.bf16.mxu0 %v9797_v21  ;;  %8713 = vmatpush3.bf16.msra.mxu1 %v9805_v58  ;;  %v9814_v34 = vld [vmem:[%s15097_s8 + $0xb0] ss:$12 sps:$4 sm:$0xff]  }
 0x2f2   :  { %v7952_v31 = vpop.f32.mrb[109].mxu1  ;;  %8714 = vmatprep.subr.bf16.mxu1 %v9806_v54 }
 0x2f3   :  { %v7953_v56 = vadd.f32 %v7952_v31, %v7951_v5  ;;  %v7954_v43 = vpop.f32.mrb[110].mxu1  ;;  %2086 = vmatmul.mubr.bf16.gmra.mrb[136].mxu0 %v1891_v4  ;;  %8682 = vmatprep.mubr.bf16.mxu1 %v1891_v4 }
 0x2f4   :  { %v7955_v14 = vpop.f32.mrb[111].mxu1  ;;  %2095 = vmatprep.mubr.bf16.mxu0 %v15359_v61  ;;  %2524 = vmatpush1.bf16.msra.mxu0 %v9795_v60 }
 0x2f5   :  { %v7956_v20 = vadd.f32 %v7955_v14, %v7954_v43  ;;  %v1863_v9 = vadd.f32 %v7953_v56, %v12005_v1  ;;  %2525 = vmatprep.subr.bf16.mxu0 %v9800_v29  ;;  %8715 = vmatpush3.bf16.msra.mxu1 %v9806_v54 }
 0x2f6   :  { %8716 = vmatprep.subr.bf16.mxu1 %v9810_v26 }
 0x2f7   :  { %v1864_v23 = vadd.f32 %v7956_v20, %v12007_v51 }
 0x2f8   :  { %2526 = vmatpush1.bf16.msra.mxu0 %v9798_v19 }
 0x2f9   :  { %v7957_v49 = vpop.f32.mrb[112].mxu1  ;;  %v1892_v1 = vpack.c.bf16 %v1864_v23, %v1863_v9  ;;  %2527 = vmatprep.subr.bf16.mxu0 %v9804_v37  ;;  %8717 = vmatpush3.bf16.msra.mxu1 %v9810_v26  ;;  %v10608_v26 = vld [vmem:[%s15276_s29 + $0x4] ss:$12 sps:$4 sm:$0xff]  }
 0x2fa   :  { %v7958_v0 = vpop.f32.mrb[113].mxu1  ;;  %8718 = vmatprep.subr.bf16.mxu1 %v9811_v48 }
 0x2fb   :  { %v7959_v51 = vadd.f32 %v7958_v0, %v7957_v49  ;;  %v7960_v2 = vpop.f32.mrb[114].mxu1  ;;  %2096 = vmatmul.mubr.bf16.gmra.mrb[140].mxu0 %v1892_v1  ;;  %8683 = vmatmul.mubr.bf16.gmra.mrb[164].mxu1 %v1892_v1 }
 0x2fc   :  { %v7961_v44 = vpop.f32.mrb[115].mxu1  ;;  %2105 = vmatprep.mubr.bf16.mxu0 %v15359_v61  ;;  %2528 = vmatpush1.bf16.msra.mxu0 %v9802_v46 }
 0x2fd   :  { %v7962_v52 = vadd.f32 %v7961_v44, %v7960_v2  ;;  %v1865_v58 = vadd.f32 %v7959_v51, %v12012_v55  ;;  %2529 = vmatprep.subr.bf16.mxu0 %v9809_v59  ;;  %8719 = vmatpush3.bf16.msra.mxu1 %v9811_v48 }
 0x2fe   :  { %8720 = vmatprep.subr.bf16.mxu1 %v9812_v38 }
 0x2ff   :  { %v1866_v8 = vadd.f32 %v7962_v52, %v12014_v7 }
 0x300   :  { %2530 = vmatpush1.bf16.msra.mxu0 %v9807_v13 }
 0x301   :  { %v7963_v63 = vpop.f32.mrb[116].mxu1  ;;  %v1893_v28 = vpack.c.bf16 %v1866_v8, %v1865_v58  ;;  %8721 = vmatpush3.bf16.msra.mxu1 %v9812_v38  ;;  %8758 = vmatprep.subr.bf16.mxu0 %v12147_v33 }
 0x302   :  { %v7964_v55 = vpop.f32.mrb[117].mxu1  ;;  %8722 = vmatprep.subr.bf16.mxu1 %v9813_v6 }
 0x303   :  { %v7965_v21 = vadd.f32 %v7964_v55, %v7963_v63  ;;  %v7966_v54 = vpop.f32.mrb[118].mxu1  ;;  %2106 = vmatmul.mubr.bf16.gmra.mrb[144].mxu0 %v1893_v28  ;;  %8686 = vmatprep.mubr.bf16.mxu1 %v1893_v28 }
 0x304   :  { %v7967_v7 = vpop.f32.mrb[119].mxu1  ;;  %2115 = vmatprep.mubr.bf16.mxu0 %v15359_v61 }
 0x305   :  { %v7968_v32 = vadd.f32 %v7967_v7, %v7966_v54  ;;  %v1867_v60 = vadd.f32 %v7965_v21, %v12016_v36  ;;  %8723 = vmatpush3.bf16.msra.mxu1 %v9813_v6 }
 0x306   :  { %8724 = vmatprep.subr.bf16.mxu1 %v9814_v34 }
 0x307   :  { %v1868_v5 = vadd.f32 %v7968_v32, %v12018_v41 }
 0x309   :  { %v7969_v4 = vpop.f32.mrb[120].mxu1  ;;  %v1894_v29 = vpack.c.bf16 %v1868_v5, %v1867_v60  ;;  %8725 = vmatpush3.bf16.msra.mxu1 %v9814_v34 }
 0x30a   :  { %v7970_v31 = vpop.f32.mrb[121].mxu1  ;;  %3557 = vmatprep.subr.bf16.mxu1 %v10608_v26 }
 0x30b   :  { %v7971_v56 = vadd.f32 %v7970_v31, %v7969_v4  ;;  %v7972_v43 = vpop.f32.mrb[122].mxu1  ;;  %2116 = vmatmul.mubr.bf16.gmra.mrb[148].mxu0 %v1894_v29  ;;  %8687 = vmatmul.mubr.bf16.gmra.mrb[168].mxu1 %v1894_v29 }
 0x30c   :  { %v7973_v14 = vpop.f32.mrb[123].mxu1  ;;  %2125 = vmatprep.mubr.bf16.mxu0 %v15359_v61 }
 0x30d   :  { %v7974_v36 = vadd.f32 %v7973_v14, %v7972_v43  ;;  %v1869_v19 = vadd.f32 %v7971_v56, %v12020_v17 }
 0x30f   :  { %v1870_v41 = vadd.f32 %v7974_v36, %v12022_v57 }
 0x311   :  { %v7975_v20 = vpop.f32.mrb[124].mxu1  ;;  %v1895_v9 = vpack.c.bf16 %v1870_v41, %v1869_v19 }
 0x312   :  { %v7976_v37 = vpop.f32.mrb[125].mxu1 }
 0x313   :  { %v7977_v48 = vadd.f32 %v7976_v37, %v7975_v20  ;;  %v7978_v23 = vpop.f32.mrb[126].mxu1  ;;  %2126 = vmatmul.mubr.bf16.gmra.mrb[152].mxu0 %v1895_v9  ;;  %8690 = vmatprep.mubr.bf16.mxu1 %v1895_v9 }
 0x314   :  { %v7979_v46 = vpop.f32.mrb[127].mxu1  ;;  %2135 = vmatprep.mubr.bf16.mxu0 %v15359_v61 }
 0x315   :  { %v7980_v49 = vadd.f32 %v7979_v46, %v7978_v23  ;;  %v1871_v1 = vadd.f32 %v7977_v48, %v12024_v3 }
 0x317   :  { %v1872_v59 = vadd.f32 %v7980_v49, %v12026_v24 }
 0x319   :  { %v7981_v0 = vpop.f32.mrb[128].mxu1  ;;  %v1896_v38 = vpack.c.bf16 %v1872_v59, %v1871_v1 }
 0x31a   :  { %v7982_v17 = vpop.f32.mrb[129].mxu1 }
 0x31b   :  { %v7983_v51 = vadd.f32 %v7982_v17, %v7981_v0  ;;  %v7984_v57 = vpop.f32.mrb[130].mxu1  ;;  %2136 = vmatmul.mubr.bf16.gmra.mrb[156].mxu0 %v1896_v38  ;;  %8691 = vmatmul.mubr.bf16.gmra.mrb[172].mxu1 %v1896_v38 }
 0x31c   :  { %v7985_v2 = vpop.f32.mrb[131].mxu1  ;;  %2145 = vmatprep.mubr.bf16.mxu0 %v15359_v61 }
 0x31d   :  { %v7986_v44 = vadd.f32 %v7985_v2, %v7984_v57  ;;  %v1873_v13 = vadd.f32 %v7983_v51, %v12028_v35 }
 0x31f   :  { %v1874_v52 = vadd.f32 %v7986_v44, %v12030_v39 }
 0x321   :  { %v7987_v58 = vpop.f32.mrb[132].mxu1  ;;  %v1897_v6 = vpack.c.bf16 %v1874_v52, %v1873_v13 }
 0x322   :  { %v7988_v3 = vpop.f32.mrb[133].mxu1 }
 0x323   :  { %v7989_v8 = vadd.f32 %v7988_v3, %v7987_v58  ;;  %v7990_v24 = vpop.f32.mrb[134].mxu1  ;;  %2146 = vmatmul.mubr.bf16.gmra.mrb[160].mxu0 %v1897_v6  ;;  %8694 = vmatprep.mubr.bf16.mxu1 %v1897_v6 }
 0x324   :  { %v7991_v63 = vpop.f32.mrb[135].mxu1  ;;  %2155 = vmatprep.mubr.bf16.mxu0 %v15359_v61 }
 0x325   :  { %v7992_v28 = vadd.f32 %v7991_v63, %v7990_v24  ;;  %v1875_v55 = vadd.f32 %v7989_v8, %v12032_v11 }
 0x327   :  { %v1876_v34 = vadd.f32 %v7992_v28, %v12034_v22 }
 0x329   :  { %v7993_v21 = vpop.f32.mrb[136].mxu1  ;;  %v1898_v54 = vpack.c.bf16 %v1876_v34, %v1875_v55 }
 0x32a   :  { %v7994_v35 = vpop.f32.mrb[137].mxu1 }
 0x32b   :  { %v7995_v7 = vadd.f32 %v7994_v35, %v7993_v21  ;;  %v7996_v39 = vpop.f32.mrb[138].mxu1  ;;  %2156 = vmatmul.mubr.bf16.gmra.mrb[164].mxu0 %v1898_v54  ;;  %8695 = vmatmul.mubr.bf16.gmra.mrb[176].mxu1 %v1898_v54  ;;  %v15362_v21 = vld [vmem:[#allocation10_spill] sm:$0xff]  ;;  %v10611_v54 = vld [vmem:[%s15276_s29 + $0x20] ss:$12 sps:$4 sm:$0xff]  }
 0x32c   :  { %v7997_v32 = vpop.f32.mrb[139].mxu1  ;;  %2165 = vmatprep.mubr.bf16.mxu0 %v15359_v61  ;;  %v10612_v35 = vld [vmem:[%s15276_s29 + $0x18] ss:$12 sps:$4 sm:$0xff]  }
 0x32d   :  { %v7998_v60 = vadd.f32 %v7997_v32, %v7996_v39  ;;  %v1877_v5 = vadd.f32 %v7995_v7, %v12036_v53  ;;  %v10614_v7 = vld [vmem:[%s15276_s29 + $0x38] ss:$12 sps:$4 sm:$0xff]   ;;  %v15363_v39 = vld [vmem:[#allocation11_spill] sm:$0xff] }
 0x32e   :  { %v15364_v32 = vld [vmem:[#allocation12_spill] sm:$0xff] }
 0x32f   :  { %v1878_v4 = vadd.f32 %v7998_v60, %v12038_v45  ;;  %v10615_v60 = vld [vmem:[%s15276_s29 + $0x30] ss:$12 sps:$4 sm:$0xff]  }
 0x331   :  { %v7999_v29 = vpop.f32.mrb[140].mxu1  ;;  %v1899_v31 = vpack.c.bf16 %v1878_v4, %v1877_v5  ;;  %v10616_v5 = vld [vmem:[%s15276_s29 + $0x4c] ss:$12 sps:$4 sm:$0xff]   ;;  %v10617_v4 = vld [vmem:[%s15276_s29 + $0x50] ss:$12 sps:$4 sm:$0xff]  }
 0x332   :  { %v8000_v11 = vpop.f32.mrb[141].mxu1 }
 0x333   :  { %v8001_v26 = vadd.f32 %v8000_v11, %v7999_v29  ;;  %v8002_v22 = vpop.f32.mrb[142].mxu1  ;;  %2166 = vmatmul.mubr.bf16.gmra.mrb[168].mxu0 %v1899_v31  ;;  %8698 = vmatprep.mubr.bf16.mxu1 %v1899_v31  ;;  %v10618_v29 = vld [vmem:[%s15276_s29 + $0x48] ss:$12 sps:$4 sm:$0xff]   ;;  %v10619_v31 = vld [vmem:[%s15276_s29 + $0x64] ss:$12 sps:$4 sm:$0xff]  }
 0x334   :  { %v8003_v56 = vpop.f32.mrb[143].mxu1  ;;  %2175 = vmatprep.mubr.bf16.mxu0 %v15359_v61  ;;  %v10620_v11 = vld [vmem:[%s15276_s29 + $0x68] ss:$12 sps:$4 sm:$0xff]  }
 0x335   :  { %v8004_v43 = vadd.f32 %v8003_v56, %v8002_v22  ;;  %v1879_v14 = vadd.f32 %v8001_v26, %v12040_v27  ;;  %v15365_v26 = vld [vmem:[#allocation13_spill] sm:$0xff]  ;;  %v15366_v22 = vld [vmem:[#allocation14_spill] sm:$0xff] }
 0x336   :  { %v10621_v56 = vld [vmem:[%s15276_s29 + $0x60] ss:$12 sps:$4 sm:$0xff]  }
 0x337   :  { %v1880_v36 = vadd.f32 %v8004_v43, %v12042_v10  ;;  %v10622_v43 = vld [vmem:[%s15276_s29 + $0x7c] ss:$12 sps:$4 sm:$0xff]  }
 0x339   :  { %v8005_v19 = vpop.f32.mrb[144].mxu1  ;;  %v1900_v41 = vpack.c.bf16 %v1880_v36, %v1879_v14  ;;  %v10623_v14 = vld [vmem:[%s15276_s29 + $0x80] ss:$12 sps:$4 sm:$0xff]   ;;  %v10624_v36 = vld [vmem:[%s15276_s29 + $0x78] ss:$12 sps:$4 sm:$0xff]  }
 0x33a   :  { %v8006_v53 = vpop.f32.mrb[145].mxu1 }
 0x33b   :  { %v8007_v20 = vadd.f32 %v8006_v53, %v8005_v19  ;;  %v8008_v45 = vpop.f32.mrb[146].mxu1  ;;  %2176 = vmatmul.mubr.bf16.gmra.mrb[172].mxu0 %v1900_v41  ;;  %8699 = vmatmul.mubr.bf16.gmra.mrb[180].mxu1 %v1900_v41  ;;  %v10625_v19 = vld [vmem:[%s15276_s29 + $0x94] ss:$12 sps:$4 sm:$0xff]   ;;  %v10626_v41 = vld [vmem:[%s15276_s29 + $0x98] ss:$12 sps:$4 sm:$0xff]  }
 0x33c   :  { %v8009_v9 = vpop.f32.mrb[147].mxu1  ;;  %2185 = vmatprep.mubr.bf16.mxu0 %v15359_v61  ;;  %v15367_v53 = vld [vmem:[#allocation15_spill] sm:$0xff] }
 0x33d   :  { %v8010_v37 = vadd.f32 %v8009_v9, %v8008_v45  ;;  %v1881_v48 = vadd.f32 %v8007_v20, %v12044_v50  ;;  %v15368_v20 = vld [vmem:[#allocation16_spill] sm:$0xff]  ;;  %v10627_v45 = vld [vmem:[%s15276_s29 + $0x90] ss:$12 sps:$4 sm:$0xff]   ;;  %v10628_v9 = vld [vmem:[%s15276_s29 + $0xac] ss:$12 sps:$4 sm:$0xff]  }
 0x33f   :  { %v1882_v23 = vadd.f32 %v8010_v37, %v12046_v62  ;;  %v10629_v37 = vld [vmem:[%s15276_s29 + $0xb0] ss:$12 sps:$4 sm:$0xff]  }
 0x341   :  { %v8011_v46 = vpop.f32.mrb[148].mxu1  ;;  %v1901_v49 = vpack.c.bf16 %v1882_v23, %v1881_v48  ;;  %v10630_v48 = vld [vmem:[%s15276_s29 + $0xa8] ss:$12 sps:$4 sm:$0xff]   ;;  %v15369_v23 = vld [vmem:[#allocation17_spill] sm:$0xff] }
 0x342   :  { %v8012_v27 = vpop.f32.mrb[149].mxu1 }
 0x343   :  { %v8013_v1 = vadd.f32 %v8012_v27, %v8011_v46  ;;  %v8014_v10 = vpop.f32.mrb[150].mxu1  ;;  %2186 = vmatmul.mubr.bf16.gmra.mrb[176].mxu0 %v1901_v49  ;;  %8702 = vmatprep.mubr.bf16.mxu1 %v1901_v49  ;;  %v15370_v46 = vld [vmem:[#allocation18_spill] sm:$0xff]  ;;  %v15371_v49 = vld [vmem:[#allocation19_spill] sm:$0xff]  ;;  %v15372_v27 = vld [vmem:[#allocation20_spill] sm:$0xff] }
 0x344   :  { %v8015_v59 = vpop.f32.mrb[151].mxu1  ;;  %2195 = vmatprep.mubr.bf16.mxu0 %v15359_v61 }
 0x345   :  { %v8016_v0 = vadd.f32 %v8015_v59, %v8014_v10  ;;  %v1883_v38 = vadd.f32 %v8013_v1, %v12048_v25  ;;  %v15373_v1 = vld [vmem:[#allocation21_spill] sm:$0xff]  ;;  %v15374_v10 = vld [vmem:[#allocation22_spill] sm:$0xff]  ;;  %v15375_v59 = vld [vmem:[#allocation23_spill] sm:$0xff] }
 0x347   :  { %v1884_v17 = vadd.f32 %v8016_v0, %v12055_v40 }
 0x349   :  { %v8017_v51 = vpop.f32.mrb[152].mxu1  ;;  %v1902_v57 = vpack.c.bf16 %v1884_v17, %v1883_v38 }
 0x34a   :  { %v8018_v50 = vpop.f32.mrb[153].mxu1 }
 0x34b   :  { %v8019_v2 = vadd.f32 %v8018_v50, %v8017_v51  ;;  %v8020_v62 = vpop.f32.mrb[154].mxu1  ;;  %2196 = vmatmul.mubr.bf16.gmra.mrb[180].mxu0 %v1902_v57  ;;  %8703 = vmatmul.mubr.bf16.gmra.mrb[184].mxu1 %v1902_v57 }
 0x34c   :  { %v8021_v44 = vpop.f32.mrb[155].mxu1  ;;  %2205 = vmatprep.mubr.bf16.mxu0 %v15359_v61 }
 0x34d   :  { %v8022_v13 = vadd.f32 %v8021_v44, %v8020_v62  ;;  %v1885_v52 = vadd.f32 %v8019_v2, %v12058_v30  ;;  %v15360_v30 = vld [vmem:[#allocation8_spill] sm:$0xff] }
 0x34f   :  { %v1886_v58 = vadd.f32 %v8022_v13, %v12060_v42  ;;  %v15361_v42 = vld [vmem:[#allocation9_spill] sm:$0xff] }
 0x351   :  { %v8023_v6 = vpop.f32.mrb[156].mxu1  ;;  %v1903_v3 = vpack.c.bf16 %v1886_v58, %v1885_v52 }
 0x352   :  { %v8024_v25 = vpop.f32.mrb[157].mxu1 }
 0x353   :  { %v8025_v8 = vadd.f32 %v8024_v25, %v8023_v6  ;;  %v8026_v40 = vpop.f32.mrb[158].mxu1  ;;  %2206 = vmatmul.mubr.bf16.gmra.mrb[184].mxu0 %v1903_v3  ;;  %8706 = vmatprep.mubr.bf16.mxu1 %v1903_v3 }
 0x354   :  { %v8027_v24 = vpop.f32.mrb[159].mxu1  ;;  %2215 = vmatprep.mubr.bf16.mxu0 %v15359_v61 }
 0x355   :  { %v8028_v63 = vadd.f32 %v8027_v24, %v8026_v40  ;;  %v1887_v28 = vadd.f32 %v8025_v8, %v12062_v15  ;;  %v10609_v15 = vld [vmem:[%s15276_s29] ss:$12 sps:$4 sm:$0xff]  }
 0x357   :  { %v1888_v55 = vadd.f32 %v8028_v63, %v12064_v12  ;;  %v10610_v12 = vld [vmem:[%s15276_s29 + $0x1c] ss:$12 sps:$4 sm:$0xff]  }
 0x359   :  { %v1904_v34 = vpack.c.bf16 %v1888_v55, %v1887_v28 }
 0x35b   :  { %2216 = vmatmul.mubr.bf16.gmra.mrb[188].mxu0 %v1904_v34  ;;  %8707 = vmatmul.mubr.bf16.gmra.mrb[188].mxu1 %v1904_v34 }
 0x35c   :  { %2547 = vmatprep.mubr.bf16.mxu0 %v15359_v61  ;;  %8726 = vmatprep.mubr.bf16.mxu1 %v15360_v30 }
 0x363   :  { %2548 = vmatmul.mubr.bf16.vlgmr.msra.gmra.mrb[128].mxu0 %v15360_v30  ;;  %8727 = vmatmul.mubr.bf16.vlgmr.msra.gmra.mrb[192].mxu1 %v15361_v42 }
 0x364   :  { %2557 = vmatprep.mubr.bf16.mxu0 %v15359_v61  ;;  %8730 = vmatprep.mubr.bf16.mxu1 %v15362_v21 }
 0x365   :  { %3558 = vmatpush1.bf16.msra.mxu1 %v10609_v15  ;;  %8759 = vmatpush3.bf16.msra.mxu0 %v12147_v33  ;;  %v10613_v33 = vld [vmem:[%s15276_s29 + $0x34] ss:$12 sps:$4 sm:$0xff]  }
 0x366   :  { %3559 = vmatprep.subr.bf16.mxu1 %v10610_v12  ;;  %8760 = vmatprep.subr.bf16.mxu0 %v10611_v54 }
 0x369   :  { %3560 = vmatpush1.bf16.msra.mxu1 %v10612_v35  ;;  %8761 = vmatpush3.bf16.msra.mxu0 %v10611_v54 }
 0x36a   :  { %3561 = vmatprep.subr.bf16.mxu1 %v10613_v33  ;;  %8762 = vmatprep.subr.bf16.mxu0 %v10614_v7 }
 0x36b   :  { %2558 = vmatmul.mubr.bf16.gmra.mrb[132].mxu0 %v15361_v42  ;;  %8731 = vmatmul.mubr.bf16.gmra.mrb[196].mxu1 %v15363_v39 }
 0x36c   :  { %2567 = vmatprep.mubr.bf16.mxu0 %v15359_v61  ;;  %8734 = vmatprep.mubr.bf16.mxu1 %v15364_v32 }
 0x36d   :  { %3562 = vmatpush1.bf16.msra.mxu1 %v10615_v60  ;;  %8763 = vmatpush3.bf16.msra.mxu0 %v10614_v7  ;;  %v12364_v60 = vld [vmem:[%s15098_s9] sm:$0x7] }
 0x36e   :  { %3563 = vmatprep.subr.bf16.mxu1 %v10616_v5  ;;  %8764 = vmatprep.subr.bf16.mxu0 %v10617_v4  ;;  %v12369_v5 = vld [vmem:[%s15096_s7] sm:$0x7] }
 0x371   :  { %3564 = vmatpush1.bf16.msra.mxu1 %v10618_v29  ;;  %8765 = vmatpush3.bf16.msra.mxu0 %v10617_v4  ;;  %v15385_v29 = vld [vmem:[#allocation25_spill] sm:$0xff] }
 0x372   :  { %3565 = vmatprep.subr.bf16.mxu1 %v10619_v31  ;;  %8766 = vmatprep.subr.bf16.mxu0 %v10620_v11  ;;  %v221_v31 = vrot.slane %v12369_v5, %v15385_v29 }
 0x373   :  { %2568 = vmatmul.mubr.bf16.gmra.mrb[136].mxu0 %v15362_v21  ;;  %8735 = vmatmul.mubr.bf16.gmra.mrb[200].mxu1 %v15365_v26 }
 0x374   :  { %2577 = vmatprep.mubr.bf16.mxu0 %v15359_v61  ;;  %8738 = vmatprep.mubr.bf16.mxu1 %v15366_v22 }
 0x375   :  { %3566 = vmatpush1.bf16.msra.mxu1 %v10621_v56  ;;  %8767 = vmatpush3.bf16.msra.mxu0 %v10620_v11  ;;  %v238_v11 = vrot.slane %v12364_v60, %v15385_v29 }
 0x376   :  { %3567 = vmatprep.subr.bf16.mxu1 %v10622_v43  ;;  %8768 = vmatprep.subr.bf16.mxu0 %v10623_v14  ;;  %v15387_v43 = vld [vmem:[#allocation26_spill] sm:$0xff] }
 0x379   :  { %3568 = vmatpush1.bf16.msra.mxu1 %v10624_v36  ;;  %8769 = vmatpush3.bf16.msra.mxu0 %v10623_v14  ;;  %v225_v14 = vrot.slane %v12369_v5, %v15387_v43  ;;  %v242_v36 = vrot.slane %v12364_v60, %v15387_v43 }
 0x37a   :  { %3569 = vmatprep.subr.bf16.mxu1 %v10625_v19  ;;  %8770 = vmatprep.subr.bf16.mxu0 %v10626_v41 }
 0x37b   :  { %2578 = vmatmul.mubr.bf16.gmra.mrb[140].mxu0 %v15363_v39  ;;  %8739 = vmatmul.mubr.bf16.gmra.mrb[204].mxu1 %v15367_v53 }
 0x37c   :  { %2587 = vmatprep.mubr.bf16.mxu0 %v15359_v61  ;;  %8742 = vmatprep.mubr.bf16.mxu1 %v15368_v20 }
 0x37d   :  { %3570 = vmatpush1.bf16.msra.mxu1 %v10627_v45  ;;  %8771 = vmatpush3.bf16.msra.mxu0 %v10626_v41  ;;  %v12387_v45 = vadd.f32 %v238_v11, %v221_v31 }
 0x37e   :  { %3571 = vmatprep.subr.bf16.mxu1 %v10628_v9  ;;  %8772 = vmatprep.subr.bf16.mxu0 %v10629_v37  ;;  %v12389_v9 = vadd.f32 %v242_v36, %v225_v14 }
 0x37f   :  { %15390 = vst [vmem:[#allocation43_spill] sm:$0xff] %v12387_v45 }
 0x380   :  { %15391 = vst [vmem:[#allocation44_spill] sm:$0xff] %v12389_v9 }
 0x381   :  { %3572 = vmatpush1.bf16.msra.mxu1 %v10630_v48  ;;  %8773 = vmatpush3.bf16.msra.mxu0 %v10629_v37 }
 0x383   :  { %2588 = vmatmul.mubr.bf16.gmra.mrb[144].mxu0 %v15364_v32  ;;  %8743 = vmatmul.mubr.bf16.gmra.mrb[208].mxu1 %v15369_v23 }
 0x384   :  { %2597 = vmatprep.mubr.bf16.mxu0 %v15359_v61  ;;  %8746 = vmatprep.mubr.bf16.mxu1 %v15370_v46 }
 0x38b   :  { %2598 = vmatmul.mubr.bf16.gmra.mrb[148].mxu0 %v15365_v26  ;;  %8747 = vmatmul.mubr.bf16.gmra.mrb[212].mxu1 %v15371_v49 }
 0x38c   :  { %2607 = vmatprep.mubr.bf16.mxu0 %v15359_v61  ;;  %8750 = vmatprep.mubr.bf16.mxu1 %v15372_v27 }
 0x393   :  { %2608 = vmatmul.mubr.bf16.gmra.mrb[152].mxu0 %v15366_v22  ;;  %8751 = vmatmul.mubr.bf16.gmra.mrb[216].mxu1 %v15373_v1 }
 0x394   :  { %2617 = vmatprep.mubr.bf16.mxu0 %v15359_v61  ;;  %8754 = vmatprep.mubr.bf16.mxu1 %v15374_v10 }
 0x39b   :  { %2618 = vmatmul.mubr.bf16.gmra.mrb[156].mxu0 %v15367_v53  ;;  %8755 = vmatmul.mubr.bf16.gmra.mrb[220].mxu1 %v15375_v59 }
 0x39c   :  { %2627 = vmatprep.mubr.bf16.mxu0 %v15359_v61  ;;  %3589 = vmatprep.mubr.bf16.mxu1 %v15359_v61 }
 0x3a3   :  { %2628 = vmatmul.mubr.bf16.gmra.mrb[160].mxu0 %v15368_v20 }
 0x3a4   :  { %2637 = vmatprep.mubr.bf16.mxu0 %v15359_v61 }
 0x3ab   :  { %2638 = vmatmul.mubr.bf16.gmra.mrb[164].mxu0 %v15369_v23 }
 0x3ac   :  { %2647 = vmatprep.mubr.bf16.mxu0 %v15359_v61 }
 0x3b3   :  { %2648 = vmatmul.mubr.bf16.gmra.mrb[168].mxu0 %v15370_v46 }
 0x3b4   :  { %2657 = vmatprep.mubr.bf16.mxu0 %v15359_v61 }
 0x3bb   :  { %2658 = vmatmul.mubr.bf16.gmra.mrb[172].mxu0 %v15371_v49 }
 0x3bc   :  { %2667 = vmatprep.mubr.bf16.mxu0 %v15359_v61 }
 0x3be   :  { %v12298_v0 = vpop.f32.mrb[160].mxu1 }
 0x3bf   :  { %v12300_v38 = vpop.f32.mrb[161].mxu1 }
 0x3c0   :  { %v12302_v17 = vpop.f32.mrb[162].mxu1 }
 0x3c1   :  { %v12304_v51 = vpop.f32.mrb[163].mxu1 }
 0x3c3   :  { %2668 = vmatmul.mubr.bf16.gmra.mrb[176].mxu0 %v15372_v27 }
 0x3c4   :  { %2677 = vmatprep.mubr.bf16.mxu0 %v15359_v61 }
 0x3cb   :  { %2678 = vmatmul.mubr.bf16.gmra.mrb[180].mxu0 %v15373_v1 }
 0x3cc   :  { %2687 = vmatprep.mubr.bf16.mxu0 %v15359_v61 }
 0x3ce   :  { %v12310_v57 = vpop.f32.mrb[164].mxu1 }
 0x3cf   :  { %v12312_v50 = vpop.f32.mrb[165].mxu1 }
 0x3d0   :  { %v12314_v2 = vpop.f32.mrb[166].mxu1 }
 0x3d1   :  { %v12316_v62 = vpop.f32.mrb[167].mxu1 }
 0x3d3   :  { %2688 = vmatmul.mubr.bf16.gmra.mrb[184].mxu0 %v15374_v10 }
 0x3d4   :  { %2697 = vmatprep.mubr.bf16.mxu0 %v15359_v61 }
 0x3db   :  { %2698 = vmatmul.mubr.bf16.gmra.mrb[188].mxu0 %v15375_v59 }
 0x3de   :  { %v12321_v44 = vpop.f32.mrb[168].mxu1 }
 0x3df   :  { %v12323_v13 = vpop.f32.mrb[169].mxu1 }
 0x3e0   :  { %v12325_v52 = vpop.f32.mrb[170].mxu1 }
 0x3e1   :  { %v12327_v58 = vpop.f32.mrb[171].mxu1 }
 0x3ee   :  { %v12329_v6 = vpop.f32.mrb[172].mxu1 }
 0x3ef   :  { %v12331_v3 = vpop.f32.mrb[173].mxu1 }
 0x3f0   :  { %v12333_v25 = vpop.f32.mrb[174].mxu1 }
 0x3f1   :  { %v12335_v8 = vpop.f32.mrb[175].mxu1 }
 0x3fe   :  { %v12337_v40 = vpop.f32.mrb[176].mxu1 }
 0x3ff   :  { %v12339_v24 = vpop.f32.mrb[177].mxu1 }
 0x400   :  { %v12341_v63 = vpop.f32.mrb[178].mxu1 }
 0x401   :  { %v12343_v28 = vpop.f32.mrb[179].mxu1 }
 0x40e   :  { %v12345_v55 = vpop.f32.mrb[180].mxu1 }
 0x40f   :  { %15376 = vst [vmem:[#allocation42_spill] sm:$0xff] %v12345_v55  ;;  %v12347_v34 = vpop.f32.mrb[181].mxu1 }
 0x410   :  { %15377 = vst [vmem:[#allocation41_spill] sm:$0xff] %v12347_v34  ;;  %v12349_v15 = vpop.f32.mrb[182].mxu1 }
 0x411   :  { %15378 = vst [vmem:[#allocation32_spill] sm:$0xff] %v12349_v15  ;;  %v12351_v12 = vpop.f32.mrb[183].mxu1 }
 0x412   :  { %15379 = vst [vmem:[#allocation31_spill] sm:$0xff] %v12351_v12 }
 0x41e   :  { %v12353_v54 = vpop.f32.mrb[184].mxu1 }
 0x41f   :  { %15380 = vst [vmem:[#allocation36_spill] sm:$0xff] %v12353_v54  ;;  %v12355_v35 = vpop.f32.mrb[185].mxu1 }
 0x420   :  { %15381 = vst [vmem:[#allocation34_spill] sm:$0xff] %v12355_v35  ;;  %v12357_v33 = vpop.f32.mrb[186].mxu1 }
 0x421   :  { %15382 = vst [vmem:[#allocation35_spill] sm:$0xff] %v12357_v33  ;;  %v12359_v7 = vpop.f32.mrb[187].mxu1 }
 0x422   :  { %15383 = vst [vmem:[#allocation33_spill] sm:$0xff] %v12359_v7 }
 0x42e   :  { %v12371_v4 = vpop.f32.mrb[188].mxu1 }
 0x42f   :  { %15384 = vst [vmem:[#allocation40_spill] sm:$0xff] %v12371_v4  ;;  %v12377_v56 = vpop.f32.mrb[189].mxu1 }
 0x430   :  { %15386 = vst [vmem:[#allocation38_spill] sm:$0xff] %v12377_v56  ;;  %v12383_v19 = vpop.f32.mrb[190].mxu1 }
 0x431   :  { %15388 = vst [vmem:[#allocation39_spill] sm:$0xff] %v12383_v19  ;;  %v12385_v41 = vpop.f32.mrb[191].mxu1 }
 0x432   :  { %15389 = vst [vmem:[#allocation37_spill] sm:$0xff] %v12385_v41 }
 0x436   :  { %v2549_v37 = vpop.f32.mrb[128].mxu0  ;;  %v12391_v48 = vpop.f32.mrb[192].mxu1 }
 0x437   :  { %v9153_v29 = vadd.f32 %v12387_v45, %v2549_v37  ;;  %v2551_v59 = vpop.f32.mrb[129].mxu0  ;;  %v12394_v10 = vpop.f32.mrb[193].mxu1 }
 0x438   :  { %v9155_v1 = vadd.f32 %v12389_v9, %v2551_v59  ;;  %v2553_v27 = vpop.f32.mrb[130].mxu0  ;;  %v12397_v43 = vpop.f32.mrb[194].mxu1 }
 0x439   :  { %v7474_v49 = vmul.f32 -1.442695, %v9153_v29  ;;  %v9157_v46 = vadd.f32 %v12387_v45, %v2553_v27  ;;  %v2555_v31 = vpop.f32.mrb[131].mxu0  ;;  %v12400_v11 = vpop.f32.mrb[195].mxu1 }
 0x43a   :  { %v7506_v14 = vmul.f32 -1.442695, %v9155_v1  ;;  %v9159_v36 = vadd.f32 %v12389_v9, %v2555_v31 }
 0x43b   :  { %9839 = vpow2.f32 %v7474_v49  ;;  %v7475_v23 = vmul.f32 -1.442695, %v9157_v46 }
 0x43c   :  { %9841 = vpow2.f32 %v7506_v14  ;;  %v7507_v37 = vmul.f32 -1.442695, %v9159_v36 }
 0x43d   :  { %9843 = vpow2.f32 %v7475_v23 }
 0x43e   :  { %9845 = vpow2.f32 %v7507_v37  ;;  %v2559_v20 = vpop.f32.mrb[132].mxu0  ;;  %v12403_v59 = vpop.f32.mrb[196].mxu1 }
 0x43f   :  { %v9161_v53 = vadd.f32 %v12387_v45, %v2559_v20  ;;  %v2561_v29 = vpop.f32.mrb[133].mxu0  ;;  %v12406_v22 = vpop.f32.mrb[197].mxu1 }
 0x440   :  { %v9163_v27 = vadd.f32 %v12389_v9, %v2561_v29  ;;  %v2563_v26 = vpop.f32.mrb[134].mxu0  ;;  %v12409_v1 = vpop.f32.mrb[198].mxu1 }
 0x441   :  { %v7476_v31 = vmul.f32 -1.442695, %v9161_v53  ;;  %v9165_v46 = vadd.f32 %v12387_v45, %v2563_v26  ;;  %v2565_v49 = vpop.f32.mrb[135].mxu0  ;;  %v12412_v14 = vpop.f32.mrb[199].mxu1 }
 0x442   :  { %v7508_v23 = vmul.f32 -1.442695, %v9163_v27  ;;  %v9167_v36 = vadd.f32 %v12389_v9, %v2565_v49 }
 0x443   :  { %9847 = vpow2.f32 %v7476_v31  ;;  %v7477_v37 = vmul.f32 -1.442695, %v9165_v46 }
 0x444   :  { %9849 = vpow2.f32 %v7508_v23  ;;  %v7509_v20 = vmul.f32 -1.442695, %v9167_v36 }
 0x445   :  { %v9840_v32 = vpop.eup %9839  ;;  %9851 = vpow2.f32 %v7477_v37 }
 0x446   :  { %v9842_v39 = vpop.eup %9841  ;;  %v2997_v29 = vadd.f32 1.0, %v9840_v32  ;;  %v2569_v21 = vpop.f32.mrb[136].mxu0  ;;  %9853 = vpow2.f32 %v7509_v20 }
 0x447   :  { %v12415_v42 = vpop.f32.mrb[200].mxu1  ;;  %v9844_v53 = vpop.eup %9843  ;;  %v3221_v30 = vadd.f32 1.0, %v9842_v39  ;;  %v9169_v26 = vadd.f32 %v12387_v45, %v2569_v21 }
 0x448   :  { %v2571_v47 = vpop.f32.mrb[137].mxu0  ;;  %v12418_v27 = vpop.f32.mrb[201].mxu1  ;;  %9855 = vrcp.f32 %v2997_v29  ;;  %v2998_v31 = vadd.f32 1.0, %v9844_v53  ;;  %v15392_v29 = vld [vmem:[#allocation29_spill] sm:$0xff] }
 0x449   :  { %v9846_v49 = vpop.eup %9845  ;;  %v9171_v46 = vadd.f32 %v12389_v9, %v2571_v47  ;;  %v2573_v23 = vpop.f32.mrb[138].mxu0  ;;  %v7478_v32 = vmul.f32 -1.442695, %v9169_v26  ;;  %v12429_v53 = vrot.slane %v12364_v60, %v15392_v29 }
 0x44a   :  { %v12421_v36 = vpop.f32.mrb[202].mxu1  ;;  %v9173_v37 = vadd.f32 %v12387_v45, %v2573_v23  ;;  %v2575_v18 = vpop.f32.mrb[139].mxu0  ;;  %9857 = vrcp.f32 %v2998_v31  ;;  %v3222_v20 = vadd.f32 1.0, %v9846_v49  ;;  %v12433_v23 = vrot.slane %v12369_v5, %v15392_v29 }
 0x44b   :  { %v12424_v16 = vpop.f32.mrb[203].mxu1  ;;  %v7510_v39 = vmul.f32 -1.442695, %v9171_v46  ;;  %v9175_v21 = vadd.f32 %v12389_v9, %v2575_v18  ;;  %9859 = vrcp.f32 %v3221_v30  ;;  %15393 = vst [vmem:[#allocation29_spill] sm:$0xff] %v12429_v53  ;;  %v2743_v60 = vadd.f32 %v12394_v10, %v12429_v53 }
 0x44c   :  { %v7479_v19 = vmul.f32 -1.442695, %v9173_v37  ;;  %9861 = vpow2.f32 %v7478_v32  ;;  %15394 = vst [vmem:[#allocation45_spill] sm:$0xff] %v12433_v23  ;;  %v2746_v33 = vadd.f32 %v12400_v11, %v12429_v53  ;;  %v2264_v7 = vadd.f32 %v12304_v51, %v12433_v23 }
 0x44d   :  { %v9848_v47 = vpop.eup %9847  ;;  %9863 = vpow2.f32 %v7510_v39  ;;  %v7511_v26 = vmul.f32 -1.442695, %v9175_v21 }
 0x44e   :  { %v9850_v4 = vpop.eup %9849  ;;  %v2999_v31 = vadd.f32 1.0, %v9848_v47  ;;  %9865 = vpow2.f32 %v7479_v19  ;;  %v2579_v46 = vpop.f32.mrb[140].mxu0 }
 0x44f   :  { %v12435_v18 = vpop.f32.mrb[204].mxu1  ;;  %v9852_v30 = vpop.eup %9851  ;;  %9867 = vrcp.f32 %v3222_v20  ;;  %v3223_v49 = vadd.f32 1.0, %v9850_v4  ;;  %v9177_v32 = vadd.f32 %v12387_v45, %v2579_v46  ;;  %v2261_v46 = vadd.f32 %v12300_v38, %v12433_v23 }
 0x450   :  { %v2581_v37 = vpop.f32.mrb[141].mxu0  ;;  %v12440_v39 = vpop.f32.mrb[205].mxu1  ;;  %9869 = vrcp.f32 %v2999_v31  ;;  %v3000_v21 = vadd.f32 1.0, %v9852_v30 }
 0x451   :  { %v9179_v5 = vadd.f32 %v12389_v9, %v2581_v37  ;;  %v2583_v29 = vpop.f32.mrb[142].mxu0  ;;  %v12443_v19 = vpop.f32.mrb[206].mxu1  ;;  %9871 = vpow2.f32 %v7511_v26  ;;  %v7480_v41 = vmul.f32 -1.442695, %v9177_v32 }
 0x452   :  { %v9854_v47 = vpop.eup %9853  ;;  %v9181_v4 = vadd.f32 %v12387_v45, %v2583_v29  ;;  %v2585_v20 = vpop.f32.mrb[143].mxu0  ;;  %9873 = vrcp.f32 %v3000_v21 }
 0x453   :  { %v12446_v56 = vpop.f32.mrb[207].mxu1  ;;  %v9856_v10 = vpop.eup %9855  ;;  %v7512_v31 = vmul.f32 -1.442695, %v9179_v5  ;;  %v9183_v30 = vadd.f32 %v12389_v9, %v2585_v20  ;;  %9875 = vrcp.f32 %v3223_v49  ;;  %v3224_v54 = vadd.f32 1.0, %v9854_v47 }
 0x454   :  { %v3317_v37 = vmul.f32 %v9856_v10, %v2743_v60  ;;  %v7481_v26 = vmul.f32 -1.442695, %v9181_v4  ;;  %v9858_v32 = vpop.eup %9857  ;;  %9877 = vpow2.f32 %v7480_v41 }
 0x455   :  { %v12453_v29 = vpop.eup %9859  ;;  %9879 = vpow2.f32 %v7512_v31  ;;  %v3318_v38 = vmul.f32 %v9858_v32, %v2746_v33  ;;  %v7513_v5 = vmul.f32 -1.442695, %v9183_v30 }
 0x456   :  { %v3349_v35 = vadd.f32 %v3317_v37, %v2261_v46  ;;  %v9862_v21 = vpop.eup %9861  ;;  %9881 = vpow2.f32 %v7481_v26  ;;  %v2589_v49 = vpop.f32.mrb[144].mxu0 }
 0x457   :  { %v12457_v60 = vpop.f32.mrb[208].mxu1  ;;  %v9864_v20 = vpop.eup %9863  ;;  %v3001_v11 = vadd.f32 1.0, %v9862_v21  ;;  %v3350_v4 = vadd.f32 %v3318_v38, %v2264_v7  ;;  %v9185_v41 = vadd.f32 %v12387_v45, %v2589_v49  ;;  %v2269_v21 = vadd.f32 %v12298_v0, %v12433_v23 }
 0x458   :  { %9883 = vtanh.f32 %v3349_v35  ;;  %v2591_v47 = vpop.f32.mrb[145].mxu0  ;;  %v12460_v10 = vpop.f32.mrb[209].mxu1  ;;  %v3225_v51 = vadd.f32 1.0, %v9864_v20  ;;  %v2751_v35 = vadd.f32 %v12391_v48, %v12429_v53  ;;  %v2754_v20 = vadd.f32 %v12397_v43, %v12429_v53 }
 0x459   :  { %v9866_v15 = vpop.eup %9865  ;;  %9885 = vrcp.f32 %v3224_v54  ;;  %v9187_v33 = vadd.f32 %v12389_v9, %v2591_v47  ;;  %v2593_v46 = vpop.f32.mrb[146].mxu0  ;;  %v7482_v38 = vmul.f32 -1.442695, %v9185_v41  ;;  %v12479_v48 = vadd.f32 %v12310_v57, %v12433_v23 }
 0x45a   :  { %v12463_v31 = vpop.f32.mrb[210].mxu1  ;;  %v12465_v30 = vpop.eup %9867  ;;  %9887 = vrcp.f32 %v3001_v11  ;;  %v3002_v37 = vadd.f32 1.0, %v9866_v15  ;;  %v2272_v15 = vadd.f32 %v12302_v17, %v12433_v23  ;;  %v2277_v0 = vadd.f32 %v12312_v50, %v12433_v23 }
 0x45b   :  { %15395 = vst [vmem:[#allocation46_spill] sm:$0xff] %v12463_v31  ;;  %v2595_v7 = vpop.f32.mrb[147].mxu0  ;;  %v12469_v26 = vpop.f32.mrb[211].mxu1  ;;  %9889 = vpow2.f32 %v7513_v5  ;;  %v7514_v5 = vmul.f32 -1.442695, %v9187_v33  ;;  %v12487_v43 = vadd.f32 %v12316_v62, %v12433_v23  ;;  %v9189_v57 = vadd.f32 %v12387_v45, %v2593_v46 }
 0x45c   :  { %v9870_v32 = vpop.eup %9869  ;;  %9891 = vrcp.f32 %v3002_v37  ;;  %v9191_v50 = vadd.f32 %v12389_v9, %v2595_v7  ;;  %v2759_v62 = vadd.f32 %v12406_v22, %v12429_v53  ;;  %v3413_v46 = vsub.f32 1.0, %v12453_v29 }
 0x45d   :  { %v9872_v54 = vpop.eup %9871  ;;  %v3319_v49 = vmul.f32 %v9870_v32, %v2751_v35  ;;  %9893 = vrcp.f32 %v3225_v51 }
 0x45e   :  { %v9874_v11 = vpop.eup %9873  ;;  %9895 = vtanh.f32 %v3350_v4  ;;  %v3226_v17 = vadd.f32 1.0, %v9872_v54  ;;  %v2599_v32 = vpop.f32.mrb[148].mxu0  ;;  %v10631_v54 = vld [vmem:[%s15277_s30] sm:$0xff] }
 0x45f   :  { %v12481_v41 = vpop.eup %9875  ;;  %v3351_v47 = vadd.f32 %v3319_v49, %v2269_v21  ;;  %v3320_v37 = vmul.f32 %v9874_v11, %v2754_v20  ;;  %9897 = vpow2.f32 %v7482_v38  ;;  %v12490_v51 = vpop.f32.mrb[212].mxu1  ;;  %v3477_v20 = vmul.f32 %v10631_v54, %v12453_v29 }
 0x460   :  { %v9878_v35 = vpop.eup %9877  ;;  %15396 = vst [vmem:[#allocation47_spill] sm:$0xff] %v12490_v51  ;;  %v2601_v21 = vpop.f32.mrb[149].mxu0  ;;  %v7483_v51 = vmul.f32 -1.442695, %v9189_v57  ;;  %v7515_v29 = vmul.f32 -1.442695, %v9191_v50 }
 0x461   :  { %v9880_v33 = vpop.eup %9879  ;;  %9899 = vtanh.f32 %v3351_v47  ;;  %v3003_v55 = vadd.f32 1.0, %v9878_v35  ;;  %v3352_v12 = vadd.f32 %v3320_v37, %v2272_v15  ;;  %v12493_v4 = vpop.f32.mrb[213].mxu1  ;;  %v9195_v34 = vadd.f32 %v12389_v9, %v2601_v21 }
 0x462   :  { %15397 = vst [vmem:[#allocation48_spill] sm:$0xff] %v12493_v4  ;;  %v9882_v49 = vpop.eup %9881  ;;  %9901 = vpow2.f32 %v7514_v5  ;;  %v2603_v38 = vpop.f32.mrb[150].mxu0  ;;  %v3227_v15 = vadd.f32 1.0, %v9880_v33  ;;  %v9193_v5 = vadd.f32 %v12387_v45, %v2599_v32  ;;  %v12514_v33 = vadd.f32 %v12409_v1, %v12429_v53 }
 0x463   :  { %v12502_v11 = vpop.f32.mrb[214].mxu1  ;;  %v9884_v7 = vpop.eup %9883  ;;  %9903 = vrcp.f32 %v3003_v55  ;;  %v3004_v47 = vadd.f32 1.0, %v9882_v49  ;;  %v2767_v55 = vadd.f32 %v12403_v59, %v12429_v53  ;;  %v3414_v50 = vsub.f32 1.0, %v12465_v30 }
 0x464   :  { %15398 = vst [vmem:[#allocation49_spill] sm:$0xff] %v12502_v11  ;;  %v2605_v37 = vpop.f32.mrb[151].mxu0  ;;  %v12505_v35 = vpop.f32.mrb[215].mxu1  ;;  %9905 = vtanh.f32 %v3352_v12  ;;  %v3445_v4 = vmul.f32 %v9884_v7, %v3413_v46  ;;  %v2762_v12 = vadd.f32 %v12412_v14, %v12429_v53  ;;  %v7484_v46 = vmul.f32 -1.442695, %v9193_v5 }
 0x465   :  { %v12507_v22 = vpop.eup %9885  ;;  %9907 = vrcp.f32 %v3226_v17  ;;  %v9197_v17 = vadd.f32 %v12387_v45, %v2603_v38  ;;  %v7516_v54 = vmul.f32 -1.442695, %v9195_v34  ;;  %v9199_v14 = vadd.f32 %v12389_v9, %v2605_v37  ;;  %v10632_v38 = vld [vmem:[%s15277_s30 + $0x8] sm:$0xff]  ;;  %v10633_v37 = vld [vmem:[%s15277_s30 + $0x10] sm:$0xff] }
 0x466   :  { %v9888_v31 = vpop.eup %9887  ;;  %9909 = vrcp.f32 %v3004_v47  ;;  %v12518_v57 = vadd.f32 %v3477_v20, %v3445_v4  ;;  %v2609_v47 = vpop.f32.mrb[152].mxu0  ;;  %v3478_v20 = vmul.f32 %v10632_v38, %v12465_v30 }
 0x467   :  { %v9890_v32 = vpop.eup %9889  ;;  %v3321_v49 = vmul.f32 %v9888_v31, %v2759_v62  ;;  %9911 = vrcp.f32 %v3227_v15  ;;  %v12524_v31 = vpop.f32.mrb[216].mxu1  ;;  %v3415_v15 = vsub.f32 1.0, %v12481_v41 }
 0x468   :  { %15399 = vst [vmem:[#allocation50_spill] sm:$0xff] %v12518_v57  ;;  %v9892_v21 = vpop.eup %9891  ;;  %9913 = vpow2.f32 %v7483_v51  ;;  %15400 = vst [vmem:[#allocation51_spill] sm:$0xff] %v12524_v31  ;;  %v2611_v4 = vpop.f32.mrb[153].mxu0  ;;  %v3228_v30 = vadd.f32 1.0, %v9890_v32  ;;  %v9201_v31 = vadd.f32 %v12387_v45, %v2609_v47  ;;  %v10634_v32 = vld [vmem:[%s15277_s30 + $0x18] sm:$0xff] }
 0x469   :  { %v12522_v59 = vpop.eup %9893  ;;  %v3353_v1 = vadd.f32 %v3321_v49, %v2277_v0  ;;  %v3322_v7 = vmul.f32 %v9892_v21, %v2762_v12  ;;  %9915 = vpow2.f32 %v7515_v29  ;;  %v12532_v51 = vpop.f32.mrb[217].mxu1  ;;  %v3479_v29 = vmul.f32 %v10633_v37, %v12481_v41 }
 0x46a   :  { %v9896_v62 = vpop.eup %9895  ;;  %15401 = vst [vmem:[#allocation52_spill] sm:$0xff] %v12532_v51  ;;  %v2613_v5 = vpop.f32.mrb[154].mxu0  ;;  %v7517_v41 = vmul.f32 -1.442695, %v9199_v14  ;;  %v7486_v14 = vmul.f32 -1.442695, %v9201_v31  ;;  %v2288_v31 = vadd.f32 %v12314_v2, %v12433_v23 }
 0x46b   :  { %v9898_v34 = vpop.eup %9897  ;;  %9917 = vtanh.f32 %v3353_v1  ;;  %v3354_v0 = vadd.f32 %v3322_v7, %v12487_v43  ;;  %v3446_v49 = vmul.f32 %v9896_v62, %v3414_v50  ;;  %v12539_v12 = vpop.f32.mrb[218].mxu1  ;;  %v7485_v50 = vmul.f32 -1.442695, %v9197_v17 }
 0x46c   :  { %v9900_v21 = vpop.eup %9899  ;;  %v3005_v38 = vadd.f32 1.0, %v9898_v34  ;;  %9919 = vpow2.f32 %v7484_v46  ;;  %v2615_v51 = vpop.f32.mrb[155].mxu0  ;;  %v3416_v62 = vsub.f32 1.0, %v12507_v22  ;;  %v3480_v46 = vmul.f32 %v10634_v32, %v12507_v22 }
 0x46d   :  { %v12542_v1 = vpop.f32.mrb[219].mxu1  ;;  %v9902_v43 = vpop.eup %9901  ;;  %9921 = vpow2.f32 %v7516_v54  ;;  %v12544_v7 = vadd.f32 %v3478_v20, %v3446_v49  ;;  %v3447_v37 = vmul.f32 %v9900_v21, %v3415_v15  ;;  %v9203_v54 = vadd.f32 %v12389_v9, %v2611_v4 }
 0x46e   :  { %v9904_v11 = vpop.eup %9903  ;;  %9923 = vrcp.f32 %v3005_v38  ;;  %v3229_v38 = vadd.f32 1.0, %v9902_v43  ;;  %v3417_v32 = vsub.f32 1.0, %v12522_v59 }
 0x46f   :  { %15402 = vst [vmem:[#allocation53_spill] sm:$0xff] %v12544_v7  ;;  %v9906_v47 = vpop.eup %9905  ;;  %v3323_v34 = vmul.f32 %v9904_v11, %v2767_v55  ;;  %9925 = vtanh.f32 %v3354_v0  ;;  %v12554_v17 = vpack.c.bf16 %v12544_v7, %v12518_v57  ;;  %v12558_v49 = vadd.f32 %v3479_v29, %v3447_v37  ;;  %v2619_v11 = vpop.f32.mrb[156].mxu0 }
 0x470   :  { %v12556_v20 = vpop.eup %9907  ;;  %9927 = vrcp.f32 %v3228_v30  ;;  %v3448_v15 = vmul.f32 %v9906_v47, %v3416_v62  ;;  %v12563_v55 = vpop.f32.mrb[220].mxu1  ;;  %v9205_v62 = vadd.f32 %v12387_v45, %v2613_v5  ;;  %v2775_v5 = vadd.f32 %v12418_v27, %v12429_v53 }
 0x471   :  { %15403 = vst [vmem:[#allocation54_spill] sm:$0xff] %v12554_v17  ;;  %15404 = vst [vmem:[#allocation55_spill] sm:$0xff] %v12558_v49  ;;  %v9910_v21 = vpop.eup %9909  ;;  %v3355_v22 = vadd.f32 %v3323_v34, %v12479_v48  ;;  %9929 = vpow2.f32 %v7485_v50  ;;  %3590 = vmatmul.mubr.bf16.vlgmr.msra.gmra.mrb[224].mxu1 %v12554_v17  ;;  %8774 = vmatprep.mubr.bf16.mxu0 %v12554_v17  ;;  %v2621_v29 = vpop.f32.mrb[157].mxu0  ;;  %v7518_v50 = vmul.f32 -1.442695, %v9203_v54  ;;  %v3418_v27 = vsub.f32 1.0, %v12556_v20 }
 0x472   :  { %v12565_v4 = vpop.eup %9911  ;;  %v3324_v0 = vmul.f32 %v9910_v21, %v12514_v33  ;;  %9931 = vpow2.f32 %v7517_v41  ;;  %3599 = vmatprep.mubr.bf16.mxu1 %v15359_v61  ;;  %v12571_v48 = vadd.f32 %v3480_v46, %v3448_v15  ;;  %v12573_v30 = vpop.f32.mrb[221].mxu1  ;;  %v9207_v34 = vadd.f32 %v12389_v9, %v2615_v51 }
 0x473   :  { %v9914_v43 = vpop.eup %9913  ;;  %9933 = vtanh.f32 %v3355_v22  ;;  %v2623_v37 = vpop.f32.mrb[158].mxu0  ;;  %v12584_v54 = vadd.f32 %v12321_v44, %v12433_v23  ;;  %v10635_v22 = vld [vmem:[%s15277_s30 + $0x20] sm:$0xff] }
 0x474   :  { %15405 = vst [vmem:[#allocation56_spill] sm:$0xff] %v12571_v48  ;;  %v12577_v47 = vpop.f32.mrb[222].mxu1  ;;  %v9916_v2 = vpop.eup %9915  ;;  %v3006_v33 = vadd.f32 1.0, %v9914_v43  ;;  %v3356_v41 = vadd.f32 %v3324_v0, %v2288_v31  ;;  %9935 = vpow2.f32 %v7486_v14  ;;  %v3481_v14 = vmul.f32 %v10635_v22, %v12522_v59 }
 0x475   :  { %15406 = vst [vmem:[#allocation57_spill] sm:$0xff] %v12577_v47  ;;  %v2625_v46 = vpop.f32.mrb[159].mxu0  ;;  %v12580_v15 = vpop.f32.mrb[223].mxu1  ;;  %9937 = vrcp.f32 %v3229_v38  ;;  %v3230_v51 = vadd.f32 1.0, %v9916_v2  ;;  %v12594_v0 = vpack.c.bf16 %v12571_v48, %v12558_v49  ;;  %v7487_v38 = vmul.f32 -1.442695, %v9205_v62 }
 0x476   :  { %v9918_v21 = vpop.eup %9917  ;;  %9939 = vrcp.f32 %v3006_v33  ;;  %v7519_v17 = vmul.f32 -1.442695, %v9207_v34  ;;  %v9209_v47 = vadd.f32 %v12387_v45, %v2619_v11  ;;  %v2293_v33 = vadd.f32 %v12323_v13, %v12433_v23  ;;  %v2629_v62 = vpop.f32.mrb[160].mxu0  ;;  %v10636_v13 = vld [vmem:[%s15277_s30 + $0x28] sm:$0xff] }
 0x477   :  { %v9920_v31 = vpop.eup %9919  ;;  %15407 = vst [vmem:[#allocation58_spill] sm:$0xff] %v12594_v0  ;;  %v3449_v43 = vmul.f32 %v9918_v21, %v3417_v32  ;;  %9941 = vpow2.f32 %v7518_v50  ;;  %8775 = vmatmul.mubr.bf16.vlgmr.msra.gmra.mrb[192].mxu0 %v12594_v0  ;;  %v12605_v32 = vadd.f32 %v12327_v58, %v12433_v23  ;;  %v2631_v11 = vpop.f32.mrb[161].mxu0  ;;  %v3482_v21 = vmul.f32 %v10636_v13, %v12556_v20 }
 0x478   :  { %v9922_v44 = vpop.eup %9921  ;;  %v3007_v7 = vadd.f32 1.0, %v9920_v31  ;;  %9943 = vtanh.f32 %v3356_v41  ;;  %v3419_v58 = vsub.f32 1.0, %v12565_v4  ;;  %v9211_v22 = vadd.f32 %v12389_v9, %v2621_v29  ;;  %v10637_v29 = vld [vmem:[%s15277_s30 + $0x30] sm:$0xff] }
 0x479   :  { %v9924_v57 = vpop.eup %9923  ;;  %v12599_v59 = vadd.f32 %v3481_v14, %v3449_v43  ;;  %3600 = vmatmul.mubr.bf16.gmra.mrb[228].mxu1 %v12594_v0  ;;  %v2633_v14 = vpop.f32.mrb[162].mxu0  ;;  %v7488_v43 = vmul.f32 -1.442695, %v9209_v47  ;;  %v2778_v20 = vadd.f32 %v12424_v16, %v12429_v53  ;;  %v9217_v16 = vadd.f32 %v12387_v45, %v2629_v62 }
 0x47a   :  { %v9926_v2 = vpop.eup %9925  ;;  %9945 = vrcp.f32 %v3007_v7  ;;  %v3325_v50 = vmul.f32 %v9924_v57, %v2775_v5  ;;  %3609 = vmatprep.mubr.bf16.mxu1 %v15359_v61  ;;  %v3231_v57 = vadd.f32 1.0, %v9922_v44  ;;  %v9215_v44 = vadd.f32 %v12389_v9, %v2625_v46 }
 0x47b   :  { %15408 = vst [vmem:[#allocation59_spill] sm:$0xff] %v12599_v59  ;;  %v12608_v41 = vpop.eup %9927  ;;  %9947 = vrcp.f32 %v3230_v51  ;;  %v3450_v34 = vmul.f32 %v9926_v2, %v3418_v27  ;;  %v9213_v27 = vadd.f32 %v12387_v45, %v2623_v37  ;;  %v12618_v2 = vpop.f32.mrb[163].mxu0 }
 0x47c   :  { %v9930_v7 = vpop.eup %9929  ;;  %9949 = vpow2.f32 %v7487_v38  ;;  %v3357_v5 = vadd.f32 %v3325_v50, %v2293_v33  ;;  %v3483_v38 = vmul.f32 %v10637_v29, %v12565_v4  ;;  %v7490_v29 = vmul.f32 -1.442695, %v9217_v16 }
 0x47d   :  { %v9932_v31 = vpop.eup %9931  ;;  %v3008_v51 = vadd.f32 1.0, %v9930_v7  ;;  %9951 = vpow2.f32 %v7519_v17  ;;  %v12627_v47 = vadd.f32 %v3482_v21, %v3450_v34  ;;  %v7520_v7 = vmul.f32 -1.442695, %v9211_v22 }
 0x47e   :  { %v9934_v48 = vpop.eup %9933  ;;  %9953 = vtanh.f32 %v3357_v5  ;;  %v3232_v17 = vadd.f32 1.0, %v9932_v31  ;;  %v7489_v46 = vmul.f32 -1.442695, %v9213_v27  ;;  %v12638_v21 = vpop.f32.mrb[164].mxu0  ;;  %v9219_v22 = vadd.f32 %v12389_v9, %v2631_v11 }
 0x47f   :  { %v9936_v33 = vpop.eup %9935  ;;  %9955 = vrcp.f32 %v3008_v51  ;;  %15409 = vst [vmem:[#allocation60_spill] sm:$0xff] %v12627_v47  ;;  %v3451_v37 = vmul.f32 %v9934_v48, %v3419_v58  ;;  %v12632_v49 = vpack.c.bf16 %v12627_v47, %v12599_v59  ;;  %v2783_v48 = vadd.f32 %v12415_v42, %v12429_v53  ;;  %v12644_v31 = vpop.f32.mrb[165].mxu0  ;;  %v10638_v42 = vld [vmem:[%s15277_s30 + $0x38] sm:$0xff] }
 0x480   :  { %v9938_v50 = vpop.eup %9937  ;;  %9957 = vrcp.f32 %v3231_v57  ;;  %v3009_v13 = vadd.f32 1.0, %v9936_v33  ;;  %v3420_v58 = vsub.f32 1.0, %v12608_v41  ;;  %v7521_v57 = vmul.f32 -1.442695, %v9215_v44  ;;  %v12651_v44 = vpop.f32.mrb[166].mxu0 }
 0x481   :  { %v9940_v5 = vpop.eup %9939  ;;  %9959 = vpow2.f32 %v7488_v43  ;;  %15410 = vst [vmem:[#allocation61_spill] sm:$0xff] %v12632_v49  ;;  %v12634_v4 = vadd.f32 %v3483_v38, %v3451_v37  ;;  %3610 = vmatmul.mubr.bf16.gmra.mrb[232].mxu1 %v12632_v49  ;;  %8778 = vmatprep.mubr.bf16.mxu0 %v12632_v49  ;;  %v3484_v43 = vmul.f32 %v10638_v42, %v12608_v41  ;;  %v12659_v41 = vpop.f32.mrb[167].mxu0 }
 0x482   :  { %v9942_v51 = vpop.eup %9941  ;;  %9961 = vrcp.f32 %v3009_v13  ;;  %v3326_v34 = vmul.f32 %v9940_v5, %v2778_v20  ;;  %3619 = vmatprep.mubr.bf16.mxu1 %v15359_v61  ;;  %v9221_v37 = vadd.f32 %v12387_v45, %v2633_v14  ;;  %v9223_v14 = vadd.f32 %v12389_v9, %v12618_v2 }
 0x483   :  { %15411 = vst [vmem:[#allocation62_spill] sm:$0xff] %v12634_v4  ;;  %v9944_v62 = vpop.eup %9943  ;;  %9963 = vrcp.f32 %v3232_v17  ;;  %v2786_v17 = vadd.f32 %v12421_v36, %v12429_v53 }
 0x484   :  { %v9946_v27 = vpop.eup %9945  ;;  %9965 = vpow2.f32 %v7520_v7  ;;  %v3358_v20 = vadd.f32 %v3326_v34, %v12605_v32  ;;  %v3452_v11 = vmul.f32 %v9944_v62, %v3420_v58  ;;  %v3233_v7 = vadd.f32 1.0, %v9942_v51 }
 0x485   :  { %v12654_v38 = vpop.eup %9947  ;;  %v3327_v33 = vmul.f32 %v9946_v27, %v2783_v48  ;;  %9967 = vpow2.f32 %v7489_v46  ;;  %v2791_v32 = vadd.f32 %v12440_v39, %v12429_v53  ;;  %v3421_v58 = vsub.f32 1.0, %v9938_v50 }
 0x486   :  { %v9950_v13 = vpop.eup %9949  ;;  %9969 = vtanh.f32 %v3358_v20  ;;  %v12663_v16 = vadd.f32 %v3484_v43, %v3452_v11  ;;  %v7522_v46 = vmul.f32 -1.442695, %v9219_v22  ;;  %v7491_v39 = vmul.f32 -1.442695, %v9221_v37  ;;  %v12680_v27 = vpop.f32.mrb[168].mxu0 }
 0x487   :  { %v9952_v5 = vpop.eup %9951  ;;  %v3010_v34 = vadd.f32 1.0, %v9950_v13  ;;  %v3359_v48 = vadd.f32 %v3327_v33, %v12584_v54  ;;  %9971 = vpow2.f32 %v7521_v57  ;;  %v10639_v54 = vld [vmem:[%s15277_s30 + $0x40] sm:$0xff]  ;;  %v2304_v22 = vadd.f32 %v12325_v52, %v12433_v23 }
 0x488   :  { %15412 = vst [vmem:[#allocation63_spill] sm:$0xff] %v12663_v16  ;;  %v9954_v36 = vpop.eup %9953  ;;  %9973 = vpow2.f32 %v7490_v29  ;;  %v12670_v51 = vpack.c.bf16 %v12663_v16, %v12634_v4  ;;  %v3485_v57 = vmul.f32 %v10639_v54, %v9938_v50  ;;  %v12683_v29 = vpop.f32.mrb[169].mxu0  ;;  %v3234_v33 = vadd.f32 1.0, %v9952_v5 }
 0x489   :  { %v9956_v62 = vpop.eup %9955  ;;  %9975 = vrcp.f32 %v3010_v34  ;;  %v3453_v42 = vmul.f32 %v9954_v36, %v3421_v58  ;;  %v12687_v52 = vpop.f32.mrb[170].mxu0  ;;  %v7523_v34 = vmul.f32 -1.442695, %v9223_v14  ;;  %v12698_v5 = vadd.f32 %v12329_v6, %v12433_v23 }
 0x48a   :  { %15413 = vst [vmem:[#allocation64_spill] sm:$0xff] %v12670_v51  ;;  %v12675_v43 = vpop.eup %9957  ;;  %9977 = vrcp.f32 %v3233_v7  ;;  %v3328_v2 = vmul.f32 %v9956_v62, %v2786_v17  ;;  %8779 = vmatmul.mubr.bf16.gmra.mrb[196].mxu0 %v12670_v51  ;;  %3620 = vmatmul.mubr.bf16.gmra.mrb[236].mxu1 %v12670_v51  ;;  %v2309_v7 = vadd.f32 %v12331_v3, %v12433_v23  ;;  %v12694_v58 = vpop.f32.mrb[171].mxu0  ;;  %v3422_v14 = vsub.f32 1.0, %v12654_v38 }
 0x48b   :  { %v9960_v20 = vpop.eup %9959  ;;  %9979 = vtanh.f32 %v3359_v48  ;;  %v12685_v11 = vadd.f32 %v3485_v57, %v3453_v42  ;;  %3629 = vmatprep.mubr.bf16.mxu1 %v15359_v61  ;;  %v9225_v62 = vadd.f32 %v12387_v45, %v12638_v21  ;;  %v2312_v6 = vadd.f32 %v12335_v8, %v12433_v23 }
 0x48c   :  { %v9962_v50 = vpop.eup %9961  ;;  %v3011_v37 = vadd.f32 1.0, %v9960_v20  ;;  %v3360_v13 = vadd.f32 %v3328_v2, %v2304_v22  ;;  %9981 = vpow2.f32 %v7522_v46  ;;  %v12702_v46 = vadd.f32 %v12333_v25, %v12433_v23  ;;  %v10640_v2 = vld [vmem:[%s15277_s30 + $0x48] sm:$0xff] }
 0x48d   :  { %15414 = vst [vmem:[#allocation65_spill] sm:$0xff] %v12685_v11  ;;  %v12690_v17 = vpop.eup %9963  ;;  %9983 = vpow2.f32 %v7491_v39  ;;  %v3329_v48 = vmul.f32 %v9962_v50, %v2791_v32  ;;  %v9227_v32 = vadd.f32 %v12389_v9, %v12644_v31  ;;  %v2794_v21 = vadd.f32 %v12446_v56, %v12429_v53 }
 0x48e   :  { %v9966_v36 = vpop.eup %9965  ;;  %9985 = vrcp.f32 %v3011_v37  ;;  %v3486_v31 = vmul.f32 %v10640_v2, %v12654_v38  ;;  %v7492_v50 = vmul.f32 -1.442695, %v9225_v62  ;;  %v9229_v8 = vadd.f32 %v12387_v45, %v12651_v44  ;;  %v12721_v37 = vpop.f32.mrb[172].mxu0  ;;  %v10641_v2 = vld [vmem:[%s15277_s30 + $0x50] sm:$0xff] }
 0x48f   :  { %v9968_v42 = vpop.eup %9967  ;;  %9987 = vtanh.f32 %v3360_v13  ;;  %v3361_v3 = vadd.f32 %v3329_v48, %v2309_v7  ;;  %v3235_v54 = vadd.f32 1.0, %v9966_v36  ;;  %v7524_v7 = vmul.f32 -1.442695, %v9227_v32  ;;  %v12725_v48 = vpop.f32.mrb[173].mxu0 }
 0x490   :  { %v9970_v39 = vpop.eup %9969  ;;  %9989 = vrcp.f32 %v3234_v33  ;;  %v3012_v25 = vadd.f32 1.0, %v9968_v42  ;;  %v9231_v33 = vadd.f32 %v12389_v9, %v12659_v41  ;;  %v2799_v36 = vadd.f32 %v12435_v18, %v12429_v53  ;;  %v12733_v62 = vpop.f32.mrb[174].mxu0 }
 0x491   :  { %v9972_v57 = vpop.eup %9971  ;;  %9991 = vpow2.f32 %v7523_v34  ;;  %v3454_v22 = vmul.f32 %v9970_v39, %v3422_v14  ;;  %v2802_v44 = vadd.f32 %v12443_v19, %v12429_v53  ;;  %v12739_v32 = vpop.f32.mrb[175].mxu0  ;;  %v3423_v39 = vsub.f32 1.0, %v12675_v43 }
 0x492   :  { %v9974_v20 = vpop.eup %9973  ;;  %9993 = vrcp.f32 %v3012_v25  ;;  %v3236_v14 = vadd.f32 1.0, %v9972_v57  ;;  %v7493_v25 = vmul.f32 -1.442695, %v9229_v8 }
 0x493   :  { %v9976_v13 = vpop.eup %9975  ;;  %v3013_v56 = vadd.f32 1.0, %v9974_v20  ;;  %9995 = vtanh.f32 %v3361_v3  ;;  %v12723_v34 = vadd.f32 %v3486_v31, %v3454_v22  ;;  %v7525_v22 = vmul.f32 -1.442695, %v9231_v33 }
 0x494   :  { %v12727_v38 = vpop.eup %9977  ;;  %9997 = vrcp.f32 %v3235_v54  ;;  %v3330_v41 = vmul.f32 %v9976_v13, %v2794_v21  ;;  %v9233_v21 = vadd.f32 %v12387_v45, %v12680_v27  ;;  %v3487_v31 = vmul.f32 %v10641_v2, %v12675_v43 }
 0x495   :  { %15415 = vst [vmem:[#allocation66_spill] sm:$0xff] %v12723_v34  ;;  %v9980_v42 = vpop.eup %9979  ;;  %9999 = vrcp.f32 %v3013_v56  ;;  %v12737_v3 = vpack.c.bf16 %v12723_v34, %v12685_v11  ;;  %v3424_v27 = vsub.f32 1.0, %v12690_v17  ;;  %v9237_v43 = vadd.f32 %v12387_v45, %v12687_v52 }
 0x496   :  { %v9982_v54 = vpop.eup %9981  ;;  %10001 = vpow2.f32 %v7492_v50  ;;  %v3362_v18 = vadd.f32 %v3330_v41, %v2312_v6  ;;  %v3455_v57 = vmul.f32 %v9980_v42, %v3423_v39  ;;  %v9235_v50 = vadd.f32 %v12389_v9, %v12683_v29  ;;  %v10642_v29 = vld [vmem:[%s15277_s30 + $0x58] sm:$0xff]  ;;  %v12762_v39 = vpop.f32.mrb[176].mxu0 }
 0x497   :  { %15416 = vst [vmem:[#allocation67_spill] sm:$0xff] %v12737_v3  ;;  %v9984_v19 = vpop.eup %9983  ;;  %10003 = vpow2.f32 %v7524_v7  ;;  %3630 = vmatmul.mubr.bf16.gmra.mrb[240].mxu1 %v12737_v3  ;;  %8782 = vmatprep.mubr.bf16.mxu0 %v12737_v3  ;;  %v3237_v33 = vadd.f32 1.0, %v9982_v54  ;;  %v3488_v42 = vmul.f32 %v10642_v29, %v12690_v17  ;;  %v2807_v54 = vadd.f32 %v12460_v10, %v12429_v53 }
 0x498   :  { %v9986_v20 = vpop.eup %9985  ;;  %v3014_v6 = vadd.f32 1.0, %v9984_v19  ;;  %10005 = vtanh.f32 %v3362_v18  ;;  %3639 = vmatprep.mubr.bf16.mxu1 %v15359_v61  ;;  %v12754_v56 = vadd.f32 %v3487_v31, %v3455_v57  ;;  %v12767_v19 = vpop.f32.mrb[177].mxu0  ;;  %v7526_v57 = vmul.f32 -1.442695, %v9235_v50  ;;  %v10643_v50 = vld [vmem:[%s15277_s30 + $0x60] sm:$0xff] }
 0x499   :  { %v9988_v8 = vpop.eup %9987  ;;  %10007 = vrcp.f32 %v3236_v14  ;;  %v3331_v13 = vmul.f32 %v9986_v20, %v2799_v36  ;;  %v7494_v36 = vmul.f32 -1.442695, %v9233_v21  ;;  %v9239_v2 = vadd.f32 %v12389_v9, %v12694_v58  ;;  %v12773_v17 = vpop.f32.mrb[178].mxu0 }
 0x49a   :  { %15417 = vst [vmem:[#allocation68_spill] sm:$0xff] %v12754_v56  ;;  %v9990_v7 = vpop.eup %9989  ;;  %10009 = vrcp.f32 %v3014_v6  ;;  %v3456_v41 = vmul.f32 %v9988_v8, %v3424_v27  ;;  %v12777_v21 = vpop.f32.mrb[179].mxu0  ;;  %v3425_v10 = vsub.f32 1.0, %v12727_v38  ;;  %v9241_v8 = vadd.f32 %v12387_v45, %v12721_v37 }
 0x49b   :  { %v9992_v18 = vpop.eup %9991  ;;  %v3363_v14 = vadd.f32 %v3331_v13, %v12698_v5  ;;  %10011 = vpow2.f32 %v7493_v25  ;;  %v2325_v5 = vadd.f32 %v12339_v24, %v12433_v23  ;;  %v3489_v24 = vmul.f32 %v10643_v50, %v12727_v38 }
 0x49c   :  { %v9994_v52 = vpop.eup %9993  ;;  %10013 = vpow2.f32 %v7525_v22  ;;  %v12771_v31 = vadd.f32 %v3488_v42, %v3456_v41  ;;  %v7495_v22 = vmul.f32 -1.442695, %v9237_v43  ;;  %v3238_v43 = vadd.f32 1.0, %v9992_v18 }
 0x49d   :  { %v9996_v20 = vpop.eup %9995  ;;  %10015 = vrcp.f32 %v3237_v33  ;;  %v3332_v25 = vmul.f32 %v9994_v52, %v2802_v44  ;;  %v7527_v41 = vmul.f32 -1.442695, %v9239_v2  ;;  %v9243_v18 = vadd.f32 %v12389_v9, %v12725_v48 }
 0x49e   :  { %15418 = vst [vmem:[#allocation69_spill] sm:$0xff] %v12771_v31  ;;  %v12780_v6 = vpop.eup %9997  ;;  %10017 = vtanh.f32 %v3363_v14  ;;  %v12784_v58 = vpack.c.bf16 %v12771_v31, %v12754_v56  ;;  %v3457_v33 = vmul.f32 %v9996_v20, %v3425_v10  ;;  %v12802_v52 = vpop.f32.mrb[180].mxu0  ;;  %v7496_v2 = vmul.f32 -1.442695, %v9241_v8 }
 0x49f   :  { %v10000_v27 = vpop.eup %9999  ;;  %v3364_v44 = vadd.f32 %v3332_v25, %v12702_v46  ;;  %10019 = vpow2.f32 %v7494_v36  ;;  %v3426_v46 = vsub.f32 1.0, %v9990_v7  ;;  %v10644_v25 = vld [vmem:[%s15277_s30 + $0x68] sm:$0xff]  ;;  %v12807_v50 = vpop.f32.mrb[181].mxu0  ;;  %v2328_v48 = vadd.f32 %v12343_v28, %v12433_v23 }
 0x4a0   :  { %15419 = vst [vmem:[#allocation70_spill] sm:$0xff] %v12784_v58  ;;  %v10002_v13 = vpop.eup %10001  ;;  %10021 = vpow2.f32 %v7526_v57  ;;  %v3333_v29 = vmul.f32 %v10000_v27, %v2807_v54  ;;  %3640 = vmatmul.mubr.bf16.gmra.mrb[244].mxu1 %v12784_v58  ;;  %8783 = vmatmul.mubr.bf16.gmra.mrb[200].mxu0 %v12784_v58  ;;  %v12796_v38 = vadd.f32 %v3489_v24, %v3457_v33 }
 0x4a1   :  { %v10004_v42 = vpop.eup %10003  ;;  %v3015_v14 = vadd.f32 1.0, %v10002_v13  ;;  %10023 = vtanh.f32 %v3364_v44  ;;  %3649 = vmatprep.mubr.bf16.mxu1 %v15359_v61  ;;  %v2810_v54 = vadd.f32 %v12469_v26, %v12429_v53  ;;  %v3490_v10 = vmul.f32 %v10644_v25, %v9990_v7 }
 0x4a2   :  { %15420 = vst [vmem:[#allocation71_spill] sm:$0xff] %v12796_v38  ;;  %v10006_v36 = vpop.eup %10005  ;;  %10025 = vpow2.f32 %v7495_v22  ;;  %v3365_v37 = vadd.f32 %v3333_v29, %v2325_v5  ;;  %v12811_v22 = vpop.f32.mrb[182].mxu0  ;;  %v3239_v24 = vadd.f32 1.0, %v10004_v42  ;;  %v7528_v7 = vmul.f32 -1.442695, %v9243_v18 }
 0x4a3   :  { %v10008_v57 = vpop.eup %10007  ;;  %10027 = vrcp.f32 %v3015_v14  ;;  %v3458_v20 = vmul.f32 %v10006_v36, %v3426_v46  ;;  %v12815_v8 = vpop.f32.mrb[183].mxu0  ;;  %v9245_v29 = vadd.f32 %v12387_v45, %v12733_v62  ;;  %v2333_v46 = vadd.f32 %v12337_v40, %v12433_v23 }
 0x4a4   :  { %v10010_v5 = vpop.eup %10009  ;;  %10029 = vrcp.f32 %v3238_v43  ;;  %v9247_v36 = vadd.f32 %v12389_v9, %v12739_v32  ;;  %v9249_v62 = vadd.f32 %v12387_v45, %v12762_v39  ;;  %v3428_v39 = vsub.f32 1.0, %v10008_v57 }
 0x4a5   :  { %v10012_v26 = vpop.eup %10011  ;;  %10031 = vpow2.f32 %v7527_v41  ;;  %v3334_v27 = vmul.f32 %v10010_v5, %v2810_v54  ;;  %v12813_v44 = vadd.f32 %v3490_v10, %v3458_v20  ;;  %v3427_v41 = vsub.f32 1.0, %v12780_v6 }
 0x4a6   :  { %v10014_v33 = vpop.eup %10013  ;;  %v3016_v13 = vadd.f32 1.0, %v10012_v26  ;;  %10033 = vtanh.f32 %v3365_v37  ;;  %v7497_v32 = vmul.f32 -1.442695, %v9245_v29  ;;  %v12839_v10 = vpop.f32.mrb[184].mxu0  ;;  %v2815_v26 = vadd.f32 %v12457_v60, %v12429_v53 }
 0x4a7   :  { %15421 = vst [vmem:[#allocation72_spill] sm:$0xff] %v12813_v44  ;;  %v12819_v14 = vpop.eup %10015  ;;  %10035 = vpow2.f32 %v7496_v2  ;;  %v3366_v28 = vadd.f32 %v3334_v27, %v2328_v48  ;;  %v12823_v43 = vpack.c.bf16 %v12813_v44, %v12796_v38  ;;  %v3240_v18 = vadd.f32 1.0, %v10014_v33  ;;  %v10645_v2 = vld [vmem:[%s15277_s30 + $0x70] sm:$0xff] }
 0x4a8   :  { %v10018_v42 = vpop.eup %10017  ;;  %10037 = vrcp.f32 %v3016_v13  ;;  %v3491_v40 = vmul.f32 %v10645_v2, %v12780_v6  ;;  %v2336_v48 = vadd.f32 %v12341_v63, %v12433_v23  ;;  %v12847_v6 = vpop.f32.mrb[185].mxu0  ;;  %v7529_v60 = vmul.f32 -1.442695, %v9247_v36 }
 0x4a9   :  { %15422 = vst [vmem:[#allocation73_spill] sm:$0xff] %v12823_v43  ;;  %v10020_v37 = vpop.eup %10019  ;;  %10039 = vrcp.f32 %v3239_v24  ;;  %3650 = vmatmul.mubr.bf16.gmra.mrb[248].mxu1 %v12823_v43  ;;  %8786 = vmatprep.mubr.bf16.mxu0 %v12823_v43  ;;  %v3459_v54 = vmul.f32 %v10018_v42, %v3427_v41  ;;  %v12852_v41 = vpop.f32.mrb[186].mxu0  ;;  %v9251_v36 = vadd.f32 %v12389_v9, %v12767_v19 }
 0x4aa   :  { %v10022_v20 = vpop.eup %10021  ;;  %v3017_v25 = vadd.f32 1.0, %v10020_v37  ;;  %10041 = vpow2.f32 %v7528_v7  ;;  %3659 = vmatprep.mubr.bf16.mxu1 %v15359_v61  ;;  %v10646_v7 = vld [vmem:[%s15277_s30 + $0x78] sm:$0xff]  ;;  %v12854_v37 = vpop.f32.mrb[187].mxu0 }
 0x4ab   :  { %v10024_v5 = vpop.eup %10023  ;;  %10043 = vtanh.f32 %v3366_v28  ;;  %v12845_v24 = vadd.f32 %v3491_v40, %v3459_v54  ;;  %v3241_v33 = vadd.f32 1.0, %v10022_v20  ;;  %v3492_v29 = vmul.f32 %v10646_v7, %v10008_v57  ;;  %v10647_v7 = vld [vmem:[%s15277_s30 + $0x80] sm:$0xff] }
 0x4ac   :  { %v10026_v27 = vpop.eup %10025  ;;  %10045 = vrcp.f32 %v3017_v25  ;;  %v3460_v13 = vmul.f32 %v10024_v5, %v3428_v39  ;;  %v7498_v28 = vmul.f32 -1.442695, %v9249_v62  ;;  %v9253_v40 = vadd.f32 %v12387_v45, %v12773_v17  ;;  %v15425_v39 = vld [vmem:[#allocation46_spill] sm:$0xff] }
 0x4ad   :  { %15423 = vst [vmem:[#allocation74_spill] sm:$0xff] %v12845_v24  ;;  %v10028_v63 = vpop.eup %10027  ;;  %10047 = vrcp.f32 %v3240_v18  ;;  %v3018_v42 = vadd.f32 1.0, %v10026_v27  ;;  %v3429_v57 = vsub.f32 1.0, %v12819_v14  ;;  %v2818_v18 = vadd.f32 %v15425_v39, %v12429_v53 }
 0x4ae   :  { %v10030_v54 = vpop.eup %10029  ;;  %v3335_v2 = vmul.f32 %v10028_v63, %v2815_v26  ;;  %10049 = vpow2.f32 %v7497_v32  ;;  %v12858_v20 = vadd.f32 %v3492_v29, %v3460_v13  ;;  %v9255_v32 = vadd.f32 %v12389_v9, %v12777_v21  ;;  %v12879_v63 = vpop.f32.mrb[188].mxu0 }
 0x4af   :  { %v10032_v25 = vpop.eup %10031  ;;  %10051 = vrcp.f32 %v3018_v42  ;;  %v3493_v29 = vmul.f32 %v10647_v7, %v12819_v14  ;;  %v9257_v21 = vadd.f32 %v12387_v45, %v12802_v52  ;;  %v15428_v14 = vld [vmem:[#allocation48_spill] sm:$0xff]  ;;  %v3430_v52 = vsub.f32 1.0, %v10030_v54 }
 0x4b0   :  { %15424 = vst [vmem:[#allocation75_spill] sm:$0xff] %v12858_v20  ;;  %v10034_v62 = vpop.eup %10033  ;;  %10053 = vrcp.f32 %v3241_v33  ;;  %v3367_v5 = vadd.f32 %v3335_v2, %v2333_v46  ;;  %v12869_v17 = vpack.c.bf16 %v12858_v20, %v12845_v24  ;;  %v3242_v27 = vadd.f32 1.0, %v10032_v25 }
 0x4b1   :  { %v10036_v26 = vpop.eup %10035  ;;  %v3461_v13 = vmul.f32 %v10034_v62, %v3429_v57  ;;  %10055 = vpow2.f32 %v7498_v28  ;;  %v7499_v46 = vmul.f32 -1.442695, %v9253_v40  ;;  %v2823_v28 = vadd.f32 %v15428_v14, %v12429_v53 }
 0x4b2   :  { %15426 = vst [vmem:[#allocation46_spill] sm:$0xff] %v12869_v17  ;;  %v10038_v19 = vpop.eup %10037  ;;  %v3019_v33 = vadd.f32 1.0, %v10036_v26  ;;  %10057 = vpow2.f32 %v7529_v60  ;;  %3660 = vmatmul.mubr.bf16.gmra.mrb[252].mxu1 %v12869_v17  ;;  %8787 = vmatmul.mubr.bf16.gmra.mrb[204].mxu0 %v12869_v17  ;;  %v12886_v60 = vpop.f32.mrb[189].mxu0  ;;  %v7530_v57 = vmul.f32 -1.442695, %v9251_v36  ;;  %v15429_v36 = vld [vmem:[#allocation41_spill] sm:$0xff] }
 0x4b3   :  { %v10040_v42 = vpop.eup %10039  ;;  %10059 = vtanh.f32 %v3367_v5  ;;  %v12881_v2 = vadd.f32 %v3493_v29, %v3461_v13  ;;  %v3336_v25 = vmul.f32 %v10038_v19, %v2818_v18  ;;  %3669 = vmatprep.mubr.bf16.mxu1 %v15359_v61  ;;  %v12888_v39 = vpop.f32.mrb[190].mxu0  ;;  %v7531_v5 = vmul.f32 -1.442695, %v9255_v32  ;;  %v10648_v29 = vld [vmem:[%s15277_s30 + $0x88] sm:$0xff] }
 0x4b4   :  { %v10042_v40 = vpop.eup %10041  ;;  %10061 = vrcp.f32 %v3019_v33  ;;  %v12890_v13 = vpop.f32.mrb[191].mxu0  ;;  %v3494_v19 = vmul.f32 %v10648_v29, %v10030_v54  ;;  %v7500_v14 = vmul.f32 -1.442695, %v9257_v21  ;;  %v2341_v20 = vadd.f32 %v15429_v36, %v12433_v23 }
 0x4b5   :  { %15427 = vst [vmem:[#allocation76_spill] sm:$0xff] %v12881_v2  ;;  %v10044_v62 = vpop.eup %10043  ;;  %10063 = vrcp.f32 %v3242_v27  ;;  %v3368_v26 = vadd.f32 %v3336_v25, %v2336_v48  ;;  %v9259_v48 = vadd.f32 %v12389_v9, %v12807_v50  ;;  %v2826_v25 = vadd.f32 %v12505_v35, %v12429_v53 }
 0x4b6   :  { %v10046_v18 = vpop.eup %10045  ;;  %v3462_v7 = vmul.f32 %v10044_v62, %v3430_v52  ;;  %10065 = vpow2.f32 %v7499_v46  ;;  %v9261_v54 = vadd.f32 %v12387_v45, %v12811_v22  ;;  %v3243_v21 = vadd.f32 1.0, %v10042_v40 }
 0x4b7   :  { %v10048_v33 = vpop.eup %10047  ;;  %10067 = vtanh.f32 %v3368_v26  ;;  %v3337_v24 = vmul.f32 %v10046_v18, %v2823_v28  ;;  %v15431_v28 = vld [vmem:[#allocation31_spill] sm:$0xff]  ;;  %v3431_v29 = vsub.f32 1.0, %v10040_v42 }
 0x4b8   :  { %v10050_v32 = vpop.eup %10049  ;;  %v12899_v27 = vadd.f32 %v3494_v19, %v3462_v7  ;;  %10069 = vpow2.f32 %v7530_v57  ;;  %v2344_v50 = vadd.f32 %v15431_v28, %v12433_v23  ;;  %v7532_v7 = vmul.f32 -1.442695, %v9259_v48  ;;  %v10649_v48 = vld [vmem:[%s15277_s30 + $0x90] sm:$0xff] }
 0x4b9   :  { %v10052_v46 = vpop.eup %10051  ;;  %v3020_v52 = vadd.f32 1.0, %v10050_v32  ;;  %10071 = vpow2.f32 %v7531_v5  ;;  %v3369_v62 = vadd.f32 %v3337_v24, %v2341_v20  ;;  %v15433_v20 = vld [vmem:[#allocation47_spill] sm:$0xff]  ;;  %v7501_v36 = vmul.f32 -1.442695, %v9261_v54  ;;  %v15435_v54 = vld [vmem:[#allocation32_spill] sm:$0xff] }
 0x4ba   :  { %15430 = vst [vmem:[#allocation48_spill] sm:$0xff] %v12899_v27  ;;  %v12905_v26 = vpop.eup %10053  ;;  %v12911_v18 = vpack.c.bf16 %v12899_v27, %v12881_v2  ;;  %10073 = vpow2.f32 %v7500_v14  ;;  %v3338_v57 = vmul.f32 %v10052_v46, %v2826_v25  ;;  %v2831_v19 = vadd.f32 %v15433_v20, %v12429_v53 }
 0x4bb   :  { %v10056_v35 = vpop.eup %10055  ;;  %10075 = vrcp.f32 %v3020_v52  ;;  %v3495_v25 = vmul.f32 %v10649_v48, %v10040_v42  ;;  %v9263_v46 = vadd.f32 %v12389_v9, %v12815_v8  ;;  %v2352_v28 = vadd.f32 %v15435_v54, %v12433_v23 }
 0x4bc   :  { %15432 = vst [vmem:[#allocation41_spill] sm:$0xff] %v12911_v18  ;;  %v10058_v22 = vpop.eup %10057  ;;  %v3021_v40 = vadd.f32 1.0, %v10056_v35  ;;  %10077 = vtanh.f32 %v3369_v62  ;;  %v3370_v5 = vadd.f32 %v3338_v57, %v2344_v50  ;;  %3670 = vmatmul.mubr.bf16.gmra.mrb[0].mxu1 %v12911_v18  ;;  %8790 = vmatprep.mubr.bf16.mxu0 %v12911_v18  ;;  %v9265_v42 = vadd.f32 %v12387_v45, %v12839_v10 }
 0x4bd   :  { %v10060_v24 = vpop.eup %10059  ;;  %10079 = vrcp.f32 %v3243_v21  ;;  %3679 = vmatprep.mubr.bf16.mxu1 %v15359_v61  ;;  %v15434_v21 = vld [vmem:[#allocation42_spill] sm:$0xff]  ;;  %v3244_v8 = vadd.f32 1.0, %v10058_v22  ;;  %v15438_v22 = vld [vmem:[#allocation49_spill] sm:$0xff] }
 0x4be   :  { %v10062_v14 = vpop.eup %10061  ;;  %v3463_v32 = vmul.f32 %v10060_v24, %v3431_v29  ;;  %10081 = vrcp.f32 %v3021_v40  ;;  %v2349_v62 = vadd.f32 %v15434_v21, %v12433_v23  ;;  %v3432_v29 = vsub.f32 1.0, %v10048_v33 }
 0x4bf   :  { %v12923_v52 = vpop.eup %10063  ;;  %v3339_v50 = vmul.f32 %v10062_v14, %v2831_v19  ;;  %10083 = vpow2.f32 %v7532_v7  ;;  %v10650_v19 = vld [vmem:[%s15277_s30 + $0x98] sm:$0xff]  ;;  %v7533_v14 = vmul.f32 -1.442695, %v9263_v46  ;;  %v15440_v46 = vld [vmem:[#allocation52_spill] sm:$0xff] }
 0x4c0   :  { %v10066_v57 = vpop.eup %10065  ;;  %v12929_v35 = vadd.f32 %v3495_v25, %v3463_v32  ;;  %10085 = vtanh.f32 %v3370_v5  ;;  %v3496_v7 = vmul.f32 %v10650_v19, %v10048_v33  ;;  %v9267_v32 = vadd.f32 %v12389_v9, %v12847_v6  ;;  %v15437_v25 = vld [vmem:[#allocation34_spill] sm:$0xff] }
 0x4c1   :  { %v10068_v40 = vpop.eup %10067  ;;  %v3022_v24 = vadd.f32 1.0, %v10066_v57  ;;  %v3371_v20 = vadd.f32 %v3339_v50, %v2349_v62  ;;  %10087 = vpow2.f32 %v7501_v36  ;;  %v2357_v10 = vadd.f32 %v15437_v25, %v12433_v23 }
 0x4c2   :  { %15436 = vst [vmem:[#allocation31_spill] sm:$0xff] %v12929_v35  ;;  %v10070_v48 = vpop.eup %10069  ;;  %v3464_v21 = vmul.f32 %v10068_v40, %v3432_v29  ;;  %v2834_v62 = vadd.f32 %v15438_v22, %v12429_v53  ;;  %v9269_v36 = vadd.f32 %v12387_v45, %v12852_v41  ;;  %v7502_v33 = vmul.f32 -1.442695, %v9265_v42  ;;  %v10651_v42 = vld [vmem:[%s15277_s30 + $0xa0] sm:$0xff] }
 0x4c3   :  { %v10072_v5 = vpop.eup %10071  ;;  %10089 = vrcp.f32 %v3022_v24  ;;  %v2839_v57 = vadd.f32 %v15440_v46, %v12429_v53  ;;  %v3245_v29 = vadd.f32 1.0, %v10070_v48  ;;  %v3433_v40 = vsub.f32 1.0, %v12905_v26 }
 0x4c4   :  { %v10074_v54 = vpop.eup %10073  ;;  %v12944_v50 = vadd.f32 %v3496_v7, %v3464_v21  ;;  %10091 = vtanh.f32 %v3371_v20  ;;  %v7534_v21 = vmul.f32 -1.442695, %v9267_v32  ;;  %v7503_v48 = vmul.f32 -1.442695, %v9269_v36 }
 0x4c5   :  { %v10076_v6 = vpop.eup %10075  ;;  %10093 = vrcp.f32 %v3244_v8  ;;  %v3023_v24 = vadd.f32 1.0, %v10074_v54  ;;  %v3497_v8 = vmul.f32 %v10651_v42, %v12905_v26  ;;  %v3246_v54 = vadd.f32 1.0, %v10072_v5 }
 0x4c6   :  { %15439 = vst [vmem:[#allocation47_spill] sm:$0xff] %v12944_v50  ;;  %v10078_v19 = vpop.eup %10077  ;;  %v12951_v25 = vpack.c.bf16 %v12944_v50, %v12929_v35  ;;  %v3340_v41 = vmul.f32 %v10076_v6, %v2834_v62  ;;  %10095 = vpow2.f32 %v7533_v14  ;;  %v9273_v50 = vadd.f32 %v12387_v45, %v12879_v63 }
 0x4c7   :  { %v10080_v7 = vpop.eup %10079  ;;  %v3465_v20 = vmul.f32 %v10078_v19, %v3433_v40  ;;  %10097 = vrcp.f32 %v3023_v24  ;;  %v3434_v62 = vsub.f32 1.0, %v12923_v52  ;;  %v9271_v63 = vadd.f32 %v12389_v9, %v12854_v37  ;;  %v10652_v40 = vld [vmem:[%s15277_s30 + $0xa8] sm:$0xff] }
 0x4c8   :  { %15441 = vst [vmem:[#allocation42_spill] sm:$0xff] %v12951_v25  ;;  %v10082_v22 = vpop.eup %10081  ;;  %v3372_v46 = vadd.f32 %v3340_v41, %v2352_v28  ;;  %10099 = vpow2.f32 %v7502_v33  ;;  %3680 = vmatmul.mubr.bf16.gmra.mrb[4].mxu1 %v12951_v25  ;;  %8791 = vmatmul.mubr.bf16.gmra.mrb[208].mxu0 %v12951_v25  ;;  %v15443_v28 = vld [vmem:[#allocation33_spill] sm:$0xff]  ;;  %v2842_v33 = vadd.f32 %v12542_v1, %v12429_v53  ;;  %v7504_v41 = vmul.f32 -1.442695, %v9273_v50 }
 0x4c9   :  { %v10084_v14 = vpop.eup %10083  ;;  %10101 = vrcp.f32 %v3245_v29  ;;  %v12961_v32 = vadd.f32 %v3497_v8, %v3465_v20  ;;  %v3341_v26 = vmul.f32 %v10082_v22, %v2839_v57  ;;  %3689 = vmatprep.mubr.bf16.mxu1 %v15359_v61  ;;  %v2360_v5 = vadd.f32 %v15443_v28, %v12433_v23  ;;  %v10653_v50 = vld [vmem:[%s15277_s30 + $0xb0] sm:$0xff] }
 0x4ca   :  { %v10086_v36 = vpop.eup %10085  ;;  %10103 = vtanh.f32 %v3372_v46  ;;  %v3498_v57 = vmul.f32 %v10652_v40, %v12923_v52  ;;  %v9277_v20 = vadd.f32 %v12387_v45, %v12888_v39  ;;  %v3435_v42 = vsub.f32 1.0, %v10080_v7 }
 0x4cb   :  { %15442 = vst [vmem:[#allocation32_spill] sm:$0xff] %v12961_v32  ;;  %v10088_v6 = vpop.eup %10087  ;;  %v3466_v29 = vmul.f32 %v10086_v36, %v3434_v62  ;;  %10105 = vpow2.f32 %v7503_v48  ;;  %v3373_v24 = vadd.f32 %v3341_v26, %v2357_v10  ;;  %v3247_v8 = vadd.f32 1.0, %v10084_v14  ;;  %v15446_v62 = vld [vmem:[#allocation51_spill] sm:$0xff] }
 0x4cc   :  { %10107 = vrcp.f32 %v3246_v54  ;;  %v3024_v19 = vadd.f32 1.0, %v10088_v6  ;;  %v7535_v46 = vmul.f32 -1.442695, %v9271_v63  ;;  %v9275_v52 = vadd.f32 %v12389_v9, %v12886_v60  ;;  %v15447_v63 = vld [vmem:[#allocation36_spill] sm:$0xff] }
 0x4cd   :  { %v10090_v37 = vpop.eup %10089  ;;  %v12977_v1 = vadd.f32 %v3498_v57, %v3466_v29  ;;  %10109 = vpow2.f32 %v7534_v21  ;;  %v3499_v39 = vmul.f32 %v10653_v50, %v10080_v7  ;;  %v2847_v26 = vadd.f32 %v15446_v62, %v12429_v53 }
 0x4ce   :  { %v10092_v22 = vpop.eup %10091  ;;  %10111 = vrcp.f32 %v3024_v19  ;;  %v3342_v48 = vmul.f32 %v10090_v37, %v2842_v33  ;;  %v7505_v60 = vmul.f32 -1.442695, %v9277_v20  ;;  %v2365_v33 = vadd.f32 %v15447_v63, %v12433_v23 }
 0x4cf   :  { %15444 = vst [vmem:[#allocation34_spill] sm:$0xff] %v12977_v1  ;;  %v10094_v10 = vpop.eup %10093  ;;  %v3467_v54 = vmul.f32 %v10092_v22, %v3435_v42  ;;  %v12986_v14 = vpack.c.bf16 %v12977_v1, %v12961_v32  ;;  %10113 = vtanh.f32 %v3373_v24  ;;  %v7536_v40 = vmul.f32 -1.442695, %v9275_v52 }
 0x4d0   :  { %v10096_v21 = vpop.eup %10095  ;;  %10115 = vpow2.f32 %v7504_v41  ;;  %v3374_v36 = vadd.f32 %v3342_v48, %v2360_v5  ;;  %v9279_v57 = vadd.f32 %v12389_v9, %v12890_v13  ;;  %v3436_v24 = vsub.f32 1.0, %v10094_v10 }
 0x4d1   :  { %15445 = vst [vmem:[#allocation49_spill] sm:$0xff] %v12986_v14  ;;  %v10098_v28 = vpop.eup %10097  ;;  %v12992_v6 = vadd.f32 %v3499_v39, %v3467_v54  ;;  %10117 = vrcp.f32 %v3247_v8  ;;  %3690 = vmatmul.mubr.bf16.gmra.mrb[8].mxu1 %v12986_v14  ;;  %8794 = vmatprep.mubr.bf16.mxu0 %v12986_v14  ;;  %v10654_v8 = vld [vmem:[%s15277_s30 + $0xb8] sm:$0xff]  ;;  %v2850_v39 = vadd.f32 %v12539_v12, %v12429_v53 }
 0x4d2   :  { %v10100_v7 = vpop.eup %10099  ;;  %10119 = vpow2.f32 %v7535_v46  ;;  %v3343_v29 = vmul.f32 %v10098_v28, %v2847_v26  ;;  %3699 = vmatprep.mubr.bf16.mxu1 %v15359_v61  ;;  %v3500_v22 = vmul.f32 %v10654_v8, %v10094_v10  ;;  %v3248_v46 = vadd.f32 1.0, %v10096_v21 }
 0x4d3   :  { %15448 = vst [vmem:[#allocation52_spill] sm:$0xff] %v12992_v6  ;;  %v10102_v5 = vpop.eup %10101  ;;  %v3025_v19 = vadd.f32 1.0, %v10100_v7  ;;  %10121 = vtanh.f32 %v3374_v36  ;;  %v7537_v48 = vmul.f32 -1.442695, %v9279_v57  ;;  %v10655_v7 = vld [vmem:[%s15277_s30 + $0xc0] sm:$0xff] }
 0x4d4   :  { %v10104_v41 = vpop.eup %10103  ;;  %v3375_v20 = vadd.f32 %v3343_v29, %v2365_v33  ;;  %10123 = vpow2.f32 %v7505_v60  ;;  %v3437_v26 = vsub.f32 1.0, %v10102_v5  ;;  %v15450_v60 = vld [vmem:[#allocation35_spill] sm:$0xff]  ;;  %v3501_v12 = vmul.f32 %v10655_v7, %v10102_v5 }
 0x4d5   :  { %v10106_v37 = vpop.eup %10105  ;;  %v3468_v42 = vmul.f32 %v10104_v41, %v3436_v24  ;;  %10125 = vrcp.f32 %v3025_v19  ;;  %v2368_v10 = vadd.f32 %v15450_v60, %v12433_v23 }
 0x4d6   :  { %v10108_v52 = vpop.eup %10107  ;;  %v3026_v13 = vadd.f32 1.0, %v10106_v37  ;;  %10127 = vpow2.f32 %v7536_v40  ;;  %v2855_v37 = vadd.f32 %v12573_v30, %v12429_v53 }
 0x4d7   :  { %v10110_v54 = vpop.eup %10109  ;;  %v13002_v50 = vadd.f32 %v3500_v22, %v3468_v42  ;;  %10129 = vtanh.f32 %v3375_v20  ;;  %v3438_v20 = vsub.f32 1.0, %v10108_v52  ;;  %v10656_v22 = vld [vmem:[%s15277_s30 + $0xc8] sm:$0xff] }
 0x4d8   :  { %v10112_v62 = vpop.eup %10111  ;;  %10131 = vrcp.f32 %v3026_v13  ;;  %v3249_v19 = vadd.f32 1.0, %v10110_v54 }
 0x4d9   :  { %15449 = vst [vmem:[#allocation33_spill] sm:$0xff] %v13002_v50  ;;  %v10114_v36 = vpop.eup %10113  ;;  %v13010_v21 = vpack.c.bf16 %v13002_v50, %v12992_v6  ;;  %10133 = vrcp.f32 %v3248_v46  ;;  %v3344_v28 = vmul.f32 %v10112_v62, %v2850_v39  ;;  %v3502_v46 = vmul.f32 %v10656_v22, %v10108_v52  ;;  %v10657_v52 = vld [vmem:[%s15277_s30 + $0xd0] sm:$0xff] }
 0x4da   :  { %v10116_v63 = vpop.eup %10115  ;;  %v3469_v33 = vmul.f32 %v10114_v36, %v3437_v26  ;;  %10135 = vpow2.f32 %v7537_v48  ;;  %v15453_v48 = vld [vmem:[#allocation38_spill] sm:$0xff] }
 0x4db   :  { %15451 = vst [vmem:[#allocation51_spill] sm:$0xff] %v13010_v21  ;;  %v10118_v29 = vpop.eup %10117  ;;  %v3027_v40 = vadd.f32 1.0, %v10116_v63  ;;  %v3376_v57 = vadd.f32 %v3344_v28, %v2368_v10  ;;  %3700 = vmatmul.mubr.bf16.gmra.mrb[12].mxu1 %v13010_v21  ;;  %8795 = vmatmul.mubr.bf16.gmra.mrb[212].mxu0 %v13010_v21  ;;  %v2373_v54 = vadd.f32 %v15453_v48, %v12433_v23  ;;  %v15458_v48 = vld [vmem:[#allocation40_spill] sm:$0xff] }
 0x4dc   :  { %v10120_v24 = vpop.eup %10119  ;;  %v13017_v41 = vadd.f32 %v3501_v12, %v3469_v33  ;;  %3709 = vmatprep.mubr.bf16.mxu1 %v15359_v61  ;;  %v3439_v30 = vsub.f32 1.0, %v10118_v29  ;;  %v2858_v28 = vadd.f32 %v12580_v15, %v12429_v53  ;;  %v3503_v7 = vmul.f32 %v10657_v52, %v10118_v29  ;;  %v15461_v52 = vld [vmem:[#allocation39_spill] sm:$0xff] }
 0x4dd   :  { %v10122_v42 = vpop.eup %10121  ;;  %10137 = vrcp.f32 %v3027_v40  ;;  %v3250_v39 = vadd.f32 1.0, %v10120_v24  ;;  %v15456_v24 = vld [vmem:[#allocation37_spill] sm:$0xff] }
 0x4de   :  { %15452 = vst [vmem:[#allocation36_spill] sm:$0xff] %v13017_v41  ;;  %v10124_v5 = vpop.eup %10123  ;;  %10139 = vtanh.f32 %v3376_v57  ;;  %v3470_v8 = vmul.f32 %v10122_v42, %v3438_v20 }
 0x4df   :  { %v10126_v13 = vpop.eup %10125  ;;  %v3028_v62 = vadd.f32 1.0, %v10124_v5  ;;  %10141 = vrcp.f32 %v3249_v19  ;;  %v2376_v19 = vadd.f32 %v15456_v24, %v12433_v23  ;;  %v2863_v5 = vadd.f32 %v12563_v55, %v12429_v53  ;;  %v15459_v55 = vld [vmem:[#allocation57_spill] sm:$0xff] }
 0x4e0   :  { %v10128_v26 = vpop.eup %10127  ;;  %v13027_v36 = vadd.f32 %v3502_v46, %v3470_v8  ;;  %v3345_v60 = vmul.f32 %v10126_v13, %v2855_v37 }
 0x4e1   :  { %v10130_v10 = vpop.eup %10129  ;;  %10143 = vrcp.f32 %v3028_v62  ;;  %v3251_v42 = vadd.f32 1.0, %v10128_v26  ;;  %v10658_v26 = vld [vmem:[%s15277_s30 + $0xd8] sm:$0xff] }
 0x4e2   :  { %15454 = vst [vmem:[#allocation35_spill] sm:$0xff] %v13027_v36  ;;  %v10132_v63 = vpop.eup %10131  ;;  %v3471_v33 = vmul.f32 %v10130_v10, %v3439_v30  ;;  %v13036_v12 = vpack.c.bf16 %v13027_v36, %v13017_v41  ;;  %v3377_v40 = vadd.f32 %v3345_v60, %v2373_v54  ;;  %10145 = vrcp.f32 %v3250_v39 }
 0x4e3   :  { %v10134_v57 = vpop.eup %10133  ;;  %v3346_v20 = vmul.f32 %v10132_v63, %v2858_v28  ;;  %v2381_v54 = vadd.f32 %v15458_v48, %v12433_v23  ;;  %v2866_v28 = vadd.f32 %v15459_v55, %v12429_v53 }
 0x4e4   :  { %15455 = vst [vmem:[#allocation38_spill] sm:$0xff] %v13036_v12  ;;  %v10136_v37 = vpop.eup %10135  ;;  %v13040_v15 = vadd.f32 %v3503_v7, %v3471_v33  ;;  %10147 = vtanh.f32 %v3377_v40  ;;  %3710 = vmatmul.mubr.bf16.gmra.mrb[16].mxu1 %v13036_v12  ;;  %8798 = vmatprep.mubr.bf16.mxu0 %v13036_v12  ;;  %v3440_v22 = vsub.f32 1.0, %v10134_v57  ;;  %v3504_v30 = vmul.f32 %v10658_v26, %v10134_v57 }
 0x4e5   :  { %v3378_v29 = vadd.f32 %v3346_v20, %v2376_v19  ;;  %3719 = vmatprep.mubr.bf16.mxu1 %v15359_v61  ;;  %v3252_v46 = vadd.f32 1.0, %v10136_v37  ;;  %v2384_v7 = vadd.f32 %v15461_v52, %v12433_v23 }
 0x4e6   :  { %15457 = vst [vmem:[#allocation37_spill] sm:$0xff] %v13040_v15 }
 0x4e7   :  { %v10138_v8 = vpop.eup %10137  ;;  %10149 = vtanh.f32 %v3378_v29  ;;  %v10659_v29 = vld [vmem:[%s15277_s30 + $0xe0] sm:$0xff] }
 0x4e8   :  { %v10140_v13 = vpop.eup %10139  ;;  %10151 = vrcp.f32 %v3251_v42  ;;  %v3347_v39 = vmul.f32 %v10138_v8, %v2863_v5 }
 0x4e9   :  { %v3472_v62 = vmul.f32 %v10140_v13, %v3440_v22  ;;  %v10142_v60 = vpop.eup %10141  ;;  %10153 = vrcp.f32 %v3252_v46 }
 0x4ea   :  { %v3379_v10 = vadd.f32 %v3347_v39, %v2381_v54  ;;  %v3441_v57 = vsub.f32 1.0, %v10142_v60  ;;  %v3505_v5 = vmul.f32 %v10659_v29, %v10142_v60  ;;  %v10660_v54 = vld [vmem:[%s15277_s30 + $0xe8] sm:$0xff] }
 0x4eb   :  { %v10144_v63 = vpop.eup %10143  ;;  %v13054_v33 = vadd.f32 %v3504_v30, %v3472_v62  ;;  %v10663_v29 = vld [vmem:[%s15300_s27 + $0x104] ss:$8 sps:$4 sm:$0xff]  }
 0x4ec   :  { %10155 = vtanh.f32 %v3379_v10  ;;  %v3348_v40 = vmul.f32 %v10144_v63, %v2866_v28  ;;  %v10146_v24 = vpop.eup %10145  ;;  %v10661_v28 = vld [vmem:[%s15277_s30 + $0xf0] sm:$0xff] }
 0x4ed   :  { %15460 = vst [vmem:[#allocation40_spill] sm:$0xff] %v13054_v33  ;;  %v13060_v19 = vpack.c.bf16 %v13054_v33, %v13040_v15  ;;  %v3442_v8 = vsub.f32 1.0, %v10146_v24  ;;  %v3506_v39 = vmul.f32 %v10660_v54, %v10146_v24 }
 0x4ee   :  { %v10148_v20 = vpop.eup %10147  ;;  %v3380_v37 = vadd.f32 %v3348_v40, %v2384_v7 }
 0x4ef   :  { %15462 = vst [vmem:[#allocation57_spill] sm:$0xff] %v13060_v19  ;;  %v3473_v42 = vmul.f32 %v10148_v20, %v3441_v57  ;;  %3720 = vmatmul.mubr.bf16.gmra.mrb[20].mxu1 %v13060_v19  ;;  %8799 = vmatmul.mubr.bf16.gmra.mrb[216].mxu0 %v13060_v19  ;;  %v10662_v57 = vld [vmem:[%s15277_s30 + $0xf8] sm:$0xff] }
 0x4f0   :  { %10157 = vtanh.f32 %v3380_v37  ;;  %3729 = vmatprep.mubr.bf16.mxu1 %v15359_v61 }
 0x4f1   :  { %v10150_v22 = vpop.eup %10149  ;;  %v13068_v46 = vadd.f32 %v3505_v5, %v3473_v42  ;;  %v10664_v5 = vld [vmem:[%s15300_s27 + $0x4] ss:$8 sps:$4 sm:$0xff]  }
 0x4f2   :  { %v10152_v13 = vpop.eup %10151  ;;  %v3474_v48 = vmul.f32 %v10150_v22, %v3442_v8 }
 0x4f3   :  { %15463 = vst [vmem:[#allocation39_spill] sm:$0xff] %v13068_v46  ;;  %v10154_v26 = vpop.eup %10153  ;;  %v3443_v30 = vsub.f32 1.0, %v10152_v13  ;;  %v3507_v63 = vmul.f32 %v10661_v28, %v10152_v13 }
 0x4f4   :  { %v13073_v62 = vadd.f32 %v3506_v39, %v3474_v48  ;;  %v3444_v7 = vsub.f32 1.0, %v10154_v26  ;;  %v3508_v20 = vmul.f32 %v10662_v57, %v10154_v26  ;;  %v15469_v48 = vld [vmem:[#allocation27_spill] sm:$0xff] }
 0x4f6   :  { %15464 = vst [vmem:[#allocation77_spill] sm:$0xff] %v13073_v62  ;;  %v10156_v60 = vpop.eup %10155  ;;  %v13077_v10 = vpack.c.bf16 %v13073_v62, %v13068_v46 }
 0x4f7   :  { %v3475_v55 = vmul.f32 %v10156_v60, %v3443_v30  ;;  %v15470_v30 = vld [vmem:[#allocation28_spill] sm:$0xff] }
 0x4f8   :  { %15465 = vst [vmem:[#allocation78_spill] sm:$0xff] %v13077_v10  ;;  %3730 = vmatmul.mubr.bf16.gmra.mrb[24].mxu1 %v13077_v10  ;;  %8802 = vmatprep.mubr.bf16.mxu0 %v13077_v10 }
 0x4f9   :  { %v13084_v52 = vadd.f32 %v3507_v63, %v3475_v55  ;;  %3739 = vmatprep.mubr.bf16.mxu1 %v15359_v61 }
 0x4fa   :  { %v10158_v40 = vpop.eup %10157 }
 0x4fb   :  { %15466 = vst [vmem:[#allocation79_spill] sm:$0xff] %v13084_v52  ;;  %v3476_v24 = vmul.f32 %v10158_v40, %v3444_v7 }
 0x4fd   :  { %v13090_v37 = vadd.f32 %v3508_v20, %v3476_v24 }
 0x4ff   :  { %15467 = vst [vmem:[#allocation80_spill] sm:$0xff] %v13090_v37  ;;  %v13094_v42 = vpack.c.bf16 %v13090_v37, %v13084_v52 }
 0x501   :  { %15468 = vst [vmem:[#allocation81_spill] sm:$0xff] %v13094_v42  ;;  %3740 = vmatmul.mubr.bf16.gmra.mrb[28].mxu1 %v13094_v42  ;;  %8803 = vmatmul.mubr.bf16.gmra.mrb[220].mxu0 %v13094_v42 }
 0x502   :  { %3991 = vmatprep.mubr.bf16.mxu0 %v10663_v29  ;;  %4152 = vmatprep.mubr.bf16.mxu1 %v10664_v5  ;;  %v15471_v29 = vld [vmem:[#allocation30_spill] sm:$0xff] }
 0x544   :  { %v3591_v8 = vpop.f32.mrb[224].mxu1 }
 0x545   :  { %v3593_v22 = vpop.f32.mrb[225].mxu1  ;;  %v13105_v54 = vadd.f32 %v3591_v8, %v15469_v48 }
 0x546   :  { %v3595_v13 = vpop.f32.mrb[226].mxu1  ;;  %v13111_v60 = vadd.f32 %v3593_v22, %v15470_v30 }
 0x547   :  { %v13108_v39 = vadd.f32 %v3595_v13, %v15469_v48  ;;  %v3597_v26 = vpop.f32.mrb[227].mxu1 }
 0x548   :  { %v13114_v55 = vadd.f32 %v3597_v26, %v15470_v30 }
 0x549   :  { %v15474_v43 = vpack.c.bf16 %v13108_v39, %v13105_v54 }
 0x54a   :  { %v8776_v7 = vpop.f32.mrb[192].mxu0 }
 0x54b   :  { %v3784_v24 = vpop.f32.mrb[193].mxu0  ;;  %v13121_v5 = vadd.f32 %v8776_v7, %v15471_v29 }
 0x54c   :  { %v3601_v40 = vpop.f32.mrb[228].mxu1  ;;  %v8777_v20 = vpop.f32.mrb[194].mxu0  ;;  %v13130_v28 = vadd.f32 %v3784_v24, %v15471_v29 }
 0x54d   :  { %v3603_v57 = vpop.f32.mrb[229].mxu1  ;;  %v13124_v22 = vadd.f32 %v8777_v20, %v15471_v29  ;;  %v3787_v13 = vpop.f32.mrb[195].mxu0  ;;  %v13127_v26 = vadd.f32 %v3601_v40, %v15469_v48 }
 0x54e   :  { %v3605_v8 = vpop.f32.mrb[230].mxu1  ;;  %v13136_v52 = vadd.f32 %v3787_v13, %v15471_v29  ;;  %v13139_v7 = vadd.f32 %v3603_v57, %v15470_v30 }
 0x54f   :  { %v13133_v63 = vadd.f32 %v3605_v8, %v15469_v48  ;;  %v3607_v37 = vpop.f32.mrb[231].mxu1 }
 0x550   :  { %v13144_v62 = vadd.f32 %v3607_v37, %v15470_v30 }
 0x554   :  { %v3611_v13 = vpop.f32.mrb[232].mxu1 }
 0x555   :  { %v3613_v46 = vpop.f32.mrb[233].mxu1  ;;  %v13153_v57 = vadd.f32 %v3611_v13, %v15469_v48 }
 0x556   :  { %v3615_v33 = vpop.f32.mrb[234].mxu1  ;;  %v13159_v15 = vadd.f32 %v3613_v46, %v15470_v30 }
 0x557   :  { %v13156_v20 = vadd.f32 %v3615_v33, %v15469_v48  ;;  %v3617_v37 = vpop.f32.mrb[235].mxu1 }
 0x558   :  { %v13162_v40 = vadd.f32 %v3617_v37, %v15470_v30 }
 0x55d   :  { %v8780_v36 = vpop.f32.mrb[196].mxu0  ;;  %v3621_v41 = vpop.f32.mrb[236].mxu1 }
 0x55e   :  { %v3800_v13 = vpop.f32.mrb[197].mxu0  ;;  %v3623_v50 = vpop.f32.mrb[237].mxu1  ;;  %v13169_v33 = vadd.f32 %v8780_v36, %v15471_v29  ;;  %v13175_v32 = vadd.f32 %v3621_v41, %v15469_v48 }
 0x55f   :  { %v8781_v6 = vpop.f32.mrb[198].mxu0  ;;  %v3625_v1 = vpop.f32.mrb[238].mxu1  ;;  %v13178_v24 = vadd.f32 %v3800_v13, %v15471_v29  ;;  %v13187_v36 = vadd.f32 %v3623_v50, %v15470_v30 }
 0x560   :  { %v13172_v46 = vadd.f32 %v8781_v6, %v15471_v29  ;;  %v3803_v37 = vpop.f32.mrb[199].mxu0  ;;  %v13181_v8 = vadd.f32 %v3625_v1, %v15469_v48  ;;  %v3627_v35 = vpop.f32.mrb[239].mxu1 }
 0x561   :  { %v13184_v27 = vadd.f32 %v3803_v37, %v15471_v29  ;;  %v13192_v2 = vadd.f32 %v3627_v35, %v15470_v30 }
 0x56a   :  { %v3631_v37 = vpop.f32.mrb[240].mxu1 }
 0x56b   :  { %v3633_v44 = vpop.f32.mrb[241].mxu1  ;;  %v13201_v50 = vadd.f32 %v3631_v37, %v15469_v48 }
 0x56c   :  { %v3635_v38 = vpop.f32.mrb[242].mxu1  ;;  %v13207_v31 = vadd.f32 %v3633_v44, %v15470_v30 }
 0x56d   :  { %v13204_v6 = vadd.f32 %v3635_v38, %v15469_v48  ;;  %v3637_v35 = vpop.f32.mrb[243].mxu1 }
 0x56e   :  { %v13210_v41 = vadd.f32 %v3637_v35, %v15470_v30 }
 0x573   :  { %v3641_v56 = vpop.f32.mrb[244].mxu1  ;;  %v8784_v34 = vpop.f32.mrb[200].mxu0 }
 0x574   :  { %v3643_v37 = vpop.f32.mrb[245].mxu1  ;;  %v3816_v11 = vpop.f32.mrb[201].mxu0  ;;  %v13217_v47 = vadd.f32 %v3641_v56, %v15469_v48  ;;  %v13220_v44 = vadd.f32 %v8784_v34, %v15471_v29 }
 0x575   :  { %v3645_v16 = vpop.f32.mrb[246].mxu1  ;;  %v8785_v38 = vpop.f32.mrb[202].mxu0  ;;  %v13229_v4 = vadd.f32 %v3643_v37, %v15470_v30  ;;  %v13232_v23 = vadd.f32 %v3816_v11, %v15471_v29 }
 0x576   :  { %v13223_v35 = vadd.f32 %v3645_v16, %v15469_v48  ;;  %v13226_v1 = vadd.f32 %v8785_v38, %v15471_v29  ;;  %v3647_v59 = vpop.f32.mrb[247].mxu1  ;;  %v3819_v13 = vpop.f32.mrb[203].mxu0 }
 0x577   :  { %v13235_v56 = vadd.f32 %v3647_v59, %v15470_v30  ;;  %v13238_v34 = vadd.f32 %v3819_v13, %v15471_v29 }
 0x57c   :  { %v3651_v11 = vpop.f32.mrb[248].mxu1 }
 0x57d   :  { %v3653_v9 = vpop.f32.mrb[249].mxu1  ;;  %v13249_v59 = vadd.f32 %v3651_v11, %v15469_v48 }
 0x57e   :  { %v3655_v45 = vpop.f32.mrb[250].mxu1  ;;  %v13255_v16 = vadd.f32 %v3653_v9, %v15470_v30 }
 0x57f   :  { %v13252_v13 = vadd.f32 %v3655_v45, %v15469_v48  ;;  %v3657_v42 = vpop.f32.mrb[251].mxu1 }
 0x580   :  { %v13258_v38 = vadd.f32 %v3657_v42, %v15470_v30 }
 0x585   :  { %v3661_v10 = vpop.f32.mrb[252].mxu1  ;;  %v8788_v19 = vpop.f32.mrb[204].mxu0 }
 0x586   :  { %v3663_v11 = vpop.f32.mrb[253].mxu1  ;;  %v3832_v12 = vpop.f32.mrb[205].mxu0  ;;  %v13265_v14 = vadd.f32 %v3661_v10, %v15469_v48  ;;  %v13268_v9 = vadd.f32 %v8788_v19, %v15471_v29 }
 0x587   :  { %v3665_v21 = vpop.f32.mrb[254].mxu1  ;;  %v8789_v45 = vpop.f32.mrb[206].mxu0  ;;  %v13277_v18 = vadd.f32 %v3663_v11, %v15470_v30  ;;  %v13280_v17 = vadd.f32 %v3832_v12, %v15471_v29  ;;  %v15475_v11 = vpack.c.bf16 %v13114_v55, %v13111_v60 }
 0x588   :  { %15472 = vst [vmem:[#allocation27_spill] sm:$0xff] %v13268_v9  ;;  %v13271_v42 = vadd.f32 %v3665_v21, %v15469_v48  ;;  %v13274_v53 = vadd.f32 %v8789_v45, %v15471_v29  ;;  %v3667_v25 = vpop.f32.mrb[255].mxu1  ;;  %v3835_v37 = vpop.f32.mrb[207].mxu0 }
 0x589   :  { %v13283_v10 = vadd.f32 %v3667_v25, %v15470_v30  ;;  %v13286_v19 = vadd.f32 %v3835_v37, %v15471_v29 }
 0x58a   :  { %15473 = vst [vmem:[#allocation28_spill] sm:$0xff] %v13274_v53 }
 0x58f   :  { %v3671_v12 = vpop.f32.mrb[0].mxu1 }
 0x590   :  { %v3673_v58 = vpop.f32.mrb[1].mxu1  ;;  %v3672_v25 = vadd.f32 %v3671_v12, %v15469_v48 }
 0x591   :  { %v3675_v3 = vpop.f32.mrb[2].mxu1  ;;  %v3674_v49 = vadd.f32 %v3673_v58, %v15470_v30 }
 0x592   :  { %v3676_v37 = vadd.f32 %v3675_v3, %v15469_v48  ;;  %v3677_v51 = vpop.f32.mrb[3].mxu1 }
 0x593   :  { %v3678_v21 = vadd.f32 %v3677_v51, %v15470_v30 }
 0x594   :  { %v3935_v0 = vpack.c.bf16 %v3676_v37, %v3672_v25  ;;  %v15476_v37 = vpack.c.bf16 %v13133_v63, %v13127_v26  ;;  %v15478_v63 = vpack.c.bf16 %v13156_v20, %v13153_v57 }
 0x595   :  { %v3936_v45 = vpack.c.bf16 %v3678_v21, %v3674_v49 }
 0x596   :  { %8213 = vmatprep.subr.bf16.mxu1 %v3935_v0 }
 0x597   :  { %8101 = vmatprep.subr.bf16.mxu0 %v3936_v45  ;;  %8214 = vmatpush3.bf16.msra.mxu1 %v15474_v43 }
 0x598   :  { %8102 = vmatpush3.bf16.msra.mxu0 %v15475_v11 }
 0x59b   :  { %v3681_v12 = vpop.f32.mrb[4].mxu1  ;;  %v8792_v61 = vpop.f32.mrb[208].mxu0 }
 0x59c   :  { %v3683_v3 = vpop.f32.mrb[5].mxu1  ;;  %v3848_v9 = vpop.f32.mrb[209].mxu0  ;;  %v3682_v51 = vadd.f32 %v3681_v12, %v15469_v48  ;;  %v13308_v49 = vadd.f32 %v8792_v61, %v15471_v29  ;;  %v15477_v12 = vpack.c.bf16 %v13144_v62, %v13139_v7  ;;  %v15479_v62 = vpack.c.bf16 %v13162_v40, %v13159_v15 }
 0x59d   :  { %v3685_v53 = vpop.f32.mrb[6].mxu1  ;;  %v8793_v58 = vpop.f32.mrb[210].mxu0  ;;  %v3684_v60 = vadd.f32 %v3683_v3, %v15470_v30  ;;  %v13316_v55 = vadd.f32 %v3848_v9, %v15471_v29 }
 0x59e   :  { %v3686_v0 = vadd.f32 %v3685_v53, %v15469_v48  ;;  %v13312_v54 = vadd.f32 %v8793_v58, %v15471_v29  ;;  %v3687_v43 = vpop.f32.mrb[7].mxu1  ;;  %v3851_v39 = vpop.f32.mrb[211].mxu0 }
 0x59f   :  { %v3688_v21 = vadd.f32 %v3687_v43, %v15470_v30  ;;  %v13320_v45 = vadd.f32 %v3851_v39, %v15471_v29 }
 0x5a0   :  { %v3938_v11 = vpack.c.bf16 %v3686_v0, %v3682_v51  ;;  %v3940_v61 = vpack.c.bf16 %v13312_v54, %v13308_v49  ;;  %v10673_v49 = vld [vmem:[%s15300_s27 + $0x10] ss:$8 sps:$4 sm:$0xff]   ;;  %v10674_v54 = vld [vmem:[%s15358_s6 + $0x34] ss:$12 sps:$4 sm:$0xff]  }
 0x5a1   :  { %v3939_v53 = vpack.c.bf16 %v3688_v21, %v3684_v60  ;;  %v3937_v25 = vpack.c.bf16 %v13320_v45, %v13316_v55  ;;  %v10670_v55 = vld [vmem:[%s15358_s6] ss:$12 sps:$4 sm:$0xff]   ;;  %v10671_v45 = vld [vmem:[%s15358_s6 + $0x1c] ss:$12 sps:$4 sm:$0xff]  }
 0x5a2   :  { %8215 = vmatprep.subr.bf16.mxu1 %v3938_v11 }
 0x5a3   :  { %8103 = vmatprep.subr.bf16.mxu0 %v3939_v53  ;;  %8216 = vmatpush3.bf16.msra.mxu1 %v15476_v37 }
 0x5a4   :  { %v3691_v9 = vpop.f32.mrb[8].mxu1  ;;  %8104 = vmatpush3.bf16.msra.mxu0 %v15477_v12 }
 0x5a5   :  { %v3693_v3 = vpop.f32.mrb[9].mxu1  ;;  %v3692_v51 = vadd.f32 %v3691_v9, %v15469_v48 }
 0x5a6   :  { %v3695_v58 = vpop.f32.mrb[10].mxu1  ;;  %v3694_v39 = vadd.f32 %v3693_v3, %v15470_v30 }
 0x5a7   :  { %v3696_v0 = vadd.f32 %v3695_v58, %v15469_v48  ;;  %v3697_v43 = vpop.f32.mrb[11].mxu1 }
 0x5a8   :  { %v3698_v60 = vadd.f32 %v3697_v43, %v15470_v30 }
 0x5a9   :  { %v3941_v21 = vpack.c.bf16 %v3696_v0, %v3692_v51 }
 0x5aa   :  { %v3942_v11 = vpack.c.bf16 %v3698_v60, %v3694_v39 }
 0x5ab   :  { %8217 = vmatprep.subr.bf16.mxu1 %v3941_v21 }
 0x5ac   :  { %8105 = vmatprep.subr.bf16.mxu0 %v3942_v11  ;;  %8218 = vmatpush3.bf16.msra.mxu1 %v15478_v63 }
 0x5ad   :  { %8106 = vmatpush3.bf16.msra.mxu0 %v15479_v62  ;;  %v15480_v62 = vpack.c.bf16 %v13181_v8, %v13175_v32  ;;  %v15482_v32 = vpack.c.bf16 %v13204_v6, %v13201_v50 }
 0x5ae   :  { %v3701_v26 = vpop.f32.mrb[12].mxu1  ;;  %v8796_v7 = vpop.f32.mrb[212].mxu0 }
 0x5af   :  { %v3703_v53 = vpop.f32.mrb[13].mxu1  ;;  %v3864_v37 = vpop.f32.mrb[213].mxu0  ;;  %v3702_v3 = vadd.f32 %v3701_v26, %v15469_v48  ;;  %v13344_v58 = vadd.f32 %v8796_v7, %v15471_v29  ;;  %v15481_v7 = vpack.c.bf16 %v13192_v2, %v13187_v36  ;;  %v15483_v2 = vpack.c.bf16 %v13210_v41, %v13207_v31 }
 0x5b0   :  { %v3705_v9 = vpop.f32.mrb[14].mxu1  ;;  %v8797_v12 = vpop.f32.mrb[214].mxu0  ;;  %v3704_v15 = vadd.f32 %v3703_v53, %v15470_v30  ;;  %v13352_v40 = vadd.f32 %v3864_v37, %v15471_v29 }
 0x5b1   :  { %v3706_v51 = vadd.f32 %v3705_v9, %v15469_v48  ;;  %v13348_v20 = vadd.f32 %v8797_v12, %v15471_v29  ;;  %v3707_v57 = vpop.f32.mrb[15].mxu1  ;;  %v3867_v0 = vpop.f32.mrb[215].mxu0 }
 0x5b2   :  { %v3708_v43 = vadd.f32 %v3707_v57, %v15470_v30  ;;  %v13356_v39 = vadd.f32 %v3867_v0, %v15471_v29 }
 0x5b3   :  { %v3944_v60 = vpack.c.bf16 %v3706_v51, %v3702_v3  ;;  %v3946_v21 = vpack.c.bf16 %v13348_v20, %v13344_v58  ;;  %v10681_v58 = vld [vmem:[%s15300_s27 + $0x20] ss:$8 sps:$4 sm:$0xff]   ;;  %v10682_v20 = vld [vmem:[%s15358_s6 + $0x64] ss:$12 sps:$4 sm:$0xff]  }
 0x5b4   :  { %v3945_v11 = vpack.c.bf16 %v3708_v43, %v3704_v15  ;;  %v3943_v63 = vpack.c.bf16 %v13356_v39, %v13352_v40  ;;  %v10678_v40 = vld [vmem:[%s15358_s6 + $0x30] ss:$12 sps:$4 sm:$0xff]   ;;  %v10679_v39 = vld [vmem:[%s15358_s6 + $0x4c] ss:$12 sps:$4 sm:$0xff]  }
 0x5b5   :  { %8219 = vmatprep.subr.bf16.mxu1 %v3944_v60 }
 0x5b6   :  { %8107 = vmatprep.subr.bf16.mxu0 %v3945_v11  ;;  %8220 = vmatpush3.bf16.msra.mxu1 %v15480_v62 }
 0x5b7   :  { %v3711_v26 = vpop.f32.mrb[16].mxu1  ;;  %8108 = vmatpush3.bf16.msra.mxu0 %v15481_v7 }
 0x5b8   :  { %v3713_v53 = vpop.f32.mrb[17].mxu1  ;;  %v3712_v9 = vadd.f32 %v3711_v26, %v15469_v48 }
 0x5b9   :  { %v3715_v37 = vpop.f32.mrb[18].mxu1  ;;  %v3714_v51 = vadd.f32 %v3713_v53, %v15470_v30 }
 0x5ba   :  { %v3716_v12 = vadd.f32 %v3715_v37, %v15469_v48  ;;  %v3717_v3 = vpop.f32.mrb[19].mxu1 }
 0x5bb   :  { %v3718_v57 = vadd.f32 %v3717_v3, %v15470_v30 }
 0x5bc   :  { %v3947_v0 = vpack.c.bf16 %v3716_v12, %v3712_v9 }
 0x5bd   :  { %v3948_v15 = vpack.c.bf16 %v3718_v57, %v3714_v51 }
 0x5be   :  { %8221 = vmatprep.subr.bf16.mxu1 %v3947_v0 }
 0x5bf   :  { %8109 = vmatprep.subr.bf16.mxu0 %v3948_v15  ;;  %8222 = vmatpush3.bf16.msra.mxu1 %v15482_v32  ;;  %v15484_v15 = vpack.c.bf16 %v13223_v35, %v13217_v47  ;;  %v15486_v47 = vpack.c.bf16 %v13252_v13, %v13249_v59 }
 0x5c0   :  { %8110 = vmatpush3.bf16.msra.mxu0 %v15483_v2  ;;  %v15485_v2 = vpack.c.bf16 %v13235_v56, %v13229_v4  ;;  %v15487_v56 = vpack.c.bf16 %v13258_v38, %v13255_v16 }
 0x5c2   :  { %v3721_v8 = vpop.f32.mrb[20].mxu1  ;;  %v8800_v36 = vpop.f32.mrb[216].mxu0 }
 0x5c3   :  { %v3723_v43 = vpop.f32.mrb[21].mxu1  ;;  %v3880_v60 = vpop.f32.mrb[217].mxu0  ;;  %v3722_v26 = vadd.f32 %v3721_v8, %v15469_v48  ;;  %v13380_v7 = vadd.f32 %v8800_v36, %v15471_v29 }
 0x5c4   :  { %v3725_v11 = vpop.f32.mrb[22].mxu1  ;;  %v8801_v62 = vpop.f32.mrb[218].mxu0  ;;  %v3724_v31 = vadd.f32 %v3723_v43, %v15470_v30  ;;  %v13388_v41 = vadd.f32 %v3880_v60, %v15471_v29 }
 0x5c5   :  { %v3726_v53 = vadd.f32 %v3725_v11, %v15469_v48  ;;  %v13384_v6 = vadd.f32 %v8801_v62, %v15471_v29  ;;  %v3727_v50 = vpop.f32.mrb[23].mxu1  ;;  %v3883_v37 = vpop.f32.mrb[219].mxu0 }
 0x5c6   :  { %v3728_v9 = vadd.f32 %v3727_v50, %v15470_v30  ;;  %v13392_v12 = vadd.f32 %v3883_v37, %v15471_v29 }
 0x5c7   :  { %v3950_v3 = vpack.c.bf16 %v3726_v53, %v3722_v26  ;;  %v3952_v51 = vpack.c.bf16 %v13384_v6, %v13380_v7  ;;  %v10689_v7 = vld [vmem:[%s15300_s27 + $0x30] ss:$8 sps:$4 sm:$0xff]   ;;  %v10690_v6 = vld [vmem:[%s15358_s6 + $0x94] ss:$12 sps:$4 sm:$0xff]  }
 0x5c8   :  { %v3951_v57 = vpack.c.bf16 %v3728_v9, %v3724_v31  ;;  %v3949_v0 = vpack.c.bf16 %v13392_v12, %v13388_v41  ;;  %v10686_v41 = vld [vmem:[%s15358_s6 + $0x60] ss:$12 sps:$4 sm:$0xff]   ;;  %v10687_v12 = vld [vmem:[%s15358_s6 + $0x7c] ss:$12 sps:$4 sm:$0xff]  }
 0x5c9   :  { %8223 = vmatprep.subr.bf16.mxu1 %v3950_v3 }
 0x5ca   :  { %8111 = vmatprep.subr.bf16.mxu0 %v3951_v57  ;;  %8224 = vmatpush3.bf16.msra.mxu1 %v15484_v15 }
 0x5cb   :  { %v3731_v32 = vpop.f32.mrb[24].mxu1  ;;  %8112 = vmatpush3.bf16.msra.mxu0 %v15485_v2 }
 0x5cc   :  { %v3733_v8 = vpop.f32.mrb[25].mxu1  ;;  %v3732_v43 = vadd.f32 %v3731_v32, %v15469_v48 }
 0x5cd   :  { %v3735_v36 = vpop.f32.mrb[26].mxu1  ;;  %v3734_v62 = vadd.f32 %v3733_v8, %v15470_v30 }
 0x5ce   :  { %v3736_v60 = vadd.f32 %v3735_v36, %v15469_v48  ;;  %v3737_v11 = vpop.f32.mrb[27].mxu1 }
 0x5cf   :  { %v3738_v26 = vadd.f32 %v3737_v11, %v15470_v30 }
 0x5d0   :  { %v3953_v53 = vpack.c.bf16 %v3736_v60, %v3732_v43 }
 0x5d1   :  { %v3954_v50 = vpack.c.bf16 %v3738_v26, %v3734_v62  ;;  %v15488_v62 = vpack.c.bf16 %v13271_v42, %v13265_v14  ;;  %v10666_v26 = vld [vmem:[%s15300_s27] ss:$8 sps:$4 sm:$0xff]   ;;  %v15490_v42 = vpack.c.bf16 %v13136_v52, %v13130_v28  ;;  %v15491_v52 = vpack.c.bf16 %v13124_v22, %v13121_v5  ;;  %v10672_v28 = vld [vmem:[%s15358_s6 + $0x18] ss:$12 sps:$4 sm:$0xff]  }
 0x5d2   :  { %8225 = vmatprep.subr.bf16.mxu1 %v3953_v53  ;;  %v10667_v14 = vld [vmem:[%s15300_s27 + $0x100] ss:$8 sps:$4 sm:$0xff]   ;;  %v10675_v5 = vld [vmem:[%s15300_s27 + $0x110] ss:$8 sps:$4 sm:$0xff]   ;;  %v10676_v22 = vld [vmem:[%s15300_s27 + $0x24] ss:$8 sps:$4 sm:$0xff]  }
 0x5d3   :  { %8113 = vmatprep.subr.bf16.mxu0 %v3954_v50  ;;  %8226 = vmatpush3.bf16.msra.mxu1 %v15486_v47  ;;  %v10694_v53 = vld [vmem:[%s15358_s6 + $0x90] ss:$12 sps:$4 sm:$0xff]   ;;  %v10695_v50 = vld [vmem:[%s15358_s6 + $0xac] ss:$12 sps:$4 sm:$0xff]  }
 0x5d4   :  { %v3741_v4 = vpop.f32.mrb[28].mxu1  ;;  %v8804_v35 = vpop.f32.mrb[220].mxu0  ;;  %8114 = vmatpush3.bf16.msra.mxu0 %v15487_v56  ;;  %v10698_v56 = vld [vmem:[%s15300_s27 + $0x40] ss:$8 sps:$4 sm:$0xff]  }
 0x5d5   :  { %v3743_v37 = vpop.f32.mrb[29].mxu1  ;;  %v3896_v31 = vpop.f32.mrb[221].mxu0  ;;  %v3742_v57 = vadd.f32 %v3741_v4, %v15469_v48  ;;  %v13416_v15 = vadd.f32 %v8804_v35, %v15471_v29  ;;  %v13581_v4 = vld [vmem:[%s15358_s6 + $0x8] ss:$12 sps:$4 sm:$0xff]  }
 0x5d6   :  { %v3745_v9 = vpop.f32.mrb[30].mxu1  ;;  %v8805_v3 = vpop.f32.mrb[222].mxu0  ;;  %v3744_v8 = vadd.f32 %v3743_v37, %v15470_v30  ;;  %v13424_v16 = vadd.f32 %v3896_v31, %v15471_v29  ;;  %v10697_v35 = vld [vmem:[%s15358_s6 + $0xa8] ss:$12 sps:$4 sm:$0xff]   ;;  %v10699_v37 = vld [vmem:[%s15097_s8 + $0x4] ss:$12 sps:$4 sm:$0xff]  }
 0x5d7   :  { %v3746_v32 = vadd.f32 %v3745_v9, %v15469_v48  ;;  %v13420_v59 = vadd.f32 %v8805_v3, %v15471_v29  ;;  %v3747_v13 = vpop.f32.mrb[31].mxu1  ;;  %v3899_v2 = vpop.f32.mrb[223].mxu0  ;;  %v10700_v31 = vld [vmem:[%s15300_s27 + $0x140] ss:$8 sps:$4 sm:$0xff]   ;;  %v10701_v9 = vld [vmem:[%s15300_s27 + $0x54] ss:$8 sps:$4 sm:$0xff]  }
 0x5d8   :  { %v3748_v38 = vadd.f32 %v3747_v13, %v15470_v30  ;;  %v13428_v36 = vadd.f32 %v3899_v2, %v15471_v29  ;;  %v15489_v30 = vpack.c.bf16 %v13283_v10, %v13277_v18  ;;  %v10665_v29 = vld [vmem:[%s15358_s6 + $0x4] ss:$12 sps:$4 sm:$0xff]   ;;  %v10668_v18 = vld [vmem:[%s15300_s27 + $0x14] ss:$8 sps:$4 sm:$0xff]   ;;  %v10707_v13 = vld [vmem:[%s15300_s27 + $0x60] ss:$8 sps:$4 sm:$0xff]  }
 0x5d9   :  { %v3956_v43 = vpack.c.bf16 %v3746_v32, %v3742_v57  ;;  %v3958_v60 = vpack.c.bf16 %v13420_v59, %v13416_v15  ;;  %v10669_v10 = vld [vmem:[%s15300_s27 + $0x114] ss:$8 sps:$4 sm:$0xff]   ;;  %v10703_v57 = vld [vmem:[%s15300_s27 + $0x50] ss:$8 sps:$4 sm:$0xff]   ;;  %v10705_v32 = vld [vmem:[%s15300_s27 + $0x64] ss:$8 sps:$4 sm:$0xff]  }
 0x5da   :  { %v3957_v48 = vpack.c.bf16 %v3748_v38, %v3744_v8  ;;  %v3955_v11 = vpack.c.bf16 %v13428_v36, %v13424_v16  ;;  %v10702_v3 = vld [vmem:[%s15300_s27 + $0x154] ss:$8 sps:$4 sm:$0xff]   ;;  %v10704_v15 = vld [vmem:[%s15300_s27 + $0x150] ss:$8 sps:$4 sm:$0xff]   ;;  %v10706_v59 = vld [vmem:[%s15300_s27 + $0x164] ss:$8 sps:$4 sm:$0xff]  }
 0x5db   :  { %8227 = vmatprep.subr.bf16.mxu1 %v3956_v43  ;;  %v10708_v2 = vld [vmem:[%s15300_s27 + $0x160] ss:$8 sps:$4 sm:$0xff]   ;;  %v10709_v8 = vld [vmem:[%s15300_s27 + $0x74] ss:$8 sps:$4 sm:$0xff]   ;;  %v10711_v38 = vld [vmem:[%s15300_s27 + $0x70] ss:$8 sps:$4 sm:$0xff]  }
 0x5dc   :  { %8115 = vmatprep.subr.bf16.mxu0 %v3957_v48  ;;  %8228 = vmatpush3.bf16.msra.mxu1 %v15488_v62  ;;  %v10710_v16 = vld [vmem:[%s15300_s27 + $0x174] ss:$8 sps:$4 sm:$0xff]   ;;  %v10712_v36 = vld [vmem:[%s15300_s27 + $0x170] ss:$8 sps:$4 sm:$0xff]   ;;  %v10713_v43 = vld [vmem:[%s15300_s27 + $0x84] ss:$8 sps:$4 sm:$0xff]  }
 0x5dd   :  { %8116 = vmatpush3.bf16.msra.mxu0 %v15489_v30  ;;  %4490 = vmatprep.subr.bf16.mxu1 %v10665_v29  ;;  %v10715_v48 = vld [vmem:[%s15300_s27 + $0x80] ss:$8 sps:$4 sm:$0xff]   ;;  %v10717_v62 = vld [vmem:[%s15300_s27 + $0x94] ss:$8 sps:$4 sm:$0xff]   ;;  %v10719_v29 = vld [vmem:[%s15300_s27 + $0x90] ss:$8 sps:$4 sm:$0xff]  }
 0x5de   :  { %8325 = vmatprep.subr.bf16.mxu0 %v3937_v25  ;;  %v10677_v25 = vld [vmem:[%s15300_s27 + $0x124] ss:$8 sps:$4 sm:$0xff]   ;;  %v10718_v30 = vld [vmem:[%s15300_s27 + $0x194] ss:$8 sps:$4 sm:$0xff]  }
 0x5df   :  { %4153 = vmatmul.mubr.bf16.vlgmr.msra.gmra.mrb[32].mxu1 %v10666_v26  ;;  %v10720_v26 = vld [vmem:[%s15300_s27 + $0x190] ss:$8 sps:$4 sm:$0xff]  }
 0x5e0   :  { %3992 = vmatmul.mubr.bf16.vlgmr.msra.gmra.mrb[224].mxu0 %v10667_v14  ;;  %4160 = vmatprep.mubr.bf16.mxu1 %v10668_v18  ;;  %v10721_v14 = vld [vmem:[%s15300_s27 + $0xa4] ss:$8 sps:$4 sm:$0xff]  }
 0x5e1   :  { %8326 = vmatpush3.bf16.msra.mxu0 %v15490_v42  ;;  %3999 = vmatprep.mubr.bf16.mxu0 %v10669_v10  ;;  %v10722_v18 = vld [vmem:[%s15300_s27 + $0x1a4] ss:$8 sps:$4 sm:$0xff]   ;;  %v10723_v42 = vld [vmem:[%s15300_s27 + $0xa0] ss:$8 sps:$4 sm:$0xff]  }
 0x5e2   :  { %8327 = vmatprep.subr.bf16.mxu0 %v3940_v61  ;;  %4491 = vmatpush1.bf16.msra.mxu1 %v10670_v55  ;;  %v15492_v61 = vpack.c.bf16 %v13184_v27, %v13178_v24  ;;  %v15493_v27 = vpack.c.bf16 %v13172_v46, %v13169_v33  ;;  %v10680_v24 = vld [vmem:[%s15358_s6 + $0x48] ss:$12 sps:$4 sm:$0xff]  }
 0x5e3   :  { %4492 = vmatprep.subr.bf16.mxu1 %v10671_v45  ;;  %v10683_v33 = vld [vmem:[%s15300_s27 + $0x120] ss:$8 sps:$4 sm:$0xff]   ;;  %v10684_v46 = vld [vmem:[%s15300_s27 + $0x34] ss:$8 sps:$4 sm:$0xff]  }
 0x5e4   :  { %v10724_v10 = vld [vmem:[%s15300_s27 + $0x1a0] ss:$8 sps:$4 sm:$0xff]   ;;  %v10725_v55 = vld [vmem:[%s15300_s27 + $0xb4] ss:$8 sps:$4 sm:$0xff]  }
 0x5e5   :  { %8328 = vmatpush3.bf16.msra.mxu0 %v15491_v52  ;;  %v10726_v45 = vld [vmem:[%s15300_s27 + $0x1b4] ss:$8 sps:$4 sm:$0xff]   ;;  %v10727_v52 = vld [vmem:[%s15300_s27 + $0xb0] ss:$8 sps:$4 sm:$0xff]  }
 0x5e6   :  { %8329 = vmatprep.subr.bf16.mxu0 %v3943_v63  ;;  %4493 = vmatpush1.bf16.msra.mxu1 %v10672_v28  ;;  %v10685_v63 = vld [vmem:[%s15300_s27 + $0x134] ss:$8 sps:$4 sm:$0xff]   ;;  %v10728_v28 = vld [vmem:[%s15300_s27 + $0x1b0] ss:$8 sps:$4 sm:$0xff]  }
 0x5e7   :  { %4161 = vmatmul.mubr.bf16.gmra.mrb[36].mxu1 %v10673_v49  ;;  %4494 = vmatprep.subr.bf16.mxu1 %v10674_v54  ;;  %v10729_v49 = vld [vmem:[%s15300_s27 + $0xc4] ss:$8 sps:$4 sm:$0xff]  }
 0x5e8   :  { %4000 = vmatmul.mubr.bf16.gmra.mrb[228].mxu0 %v10675_v5  ;;  %4168 = vmatprep.mubr.bf16.mxu1 %v10676_v22  ;;  %v10730_v54 = vld [vmem:[%s15300_s27 + $0x1c4] ss:$8 sps:$4 sm:$0xff]   ;;  %v10731_v5 = vld [vmem:[%s15300_s27 + $0xc0] ss:$8 sps:$4 sm:$0xff]  }
 0x5e9   :  { %8330 = vmatpush3.bf16.msra.mxu0 %v15492_v61  ;;  %4007 = vmatprep.mubr.bf16.mxu0 %v10677_v25  ;;  %v10732_v22 = vld [vmem:[%s15300_s27 + $0x1c0] ss:$8 sps:$4 sm:$0xff]   ;;  %v10733_v61 = vld [vmem:[%s15300_s27 + $0xd4] ss:$8 sps:$4 sm:$0xff]  }
 0x5ea   :  { %8331 = vmatprep.subr.bf16.mxu0 %v3946_v21  ;;  %4495 = vmatpush1.bf16.msra.mxu1 %v10678_v40  ;;  %v15494_v21 = vpack.c.bf16 %v13238_v34, %v13232_v23  ;;  %v15495_v23 = vpack.c.bf16 %v13226_v1, %v13220_v44  ;;  %v10688_v34 = vld [vmem:[%s15358_s6 + $0x78] ss:$12 sps:$4 sm:$0xff]   ;;  %v10734_v25 = vld [vmem:[%s15300_s27 + $0x1d4] ss:$8 sps:$4 sm:$0xff]  }
 0x5eb   :  { %4496 = vmatprep.subr.bf16.mxu1 %v10679_v39  ;;  %v10691_v1 = vld [vmem:[%s15300_s27 + $0x130] ss:$8 sps:$4 sm:$0xff]   ;;  %v10692_v44 = vld [vmem:[%s15300_s27 + $0x44] ss:$8 sps:$4 sm:$0xff]  }
 0x5ec   :  { %v10735_v40 = vld [vmem:[%s15300_s27 + $0xd0] ss:$8 sps:$4 sm:$0xff]  }
 0x5ed   :  { %8332 = vmatpush3.bf16.msra.mxu0 %v15493_v27  ;;  %v10736_v39 = vld [vmem:[%s15300_s27 + $0x1d0] ss:$8 sps:$4 sm:$0xff]   ;;  %v10737_v27 = vld [vmem:[%s15300_s27 + $0xe4] ss:$8 sps:$4 sm:$0xff]  }
 0x5ee   :  { %8333 = vmatprep.subr.bf16.mxu0 %v3949_v0  ;;  %4497 = vmatpush1.bf16.msra.mxu1 %v10680_v24  ;;  %v10693_v0 = vld [vmem:[%s15300_s27 + $0x144] ss:$8 sps:$4 sm:$0xff]  }
 0x5ef   :  { %4169 = vmatmul.mubr.bf16.gmra.mrb[40].mxu1 %v10681_v58  ;;  %4498 = vmatprep.subr.bf16.mxu1 %v10682_v20  ;;  %v10738_v24 = vld [vmem:[%s15300_s27 + $0x1e4] ss:$8 sps:$4 sm:$0xff]   ;;  %v10739_v58 = vld [vmem:[%s15300_s27 + $0xe0] ss:$8 sps:$4 sm:$0xff]  }
 0x5f0   :  { %4008 = vmatmul.mubr.bf16.gmra.mrb[232].mxu0 %v10683_v33  ;;  %4176 = vmatprep.mubr.bf16.mxu1 %v10684_v46  ;;  %v10740_v20 = vld [vmem:[%s15300_s27 + $0x1e0] ss:$8 sps:$4 sm:$0xff]   ;;  %v10741_v33 = vld [vmem:[%s15300_s27 + $0xf4] ss:$8 sps:$4 sm:$0xff]  }
 0x5f1   :  { %8334 = vmatpush3.bf16.msra.mxu0 %v15494_v21  ;;  %4015 = vmatprep.mubr.bf16.mxu0 %v10685_v63  ;;  %v10742_v46 = vld [vmem:[%s15300_s27 + $0x1f4] ss:$8 sps:$4 sm:$0xff]   ;;  %v10743_v21 = vld [vmem:[%s15300_s27 + $0xf0] ss:$8 sps:$4 sm:$0xff]  }
 0x5f2   :  { %8335 = vmatprep.subr.bf16.mxu0 %v3952_v51  ;;  %4499 = vmatpush1.bf16.msra.mxu1 %v10686_v41  ;;  %v15496_v51 = vpack.c.bf16 %v13286_v19, %v13280_v17  ;;  %v15497_v17 = vld [vmem:[#allocation28_spill] sm:$0xff]  ;;  %v15498_v19 = vld [vmem:[#allocation27_spill] sm:$0xff]  ;;  %v10744_v63 = vld [vmem:[%s15300_s27 + $0x1f0] ss:$8 sps:$4 sm:$0xff]   ;;  %v15500_v41 = vmov 0  }
 0x5f3   :  { %4500 = vmatprep.subr.bf16.mxu1 %v10687_v12  ;;  %v15499_v47 = vpack.c.bf16 %v15497_v17, %v15498_v19  ;;  %v10745_v12 = vld [vmem:[%s15300_s27 + $0x204] ss:$8 sps:$4 sm:$0xff]  }
 0x5f4   :  { %v10756_v17 = vld [vmem:[%s15358_s6 + $0x80] ss:$12 sps:$4 sm:$0xff]   ;;  %v10757_v19 = vld [vmem:[%s15358_s6 + $0x98] ss:$12 sps:$4 sm:$0xff]  }
 0x5f5   :  { %8336 = vmatpush3.bf16.msra.mxu0 %v15495_v23  ;;  %v10746_v23 = vld [vmem:[%s15300_s27 + $0x200] ss:$8 sps:$4 sm:$0xff]  }
 0x5f6   :  { %8337 = vmatprep.subr.bf16.mxu0 %v3955_v11  ;;  %4501 = vmatpush1.bf16.msra.mxu1 %v10688_v34  ;;  %v10716_v11 = vld [vmem:[%s15300_s27 + $0x180] ss:$8 sps:$4 sm:$0xff]   ;;  %v10747_v34 = vld [vmem:[%s15300_s27 + $0x214] ss:$8 sps:$4 sm:$0xff]  }
 0x5f7   :  { %4177 = vmatmul.mubr.bf16.gmra.mrb[44].mxu1 %v10689_v7  ;;  %4502 = vmatprep.subr.bf16.mxu1 %v10690_v6  ;;  %v10748_v7 = vld [vmem:[%s15358_s6 + $0x20] ss:$12 sps:$4 sm:$0xff]   ;;  %v10749_v6 = vld [vmem:[%s15358_s6 + $0x38] ss:$12 sps:$4 sm:$0xff]  }
 0x5f8   :  { %4016 = vmatmul.mubr.bf16.gmra.mrb[236].mxu0 %v10691_v1  ;;  %4184 = vmatprep.mubr.bf16.mxu1 %v10692_v44  ;;  %v10750_v1 = vld [vmem:[%s15300_s27 + $0x210] ss:$8 sps:$4 sm:$0xff]   ;;  %v10751_v44 = vld [vmem:[%s15300_s27 + $0x224] ss:$8 sps:$4 sm:$0xff]  }
 0x5f9   :  { %8338 = vmatpush3.bf16.msra.mxu0 %v15496_v51  ;;  %4023 = vmatprep.mubr.bf16.mxu0 %v10693_v0  ;;  %v10752_v51 = vld [vmem:[%s15358_s6 + $0x50] ss:$12 sps:$4 sm:$0xff]   ;;  %v10753_v0 = vld [vmem:[%s15358_s6 + $0x68] ss:$12 sps:$4 sm:$0xff]  }
 0x5fa   :  { %8339 = vmatprep.subr.bf16.mxu0 %v3958_v60  ;;  %4503 = vmatpush1.bf16.msra.mxu1 %v10694_v53  ;;  %v10714_v60 = vld [vmem:[%s15300_s27 + $0x184] ss:$8 sps:$4 sm:$0xff]   ;;  %v10754_v53 = vld [vmem:[%s15300_s27 + $0x220] ss:$8 sps:$4 sm:$0xff]  }
 0x5fb   :  { %4504 = vmatprep.subr.bf16.mxu1 %v10695_v50  ;;  %v10755_v50 = vld [vmem:[%s15300_s27 + $0x234] ss:$8 sps:$4 sm:$0xff]  }
 0x5fd   :  { %8340 = vmatpush3.bf16.msra.mxu0 %v15499_v47  ;;  %v10758_v47 = vld [vmem:[%s15300_s27 + $0x230] ss:$8 sps:$4 sm:$0xff]  }
 0x5fe   :  { %8806 = vmatprep.subr.bf16.mxu0 %v13581_v4  ;;  %4505 = vmatpush1.bf16.msra.mxu1 %v10697_v35  ;;  %v10760_v35 = vld [vmem:[%s15358_s6 + $0xb0] ss:$12 sps:$4 sm:$0xff]   ;;  %s15615_s6 = sld [smem:[#allocation85_spill]] }
 0x5ff   :  { %4185 = vmatmul.mubr.bf16.gmra.mrb[48].mxu1 %v10698_v56  ;;  %4844 = vmatprep.subr.bf16.mxu1 %v10699_v37  ;;  %v13781_v56 = vld [vmem:[%s15097_s8 + $0x8] ss:$12 sps:$4 sm:$0xff]  }
 0x600   :  { %4024 = vmatmul.mubr.bf16.gmra.mrb[240].mxu0 %v10700_v31  ;;  %4192 = vmatprep.mubr.bf16.mxu1 %v10701_v9  ;;  %v10762_v37 = vld [vmem:[%s15300_s27 + $0x240] ss:$8 sps:$4 sm:$0xff]   ;;  %v10763_v31 = vld [vmem:[%s15300_s27 + $0x254] ss:$8 sps:$4 sm:$0xff]   ;;  %v10764_v9 = vld [vmem:[%s15300_s27 + $0x250] ss:$8 sps:$4 sm:$0xff]  }
 0x601   :  { %4031 = vmatprep.mubr.bf16.mxu0 %v10702_v3  ;;  %v10765_v3 = vld [vmem:[%s15300_s27 + $0x264] ss:$8 sps:$4 sm:$0xff]  }
 0x607   :  { %4193 = vmatmul.mubr.bf16.gmra.mrb[52].mxu1 %v10703_v57  ;;  %v10766_v57 = vld [vmem:[%s15300_s27 + $0x260] ss:$8 sps:$4 sm:$0xff]  }
 0x608   :  { %4032 = vmatmul.mubr.bf16.gmra.mrb[244].mxu0 %v10704_v15  ;;  %4200 = vmatprep.mubr.bf16.mxu1 %v10705_v32  ;;  %v10767_v15 = vld [vmem:[%s15300_s27 + $0x274] ss:$8 sps:$4 sm:$0xff]   ;;  %v10768_v32 = vld [vmem:[%s15300_s27 + $0x270] ss:$8 sps:$4 sm:$0xff]  }
 0x609   :  { %4039 = vmatprep.mubr.bf16.mxu0 %v10706_v59  ;;  %v10769_v59 = vld [vmem:[%s15300_s27 + $0x284] ss:$8 sps:$4 sm:$0xff]  }
 0x60f   :  { %4201 = vmatmul.mubr.bf16.gmra.mrb[56].mxu1 %v10707_v13  ;;  %v10770_v13 = vld [vmem:[%s15300_s27 + $0x280] ss:$8 sps:$4 sm:$0xff]  }
 0x610   :  { %4040 = vmatmul.mubr.bf16.gmra.mrb[248].mxu0 %v10708_v2  ;;  %4208 = vmatprep.mubr.bf16.mxu1 %v10709_v8  ;;  %v10771_v2 = vld [vmem:[%s15300_s27 + $0x294] ss:$8 sps:$4 sm:$0xff]   ;;  %v10772_v8 = vld [vmem:[%s15300_s27 + $0x290] ss:$8 sps:$4 sm:$0xff]  }
 0x611   :  { %4047 = vmatprep.mubr.bf16.mxu0 %v10710_v16  ;;  %v10773_v16 = vld [vmem:[%s15300_s27 + $0x2a4] ss:$8 sps:$4 sm:$0xff]  }
 0x617   :  { %4209 = vmatmul.mubr.bf16.gmra.mrb[60].mxu1 %v10711_v38  ;;  %v10774_v38 = vld [vmem:[%s15300_s27 + $0x2a0] ss:$8 sps:$4 sm:$0xff]  }
 0x618   :  { %4048 = vmatmul.mubr.bf16.gmra.mrb[252].mxu0 %v10712_v36  ;;  %4216 = vmatprep.mubr.bf16.mxu1 %v10713_v43  ;;  %v10775_v36 = vld [vmem:[%s15300_s27 + $0x2b4] ss:$8 sps:$4 sm:$0xff]  }
 0x619   :  { %4055 = vmatprep.mubr.bf16.mxu0 %v10714_v60 }
 0x61f   :  { %4217 = vmatmul.mubr.bf16.gmra.mrb[64].mxu1 %v10715_v48 }
 0x620   :  { %4056 = vmatmul.mubr.bf16.gmra.mrb[0].mxu0 %v10716_v11  ;;  %4224 = vmatprep.mubr.bf16.mxu1 %v10717_v62 }
 0x621   :  { %4063 = vmatprep.mubr.bf16.mxu0 %v10718_v30 }
 0x627   :  { %4225 = vmatmul.mubr.bf16.gmra.mrb[68].mxu1 %v10719_v29 }
 0x628   :  { %4064 = vmatmul.mubr.bf16.gmra.mrb[4].mxu0 %v10720_v26  ;;  %4232 = vmatprep.mubr.bf16.mxu1 %v10721_v14 }
 0x629   :  { %4071 = vmatprep.mubr.bf16.mxu0 %v10722_v18 }
 0x62f   :  { %4233 = vmatmul.mubr.bf16.gmra.mrb[72].mxu1 %v10723_v42 }
 0x630   :  { %4072 = vmatmul.mubr.bf16.gmra.mrb[8].mxu0 %v10724_v10  ;;  %4240 = vmatprep.mubr.bf16.mxu1 %v10725_v55 }
 0x631   :  { %4079 = vmatprep.mubr.bf16.mxu0 %v10726_v45  ;;  %v10776_v45 = vld [vmem:[%s15300_s27 + $0x2b0] ss:$8 sps:$4 sm:$0xff]  }
 0x637   :  { %4241 = vmatmul.mubr.bf16.gmra.mrb[76].mxu1 %v10727_v52 }
 0x638   :  { %4080 = vmatmul.mubr.bf16.gmra.mrb[12].mxu0 %v10728_v28  ;;  %4248 = vmatprep.mubr.bf16.mxu1 %v10729_v49  ;;  %v10777_v28 = vld [vmem:[%s15300_s27 + $0x2c4] ss:$8 sps:$4 sm:$0xff]  }
 0x639   :  { %4087 = vmatprep.mubr.bf16.mxu0 %v10730_v54 }
 0x63f   :  { %4249 = vmatmul.mubr.bf16.gmra.mrb[80].mxu1 %v10731_v5 }
 0x640   :  { %4088 = vmatmul.mubr.bf16.gmra.mrb[16].mxu0 %v10732_v22  ;;  %4256 = vmatprep.mubr.bf16.mxu1 %v10733_v61 }
 0x641   :  { %4095 = vmatprep.mubr.bf16.mxu0 %v10734_v25 }
 0x647   :  { %4257 = vmatmul.mubr.bf16.gmra.mrb[84].mxu1 %v10735_v40 }
 0x648   :  { %4096 = vmatmul.mubr.bf16.gmra.mrb[20].mxu0 %v10736_v39  ;;  %4264 = vmatprep.mubr.bf16.mxu1 %v10737_v27 }
 0x649   :  { %4103 = vmatprep.mubr.bf16.mxu0 %v10738_v24 }
 0x64f   :  { %4265 = vmatmul.mubr.bf16.gmra.mrb[88].mxu1 %v10739_v58 }
 0x650   :  { %4104 = vmatmul.mubr.bf16.gmra.mrb[24].mxu0 %v10740_v20  ;;  %4272 = vmatprep.mubr.bf16.mxu1 %v10741_v33 }
 0x651   :  { %4111 = vmatprep.mubr.bf16.mxu0 %v10742_v46  ;;  %v10778_v46 = vld [vmem:[%s15300_s27 + $0x2c0] ss:$8 sps:$4 sm:$0xff]  }
 0x657   :  { %4273 = vmatmul.mubr.bf16.gmra.mrb[92].mxu1 %v10743_v21 }
 0x658   :  { %4112 = vmatmul.mubr.bf16.gmra.mrb[28].mxu0 %v10744_v63  ;;  %4522 = vmatprep.mubr.bf16.mxu1 %v15500_v41  ;;  %v10779_v63 = vld [vmem:[%s15300_s27 + $0x2d4] ss:$8 sps:$4 sm:$0xff]  }
 0x659   :  { %4313 = vmatprep.mubr.bf16.mxu0 %v10745_v12 }
 0x660   :  { %4314 = vmatmul.mubr.bf16.vlgmr.msra.gmra.mrb[32].mxu0 %v10746_v23 }
 0x661   :  { %4321 = vmatprep.mubr.bf16.mxu0 %v10747_v34  ;;  %8807 = vmatpush3.bf16.msra.mxu0 %v13581_v4  ;;  %v10759_v4 = vld [vmem:[%s15300_s27 + $0x244] ss:$8 sps:$4 sm:$0xff]  }
 0x662   :  { %8808 = vmatprep.subr.bf16.mxu0 %v10748_v7 }
 0x665   :  { %8809 = vmatpush3.bf16.msra.mxu0 %v10748_v7 }
 0x666   :  { %8810 = vmatprep.subr.bf16.mxu0 %v10749_v6 }
 0x668   :  { %4322 = vmatmul.mubr.bf16.gmra.mrb[36].mxu0 %v10750_v1 }
 0x669   :  { %4329 = vmatprep.mubr.bf16.mxu0 %v10751_v44  ;;  %8811 = vmatpush3.bf16.msra.mxu0 %v10749_v6 }
 0x66a   :  { %8812 = vmatprep.subr.bf16.mxu0 %v10752_v51 }
 0x66d   :  { %8813 = vmatpush3.bf16.msra.mxu0 %v10752_v51 }
 0x66e   :  { %8814 = vmatprep.subr.bf16.mxu0 %v10753_v0 }
 0x670   :  { %4330 = vmatmul.mubr.bf16.gmra.mrb[40].mxu0 %v10754_v53 }
 0x671   :  { %4337 = vmatprep.mubr.bf16.mxu0 %v10755_v50  ;;  %8815 = vmatpush3.bf16.msra.mxu0 %v10753_v0 }
 0x672   :  { %8816 = vmatprep.subr.bf16.mxu0 %v10756_v17 }
 0x675   :  { %8817 = vmatpush3.bf16.msra.mxu0 %v10756_v17 }
 0x676   :  { %8818 = vmatprep.subr.bf16.mxu0 %v10757_v19 }
 0x678   :  { %4338 = vmatmul.mubr.bf16.gmra.mrb[44].mxu0 %v10758_v47  ;;  %v10780_v47 = vld [vmem:[%s15300_s27 + $0x2d0] ss:$8 sps:$4 sm:$0xff]  }
 0x679   :  { %4345 = vmatprep.mubr.bf16.mxu0 %v10759_v4  ;;  %8819 = vmatpush3.bf16.msra.mxu0 %v10757_v19 }
 0x67a   :  { %8820 = vmatprep.subr.bf16.mxu0 %v10760_v35 }
 0x67d   :  { %8821 = vmatpush3.bf16.msra.mxu0 %v10760_v35  ;;  %v10781_v35 = vld [vmem:[%s15300_s27 + $0x2e4] ss:$8 sps:$4 sm:$0xff]  }
 0x67e   :  { %8854 = vmatprep.subr.bf16.mxu0 %v13781_v56 }
 0x680   :  { %4346 = vmatmul.mubr.bf16.gmra.mrb[48].mxu0 %v10762_v37 }
 0x681   :  { %4353 = vmatprep.mubr.bf16.mxu0 %v10763_v31 }
 0x688   :  { %4354 = vmatmul.mubr.bf16.gmra.mrb[52].mxu0 %v10764_v9 }
 0x689   :  { %4361 = vmatprep.mubr.bf16.mxu0 %v10765_v3 }
 0x690   :  { %4362 = vmatmul.mubr.bf16.gmra.mrb[56].mxu0 %v10766_v57 }
 0x691   :  { %4369 = vmatprep.mubr.bf16.mxu0 %v10767_v15 }
 0x698   :  { %4370 = vmatmul.mubr.bf16.gmra.mrb[60].mxu0 %v10768_v32 }
 0x699   :  { %4377 = vmatprep.mubr.bf16.mxu0 %v10769_v59 }
 0x6a0   :  { %4378 = vmatmul.mubr.bf16.gmra.mrb[64].mxu0 %v10770_v13 }
 0x6a1   :  { %4385 = vmatprep.mubr.bf16.mxu0 %v10771_v2 }
 0x6a8   :  { %4386 = vmatmul.mubr.bf16.gmra.mrb[68].mxu0 %v10772_v8 }
 0x6a9   :  { %4393 = vmatprep.mubr.bf16.mxu0 %v10773_v16 }
 0x6b0   :  { %4394 = vmatmul.mubr.bf16.gmra.mrb[72].mxu0 %v10774_v38 }
 0x6b1   :  { %4401 = vmatprep.mubr.bf16.mxu0 %v10775_v36  ;;  %v10782_v36 = vld [vmem:[%s15300_s27 + $0x2e0] ss:$8 sps:$4 sm:$0xff]  }
 0x6b2   :  { %v8229_v43 = vpop.f32.mrb[32].mxu1 }
 0x6b3   :  { %v8117_v60 = vpop.f32.mrb[224].mxu0  ;;  %v8230_v48 = vpop.f32.mrb[33].mxu1 }
 0x6b4   :  { %v8118_v11 = vpop.f32.mrb[225].mxu0  ;;  %v8231_v62 = vadd.f32 %v8230_v48, %v8229_v43  ;;  %v8232_v30 = vpop.f32.mrb[34].mxu1 }
 0x6b5   :  { %v8119_v29 = vadd.f32 %v8118_v11, %v8117_v60  ;;  %v8120_v26 = vpop.f32.mrb[226].mxu0  ;;  %v8233_v14 = vpop.f32.mrb[35].mxu1  ;;  %v10783_v60 = vld [vmem:[%s15300_s27 + $0x2f4] ss:$8 sps:$4 sm:$0xff]  }
 0x6b6   :  { %v8121_v18 = vpop.f32.mrb[227].mxu0  ;;  %v8234_v42 = vadd.f32 %v8233_v14, %v8232_v30 }
 0x6b7   :  { %v13826_v10 = vadd.f32 %v8231_v62, %v8119_v29  ;;  %v8122_v55 = vadd.f32 %v8121_v18, %v8120_v26 }
 0x6b8   :  { %4402 = vmatmul.mubr.bf16.gmra.mrb[76].mxu0 %v10776_v45 }
 0x6b9   :  { %v13831_v52 = vadd.f32 %v8234_v42, %v8122_v55  ;;  %4409 = vmatprep.mubr.bf16.mxu0 %v10777_v28 }
 0x6ba   :  { %v8235_v49 = vpop.f32.mrb[36].mxu1 }
 0x6bb   :  { %v8123_v54 = vpop.f32.mrb[228].mxu0  ;;  %v8236_v5 = vpop.f32.mrb[37].mxu1 }
 0x6bc   :  { %v8124_v22 = vpop.f32.mrb[229].mxu0  ;;  %v8237_v61 = vadd.f32 %v8236_v5, %v8235_v49  ;;  %v8238_v25 = vpop.f32.mrb[38].mxu1 }
 0x6bd   :  { %v8125_v40 = vadd.f32 %v8124_v22, %v8123_v54  ;;  %v8126_v39 = vpop.f32.mrb[230].mxu0  ;;  %v8239_v27 = vpop.f32.mrb[39].mxu1  ;;  %v10784_v54 = vld [vmem:[%s15300_s27 + $0x2f0] ss:$8 sps:$4 sm:$0xff]  }
 0x6be   :  { %v8127_v24 = vpop.f32.mrb[231].mxu0  ;;  %v8240_v58 = vadd.f32 %v8239_v27, %v8238_v25 }
 0x6bf   :  { %v13836_v20 = vadd.f32 %v8237_v61, %v8125_v40  ;;  %v8128_v33 = vadd.f32 %v8127_v24, %v8126_v39 }
 0x6c0   :  { %4410 = vmatmul.mubr.bf16.gmra.mrb[80].mxu0 %v10778_v46 }
 0x6c1   :  { %v13841_v21 = vadd.f32 %v8240_v58, %v8128_v33  ;;  %4417 = vmatprep.mubr.bf16.mxu0 %v10779_v63 }
 0x6c2   :  { %v8241_v12 = vpop.f32.mrb[40].mxu1 }
 0x6c3   :  { %v8129_v23 = vpop.f32.mrb[232].mxu0  ;;  %v8242_v34 = vpop.f32.mrb[41].mxu1 }
 0x6c4   :  { %v8130_v7 = vpop.f32.mrb[233].mxu0  ;;  %v8243_v6 = vadd.f32 %v8242_v34, %v8241_v12  ;;  %v8244_v1 = vpop.f32.mrb[42].mxu1 }
 0x6c5   :  { %v8131_v44 = vadd.f32 %v8130_v7, %v8129_v23  ;;  %v8132_v51 = vpop.f32.mrb[234].mxu0  ;;  %v8245_v0 = vpop.f32.mrb[43].mxu1 }
 0x6c6   :  { %v8133_v53 = vpop.f32.mrb[235].mxu0  ;;  %v8246_v50 = vadd.f32 %v8245_v0, %v8244_v1 }
 0x6c7   :  { %v13846_v17 = vadd.f32 %v8243_v6, %v8131_v44  ;;  %v8134_v19 = vadd.f32 %v8133_v53, %v8132_v51 }
 0x6c8   :  { %4418 = vmatmul.mubr.bf16.gmra.mrb[84].mxu0 %v10780_v47 }
 0x6c9   :  { %v13851_v4 = vadd.f32 %v8246_v50, %v8134_v19  ;;  %4425 = vmatprep.mubr.bf16.mxu0 %v10781_v35 }
 0x6ca   :  { %v8247_v37 = vpop.f32.mrb[44].mxu1 }
 0x6cb   :  { %v8135_v31 = vpop.f32.mrb[236].mxu0  ;;  %v8248_v9 = vpop.f32.mrb[45].mxu1 }
 0x6cc   :  { %v8136_v3 = vpop.f32.mrb[237].mxu0  ;;  %v8249_v57 = vadd.f32 %v8248_v9, %v8247_v37  ;;  %v8250_v15 = vpop.f32.mrb[46].mxu1 }
 0x6cd   :  { %v8137_v32 = vadd.f32 %v8136_v3, %v8135_v31  ;;  %v8138_v59 = vpop.f32.mrb[238].mxu0  ;;  %v8251_v13 = vpop.f32.mrb[47].mxu1 }
 0x6ce   :  { %v8139_v2 = vpop.f32.mrb[239].mxu0  ;;  %v8252_v8 = vadd.f32 %v8251_v13, %v8250_v15 }
 0x6cf   :  { %v13856_v16 = vadd.f32 %v8249_v57, %v8137_v32  ;;  %v8140_v38 = vadd.f32 %v8139_v2, %v8138_v59 }
 0x6d0   :  { %4426 = vmatmul.mubr.bf16.gmra.mrb[88].mxu0 %v10782_v36 }
 0x6d1   :  { %v13861_v43 = vadd.f32 %v8252_v8, %v8140_v38  ;;  %4433 = vmatprep.mubr.bf16.mxu0 %v10783_v60 }
 0x6d2   :  { %v8253_v48 = vpop.f32.mrb[48].mxu1 }
 0x6d3   :  { %v8141_v11 = vpop.f32.mrb[240].mxu0  ;;  %v8254_v62 = vpop.f32.mrb[49].mxu1 }
 0x6d4   :  { %v8142_v30 = vpop.f32.mrb[241].mxu0  ;;  %v8255_v29 = vadd.f32 %v8254_v62, %v8253_v48  ;;  %v8256_v26 = vpop.f32.mrb[50].mxu1 }
 0x6d5   :  { %v8143_v14 = vadd.f32 %v8142_v30, %v8141_v11  ;;  %v8144_v18 = vpop.f32.mrb[242].mxu0  ;;  %v8257_v42 = vpop.f32.mrb[51].mxu1 }
 0x6d6   :  { %v8145_v55 = vpop.f32.mrb[243].mxu0  ;;  %v8258_v45 = vadd.f32 %v8257_v42, %v8256_v26 }
 0x6d7   :  { %v13866_v28 = vadd.f32 %v8255_v29, %v8143_v14  ;;  %v8146_v49 = vadd.f32 %v8145_v55, %v8144_v18 }
 0x6d8   :  { %4434 = vmatmul.mubr.bf16.gmra.mrb[92].mxu0 %v10784_v54 }
 0x6d9   :  { %v13871_v5 = vadd.f32 %v8258_v45, %v8146_v49 }
 0x6da   :  { %v8259_v22 = vpop.f32.mrb[52].mxu1 }
 0x6db   :  { %v8147_v61 = vpop.f32.mrb[244].mxu0  ;;  %v8260_v25 = vpop.f32.mrb[53].mxu1 }
 0x6dc   :  { %v8148_v40 = vpop.f32.mrb[245].mxu0  ;;  %v8261_v39 = vadd.f32 %v8260_v25, %v8259_v22  ;;  %v8262_v27 = vpop.f32.mrb[54].mxu1 }
 0x6dd   :  { %v8149_v24 = vadd.f32 %v8148_v40, %v8147_v61  ;;  %v8150_v58 = vpop.f32.mrb[246].mxu0  ;;  %v8263_v33 = vpop.f32.mrb[55].mxu1 }
 0x6de   :  { %v8151_v46 = vpop.f32.mrb[247].mxu0  ;;  %v8264_v63 = vadd.f32 %v8263_v33, %v8262_v27 }
 0x6df   :  { %v13873_v12 = vadd.f32 %v8261_v39, %v8149_v24  ;;  %v8152_v23 = vadd.f32 %v8151_v46, %v8150_v58 }
 0x6e1   :  { %v13875_v34 = vadd.f32 %v8264_v63, %v8152_v23 }
 0x6e2   :  { %v8265_v7 = vpop.f32.mrb[56].mxu1 }
 0x6e3   :  { %v8153_v6 = vpop.f32.mrb[248].mxu0  ;;  %v8266_v1 = vpop.f32.mrb[57].mxu1 }
 0x6e4   :  { %v8154_v44 = vpop.f32.mrb[249].mxu0  ;;  %v8267_v51 = vadd.f32 %v8266_v1, %v8265_v7  ;;  %v8268_v0 = vpop.f32.mrb[58].mxu1 }
 0x6e5   :  { %v8155_v53 = vadd.f32 %v8154_v44, %v8153_v6  ;;  %v8156_v50 = vpop.f32.mrb[250].mxu0  ;;  %v8269_v19 = vpop.f32.mrb[59].mxu1 }
 0x6e6   :  { %v8157_v47 = vpop.f32.mrb[251].mxu0  ;;  %v8270_v35 = vadd.f32 %v8269_v19, %v8268_v0 }
 0x6e7   :  { %v13877_v37 = vadd.f32 %v8267_v51, %v8155_v53  ;;  %v8158_v31 = vadd.f32 %v8157_v47, %v8156_v50 }
 0x6e9   :  { %v13879_v9 = vadd.f32 %v8270_v35, %v8158_v31 }
 0x6ea   :  { %v8271_v3 = vpop.f32.mrb[60].mxu1 }
 0x6eb   :  { %v8159_v57 = vpop.f32.mrb[252].mxu0  ;;  %v8272_v15 = vpop.f32.mrb[61].mxu1 }
 0x6ec   :  { %v8160_v32 = vpop.f32.mrb[253].mxu0  ;;  %v8273_v59 = vadd.f32 %v8272_v15, %v8271_v3  ;;  %v8274_v13 = vpop.f32.mrb[62].mxu1 }
 0x6ed   :  { %v8161_v2 = vadd.f32 %v8160_v32, %v8159_v57  ;;  %v8162_v8 = vpop.f32.mrb[254].mxu0  ;;  %v8275_v38 = vpop.f32.mrb[63].mxu1 }
 0x6ee   :  { %v8163_v36 = vpop.f32.mrb[255].mxu0  ;;  %v8276_v60 = vadd.f32 %v8275_v38, %v8274_v13 }
 0x6ef   :  { %v13881_v48 = vadd.f32 %v8273_v59, %v8161_v2  ;;  %v8164_v11 = vadd.f32 %v8163_v36, %v8162_v8 }
 0x6f1   :  { %v13883_v62 = vadd.f32 %v8276_v60, %v8164_v11 }
 0x6f2   :  { %v8277_v30 = vpop.f32.mrb[64].mxu1 }
 0x6f3   :  { %v8165_v29 = vpop.f32.mrb[0].mxu0  ;;  %v8278_v26 = vpop.f32.mrb[65].mxu1 }
 0x6f4   :  { %v8166_v14 = vpop.f32.mrb[1].mxu0  ;;  %v8279_v18 = vadd.f32 %v8278_v26, %v8277_v30  ;;  %v8280_v42 = vpop.f32.mrb[66].mxu1 }
 0x6f5   :  { %v8167_v55 = vadd.f32 %v8166_v14, %v8165_v29  ;;  %v8168_v45 = vpop.f32.mrb[2].mxu0  ;;  %v8281_v49 = vpop.f32.mrb[67].mxu1 }
 0x6f6   :  { %v8169_v54 = vpop.f32.mrb[3].mxu0  ;;  %v8282_v22 = vadd.f32 %v8281_v49, %v8280_v42 }
 0x6f7   :  { %v13885_v61 = vadd.f32 %v8279_v18, %v8167_v55  ;;  %v8170_v25 = vadd.f32 %v8169_v54, %v8168_v45 }
 0x6f9   :  { %v13887_v40 = vadd.f32 %v8282_v22, %v8170_v25 }
 0x6fa   :  { %v8283_v39 = vpop.f32.mrb[68].mxu1 }
 0x6fb   :  { %v8171_v27 = vpop.f32.mrb[4].mxu0  ;;  %v8284_v24 = vpop.f32.mrb[69].mxu1 }
 0x6fc   :  { %v8172_v58 = vpop.f32.mrb[5].mxu0  ;;  %v8285_v33 = vadd.f32 %v8284_v24, %v8283_v39  ;;  %v8286_v46 = vpop.f32.mrb[70].mxu1 }
 0x6fd   :  { %v8173_v63 = vadd.f32 %v8172_v58, %v8171_v27  ;;  %v8174_v23 = vpop.f32.mrb[6].mxu0  ;;  %v8287_v7 = vpop.f32.mrb[71].mxu1 }
 0x6fe   :  { %v8175_v6 = vpop.f32.mrb[7].mxu0  ;;  %v8288_v1 = vadd.f32 %v8287_v7, %v8286_v46 }
 0x6ff   :  { %v13889_v44 = vadd.f32 %v8285_v33, %v8173_v63  ;;  %v8176_v51 = vadd.f32 %v8175_v6, %v8174_v23 }
 0x701   :  { %v13891_v0 = vadd.f32 %v8288_v1, %v8176_v51 }
 0x702   :  { %v8289_v53 = vpop.f32.mrb[72].mxu1 }
 0x703   :  { %v8177_v50 = vpop.f32.mrb[8].mxu0  ;;  %v8290_v19 = vpop.f32.mrb[73].mxu1 }
 0x704   :  { %v8178_v47 = vpop.f32.mrb[9].mxu0  ;;  %v8291_v35 = vadd.f32 %v8290_v19, %v8289_v53  ;;  %v8292_v31 = vpop.f32.mrb[74].mxu1 }
 0x705   :  { %v8179_v3 = vadd.f32 %v8178_v47, %v8177_v50  ;;  %v8180_v57 = vpop.f32.mrb[10].mxu0  ;;  %v8293_v15 = vpop.f32.mrb[75].mxu1 }
 0x706   :  { %v8181_v32 = vpop.f32.mrb[11].mxu0  ;;  %v8294_v59 = vadd.f32 %v8293_v15, %v8292_v31 }
 0x707   :  { %v13893_v13 = vadd.f32 %v8291_v35, %v8179_v3  ;;  %v8182_v2 = vadd.f32 %v8181_v32, %v8180_v57 }
 0x709   :  { %v13895_v8 = vadd.f32 %v8294_v59, %v8182_v2 }
 0x70a   :  { %v8295_v38 = vpop.f32.mrb[76].mxu1 }
 0x70b   :  { %v8183_v36 = vpop.f32.mrb[12].mxu0  ;;  %v8296_v60 = vpop.f32.mrb[77].mxu1 }
 0x70c   :  { %v8184_v11 = vpop.f32.mrb[13].mxu0  ;;  %v8297_v30 = vadd.f32 %v8296_v60, %v8295_v38  ;;  %v8298_v29 = vpop.f32.mrb[78].mxu1 }
 0x70d   :  { %v8185_v26 = vadd.f32 %v8184_v11, %v8183_v36  ;;  %v8186_v14 = vpop.f32.mrb[14].mxu0  ;;  %v8299_v18 = vpop.f32.mrb[79].mxu1 }
 0x70e   :  { %v8187_v42 = vpop.f32.mrb[15].mxu0  ;;  %v8300_v55 = vadd.f32 %v8299_v18, %v8298_v29 }
 0x70f   :  { %v13897_v45 = vadd.f32 %v8297_v30, %v8185_v26  ;;  %v8188_v49 = vadd.f32 %v8187_v42, %v8186_v14 }
 0x711   :  { %v13899_v54 = vadd.f32 %v8300_v55, %v8188_v49 }
 0x712   :  { %v8301_v22 = vpop.f32.mrb[80].mxu1 }
 0x713   :  { %v8189_v25 = vpop.f32.mrb[16].mxu0  ;;  %v8302_v39 = vpop.f32.mrb[81].mxu1 }
 0x714   :  { %v8190_v27 = vpop.f32.mrb[17].mxu0  ;;  %v8303_v24 = vadd.f32 %v8302_v39, %v8301_v22  ;;  %v8304_v58 = vpop.f32.mrb[82].mxu1 }
 0x715   :  { %v8191_v33 = vadd.f32 %v8190_v27, %v8189_v25  ;;  %v8192_v46 = vpop.f32.mrb[18].mxu0  ;;  %v8305_v63 = vpop.f32.mrb[83].mxu1 }
 0x716   :  { %v8193_v23 = vpop.f32.mrb[19].mxu0  ;;  %v8306_v7 = vadd.f32 %v8305_v63, %v8304_v58 }
 0x717   :  { %v13901_v6 = vadd.f32 %v8303_v24, %v8191_v33  ;;  %v8194_v1 = vadd.f32 %v8193_v23, %v8192_v46 }
 0x719   :  { %v13903_v51 = vadd.f32 %v8306_v7, %v8194_v1 }
 0x71a   :  { %v8307_v53 = vpop.f32.mrb[84].mxu1 }
 0x71b   :  { %v8195_v50 = vpop.f32.mrb[20].mxu0  ;;  %v8308_v19 = vpop.f32.mrb[85].mxu1 }
 0x71c   :  { %v8196_v47 = vpop.f32.mrb[21].mxu0  ;;  %v8309_v35 = vadd.f32 %v8308_v19, %v8307_v53  ;;  %v8310_v31 = vpop.f32.mrb[86].mxu1 }
 0x71d   :  { %v8197_v3 = vadd.f32 %v8196_v47, %v8195_v50  ;;  %v8198_v57 = vpop.f32.mrb[22].mxu0  ;;  %v8311_v15 = vpop.f32.mrb[87].mxu1 }
 0x71e   :  { %v8199_v32 = vpop.f32.mrb[23].mxu0  ;;  %v8312_v59 = vadd.f32 %v8311_v15, %v8310_v31 }
 0x71f   :  { %v13905_v2 = vadd.f32 %v8309_v35, %v8197_v3  ;;  %v8200_v38 = vadd.f32 %v8199_v32, %v8198_v57 }
 0x721   :  { %v13907_v36 = vadd.f32 %v8312_v59, %v8200_v38 }
 0x722   :  { %v8313_v60 = vpop.f32.mrb[88].mxu1 }
 0x723   :  { %v8201_v11 = vpop.f32.mrb[24].mxu0  ;;  %v8314_v30 = vpop.f32.mrb[89].mxu1 }
 0x724   :  { %v8202_v29 = vpop.f32.mrb[25].mxu0  ;;  %v8315_v26 = vadd.f32 %v8314_v30, %v8313_v60  ;;  %v8316_v14 = vpop.f32.mrb[90].mxu1 }
 0x725   :  { %v8203_v18 = vadd.f32 %v8202_v29, %v8201_v11  ;;  %v8204_v42 = vpop.f32.mrb[26].mxu0  ;;  %v8317_v55 = vpop.f32.mrb[91].mxu1 }
 0x726   :  { %v8205_v49 = vpop.f32.mrb[27].mxu0  ;;  %v8318_v22 = vadd.f32 %v8317_v55, %v8316_v14  ;;  %v10785_v55 = vld [vmem:[%s15097_s8] ss:$12 sps:$4 sm:$0xff]  }
 0x727   :  { %v13909_v25 = vadd.f32 %v8315_v26, %v8203_v18  ;;  %v8206_v39 = vadd.f32 %v8205_v49, %v8204_v42 }
 0x729   :  { %v13911_v27 = vadd.f32 %v8318_v22, %v8206_v39  ;;  %v10787_v39 = vld [vmem:[%s15097_s8 + $0x18] ss:$12 sps:$4 sm:$0xff]  }
 0x72a   :  { %v8319_v24 = vpop.f32.mrb[92].mxu1 }
 0x72b   :  { %v8207_v58 = vpop.f32.mrb[28].mxu0  ;;  %v8320_v33 = vpop.f32.mrb[93].mxu1 }
 0x72c   :  { %v8208_v46 = vpop.f32.mrb[29].mxu0  ;;  %v8321_v63 = vadd.f32 %v8320_v33, %v8319_v24  ;;  %v8322_v23 = vpop.f32.mrb[94].mxu1  ;;  %v10788_v33 = vld [vmem:[%s15097_s8 + $0x34] ss:$12 sps:$4 sm:$0xff]  }
 0x72d   :  { %v8209_v7 = vadd.f32 %v8208_v46, %v8207_v58  ;;  %v8210_v1 = vpop.f32.mrb[30].mxu0  ;;  %v8323_v53 = vpop.f32.mrb[95].mxu1 }
 0x72e   :  { %v8211_v50 = vpop.f32.mrb[31].mxu0  ;;  %v8324_v19 = vadd.f32 %v8323_v53, %v8322_v23  ;;  %v10790_v53 = vld [vmem:[%s15097_s8 + $0x4c] ss:$12 sps:$4 sm:$0xff]  }
 0x72f   :  { %v13913_v47 = vadd.f32 %v8321_v63, %v8209_v7  ;;  %v8212_v35 = vadd.f32 %v8211_v50, %v8210_v1  ;;  %v10791_v50 = vld [vmem:[%s15097_s8 + $0x20] ss:$12 sps:$4 sm:$0xff]  }
 0x731   :  { %v13915_v31 = vadd.f32 %v8324_v19, %v8212_v35  ;;  %v10792_v35 = vld [vmem:[%s15097_s8 + $0x48] ss:$12 sps:$4 sm:$0xff]  }
 0x733   :  { %v8341_v3 = vpop.f32.mrb[32].mxu0 }
 0x734   :  { %v8342_v57 = vpop.f32.mrb[33].mxu0 }
 0x735   :  { %v8343_v15 = vadd.f32 %v8342_v57, %v8341_v3  ;;  %v8344_v32 = vpop.f32.mrb[34].mxu0  ;;  %v10793_v57 = vld [vmem:[%s15097_s8 + $0x64] ss:$12 sps:$4 sm:$0xff]  }
 0x736   :  { %v8345_v59 = vpop.f32.mrb[35].mxu0 }
 0x737   :  { %v4442_v38 = vadd.f32 %v8343_v15, %v13826_v10  ;;  %v8346_v60 = vadd.f32 %v8345_v59, %v8344_v32  ;;  %v10794_v15 = vld [vmem:[%s15097_s8 + $0x38] ss:$12 sps:$4 sm:$0xff]  }
 0x739   :  { %v4443_v11 = vadd.f32 %v8346_v60, %v13831_v52  ;;  %v10786_v52 = vld [vmem:[%s15097_s8 + $0x1c] ss:$12 sps:$4 sm:$0xff]  }
 0x73b   :  { %v4474_v30 = vpack.c.bf16 %v4443_v11, %v4442_v38  ;;  %v8347_v29 = vpop.f32.mrb[36].mxu0  ;;  %v10795_v38 = vld [vmem:[%s15097_s8 + $0x60] ss:$12 sps:$4 sm:$0xff]  }
 0x73c   :  { %v8348_v26 = vpop.f32.mrb[37].mxu0 }
 0x73d   :  { %v8349_v14 = vadd.f32 %v8348_v26, %v8347_v29  ;;  %v8350_v18 = vpop.f32.mrb[38].mxu0  ;;  %4523 = vmatmul.mubr.bf16.vlgmr.msra.gmra.mrb[96].mxu1 %v4474_v30  ;;  %8822 = vmatprep.mubr.bf16.mxu0 %v4474_v30  ;;  %v10796_v30 = vld [vmem:[%s15097_s8 + $0x7c] ss:$12 sps:$4 sm:$0xff]  }
 0x73e   :  { %v8351_v42 = vpop.f32.mrb[39].mxu0  ;;  %4532 = vmatprep.mubr.bf16.mxu1 %v15500_v41  ;;  %4845 = vmatpush1.bf16.msra.mxu1 %v10785_v55  ;;  %v10797_v29 = vld [vmem:[%s15097_s8 + $0x50] ss:$12 sps:$4 sm:$0xff]  }
 0x73f   :  { %v4444_v10 = vadd.f32 %v8349_v14, %v13836_v20  ;;  %v8352_v49 = vadd.f32 %v8351_v42, %v8350_v18  ;;  %4846 = vmatprep.subr.bf16.mxu1 %v10786_v52  ;;  %v10798_v14 = vld [vmem:[%s15097_s8 + $0x78] ss:$12 sps:$4 sm:$0xff]   ;;  %v10799_v42 = vld [vmem:[%s15097_s8 + $0x94] ss:$12 sps:$4 sm:$0xff]  }
 0x741   :  { %v4445_v22 = vadd.f32 %v8352_v49, %v13841_v21  ;;  %v10789_v21 = vld [vmem:[%s15097_s8 + $0x30] ss:$12 sps:$4 sm:$0xff]  }
 0x742   :  { %4847 = vmatpush1.bf16.msra.mxu1 %v10787_v39 }
 0x743   :  { %v4475_v24 = vpack.c.bf16 %v4445_v22, %v4444_v10  ;;  %v8353_v58 = vpop.f32.mrb[40].mxu0  ;;  %4848 = vmatprep.subr.bf16.mxu1 %v10788_v33  ;;  %v10800_v10 = vld [vmem:[%s15097_s8 + $0x68] ss:$12 sps:$4 sm:$0xff]   ;;  %v10801_v22 = vld [vmem:[%s15097_s8 + $0x90] ss:$12 sps:$4 sm:$0xff]  }
 0x744   :  { %v8354_v20 = vpop.f32.mrb[41].mxu0  ;;  %v10803_v33 = vld [vmem:[%s15097_s8 + $0x80] ss:$12 sps:$4 sm:$0xff]  }
 0x745   :  { %v8355_v46 = vadd.f32 %v8354_v20, %v8353_v58  ;;  %v8356_v63 = vpop.f32.mrb[42].mxu0  ;;  %4533 = vmatmul.mubr.bf16.gmra.mrb[100].mxu1 %v4475_v24  ;;  %8823 = vmatmul.mubr.bf16.vlgmr.msra.gmra.mrb[96].mxu0 %v4475_v24  ;;  %v10802_v58 = vld [vmem:[%s15097_s8 + $0xac] ss:$12 sps:$4 sm:$0xff]  }
 0x746   :  { %v8357_v23 = vpop.f32.mrb[43].mxu0  ;;  %4542 = vmatprep.mubr.bf16.mxu1 %v15500_v41  ;;  %4849 = vmatpush1.bf16.msra.mxu1 %v10789_v21  ;;  %v10805_v21 = vld [vmem:[%s15097_s8 + $0x98] ss:$12 sps:$4 sm:$0xff]  }
 0x747   :  { %v4446_v7 = vadd.f32 %v8355_v46, %v13846_v17  ;;  %v8358_v1 = vadd.f32 %v8357_v23, %v8356_v63  ;;  %4850 = vmatprep.subr.bf16.mxu1 %v10790_v53  ;;  %8855 = vmatpush3.bf16.msra.mxu0 %v13781_v56  ;;  %v10804_v46 = vld [vmem:[%s15097_s8 + $0xa8] ss:$12 sps:$4 sm:$0xff]  }
 0x748   :  { %8856 = vmatprep.subr.bf16.mxu0 %v10791_v50 }
 0x749   :  { %v4447_v19 = vadd.f32 %v8358_v1, %v13851_v4 }
 0x74a   :  { %4851 = vmatpush1.bf16.msra.mxu1 %v10792_v35 }
 0x74b   :  { %v4476_v17 = vpack.c.bf16 %v4447_v19, %v4446_v7  ;;  %v8359_v3 = vpop.f32.mrb[44].mxu0  ;;  %4852 = vmatprep.subr.bf16.mxu1 %v10793_v57  ;;  %8857 = vmatpush3.bf16.msra.mxu0 %v10791_v50  ;;  %v10806_v19 = vld [vmem:[%s15097_s8 + $0xb0] ss:$12 sps:$4 sm:$0xff]  }
 0x74c   :  { %v8360_v56 = vpop.f32.mrb[45].mxu0  ;;  %8858 = vmatprep.subr.bf16.mxu0 %v10794_v15 }
 0x74d   :  { %v8361_v4 = vadd.f32 %v8360_v56, %v8359_v3  ;;  %v8362_v32 = vpop.f32.mrb[46].mxu0  ;;  %4543 = vmatmul.mubr.bf16.gmra.mrb[104].mxu1 %v4476_v17  ;;  %8826 = vmatprep.mubr.bf16.mxu0 %v4476_v17 }
 0x74e   :  { %v8363_v59 = vpop.f32.mrb[47].mxu0  ;;  %4552 = vmatprep.mubr.bf16.mxu1 %v15500_v41  ;;  %4853 = vmatpush1.bf16.msra.mxu1 %v10795_v38 }
 0x74f   :  { %v4448_v60 = vadd.f32 %v8361_v4, %v13856_v16  ;;  %v8364_v11 = vadd.f32 %v8363_v59, %v8362_v32  ;;  %4854 = vmatprep.subr.bf16.mxu1 %v10796_v30  ;;  %8859 = vmatpush3.bf16.msra.mxu0 %v10794_v15 }
 0x750   :  { %8860 = vmatprep.subr.bf16.mxu0 %v10797_v29 }
 0x751   :  { %v4449_v26 = vadd.f32 %v8364_v11, %v13861_v43 }
 0x752   :  { %4855 = vmatpush1.bf16.msra.mxu1 %v10798_v14 }
 0x753   :  { %v4477_v16 = vpack.c.bf16 %v4449_v26, %v4448_v60  ;;  %v8365_v18 = vpop.f32.mrb[48].mxu0  ;;  %4856 = vmatprep.subr.bf16.mxu1 %v10799_v42  ;;  %8861 = vmatpush3.bf16.msra.mxu0 %v10797_v29 }
 0x754   :  { %v8366_v55 = vpop.f32.mrb[49].mxu0  ;;  %8862 = vmatprep.subr.bf16.mxu0 %v10800_v10 }
 0x755   :  { %v8367_v43 = vadd.f32 %v8366_v55, %v8365_v18  ;;  %v8368_v49 = vpop.f32.mrb[50].mxu0  ;;  %4553 = vmatmul.mubr.bf16.gmra.mrb[108].mxu1 %v4477_v16  ;;  %8827 = vmatmul.mubr.bf16.gmra.mrb[100].mxu0 %v4477_v16 }
 0x756   :  { %v8369_v52 = vpop.f32.mrb[51].mxu0  ;;  %4562 = vmatprep.mubr.bf16.mxu1 %v15500_v41  ;;  %4857 = vmatpush1.bf16.msra.mxu1 %v10801_v22 }
 0x757   :  { %v4450_v39 = vadd.f32 %v8367_v43, %v13866_v28  ;;  %v8370_v24 = vadd.f32 %v8369_v52, %v8368_v49  ;;  %8863 = vmatpush3.bf16.msra.mxu0 %v10800_v10  ;;  %4858 = vmatprep.subr.bf16.mxu1 %v10802_v58 }
 0x758   :  { %8864 = vmatprep.subr.bf16.mxu0 %v10803_v33 }
 0x759   :  { %v4451_v20 = vadd.f32 %v8370_v24, %v13871_v5 }
 0x75a   :  { %4859 = vmatpush1.bf16.msra.mxu1 %v10804_v46 }
 0x75b   :  { %v4478_v28 = vpack.c.bf16 %v4451_v20, %v4450_v39  ;;  %v8371_v63 = vpop.f32.mrb[52].mxu0  ;;  %8865 = vmatpush3.bf16.msra.mxu0 %v10803_v33 }
 0x75c   :  { %v8372_v23 = vpop.f32.mrb[53].mxu0  ;;  %8866 = vmatprep.subr.bf16.mxu0 %v10805_v21 }
 0x75d   :  { %v8373_v7 = vadd.f32 %v8372_v23, %v8371_v63  ;;  %v8374_v1 = vpop.f32.mrb[54].mxu0  ;;  %4563 = vmatmul.mubr.bf16.gmra.mrb[112].mxu1 %v4478_v28  ;;  %8830 = vmatprep.mubr.bf16.mxu0 %v4478_v28 }
 0x75e   :  { %v8375_v53 = vpop.f32.mrb[55].mxu0  ;;  %4572 = vmatprep.mubr.bf16.mxu1 %v15500_v41 }
 0x75f   :  { %v4452_v5 = vadd.f32 %v8373_v7, %v13873_v12  ;;  %v8376_v50 = vadd.f32 %v8375_v53, %v8374_v1  ;;  %8867 = vmatpush3.bf16.msra.mxu0 %v10805_v21 }
 0x760   :  { %8868 = vmatprep.subr.bf16.mxu0 %v10806_v19 }
 0x761   :  { %v4453_v35 = vadd.f32 %v8376_v50, %v13875_v34 }
 0x763   :  { %v4479_v17 = vpack.c.bf16 %v4453_v35, %v4452_v5  ;;  %v8377_v3 = vpop.f32.mrb[56].mxu0  ;;  %8869 = vmatpush3.bf16.msra.mxu0 %v10806_v19 }
 0x764   :  { %v8378_v57 = vpop.f32.mrb[57].mxu0 }
 0x765   :  { %v8379_v56 = vadd.f32 %v8378_v57, %v8377_v3  ;;  %v8380_v15 = vpop.f32.mrb[58].mxu0  ;;  %4573 = vmatmul.mubr.bf16.gmra.mrb[116].mxu1 %v4479_v17  ;;  %8831 = vmatmul.mubr.bf16.gmra.mrb[104].mxu0 %v4479_v17 }
 0x766   :  { %v8381_v4 = vpop.f32.mrb[59].mxu0  ;;  %4582 = vmatprep.mubr.bf16.mxu1 %v15500_v41 }
 0x767   :  { %v4454_v12 = vadd.f32 %v8379_v56, %v13877_v37  ;;  %v8382_v32 = vadd.f32 %v8381_v4, %v8380_v15 }
 0x769   :  { %v4455_v59 = vadd.f32 %v8382_v32, %v13879_v9 }
 0x76b   :  { %v4480_v38 = vpack.c.bf16 %v4455_v59, %v4454_v12  ;;  %v8383_v60 = vpop.f32.mrb[60].mxu0 }
 0x76c   :  { %v8384_v11 = vpop.f32.mrb[61].mxu0 }
 0x76d   :  { %v8385_v34 = vadd.f32 %v8384_v11, %v8383_v60  ;;  %v8386_v30 = vpop.f32.mrb[62].mxu0  ;;  %4583 = vmatmul.mubr.bf16.gmra.mrb[120].mxu1 %v4480_v38  ;;  %8834 = vmatprep.mubr.bf16.mxu0 %v4480_v38 }
 0x76e   :  { %v8387_v29 = vpop.f32.mrb[63].mxu0  ;;  %4592 = vmatprep.mubr.bf16.mxu1 %v15500_v41 }
 0x76f   :  { %v4456_v26 = vadd.f32 %v8385_v34, %v13881_v48  ;;  %v8388_v14 = vadd.f32 %v8387_v29, %v8386_v30 }
 0x771   :  { %v4457_v16 = vadd.f32 %v8388_v14, %v13883_v62 }
 0x773   :  { %v4481_v18 = vpack.c.bf16 %v4457_v16, %v4456_v26  ;;  %v8389_v37 = vpop.f32.mrb[64].mxu0 }
 0x774   :  { %v8390_v42 = vpop.f32.mrb[65].mxu0 }
 0x775   :  { %v8391_v55 = vadd.f32 %v8390_v42, %v8389_v37  ;;  %v8392_v9 = vpop.f32.mrb[66].mxu0  ;;  %4593 = vmatmul.mubr.bf16.gmra.mrb[124].mxu1 %v4481_v18  ;;  %8835 = vmatmul.mubr.bf16.gmra.mrb[108].mxu0 %v4481_v18 }
 0x776   :  { %v8393_v10 = vpop.f32.mrb[67].mxu0  ;;  %4602 = vmatprep.mubr.bf16.mxu1 %v15500_v41 }
 0x777   :  { %v4458_v43 = vadd.f32 %v8391_v55, %v13885_v61  ;;  %v8394_v49 = vadd.f32 %v8393_v10, %v8392_v9 }
 0x779   :  { %v4459_v52 = vadd.f32 %v8394_v49, %v13887_v40 }
 0x77b   :  { %v4482_v22 = vpack.c.bf16 %v4459_v52, %v4458_v43  ;;  %v8395_v48 = vpop.f32.mrb[68].mxu0 }
 0x77c   :  { %v8396_v39 = vpop.f32.mrb[69].mxu0 }
 0x77d   :  { %v8397_v24 = vadd.f32 %v8396_v39, %v8395_v48  ;;  %v8398_v62 = vpop.f32.mrb[70].mxu0  ;;  %4603 = vmatmul.mubr.bf16.gmra.mrb[128].mxu1 %v4482_v22  ;;  %8838 = vmatprep.mubr.bf16.mxu0 %v4482_v22 }
 0x77e   :  { %v8399_v58 = vpop.f32.mrb[71].mxu0  ;;  %4612 = vmatprep.mubr.bf16.mxu1 %v15500_v41 }
 0x77f   :  { %v4460_v33 = vadd.f32 %v8397_v24, %v13889_v44  ;;  %v8400_v20 = vadd.f32 %v8399_v58, %v8398_v62  ;;  %v15503_v58 = vld [vmem:[#allocation61_spill] sm:$0xff] }
 0x781   :  { %v4461_v46 = vadd.f32 %v8400_v20, %v13891_v0  ;;  %v15507_v20 = vld [vmem:[#allocation73_spill] sm:$0xff] }
 0x783   :  { %v4483_v28 = vpack.c.bf16 %v4461_v46, %v4460_v33  ;;  %v8401_v61 = vpop.f32.mrb[72].mxu0  ;;  %v15506_v33 = vld [vmem:[#allocation70_spill] sm:$0xff] }
 0x784   :  { %v8402_v63 = vpop.f32.mrb[73].mxu0  ;;  %v15508_v46 = vld [vmem:[#allocation46_spill] sm:$0xff] }
 0x785   :  { %v8403_v23 = vadd.f32 %v8402_v63, %v8401_v61  ;;  %v8404_v40 = vpop.f32.mrb[74].mxu0  ;;  %4613 = vmatmul.mubr.bf16.gmra.mrb[132].mxu1 %v4483_v28  ;;  %8839 = vmatmul.mubr.bf16.gmra.mrb[112].mxu0 %v4483_v28  ;;  %v15509_v28 = vld [vmem:[#allocation41_spill] sm:$0xff]  ;;  %v15510_v61 = vld [vmem:[#allocation42_spill] sm:$0xff] }
 0x786   :  { %v8405_v21 = vpop.f32.mrb[75].mxu0  ;;  %4622 = vmatprep.mubr.bf16.mxu1 %v15500_v41  ;;  %v15511_v63 = vld [vmem:[#allocation49_spill] sm:$0xff] }
 0x787   :  { %v4462_v7 = vadd.f32 %v8403_v23, %v13893_v13  ;;  %v8406_v1 = vadd.f32 %v8405_v21, %v8404_v40  ;;  %v15512_v23 = vld [vmem:[#allocation51_spill] sm:$0xff]  ;;  %v15513_v40 = vld [vmem:[#allocation38_spill] sm:$0xff] }
 0x788   :  { %v9815_v21 = vld [vmem:[%s15100_s11] sm:$0xff]  }
 0x789   :  { %v4463_v53 = vadd.f32 %v8406_v1, %v13895_v8  ;;  %v9816_v1 = vld [vmem:[%s15100_s11 + $0x8] sm:$0xff]   ;;  %8902 = vmatprep.subr.bf16.mxu0 %v9815_v21 }
 0x78b   :  { %v4484_v5 = vpack.c.bf16 %v4463_v53, %v4462_v7  ;;  %v8407_v44 = vpop.f32.mrb[76].mxu0  ;;  %v15514_v7 = vld [vmem:[#allocation57_spill] sm:$0xff]  ;;  %v15515_v53 = vld [vmem:[#allocation78_spill] sm:$0xff] }
 0x78c   :  { %v8408_v50 = vpop.f32.mrb[77].mxu0 }
 0x78d   :  { %v8409_v19 = vadd.f32 %v8408_v50, %v8407_v44  ;;  %v8410_v0 = vpop.f32.mrb[78].mxu0  ;;  %4623 = vmatmul.mubr.bf16.gmra.mrb[136].mxu1 %v4484_v5  ;;  %8842 = vmatprep.mubr.bf16.mxu0 %v4484_v5  ;;  %v9817_v5 = vld [vmem:[%s15100_s11 + $0x10] sm:$0xff]   ;;  %v9818_v50 = vld [vmem:[%s15100_s11 + $0x18] sm:$0xff]  }
 0x78e   :  { %v8411_v35 = vpop.f32.mrb[79].mxu0  ;;  %4632 = vmatprep.mubr.bf16.mxu1 %v15500_v41  ;;  %v15516_v44 = vld [vmem:[#allocation81_spill] sm:$0xff] }
 0x78f   :  { %v4464_v17 = vadd.f32 %v8409_v19, %v13897_v45  ;;  %v8412_v3 = vadd.f32 %v8411_v35, %v8410_v0  ;;  %v15517_v19 = vld [vmem:[#allocation8_spill] sm:$0xff] }
 0x790   :  { %v9819_v0 = vld [vmem:[%s15100_s11 + $0x20] sm:$0xff]   ;;  %v9820_v35 = vld [vmem:[%s15100_s11 + $0x28] sm:$0xff]  }
 0x791   :  { %v4465_v57 = vadd.f32 %v8412_v3, %v13899_v54  ;;  %v9822_v3 = vld [vmem:[%s15100_s11 + $0x38] sm:$0xff]  }
 0x793   :  { %v4485_v56 = vpack.c.bf16 %v4465_v57, %v4464_v17  ;;  %v8413_v13 = vpop.f32.mrb[80].mxu0  ;;  %v9821_v17 = vld [vmem:[%s15100_s11 + $0x30] sm:$0xff]  }
 0x794   :  { %v8414_v15 = vpop.f32.mrb[81].mxu0  ;;  %v15518_v57 = vld [vmem:[#allocation9_spill] sm:$0xff] }
 0x795   :  { %v8415_v4 = vadd.f32 %v8414_v15, %v8413_v13  ;;  %v8416_v8 = vpop.f32.mrb[82].mxu0  ;;  %4633 = vmatmul.mubr.bf16.gmra.mrb[140].mxu1 %v4485_v56  ;;  %8843 = vmatmul.mubr.bf16.gmra.mrb[116].mxu0 %v4485_v56  ;;  %v15519_v56 = vld [vmem:[#allocation10_spill] sm:$0xff]  ;;  %v15520_v13 = vld [vmem:[#allocation11_spill] sm:$0xff] }
 0x796   :  { %v8417_v12 = vpop.f32.mrb[83].mxu0  ;;  %4642 = vmatprep.mubr.bf16.mxu1 %v15500_v41 }
 0x797   :  { %v4466_v32 = vadd.f32 %v8415_v4, %v13901_v6  ;;  %v8418_v59 = vadd.f32 %v8417_v12, %v8416_v8  ;;  %v15521_v4 = vld [vmem:[#allocation12_spill] sm:$0xff] }
 0x799   :  { %v4467_v38 = vadd.f32 %v8418_v59, %v13903_v51  ;;  %v15522_v59 = vld [vmem:[#allocation13_spill] sm:$0xff] }
 0x79b   :  { %v4486_v60 = vpack.c.bf16 %v4467_v38, %v4466_v32  ;;  %v8419_v45 = vpop.f32.mrb[84].mxu0  ;;  %v15523_v38 = vld [vmem:[#allocation14_spill] sm:$0xff] }
 0x79c   :  { %v8420_v11 = vpop.f32.mrb[85].mxu0 }
 0x79d   :  { %v8421_v34 = vadd.f32 %v8420_v11, %v8419_v45  ;;  %v8422_v54 = vpop.f32.mrb[86].mxu0  ;;  %4643 = vmatmul.mubr.bf16.gmra.mrb[144].mxu1 %v4486_v60  ;;  %8846 = vmatprep.mubr.bf16.mxu0 %v4486_v60  ;;  %v15524_v60 = vld [vmem:[#allocation15_spill] sm:$0xff]  ;;  %v15525_v11 = vld [vmem:[#allocation16_spill] sm:$0xff] }
 0x79e   :  { %v8423_v30 = vpop.f32.mrb[87].mxu0  ;;  %4652 = vmatprep.mubr.bf16.mxu1 %v15500_v41 }
 0x79f   :  { %v4468_v29 = vadd.f32 %v8421_v34, %v13905_v2  ;;  %v8424_v26 = vadd.f32 %v8423_v30, %v8422_v54 }
 0x7a1   :  { %v4469_v14 = vadd.f32 %v8424_v26, %v13907_v36  ;;  %v9824_v26 = vld [vmem:[%s15099_s10] sm:$0xff]  }
 0x7a3   :  { %v4487_v16 = vpack.c.bf16 %v4469_v14, %v4468_v29  ;;  %v8425_v6 = vpop.f32.mrb[88].mxu0  ;;  %v9823_v29 = vld [vmem:[%s15102_s13] sm:$0xff]   ;;  %v15526_v14 = vld [vmem:[#allocation17_spill] sm:$0xff] }
 0x7a4   :  { %v8426_v18 = vpop.f32.mrb[89].mxu0  ;;  %8998 = vmatprep.subr.bf16.mxu1 %v9823_v29 }
 0x7a5   :  { %v8427_v37 = vadd.f32 %v8426_v18, %v8425_v6  ;;  %v8428_v51 = vpop.f32.mrb[90].mxu0  ;;  %4653 = vmatmul.mubr.bf16.gmra.mrb[148].mxu1 %v4487_v16  ;;  %8847 = vmatmul.mubr.bf16.gmra.mrb[120].mxu0 %v4487_v16  ;;  %v9825_v16 = vld [vmem:[%s15099_s10 + $0x8] sm:$0xff]   ;;  %v15527_v6 = vld [vmem:[#allocation18_spill] sm:$0xff]  ;;  %v15528_v18 = vld [vmem:[#allocation19_spill] sm:$0xff] }
 0x7a6   :  { %v8429_v42 = vpop.f32.mrb[91].mxu0  ;;  %4662 = vmatprep.mubr.bf16.mxu1 %v15500_v41 }
 0x7a7   :  { %v4470_v55 = vadd.f32 %v8427_v37, %v13909_v25  ;;  %v8430_v9 = vadd.f32 %v8429_v42, %v8428_v51  ;;  %v15501_v25 = vld [vmem:[#allocation54_spill] sm:$0xff]  ;;  %v15529_v51 = vld [vmem:[#allocation20_spill] sm:$0xff] }
 0x7a9   :  { %v4471_v10 = vadd.f32 %v8430_v9, %v13911_v27  ;;  %v15502_v27 = vld [vmem:[#allocation58_spill] sm:$0xff] }
 0x7ab   :  { %v4488_v43 = vpack.c.bf16 %v4471_v10, %v4470_v55  ;;  %v8431_v2 = vpop.f32.mrb[92].mxu0  ;;  %v9827_v10 = vld [vmem:[%s15099_s10 + $0x10] sm:$0xff]  }
 0x7ac   :  { %v8432_v49 = vpop.f32.mrb[93].mxu0 }
 0x7ad   :  { %v8433_v52 = vadd.f32 %v8432_v49, %v8431_v2  ;;  %v8434_v36 = vpop.f32.mrb[94].mxu0  ;;  %4663 = vmatmul.mubr.bf16.gmra.mrb[152].mxu1 %v4488_v43  ;;  %8850 = vmatprep.mubr.bf16.mxu0 %v4488_v43  ;;  %v9828_v43 = vld [vmem:[%s15102_s13 + $0x10] sm:$0xff]   ;;  %v9829_v2 = vld [vmem:[%s15099_s10 + $0x18] sm:$0xff]  }
 0x7ae   :  { %v8435_v22 = vpop.f32.mrb[95].mxu0  ;;  %4672 = vmatprep.mubr.bf16.mxu1 %v15500_v41  ;;  %v9830_v49 = vld [vmem:[%s15102_s13 + $0x18] sm:$0xff]  }
 0x7af   :  { %v4472_v48 = vadd.f32 %v8433_v52, %v13913_v47  ;;  %v8436_v39 = vadd.f32 %v8435_v22, %v8434_v36  ;;  %v15504_v47 = vld [vmem:[#allocation64_spill] sm:$0xff]  ;;  %v15530_v52 = vld [vmem:[#allocation21_spill] sm:$0xff]  ;;  %v15531_v36 = vld [vmem:[#allocation22_spill] sm:$0xff] }
 0x7b0   :  { %v9831_v22 = vld [vmem:[%s15099_s10 + $0x20] sm:$0xff]  }
 0x7b1   :  { %v4473_v24 = vadd.f32 %v8436_v39, %v13915_v31  ;;  %v15505_v31 = vld [vmem:[#allocation67_spill] sm:$0xff] }
 0x7b3   :  { %v4489_v62 = vpack.c.bf16 %v4473_v24, %v4472_v48  ;;  %v9832_v48 = vld [vmem:[%s15102_s13 + $0x20] sm:$0xff]   ;;  %v9833_v24 = vld [vmem:[%s15099_s10 + $0x28] sm:$0xff]  }
 0x7b5   :  { %4673 = vmatmul.mubr.bf16.gmra.mrb[156].mxu1 %v4489_v62  ;;  %8851 = vmatmul.mubr.bf16.gmra.mrb[124].mxu0 %v4489_v62  ;;  %v9834_v62 = vld [vmem:[%s15102_s13 + $0x28] sm:$0xff]  }
 0x7b6   :  { %8870 = vmatprep.mubr.bf16.mxu0 %v15501_v25  ;;  %4876 = vmatprep.mubr.bf16.mxu1 %v15500_v41 }
 0x7bd   :  { %4877 = vmatmul.mubr.bf16.vlgmr.msra.gmra.mrb[96].mxu1 %v15501_v25  ;;  %8871 = vmatmul.mubr.bf16.vlgmr.msra.gmra.mrb[128].mxu0 %v15502_v27  ;;  %v15532_v25 = vld [vmem:[#allocation23_spill] sm:$0xff] }
 0x7be   :  { %8874 = vmatprep.mubr.bf16.mxu0 %v15503_v58  ;;  %4886 = vmatprep.mubr.bf16.mxu1 %v15500_v41 }
 0x7bf   :  { %8903 = vmatpush3.bf16.msra.mxu0 %v9815_v21  ;;  %8999 = vmatpush3.bf16.msra.mxu1 %v9823_v29 }
 0x7c0   :  { %8904 = vmatprep.subr.bf16.mxu0 %v9816_v1 }
 0x7c3   :  { %8905 = vmatpush3.bf16.msra.mxu0 %v9816_v1 }
 0x7c4   :  { %8906 = vmatprep.subr.bf16.mxu0 %v9817_v5 }
 0x7c5   :  { %4887 = vmatmul.mubr.bf16.gmra.mrb[100].mxu1 %v15502_v27  ;;  %8875 = vmatmul.mubr.bf16.gmra.mrb[132].mxu0 %v15504_v47 }
 0x7c6   :  { %8878 = vmatprep.mubr.bf16.mxu0 %v15505_v31  ;;  %4896 = vmatprep.mubr.bf16.mxu1 %v15500_v41 }
 0x7c7   :  { %8907 = vmatpush3.bf16.msra.mxu0 %v9817_v5 }
 0x7c8   :  { %8908 = vmatprep.subr.bf16.mxu0 %v9818_v50 }
 0x7cb   :  { %8909 = vmatpush3.bf16.msra.mxu0 %v9818_v50 }
 0x7cc   :  { %8910 = vmatprep.subr.bf16.mxu0 %v9819_v0 }
 0x7cd   :  { %4897 = vmatmul.mubr.bf16.gmra.mrb[104].mxu1 %v15503_v58  ;;  %8879 = vmatmul.mubr.bf16.gmra.mrb[136].mxu0 %v15506_v33 }
 0x7ce   :  { %8882 = vmatprep.mubr.bf16.mxu0 %v15507_v20  ;;  %4906 = vmatprep.mubr.bf16.mxu1 %v15500_v41 }
 0x7cf   :  { %8911 = vmatpush3.bf16.msra.mxu0 %v9819_v0 }
 0x7d0   :  { %8912 = vmatprep.subr.bf16.mxu0 %v9820_v35 }
 0x7d3   :  { %8913 = vmatpush3.bf16.msra.mxu0 %v9820_v35 }
 0x7d4   :  { %8914 = vmatprep.subr.bf16.mxu0 %v9821_v17 }
 0x7d5   :  { %4907 = vmatmul.mubr.bf16.gmra.mrb[108].mxu1 %v15504_v47  ;;  %8883 = vmatmul.mubr.bf16.gmra.mrb[140].mxu0 %v15508_v46 }
 0x7d6   :  { %8886 = vmatprep.mubr.bf16.mxu0 %v15509_v28  ;;  %4916 = vmatprep.mubr.bf16.mxu1 %v15500_v41 }
 0x7d7   :  { %8915 = vmatpush3.bf16.msra.mxu0 %v9821_v17 }
 0x7d8   :  { %8916 = vmatprep.subr.bf16.mxu0 %v9822_v3 }
 0x7db   :  { %8917 = vmatpush3.bf16.msra.mxu0 %v9822_v3 }
 0x7dc   :  { %8950 = vmatprep.subr.bf16.mxu0 %v9824_v26 }
 0x7dd   :  { %4917 = vmatmul.mubr.bf16.gmra.mrb[112].mxu1 %v15505_v31  ;;  %8887 = vmatmul.mubr.bf16.gmra.mrb[144].mxu0 %v15510_v61  ;;  %v9835_v31 = vld [vmem:[%s15099_s10 + $0x30] sm:$0xff]  }
 0x7de   :  { %8890 = vmatprep.mubr.bf16.mxu0 %v15511_v63  ;;  %4926 = vmatprep.mubr.bf16.mxu1 %v15500_v41 }
 0x7e5   :  { %4927 = vmatmul.mubr.bf16.gmra.mrb[116].mxu1 %v15506_v33  ;;  %8891 = vmatmul.mubr.bf16.gmra.mrb[148].mxu0 %v15512_v23  ;;  %v9836_v33 = vld [vmem:[%s15102_s13 + $0x30] sm:$0xff]  }
 0x7e6   :  { %8894 = vmatprep.mubr.bf16.mxu0 %v15513_v40  ;;  %4936 = vmatprep.mubr.bf16.mxu1 %v15500_v41 }
 0x7ed   :  { %4937 = vmatmul.mubr.bf16.gmra.mrb[120].mxu1 %v15507_v20  ;;  %8895 = vmatmul.mubr.bf16.gmra.mrb[152].mxu0 %v15514_v7  ;;  %v9837_v20 = vld [vmem:[%s15099_s10 + $0x38] sm:$0xff]  }
 0x7ee   :  { %8898 = vmatprep.mubr.bf16.mxu0 %v15515_v53  ;;  %4946 = vmatprep.mubr.bf16.mxu1 %v15500_v41 }
 0x7f5   :  { %4947 = vmatmul.mubr.bf16.gmra.mrb[124].mxu1 %v15508_v46  ;;  %8899 = vmatmul.mubr.bf16.gmra.mrb[156].mxu0 %v15516_v44  ;;  %v9838_v46 = vld [vmem:[%s15102_s13 + $0x38] sm:$0xff]  }
 0x7f6   :  { %4956 = vmatprep.mubr.bf16.mxu1 %v15500_v41  ;;  %8918 = vmatprep.mubr.bf16.mxu0 %v15517_v19 }
 0x7fd   :  { %4957 = vmatmul.mubr.bf16.gmra.mrb[128].mxu1 %v15509_v28  ;;  %8919 = vmatmul.mubr.bf16.vlgmr.msra.gmra.mrb[160].mxu0 %v15518_v57 }
 0x7fe   :  { %4966 = vmatprep.mubr.bf16.mxu1 %v15500_v41  ;;  %8922 = vmatprep.mubr.bf16.mxu0 %v15519_v56  ;;  %v15546_v56 = vld [vmem:[#allocation43_spill] sm:$0xff] }
 0x7ff   :  { %8951 = vmatpush3.bf16.msra.mxu0 %v9824_v26 }
 0x800   :  { %8952 = vmatprep.subr.bf16.mxu0 %v9825_v16 }
 0x803   :  { %8953 = vmatpush3.bf16.msra.mxu0 %v9825_v16 }
 0x804   :  { %8954 = vmatprep.subr.bf16.mxu0 %v9827_v10 }
 0x805   :  { %4967 = vmatmul.mubr.bf16.gmra.mrb[132].mxu1 %v15510_v61  ;;  %8923 = vmatmul.mubr.bf16.gmra.mrb[164].mxu0 %v15520_v13 }
 0x806   :  { %4976 = vmatprep.mubr.bf16.mxu1 %v15500_v41  ;;  %8926 = vmatprep.mubr.bf16.mxu0 %v15521_v4 }
 0x807   :  { %8955 = vmatpush3.bf16.msra.mxu0 %v9827_v10 }
 0x808   :  { %8956 = vmatprep.subr.bf16.mxu0 %v9829_v2 }
 0x80b   :  { %8957 = vmatpush3.bf16.msra.mxu0 %v9829_v2 }
 0x80c   :  { %8958 = vmatprep.subr.bf16.mxu0 %v9831_v22 }
 0x80d   :  { %4977 = vmatmul.mubr.bf16.gmra.mrb[136].mxu1 %v15511_v63  ;;  %8927 = vmatmul.mubr.bf16.gmra.mrb[168].mxu0 %v15522_v59 }
 0x80e   :  { %4986 = vmatprep.mubr.bf16.mxu1 %v15500_v41  ;;  %8930 = vmatprep.mubr.bf16.mxu0 %v15523_v38  ;;  %v15547_v38 = vld [vmem:[#allocation44_spill] sm:$0xff] }
 0x80f   :  { %8959 = vmatpush3.bf16.msra.mxu0 %v9831_v22 }
 0x810   :  { %8960 = vmatprep.subr.bf16.mxu0 %v9833_v24 }
 0x813   :  { %8961 = vmatpush3.bf16.msra.mxu0 %v9833_v24 }
 0x814   :  { %8962 = vmatprep.subr.bf16.mxu0 %v9835_v31 }
 0x815   :  { %4987 = vmatmul.mubr.bf16.gmra.mrb[140].mxu1 %v15512_v23  ;;  %8931 = vmatmul.mubr.bf16.gmra.mrb[172].mxu0 %v15524_v60 }
 0x816   :  { %4996 = vmatprep.mubr.bf16.mxu1 %v15500_v41  ;;  %8934 = vmatprep.mubr.bf16.mxu0 %v15525_v11 }
 0x817   :  { %8963 = vmatpush3.bf16.msra.mxu0 %v9835_v31 }
 0x818   :  { %v14100_v15 = vpop.f32.mrb[96].mxu0  ;;  %8964 = vmatprep.subr.bf16.mxu0 %v9837_v20 }
 0x819   :  { %v14103_v8 = vpop.f32.mrb[97].mxu0 }
 0x81a   :  { %v14105_v12 = vpop.f32.mrb[98].mxu0 }
 0x81b   :  { %v14107_v32 = vpop.f32.mrb[99].mxu0  ;;  %8965 = vmatpush3.bf16.msra.mxu0 %v9837_v20 }
 0x81d   :  { %4997 = vmatmul.mubr.bf16.gmra.mrb[144].mxu1 %v15513_v40  ;;  %8935 = vmatmul.mubr.bf16.gmra.mrb[176].mxu0 %v15526_v14 }
 0x81e   :  { %5006 = vmatprep.mubr.bf16.mxu1 %v15500_v41  ;;  %8938 = vmatprep.mubr.bf16.mxu0 %v15527_v6 }
 0x825   :  { %5007 = vmatmul.mubr.bf16.gmra.mrb[148].mxu1 %v15514_v7  ;;  %8939 = vmatmul.mubr.bf16.gmra.mrb[180].mxu0 %v15528_v18 }
 0x826   :  { %5016 = vmatprep.mubr.bf16.mxu1 %v15500_v41  ;;  %8942 = vmatprep.mubr.bf16.mxu0 %v15529_v51 }
 0x828   :  { %v14116_v45 = vpop.f32.mrb[100].mxu0 }
 0x829   :  { %v14119_v34 = vpop.f32.mrb[101].mxu0 }
 0x82a   :  { %v14121_v54 = vpop.f32.mrb[102].mxu0 }
 0x82b   :  { %v14123_v30 = vpop.f32.mrb[103].mxu0 }
 0x82d   :  { %5017 = vmatmul.mubr.bf16.gmra.mrb[152].mxu1 %v15515_v53  ;;  %8943 = vmatmul.mubr.bf16.gmra.mrb[184].mxu0 %v15530_v52 }
 0x82e   :  { %5026 = vmatprep.mubr.bf16.mxu1 %v15500_v41  ;;  %v9826_v41 = vld [vmem:[%s15102_s13 + $0x8] sm:$0xff]   ;;  %8946 = vmatprep.mubr.bf16.mxu0 %v15531_v36 }
 0x82f   :  { %9000 = vmatprep.subr.bf16.mxu1 %v9826_v41 }
 0x830   :  { %9001 = vmatpush3.bf16.msra.mxu1 %v9826_v41 }
 0x831   :  { %9002 = vmatprep.subr.bf16.mxu1 %v9828_v43 }
 0x834   :  { %9003 = vmatpush3.bf16.msra.mxu1 %v9828_v43 }
 0x835   :  { %5027 = vmatmul.mubr.bf16.gmra.mrb[156].mxu1 %v15516_v44  ;;  %9004 = vmatprep.subr.bf16.mxu1 %v9830_v49 }
 0x836   :  { %8947 = vmatmul.mubr.bf16.gmra.mrb[188].mxu0 %v15532_v25 }
 0x838   :  { %v14143_v37 = vpop.f32.mrb[104].mxu0  ;;  %9005 = vmatpush3.bf16.msra.mxu1 %v9830_v49 }
 0x839   :  { %v14146_v42 = vpop.f32.mrb[105].mxu0  ;;  %9006 = vmatprep.subr.bf16.mxu1 %v9832_v48 }
 0x83a   :  { %v14148_v55 = vpop.f32.mrb[106].mxu0 }
 0x83b   :  { %v14150_v9 = vpop.f32.mrb[107].mxu0 }
 0x83c   :  { %9007 = vmatpush3.bf16.msra.mxu1 %v9832_v48 }
 0x83d   :  { %9008 = vmatprep.subr.bf16.mxu1 %v9834_v62 }
 0x840   :  { %9009 = vmatpush3.bf16.msra.mxu1 %v9834_v62 }
 0x841   :  { %9010 = vmatprep.subr.bf16.mxu1 %v9836_v33 }
 0x844   :  { %9011 = vmatpush3.bf16.msra.mxu1 %v9836_v33 }
 0x845   :  { %9012 = vmatprep.subr.bf16.mxu1 %v9838_v46 }
 0x848   :  { %v14172_v39 = vpop.f32.mrb[108].mxu0  ;;  %9013 = vmatpush3.bf16.msra.mxu1 %v9838_v46 }
 0x849   :  { %v14181_v27 = vpop.f32.mrb[109].mxu0 }
 0x84a   :  { %v14183_v58 = vpop.f32.mrb[110].mxu0 }
 0x84b   :  { %v14185_v47 = vpop.f32.mrb[111].mxu0 }
 0x858   :  { %v14199_v28 = vpop.f32.mrb[112].mxu0 }
 0x859   :  { %v14201_v61 = vpop.f32.mrb[113].mxu0 }
 0x85a   :  { %v14203_v63 = vpop.f32.mrb[114].mxu0 }
 0x85b   :  { %15533 = vst [vmem:[#allocation30_spill] sm:$0xff] %v14203_v63  ;;  %v14205_v23 = vpop.f32.mrb[115].mxu0 }
 0x868   :  { %v14207_v40 = vpop.f32.mrb[116].mxu0 }
 0x869   :  { %15534 = vst [vmem:[#allocation28_spill] sm:$0xff] %v14207_v40  ;;  %v14209_v21 = vpop.f32.mrb[117].mxu0 }
 0x86a   :  { %15535 = vst [vmem:[#allocation27_spill] sm:$0xff] %v14209_v21  ;;  %v14211_v7 = vpop.f32.mrb[118].mxu0 }
 0x86b   :  { %15536 = vst [vmem:[#allocation54_spill] sm:$0xff] %v14211_v7  ;;  %v14213_v1 = vpop.f32.mrb[119].mxu0 }
 0x86c   :  { %15537 = vst [vmem:[#allocation58_spill] sm:$0xff] %v14213_v1 }
 0x878   :  { %v14215_v53 = vpop.f32.mrb[120].mxu0 }
 0x879   :  { %15538 = vst [vmem:[#allocation61_spill] sm:$0xff] %v14215_v53  ;;  %v14217_v5 = vpop.f32.mrb[121].mxu0 }
 0x87a   :  { %15539 = vst [vmem:[#allocation64_spill] sm:$0xff] %v14217_v5  ;;  %v14219_v44 = vpop.f32.mrb[122].mxu0 }
 0x87b   :  { %15540 = vst [vmem:[#allocation67_spill] sm:$0xff] %v14219_v44  ;;  %v14221_v50 = vpop.f32.mrb[123].mxu0 }
 0x87c   :  { %15541 = vst [vmem:[#allocation70_spill] sm:$0xff] %v14221_v50 }
 0x888   :  { %v14223_v19 = vpop.f32.mrb[124].mxu0 }
 0x889   :  { %15542 = vst [vmem:[#allocation73_spill] sm:$0xff] %v14223_v19  ;;  %v14225_v0 = vpop.f32.mrb[125].mxu0 }
 0x88a   :  { %15543 = vst [vmem:[#allocation46_spill] sm:$0xff] %v14225_v0  ;;  %v14227_v35 = vpop.f32.mrb[126].mxu0 }
 0x88b   :  { %15544 = vst [vmem:[#allocation41_spill] sm:$0xff] %v14227_v35  ;;  %v14229_v17 = vpop.f32.mrb[127].mxu0 }
 0x88c   :  { %15545 = vst [vmem:[#allocation42_spill] sm:$0xff] %v14229_v17  ;;  %v15549_v17 = vld [vmem:[#allocation45_spill] sm:$0xff] }
 0x88d   :  { %v4718_v0 = vadd.f32 %v14103_v8, %v15549_v17  ;;  %v4721_v8 = vadd.f32 %v14107_v32, %v15549_v17 }
 0x890   :  { %v4878_v3 = vpop.f32.mrb[96].mxu1  ;;  %v14231_v57 = vpop.f32.mrb[128].mxu0 }
 0x891   :  { %v9281_v13 = vadd.f32 %v15546_v56, %v4878_v3  ;;  %v4880_v4 = vpop.f32.mrb[97].mxu1  ;;  %v14234_v59 = vpop.f32.mrb[129].mxu0 }
 0x892   :  { %v9283_v60 = vadd.f32 %v15547_v38, %v4880_v4  ;;  %v4882_v11 = vpop.f32.mrb[98].mxu1  ;;  %v14237_v29 = vpop.f32.mrb[130].mxu0 }
 0x893   :  { %v7538_v26 = vmul.f32 -1.442695, %v9281_v13  ;;  %v9285_v14 = vadd.f32 %v15546_v56, %v4882_v11  ;;  %v4884_v16 = vpop.f32.mrb[99].mxu1  ;;  %v14240_v41 = vpop.f32.mrb[131].mxu0 }
 0x894   :  { %v7570_v6 = vmul.f32 -1.442695, %v9283_v60  ;;  %v9287_v18 = vadd.f32 %v15547_v38, %v4884_v16 }
 0x895   :  { %10159 = vpow2.f32 %v7538_v26  ;;  %v7539_v51 = vmul.f32 -1.442695, %v9285_v14 }
 0x896   :  { %10161 = vpow2.f32 %v7570_v6  ;;  %v7571_v10 = vmul.f32 -1.442695, %v9287_v18 }
 0x897   :  { %10163 = vpow2.f32 %v7539_v51 }
 0x898   :  { %10165 = vpow2.f32 %v7571_v10  ;;  %v4888_v43 = vpop.f32.mrb[100].mxu1  ;;  %v14243_v2 = vpop.f32.mrb[132].mxu0 }
 0x899   :  { %v9289_v49 = vadd.f32 %v15546_v56, %v4888_v43  ;;  %v4890_v52 = vpop.f32.mrb[101].mxu1  ;;  %v14246_v36 = vpop.f32.mrb[133].mxu0 }
 0x89a   :  { %v9291_v22 = vadd.f32 %v15547_v38, %v4890_v52  ;;  %v4892_v48 = vpop.f32.mrb[102].mxu1  ;;  %v14249_v24 = vpop.f32.mrb[134].mxu0 }
 0x89b   :  { %v7540_v62 = vmul.f32 -1.442695, %v9289_v49  ;;  %v9293_v25 = vadd.f32 %v15546_v56, %v4892_v48  ;;  %v4894_v31 = vpop.f32.mrb[103].mxu1  ;;  %v14252_v33 = vpop.f32.mrb[135].mxu0 }
 0x89c   :  { %v7572_v20 = vmul.f32 -1.442695, %v9291_v22  ;;  %v9295_v46 = vadd.f32 %v15547_v38, %v4894_v31 }
 0x89d   :  { %10167 = vpow2.f32 %v7540_v62  ;;  %v7541_v3 = vmul.f32 -1.442695, %v9293_v25 }
 0x89e   :  { %10169 = vpow2.f32 %v7572_v20  ;;  %v7573_v13 = vmul.f32 -1.442695, %v9295_v46 }
 0x89f   :  { %v10160_v4 = vpop.eup %10159  ;;  %10171 = vpow2.f32 %v7541_v3 }
 0x8a0   :  { %v10162_v60 = vpop.eup %10161  ;;  %v5326_v11 = vadd.f32 1.0, %v10160_v4  ;;  %10173 = vpow2.f32 %v7573_v13  ;;  %v4898_v26 = vpop.f32.mrb[104].mxu1 }
 0x8a1   :  { %v14255_v14 = vpop.f32.mrb[136].mxu0  ;;  %v10164_v16 = vpop.eup %10163  ;;  %v5550_v6 = vadd.f32 1.0, %v10162_v60  ;;  %v9297_v18 = vadd.f32 %v15546_v56, %v4898_v26 }
 0x8a2   :  { %v4900_v51 = vpop.f32.mrb[105].mxu1  ;;  %v14258_v10 = vpop.f32.mrb[137].mxu0  ;;  %10175 = vrcp.f32 %v5326_v11  ;;  %v5327_v49 = vadd.f32 1.0, %v10164_v16 }
 0x8a3   :  { %v10166_v43 = vpop.eup %10165  ;;  %v9299_v52 = vadd.f32 %v15547_v38, %v4900_v51  ;;  %v4902_v22 = vpop.f32.mrb[106].mxu1  ;;  %10177 = vrcp.f32 %v5550_v6  ;;  %v7542_v25 = vmul.f32 -1.442695, %v9297_v18 }
 0x8a4   :  { %v14261_v48 = vpop.f32.mrb[138].mxu0  ;;  %v5551_v62 = vadd.f32 1.0, %v10166_v43  ;;  %v9301_v31 = vadd.f32 %v15546_v56, %v4902_v22  ;;  %v4904_v20 = vpop.f32.mrb[107].mxu1  ;;  %10179 = vrcp.f32 %v5327_v49 }
 0x8a5   :  { %v14264_v46 = vpop.f32.mrb[139].mxu0  ;;  %v7574_v3 = vmul.f32 -1.442695, %v9299_v52  ;;  %v9303_v13 = vadd.f32 %v15547_v38, %v4904_v20 }
 0x8a6   :  { %10181 = vrcp.f32 %v5551_v62  ;;  %v7543_v4 = vmul.f32 -1.442695, %v9301_v31  ;;  %v15548_v31 = vld [vmem:[#allocation29_spill] sm:$0xff] }
 0x8a7   :  { %10183 = vpow2.f32 %v7542_v25  ;;  %v7575_v60 = vmul.f32 -1.442695, %v9303_v13  ;;  %v10168_v11 = vpop.eup %10167  ;;  %v5072_v25 = vadd.f32 %v14234_v59, %v15548_v31 }
 0x8a8   :  { %10185 = vpow2.f32 %v7574_v3  ;;  %v10170_v26 = vpop.eup %10169  ;;  %v5328_v16 = vadd.f32 1.0, %v10168_v11  ;;  %v4908_v6 = vpop.f32.mrb[108].mxu1 }
 0x8a9   :  { %10187 = vpow2.f32 %v7543_v4  ;;  %v14267_v18 = vpop.f32.mrb[140].mxu0  ;;  %v10172_v51 = vpop.eup %10171  ;;  %v5552_v43 = vadd.f32 1.0, %v10170_v26  ;;  %v9305_v49 = vadd.f32 %v15546_v56, %v4908_v6 }
 0x8aa   :  { %10189 = vpow2.f32 %v7575_v60  ;;  %v4910_v52 = vpop.f32.mrb[109].mxu1  ;;  %v14270_v22 = vpop.f32.mrb[141].mxu0  ;;  %v5329_v20 = vadd.f32 1.0, %v10172_v51 }
 0x8ab   :  { %v10174_v62 = vpop.eup %10173  ;;  %10191 = vrcp.f32 %v5328_v16  ;;  %v9307_v3 = vadd.f32 %v15547_v38, %v4910_v52  ;;  %v4912_v13 = vpop.f32.mrb[110].mxu1  ;;  %v7544_v26 = vmul.f32 -1.442695, %v9305_v49 }
 0x8ac   :  { %v14275_v4 = vpop.f32.mrb[142].mxu0  ;;  %10193 = vrcp.f32 %v5552_v43  ;;  %v5553_v11 = vadd.f32 1.0, %v10174_v62  ;;  %v9309_v60 = vadd.f32 %v15546_v56, %v4912_v13  ;;  %v4914_v6 = vpop.f32.mrb[111].mxu1  ;;  %v5075_v43 = vadd.f32 %v14240_v41, %v15548_v31 }
 0x8ad   :  { %v14278_v35 = vpop.f32.mrb[143].mxu0  ;;  %v10176_v19 = vpop.eup %10175  ;;  %10195 = vrcp.f32 %v5329_v20  ;;  %v7576_v59 = vmul.f32 -1.442695, %v9307_v3  ;;  %v9311_v16 = vadd.f32 %v15547_v38, %v4914_v6 }
 0x8ae   :  { %v14283_v51 = vpop.eup %10177  ;;  %v5646_v52 = vmul.f32 %v10176_v19, %v5072_v25  ;;  %10197 = vrcp.f32 %v5553_v11  ;;  %v7545_v49 = vmul.f32 -1.442695, %v9309_v60 }
 0x8af   :  { %v10180_v62 = vpop.eup %10179  ;;  %10199 = vpow2.f32 %v7544_v26  ;;  %v7577_v13 = vmul.f32 -1.442695, %v9311_v16 }
 0x8b0   :  { %v14287_v44 = vpop.eup %10181  ;;  %v5678_v20 = vadd.f32 %v5646_v52, %v4718_v0  ;;  %v5647_v3 = vmul.f32 %v10180_v62, %v5075_v43  ;;  %10201 = vpow2.f32 %v7576_v59  ;;  %v4918_v53 = vpop.f32.mrb[112].mxu1  ;;  %v5080_v43 = vadd.f32 %v14231_v57, %v15548_v31 }
 0x8b1   :  { %v10184_v6 = vpop.eup %10183  ;;  %10203 = vpow2.f32 %v7545_v49  ;;  %v14291_v19 = vpop.f32.mrb[144].mxu0  ;;  %v9313_v26 = vadd.f32 %v15546_v56, %v4918_v53 }
 0x8b2   :  { %v10186_v25 = vpop.eup %10185  ;;  %10205 = vtanh.f32 %v5678_v20  ;;  %v5679_v41 = vadd.f32 %v5647_v3, %v4721_v8  ;;  %v5330_v11 = vadd.f32 1.0, %v10184_v6  ;;  %v4920_v60 = vpop.f32.mrb[113].mxu1 }
 0x8b3   :  { %v14294_v16 = vpop.f32.mrb[145].mxu0  ;;  %v10188_v50 = vpop.eup %10187  ;;  %v5554_v5 = vadd.f32 1.0, %v10186_v25  ;;  %10207 = vpow2.f32 %v7577_v13  ;;  %v9315_v32 = vadd.f32 %v15547_v38, %v4920_v60  ;;  %v7546_v3 = vmul.f32 -1.442695, %v9313_v26 }
 0x8b4   :  { %v4922_v0 = vpop.f32.mrb[114].mxu1  ;;  %v14297_v59 = vpop.f32.mrb[146].mxu0  ;;  %10209 = vtanh.f32 %v5679_v41  ;;  %v5331_v49 = vadd.f32 1.0, %v10188_v50  ;;  %v4726_v13 = vadd.f32 %v14100_v15, %v15549_v17  ;;  %v5083_v25 = vadd.f32 %v14237_v29, %v15548_v31 }
 0x8b5   :  { %15550 = vst [vmem:[#allocation49_spill] sm:$0xff] %v14297_v59  ;;  %v10190_v52 = vpop.eup %10189  ;;  %v4924_v62 = vpop.f32.mrb[115].mxu1  ;;  %10211 = vrcp.f32 %v5330_v11  ;;  %v7578_v50 = vmul.f32 -1.442695, %v9315_v32  ;;  %v4729_v11 = vadd.f32 %v14105_v12, %v15549_v17  ;;  %v4734_v15 = vadd.f32 %v14119_v34, %v15549_v17 }
 0x8b6   :  { %v14301_v8 = vpop.f32.mrb[147].mxu0  ;;  %v10192_v53 = vpop.eup %10191  ;;  %v5555_v20 = vadd.f32 1.0, %v10190_v52  ;;  %10213 = vrcp.f32 %v5554_v5  ;;  %v14317_v29 = vadd.f32 %v14123_v30, %v15549_v17  ;;  %v9317_v5 = vadd.f32 %v15546_v56, %v4922_v0 }
 0x8b7   :  { %v14303_v6 = vpop.eup %10193  ;;  %v5648_v60 = vmul.f32 %v10192_v53, %v5080_v43  ;;  %10215 = vrcp.f32 %v5331_v49  ;;  %v5088_v30 = vadd.f32 %v14246_v36, %v15548_v31 }
 0x8b8   :  { %v10196_v57 = vpop.eup %10195  ;;  %10217 = vrcp.f32 %v5555_v20  ;;  %v4928_v32 = vpop.f32.mrb[116].mxu1  ;;  %v9319_v20 = vadd.f32 %v15547_v38, %v4924_v62  ;;  %v7547_v36 = vmul.f32 -1.442695, %v9317_v5  ;;  %v5091_v5 = vadd.f32 %v14252_v33, %v15548_v31 }
 0x8b9   :  { %v14309_v41 = vpop.eup %10197  ;;  %v5680_v52 = vadd.f32 %v5648_v60, %v4726_v13  ;;  %v5649_v26 = vmul.f32 %v10196_v57, %v5083_v25  ;;  %10219 = vpow2.f32 %v7546_v3  ;;  %v14320_v43 = vpop.f32.mrb[148].mxu0  ;;  %v9321_v0 = vadd.f32 %v15546_v56, %v4928_v32 }
 0x8ba   :  { %v10200_v7 = vpop.eup %10199  ;;  %15551 = vst [vmem:[#allocation51_spill] sm:$0xff] %v14320_v43  ;;  %v4930_v13 = vpop.f32.mrb[117].mxu1 }
 0x8bb   :  { %v10202_v49 = vpop.eup %10201  ;;  %10221 = vtanh.f32 %v5680_v52  ;;  %v5681_v12 = vadd.f32 %v5649_v26, %v4729_v11  ;;  %v5332_v53 = vadd.f32 1.0, %v10200_v7  ;;  %v14323_v25 = vpop.f32.mrb[149].mxu0  ;;  %v9323_v7 = vadd.f32 %v15547_v38, %v4930_v13 }
 0x8bc   :  { %15552 = vst [vmem:[#allocation38_spill] sm:$0xff] %v14323_v25  ;;  %v10204_v34 = vpop.eup %10203  ;;  %v5556_v60 = vadd.f32 1.0, %v10202_v49  ;;  %10223 = vpow2.f32 %v7578_v50  ;;  %v4932_v3 = vpop.f32.mrb[118].mxu1  ;;  %v5742_v26 = vsub.f32 1.0, %v14283_v51  ;;  %v5743_v50 = vsub.f32 1.0, %v14287_v44  ;;  %v15555_v49 = vld [vmem:[#allocation50_spill] sm:$0xff] }
 0x8bd   :  { %v14328_v57 = vpop.f32.mrb[150].mxu0  ;;  %v10206_v43 = vpop.eup %10205  ;;  %10225 = vtanh.f32 %v5681_v12  ;;  %v5333_v11 = vadd.f32 1.0, %v10204_v34  ;;  %v5806_v32 = vmul.f32 %v14283_v51, %v15555_v49  ;;  %v7579_v12 = vmul.f32 -1.442695, %v9319_v20  ;;  %v15556_v34 = vld [vmem:[#allocation53_spill] sm:$0xff] }
 0x8be   :  { %15553 = vst [vmem:[#allocation57_spill] sm:$0xff] %v14328_v57  ;;  %v4934_v62 = vpop.f32.mrb[119].mxu1  ;;  %v14331_v52 = vpop.f32.mrb[151].mxu0  ;;  %10227 = vrcp.f32 %v5332_v53  ;;  %v5807_v13 = vmul.f32 %v14287_v44, %v15556_v34  ;;  %v5774_v25 = vmul.f32 %v10206_v43, %v5742_v26  ;;  %v7580_v51 = vmul.f32 -1.442695, %v9323_v7 }
 0x8bf   :  { %15554 = vst [vmem:[#allocation78_spill] sm:$0xff] %v14331_v52  ;;  %v10208_v40 = vpop.eup %10207  ;;  %10229 = vrcp.f32 %v5556_v60  ;;  %v7548_v52 = vmul.f32 -1.442695, %v9321_v0  ;;  %v9327_v26 = vadd.f32 %v15547_v38, %v4934_v62 }
 0x8c0   :  { %v10210_v1 = vpop.eup %10209  ;;  %v5557_v57 = vadd.f32 1.0, %v10208_v40  ;;  %10231 = vrcp.f32 %v5333_v11  ;;  %v9325_v40 = vadd.f32 %v15546_v56, %v4932_v3  ;;  %v4938_v20 = vpop.f32.mrb[120].mxu1  ;;  %v5838_v44 = vadd.f32 %v5806_v32, %v5774_v25 }
 0x8c1   :  { %v10212_v21 = vpop.eup %10211  ;;  %v5775_v59 = vmul.f32 %v10210_v1, %v5743_v50  ;;  %v14344_v60 = vpop.f32.mrb[152].mxu0  ;;  %v5744_v3 = vsub.f32 1.0, %v14303_v6  ;;  %v9329_v25 = vadd.f32 %v15546_v56, %v4938_v20 }
 0x8c2   :  { %v14339_v63 = vpop.eup %10213  ;;  %v5650_v53 = vmul.f32 %v10212_v21, %v5088_v30  ;;  %10233 = vrcp.f32 %v5557_v57  ;;  %v4940_v33 = vpop.f32.mrb[121].mxu1  ;;  %v5096_v57 = vadd.f32 %v14243_v2, %v15548_v31 }
 0x8c3   :  { %v10216_v49 = vpop.eup %10215  ;;  %10235 = vpow2.f32 %v7547_v36  ;;  %v5839_v11 = vadd.f32 %v5807_v13, %v5775_v59  ;;  %v14349_v21 = vpop.f32.mrb[153].mxu0  ;;  %v15558_v36 = vld [vmem:[#allocation55_spill] sm:$0xff] }
 0x8c4   :  { %v14346_v0 = vpop.eup %10217  ;;  %v5682_v1 = vadd.f32 %v5650_v53, %v4734_v15  ;;  %v5651_v43 = vmul.f32 %v10216_v49, %v5091_v5  ;;  %10237 = vpow2.f32 %v7579_v12  ;;  %v4942_v59 = vpop.f32.mrb[122].mxu1  ;;  %v5808_v50 = vmul.f32 %v14303_v6, %v15558_v36  ;;  %v15559_v49 = vld [vmem:[#allocation56_spill] sm:$0xff] }
 0x8c5   :  { %v10220_v30 = vpop.eup %10219  ;;  %10239 = vpow2.f32 %v7548_v52  ;;  %v14355_v7 = vpop.f32.mrb[154].mxu0  ;;  %v5745_v52 = vsub.f32 1.0, %v14309_v41  ;;  %v7549_v5 = vmul.f32 -1.442695, %v9325_v40  ;;  %v5809_v20 = vmul.f32 %v14309_v41, %v15559_v49 }
 0x8c6   :  { %15557 = vst [vmem:[#allocation81_spill] sm:$0xff] %v14355_v7  ;;  %v10222_v15 = vpop.eup %10221  ;;  %10241 = vtanh.f32 %v5682_v1  ;;  %v5683_v62 = vadd.f32 %v5651_v43, %v14317_v29  ;;  %v5334_v32 = vadd.f32 1.0, %v10220_v30  ;;  %v4944_v12 = vpop.f32.mrb[123].mxu1  ;;  %v7581_v7 = vmul.f32 -1.442695, %v9327_v26 }
 0x8c7   :  { %v14360_v34 = vpop.f32.mrb[155].mxu0  ;;  %v10224_v2 = vpop.eup %10223  ;;  %v5776_v13 = vmul.f32 %v10222_v15, %v5744_v3  ;;  %10243 = vpow2.f32 %v7580_v51  ;;  %v9331_v6 = vadd.f32 %v15547_v38, %v4940_v33  ;;  %v7550_v30 = vmul.f32 -1.442695, %v9329_v25 }
 0x8c8   :  { %v10226_v53 = vpop.eup %10225  ;;  %10245 = vtanh.f32 %v5683_v62  ;;  %v4742_v3 = vadd.f32 %v14116_v45, %v15549_v17  ;;  %v5099_v51 = vadd.f32 %v14249_v24, %v15548_v31  ;;  %v4745_v41 = vadd.f32 %v14121_v54, %v15549_v17  ;;  %v14374_v62 = vpop.f32.mrb[156].mxu0 }
 0x8c9   :  { %v10228_v1 = vpop.eup %10227  ;;  %v5840_v29 = vadd.f32 %v5808_v50, %v5776_v13  ;;  %v5777_v43 = vmul.f32 %v10226_v53, %v5745_v52  ;;  %10247 = vrcp.f32 %v5334_v32  ;;  %v5558_v33 = vadd.f32 1.0, %v10224_v2  ;;  %v4948_v50 = vpop.f32.mrb[124].mxu1  ;;  %15560 = vst [vmem:[#allocation8_spill] sm:$0xff] %v14374_v62 }
 0x8ca   :  { %v14366_v36 = vpop.eup %10229  ;;  %v5652_v40 = vmul.f32 %v10228_v1, %v5096_v57  ;;  %10249 = vpow2.f32 %v7549_v5  ;;  %v5870_v45 = vpack.c.bf16 %v5839_v11, %v5838_v44  ;;  %v4950_v52 = vpop.f32.mrb[125].mxu1  ;;  %v7582_v49 = vmul.f32 -1.442695, %v9331_v6 }
 0x8cb   :  { %v10232_v15 = vpop.eup %10231  ;;  %v5841_v26 = vadd.f32 %v5809_v20, %v5777_v43  ;;  %10251 = vpow2.f32 %v7581_v7  ;;  %v14378_v53 = vpop.f32.mrb[157].mxu0  ;;  %v9333_v54 = vadd.f32 %v15546_v56, %v4942_v59  ;;  %v4750_v6 = vadd.f32 %v14146_v42, %v15549_v17 }
 0x8cc   :  { %v14376_v25 = vpop.eup %10233  ;;  %v5684_v32 = vadd.f32 %v5652_v40, %v4742_v3  ;;  %v5653_v13 = vmul.f32 %v10232_v15, %v5099_v51  ;;  %10253 = vpow2.f32 %v7550_v30  ;;  %v4952_v2 = vpop.f32.mrb[126].mxu1  ;;  %v9335_v3 = vadd.f32 %v15547_v38, %v4944_v12  ;;  %8966 = vmatprep.mubr.bf16.mxu0 %v5870_v45  ;;  %9014 = vmatprep.mubr.bf16.mxu1 %v5870_v45 }
 0x8cd   :  { %v10236_v24 = vpop.eup %10235  ;;  %v5871_v57 = vpack.c.bf16 %v5841_v26, %v5840_v29  ;;  %v14381_v5 = vpop.f32.mrb[158].mxu0  ;;  %v9337_v59 = vadd.f32 %v15546_v56, %v4948_v50  ;;  %v14391_v30 = vadd.f32 %v14150_v9, %v15549_v17  ;;  %v5104_v15 = vadd.f32 %v14258_v10, %v15548_v31 }
 0x8ce   :  { %15561 = vst [vmem:[#allocation9_spill] sm:$0xff] %v14381_v5  ;;  %v10238_v20 = vpop.eup %10237  ;;  %10255 = vtanh.f32 %v5684_v32  ;;  %v5685_v1 = vadd.f32 %v5653_v13, %v4745_v41  ;;  %v5335_v43 = vadd.f32 1.0, %v10236_v24  ;;  %v4954_v44 = vpop.f32.mrb[127].mxu1  ;;  %v7551_v41 = vmul.f32 -1.442695, %v9333_v54  ;;  %v15562_v54 = vld [vmem:[#allocation62_spill] sm:$0xff] }
 0x8cf   :  { %v14384_v11 = vpop.f32.mrb[159].mxu0  ;;  %v10240_v7 = vpop.eup %10239  ;;  %10257 = vrcp.f32 %v5558_v33  ;;  %8967 = vmatmul.mubr.bf16.vlgmr.msra.gmra.mrb[160].mxu0 %v5871_v57  ;;  %9015 = vmatmul.mubr.bf16.vlgmr.msra.gmra.mrb[160].mxu1 %v5871_v57  ;;  %v5559_v12 = vadd.f32 1.0, %v10238_v20  ;;  %v5746_v42 = vsub.f32 1.0, %v14339_v63  ;;  %v5107_v33 = vadd.f32 %v14264_v46, %v15548_v31 }
 0x8d0   :  { %v10242_v29 = vpop.eup %10241  ;;  %10259 = vtanh.f32 %v5685_v1  ;;  %v5336_v51 = vadd.f32 1.0, %v10240_v7  ;;  %v7583_v50 = vmul.f32 -1.442695, %v9335_v3  ;;  %v9339_v9 = vadd.f32 %v15547_v38, %v4950_v52  ;;  %v4958_v45 = vpop.f32.mrb[128].mxu1 }
 0x8d1   :  { %v10244_v40 = vpop.eup %10243  ;;  %10261 = vrcp.f32 %v5335_v43  ;;  %v7552_v13 = vmul.f32 -1.442695, %v9337_v59  ;;  %v5747_v24 = vsub.f32 1.0, %v14346_v0  ;;  %v5778_v57 = vmul.f32 %v10242_v29, %v5746_v42  ;;  %v4960_v43 = vpop.f32.mrb[129].mxu1 }
 0x8d2   :  { %v10246_v26 = vpop.eup %10245  ;;  %10263 = vpow2.f32 %v7582_v49  ;;  %v5748_v10 = vsub.f32 1.0, %v14366_v36  ;;  %v5812_v20 = vmul.f32 %v14366_v36, %v15562_v54  ;;  %v5749_v49 = vsub.f32 1.0, %v14376_v25  ;;  %v4962_v3 = vpop.f32.mrb[130].mxu1 }
 0x8d3   :  { %v10248_v32 = vpop.eup %10247  ;;  %10265 = vrcp.f32 %v5336_v51  ;;  %v9341_v52 = vadd.f32 %v15546_v56, %v4952_v2  ;;  %v5779_v7 = vmul.f32 %v10246_v26, %v5747_v24  ;;  %v5560_v5 = vadd.f32 1.0, %v10244_v40  ;;  %v14405_v42 = vpop.f32.mrb[131].mxu1  ;;  %v15564_v26 = vld [vmem:[#allocation60_spill] sm:$0xff] }
 0x8d4   :  { %v5654_v1 = vmul.f32 %v10248_v32, %v5104_v15  ;;  %10267 = vrcp.f32 %v5559_v12  ;;  %v10250_v46 = vpop.eup %10249  ;;  %v7584_v36 = vmul.f32 -1.442695, %v9339_v9  ;;  %v9343_v12 = vadd.f32 %v15547_v38, %v4954_v44  ;;  %v15563_v15 = vld [vmem:[#allocation59_spill] sm:$0xff] }
 0x8d5   :  { %10269 = vpow2.f32 %v7551_v41  ;;  %v10252_v59 = vpop.eup %10251  ;;  %v5337_v29 = vadd.f32 1.0, %v10250_v46  ;;  %v5810_v32 = vmul.f32 %v14339_v63, %v15563_v15  ;;  %v9345_v24 = vadd.f32 %v15546_v56, %v4958_v45 }
 0x8d6   :  { %v5686_v51 = vadd.f32 %v5654_v1, %v4750_v6  ;;  %10271 = vpow2.f32 %v7583_v50  ;;  %v10254_v62 = vpop.eup %10253  ;;  %v5561_v2 = vadd.f32 1.0, %v10252_v59  ;;  %v5811_v6 = vmul.f32 %v14346_v0, %v15564_v26  ;;  %v15565_v1 = vld [vmem:[#allocation63_spill] sm:$0xff] }
 0x8d7   :  { %10273 = vpow2.f32 %v7552_v13  ;;  %v5338_v54 = vadd.f32 1.0, %v10254_v62  ;;  %v5842_v13 = vadd.f32 %v5810_v32, %v5778_v57  ;;  %v5813_v44 = vmul.f32 %v14376_v25, %v15565_v1 }
 0x8d8   :  { %v10256_v41 = vpop.eup %10255  ;;  %10275 = vtanh.f32 %v5686_v51  ;;  %v7553_v63 = vmul.f32 -1.442695, %v9341_v52  ;;  %v5843_v46 = vadd.f32 %v5811_v6, %v5779_v7  ;;  %v7585_v15 = vmul.f32 -1.442695, %v9343_v12  ;;  %v4968_v0 = vpop.f32.mrb[132].mxu1 }
 0x8d9   :  { %v14412_v40 = vpop.eup %10257  ;;  %v5780_v50 = vmul.f32 %v10256_v41, %v5748_v10  ;;  %10277 = vrcp.f32 %v5337_v29  ;;  %v5112_v10 = vadd.f32 %v14255_v14, %v15548_v31  ;;  %v14419_v57 = vpop.f32.mrb[133].mxu1  ;;  %v4758_v25 = vadd.f32 %v14143_v37, %v15549_v17 }
 0x8da   :  { %v10260_v9 = vpop.eup %10259  ;;  %10279 = vrcp.f32 %v5560_v5  ;;  %v5872_v45 = vpack.c.bf16 %v5843_v46, %v5842_v13  ;;  %v9347_v14 = vadd.f32 %v15547_v38, %v4960_v43  ;;  %v9349_v37 = vadd.f32 %v15546_v56, %v4962_v3 }
 0x8db   :  { %v10262_v51 = vpop.eup %10261  ;;  %v5844_v59 = vadd.f32 %v5812_v20, %v5780_v50  ;;  %v5781_v62 = vmul.f32 %v10260_v9, %v5749_v49  ;;  %10281 = vrcp.f32 %v5338_v54  ;;  %v7554_v20 = vmul.f32 -1.442695, %v9345_v24  ;;  %v14423_v49 = vpop.f32.mrb[134].mxu1 }
 0x8dc   :  { %v10264_v26 = vpop.eup %10263  ;;  %v5655_v29 = vmul.f32 %v10262_v51, %v5107_v33  ;;  %10283 = vrcp.f32 %v5561_v2  ;;  %8970 = vmatprep.mubr.bf16.mxu0 %v5872_v45  ;;  %9018 = vmatprep.mubr.bf16.mxu1 %v5872_v45  ;;  %v14429_v33 = vpop.f32.mrb[135].mxu1  ;;  %v5750_v43 = vsub.f32 1.0, %v14412_v40  ;;  %v5115_v9 = vadd.f32 %v14261_v48, %v15548_v31 }
 0x8dd   :  { %v10266_v32 = vpop.eup %10265  ;;  %v5845_v5 = vadd.f32 %v5813_v44, %v5781_v62  ;;  %10285 = vpow2.f32 %v7584_v36  ;;  %v5562_v6 = vadd.f32 1.0, %v10264_v26  ;;  %v7586_v1 = vmul.f32 -1.442695, %v9347_v14 }
 0x8de   :  { %v14425_v52 = vpop.eup %10267  ;;  %v5687_v7 = vadd.f32 %v5655_v29, %v14391_v30  ;;  %v5656_v12 = vmul.f32 %v10266_v32, %v5112_v10  ;;  %10287 = vpow2.f32 %v7553_v63  ;;  %v4761_v30 = vadd.f32 %v14148_v55, %v15549_v17 }
 0x8df   :  { %v10270_v41 = vpop.eup %10269  ;;  %v5873_v2 = vpack.c.bf16 %v5845_v5, %v5844_v59  ;;  %10289 = vpow2.f32 %v7585_v15  ;;  %v7555_v63 = vmul.f32 -1.442695, %v9349_v37  ;;  %v9351_v46 = vadd.f32 %v15547_v38, %v14405_v42 }
 0x8e0   :  { %v10272_v36 = vpop.eup %10271  ;;  %10291 = vtanh.f32 %v5687_v7  ;;  %v5688_v54 = vadd.f32 %v5656_v12, %v4758_v25  ;;  %v5339_v50 = vadd.f32 1.0, %v10270_v41  ;;  %v14439_v51 = vpop.f32.mrb[136].mxu1  ;;  %v14443_v62 = vadd.f32 %v14172_v39, %v15549_v17 }
 0x8e1   :  { %v10274_v24 = vpop.eup %10273  ;;  %10293 = vpow2.f32 %v7554_v20  ;;  %8971 = vmatmul.mubr.bf16.gmra.mrb[164].mxu0 %v5873_v2  ;;  %9019 = vmatmul.mubr.bf16.gmra.mrb[164].mxu1 %v5873_v2  ;;  %v5120_v48 = vadd.f32 %v14270_v22, %v15548_v31  ;;  %v14447_v26 = vpop.f32.mrb[137].mxu1  ;;  %v4766_v29 = vadd.f32 %v14181_v27, %v15549_v17  ;;  %v5563_v42 = vadd.f32 1.0, %v10272_v36  ;;  %v15566_v20 = vld [vmem:[#allocation65_spill] sm:$0xff] }
 0x8e2   :  { %v10276_v13 = vpop.eup %10275  ;;  %10295 = vtanh.f32 %v5688_v54  ;;  %v5340_v3 = vadd.f32 1.0, %v10274_v24  ;;  %v9353_v45 = vadd.f32 %v15546_v56, %v4968_v0  ;;  %v14452_v32 = vpop.f32.mrb[138].mxu1  ;;  %v5814_v7 = vmul.f32 %v14412_v40, %v15566_v20 }
 0x8e3   :  { %v10278_v44 = vpop.eup %10277  ;;  %10297 = vrcp.f32 %v5339_v50  ;;  %v5782_v55 = vmul.f32 %v10276_v13, %v5750_v43  ;;  %v14456_v22 = vpop.f32.mrb[139].mxu1  ;;  %v4769_v27 = vadd.f32 %v14185_v47, %v15549_v17  ;;  %v7587_v14 = vmul.f32 -1.442695, %v9351_v46 }
 0x8e4   :  { %v10280_v59 = vpop.eup %10279  ;;  %v5657_v15 = vmul.f32 %v10278_v44, %v5115_v9  ;;  %10299 = vrcp.f32 %v5562_v6  ;;  %v9355_v0 = vadd.f32 %v15547_v38, %v14419_v57  ;;  %v5751_v37 = vsub.f32 1.0, %v14425_v52 }
 0x8e5   :  { %v10282_v10 = vpop.eup %10281  ;;  %10301 = vrcp.f32 %v5340_v3  ;;  %v5846_v36 = vadd.f32 %v5814_v7, %v5782_v55  ;;  %v9357_v40 = vadd.f32 %v15546_v56, %v14423_v49  ;;  %v5123_v47 = vadd.f32 %v14278_v35, %v15548_v31  ;;  %v15567_v3 = vld [vmem:[#allocation66_spill] sm:$0xff]  ;;  %v15568_v49 = vld [vmem:[#allocation68_spill] sm:$0xff] }
 0x8e6   :  { %v14454_v25 = vpop.eup %10283  ;;  %v5689_v39 = vadd.f32 %v5657_v15, %v4761_v30  ;;  %v5658_v5 = vmul.f32 %v10282_v10, %v5120_v48  ;;  %10303 = vpow2.f32 %v7586_v1  ;;  %v7556_v30 = vmul.f32 -1.442695, %v9353_v45 }
 0x8e7   :  { %v10286_v12 = vpop.eup %10285  ;;  %10305 = vpow2.f32 %v7555_v63  ;;  %v9359_v57 = vadd.f32 %v15547_v38, %v14429_v33  ;;  %v5752_v13 = vsub.f32 1.0, %v10280_v59  ;;  %v5815_v1 = vmul.f32 %v14425_v52, %v15567_v3 }
 0x8e8   :  { %v10288_v41 = vpop.eup %10287  ;;  %10307 = vtanh.f32 %v5689_v39  ;;  %v5690_v2 = vadd.f32 %v5658_v5, %v4766_v29  ;;  %v5564_v6 = vadd.f32 1.0, %v10286_v12  ;;  %v14473_v44 = vpop.f32.mrb[140].mxu1  ;;  %v5816_v46 = vmul.f32 %v10280_v59, %v15568_v49 }
 0x8e9   :  { %v10290_v54 = vpop.eup %10289  ;;  %10309 = vrcp.f32 %v5563_v42  ;;  %v5341_v50 = vadd.f32 1.0, %v10288_v41  ;;  %v7588_v35 = vmul.f32 -1.442695, %v9355_v0  ;;  %v14476_v48 = vpop.f32.mrb[141].mxu1  ;;  %v7557_v33 = vmul.f32 -1.442695, %v9357_v40 }
 0x8ea   :  { %v10292_v24 = vpop.eup %10291  ;;  %10311 = vtanh.f32 %v5690_v2  ;;  %v14478_v42 = vpop.f32.mrb[142].mxu1  ;;  %v5128_v52 = vadd.f32 %v14267_v18, %v15548_v31  ;;  %v7589_v5 = vmul.f32 -1.442695, %v9359_v57  ;;  %v5565_v12 = vadd.f32 1.0, %v10290_v54 }
 0x8eb   :  { %v10294_v43 = vpop.eup %10293  ;;  %10313 = vpow2.f32 %v7587_v14  ;;  %v5783_v9 = vmul.f32 %v10292_v24, %v5751_v37  ;;  %v14482_v59 = vpop.f32.mrb[143].mxu1  ;;  %v9361_v37 = vadd.f32 %v15546_v56, %v14439_v51  ;;  %v5753_v18 = vsub.f32 1.0, %v14454_v25 }
 0x8ec   :  { %v10296_v63 = vpop.eup %10295  ;;  %10315 = vrcp.f32 %v5341_v50  ;;  %v5342_v55 = vadd.f32 1.0, %v10294_v43  ;;  %v9363_v50 = vadd.f32 %v15547_v38, %v14447_v26  ;;  %v9365_v40 = vadd.f32 %v15546_v56, %v14452_v32 }
 0x8ed   :  { %v10298_v15 = vpop.eup %10297  ;;  %v5784_v10 = vmul.f32 %v10296_v63, %v5752_v13  ;;  %10317 = vrcp.f32 %v5564_v6  ;;  %v5847_v29 = vadd.f32 %v5815_v1, %v5783_v9  ;;  %v4777_v32 = vadd.f32 %v14183_v58, %v15549_v17 }
 0x8ee   :  { %v10300_v45 = vpop.eup %10299  ;;  %v5659_v39 = vmul.f32 %v10298_v15, %v5123_v47  ;;  %10319 = vrcp.f32 %v5342_v55  ;;  %v5131_v9 = vadd.f32 %v14275_v4, %v15548_v31  ;;  %v7590_v49 = vmul.f32 -1.442695, %v9363_v50 }
 0x8ef   :  { %v10302_v20 = vpop.eup %10301  ;;  %v5848_v7 = vadd.f32 %v5816_v46, %v5784_v10  ;;  %10321 = vpow2.f32 %v7556_v30  ;;  %v5874_v14 = vpack.c.bf16 %v5847_v29, %v5846_v36  ;;  %v15569_v30 = vld [vmem:[#allocation69_spill] sm:$0xff]  ;;  %v5754_v26 = vsub.f32 1.0, %v10300_v45 }
 0x8f0   :  { %v10304_v0 = vpop.eup %10303  ;;  %v5691_v41 = vadd.f32 %v5659_v39, %v4769_v27  ;;  %v5660_v2 = vmul.f32 %v10302_v20, %v5128_v52  ;;  %10323 = vpow2.f32 %v7588_v35  ;;  %v5817_v57 = vmul.f32 %v14454_v25, %v15569_v30  ;;  %v14494_v43 = vpop.f32.mrb[144].mxu1  ;;  %v15571_v30 = vld [vmem:[#allocation72_spill] sm:$0xff] }
 0x8f1   :  { %v10306_v6 = vpop.eup %10305  ;;  %10325 = vpow2.f32 %v7557_v33  ;;  %8974 = vmatprep.mubr.bf16.mxu0 %v5874_v14  ;;  %9022 = vmatprep.mubr.bf16.mxu1 %v5874_v14  ;;  %v5566_v54 = vadd.f32 1.0, %v10304_v0  ;;  %v14500_v3 = vpop.f32.mrb[145].mxu1  ;;  %v4782_v35 = vadd.f32 %v14201_v61, %v15549_v17  ;;  %v5136_v58 = vadd.f32 %v14294_v16, %v15548_v31  ;;  %v15570_v16 = vld [vmem:[#allocation71_spill] sm:$0xff] }
 0x8f2   :  { %v10308_v36 = vpop.eup %10307  ;;  %10327 = vtanh.f32 %v5691_v41  ;;  %v5692_v27 = vadd.f32 %v5660_v2, %v14443_v62  ;;  %v5343_v24 = vadd.f32 1.0, %v10306_v6  ;;  %v7558_v62 = vmul.f32 -1.442695, %v9361_v37  ;;  %v14502_v25 = vpop.f32.mrb[146].mxu1 }
 0x8f3   :  { %v10310_v47 = vpop.eup %10309  ;;  %v5785_v51 = vmul.f32 %v10308_v36, %v5753_v18  ;;  %10329 = vrcp.f32 %v5565_v12  ;;  %v7559_v4 = vmul.f32 -1.442695, %v9365_v40  ;;  %v14508_v15 = vpop.f32.mrb[147].mxu1  ;;  %v9367_v52 = vadd.f32 %v15547_v38, %v14456_v22 }
 0x8f4   :  { %v10312_v13 = vpop.eup %10311  ;;  %10331 = vtanh.f32 %v5692_v27  ;;  %v4785_v20 = vadd.f32 %v14205_v23, %v15549_v17  ;;  %v9369_v61 = vadd.f32 %v15546_v56, %v14473_v44  ;;  %v5818_v12 = vmul.f32 %v10300_v45, %v15570_v16 }
 0x8f5   :  { %v10314_v1 = vpop.eup %10313  ;;  %v5849_v63 = vadd.f32 %v5817_v57, %v5785_v51  ;;  %10333 = vrcp.f32 %v5343_v24  ;;  %v5786_v46 = vmul.f32 %v10312_v13, %v5754_v26  ;;  %v7591_v44 = vmul.f32 -1.442695, %v9367_v52 }
 0x8f6   :  { %v10316_v55 = vpop.eup %10315  ;;  %10335 = vrcp.f32 %v5566_v54  ;;  %v5755_v18 = vsub.f32 1.0, %v10310_v47  ;;  %v7560_v36 = vmul.f32 -1.442695, %v9369_v61  ;;  %v5819_v57 = vmul.f32 %v10310_v47, %v15571_v30 }
 0x8f7   :  { %v10318_v10 = vpop.eup %10317  ;;  %v5875_v33 = vpack.c.bf16 %v5849_v63, %v5848_v7  ;;  %v5661_v29 = vmul.f32 %v10316_v55, %v5131_v9  ;;  %10337 = vpow2.f32 %v7589_v5  ;;  %v9373_v5 = vadd.f32 %v15546_v56, %v14478_v42 }
 0x8f8   :  { %v10320_v39 = vpop.eup %10319  ;;  %10339 = vpow2.f32 %v7558_v62  ;;  %v5567_v7 = vadd.f32 1.0, %v10314_v1  ;;  %v5850_v23 = vadd.f32 %v5818_v12, %v5786_v46  ;;  %v14519_v45 = vpop.f32.mrb[148].mxu1  ;;  %v9371_v42 = vadd.f32 %v15547_v38, %v14476_v48 }
 0x8f9   :  { %v10322_v14 = vpop.eup %10321  ;;  %v5693_v0 = vadd.f32 %v5661_v29, %v4777_v32  ;;  %v5662_v41 = vmul.f32 %v10320_v39, %v5136_v58  ;;  %10341 = vpow2.f32 %v7590_v49  ;;  %8975 = vmatmul.mubr.bf16.gmra.mrb[168].mxu0 %v5875_v33  ;;  %9023 = vmatmul.mubr.bf16.gmra.mrb[168].mxu1 %v5875_v33  ;;  %v14523_v27 = vpop.f32.mrb[149].mxu1  ;;  %v5756_v24 = vsub.f32 1.0, %v10318_v10  ;;  %v15572_v49 = vld [vmem:[#allocation74_spill] sm:$0xff] }
 0x8fa   :  { %v10324_v22 = vpop.eup %10323  ;;  %v5344_v2 = vadd.f32 1.0, %v10322_v14  ;;  %10343 = vpow2.f32 %v7559_v4  ;;  %v14526_v26 = vpop.f32.mrb[150].mxu1  ;;  %v5139_v32 = vadd.f32 %v14301_v8, %v15548_v31  ;;  %v7561_v62 = vmul.f32 -1.442695, %v9373_v5 }
 0x8fb   :  { %v10326_v37 = vpop.eup %10325  ;;  %10345 = vtanh.f32 %v5693_v0  ;;  %v5694_v6 = vadd.f32 %v5662_v41, %v4782_v35  ;;  %v5568_v9 = vadd.f32 1.0, %v10324_v22  ;;  %v14530_v1 = vpop.f32.mrb[151].mxu1  ;;  %v5820_v46 = vmul.f32 %v10318_v10, %v15572_v49 }
 0x8fc   :  { %v10328_v50 = vpop.eup %10327  ;;  %10347 = vrcp.f32 %v5344_v2  ;;  %v5345_v40 = vadd.f32 1.0, %v10326_v37  ;;  %v7592_v47 = vmul.f32 -1.442695, %v9371_v42  ;;  %v9375_v4 = vadd.f32 %v15547_v38, %v14482_v59  ;;  %v15575_v42 = vld [vmem:[#allocation49_spill] sm:$0xff] }
 0x8fd   :  { %v10330_v54 = vpop.eup %10329  ;;  %10349 = vtanh.f32 %v5694_v6  ;;  %v5787_v51 = vmul.f32 %v10328_v50, %v5755_v18  ;;  %v9377_v29 = vadd.f32 %v15546_v56, %v14494_v43  ;;  %v4790_v16 = vadd.f32 %v14199_v28, %v15549_v17 }
 0x8fe   :  { %v10332_v13 = vpop.eup %10331  ;;  %10351 = vrcp.f32 %v5567_v7  ;;  %v5144_v41 = vadd.f32 %v14291_v19, %v15548_v31  ;;  %v5757_v43 = vsub.f32 1.0, %v10330_v54  ;;  %v7593_v7 = vmul.f32 -1.442695, %v9375_v4 }
 0x8ff   :  { %v10334_v48 = vpop.eup %10333  ;;  %v5788_v63 = vmul.f32 %v10332_v13, %v5756_v24  ;;  %10353 = vrcp.f32 %v5345_v40  ;;  %v5851_v55 = vadd.f32 %v5819_v57, %v5787_v51  ;;  %v7562_v2 = vmul.f32 -1.442695, %v9377_v29 }
 0x900   :  { %v10336_v35 = vpop.eup %10335  ;;  %v5663_v58 = vmul.f32 %v10334_v48, %v5139_v32  ;;  %10355 = vpow2.f32 %v7591_v44  ;;  %v14539_v59 = vpop.f32.mrb[152].mxu1  ;;  %v15573_v44 = vld [vmem:[#allocation75_spill] sm:$0xff]  ;;  %v5147_v24 = vadd.f32 %v15575_v42, %v15548_v31  ;;  %v15576_v48 = vld [vmem:[#allocation76_spill] sm:$0xff]  ;;  %v9383_v4 = vadd.f32 %v15547_v38, %v14508_v15 }
 0x901   :  { %v10338_v33 = vpop.eup %10337  ;;  %v5852_v8 = vadd.f32 %v5820_v46, %v5788_v63  ;;  %10357 = vpow2.f32 %v7560_v36  ;;  %v5876_v52 = vpack.c.bf16 %v5851_v55, %v5850_v23  ;;  %v14545_v5 = vpop.f32.mrb[153].mxu1  ;;  %v5821_v18 = vmul.f32 %v10330_v54, %v15573_v44 }
 0x902   :  { %v10340_v39 = vpop.eup %10339  ;;  %v5695_v61 = vadd.f32 %v5663_v58, %v4785_v20  ;;  %10359 = vrcp.f32 %v5568_v9  ;;  %v5569_v12 = vadd.f32 1.0, %v10338_v33  ;;  %v9379_v20 = vadd.f32 %v15547_v38, %v14500_v3  ;;  %v14547_v23 = vpop.f32.mrb[154].mxu1  ;;  %v15574_v3 = vld [vmem:[#allocation30_spill] sm:$0xff] }
 0x903   :  { %v10342_v10 = vpop.eup %10341  ;;  %v5346_v14 = vadd.f32 1.0, %v10340_v39  ;;  %10361 = vpow2.f32 %v7561_v62  ;;  %8978 = vmatprep.mubr.bf16.mxu0 %v5876_v52  ;;  %9026 = vmatprep.mubr.bf16.mxu1 %v5876_v52  ;;  %v14550_v19 = vpop.f32.mrb[155].mxu1  ;;  %v5758_v50 = vsub.f32 1.0, %v10336_v35  ;;  %v4793_v36 = vadd.f32 %v15574_v3, %v15549_v17 }
 0x904   :  { %v10344_v0 = vpop.eup %10343  ;;  %10363 = vtanh.f32 %v5695_v61  ;;  %v7594_v13 = vmul.f32 -1.442695, %v9379_v20  ;;  %v5570_v62 = vadd.f32 1.0, %v10342_v10  ;;  %v5822_v63 = vmul.f32 %v10336_v35, %v15576_v48 }
 0x905   :  { %v10346_v22 = vpop.eup %10345  ;;  %v5347_v28 = vadd.f32 1.0, %v10344_v0  ;;  %10365 = vpow2.f32 %v7592_v47  ;;  %v9381_v58 = vadd.f32 %v15546_v56, %v14502_v25  ;;  %v9385_v33 = vadd.f32 %v15546_v56, %v14519_v45  ;;  %v15577_v45 = vld [vmem:[#allocation38_spill] sm:$0xff] }
 0x906   :  { %v10348_v37 = vpop.eup %10347  ;;  %v5789_v6 = vmul.f32 %v10346_v22, %v5757_v43  ;;  %10367 = vrcp.f32 %v5346_v14  ;;  %v5152_v14 = vadd.f32 %v15577_v45, %v15548_v31  ;;  %v7595_v22 = vmul.f32 -1.442695, %v9383_v4 }
 0x907   :  { %v10350_v40 = vpop.eup %10349  ;;  %v5664_v51 = vmul.f32 %v10348_v37, %v5144_v41  ;;  %10369 = vrcp.f32 %v5569_v12  ;;  %v7563_v41 = vmul.f32 -1.442695, %v9381_v58  ;;  %v9393_v58 = vadd.f32 %v15546_v56, %v14539_v59 }
 0x908   :  { %v10352_v30 = vpop.eup %10351  ;;  %v5853_v57 = vadd.f32 %v5821_v18, %v5789_v6  ;;  %10371 = vrcp.f32 %v5347_v28  ;;  %v5790_v32 = vmul.f32 %v10350_v40, %v5758_v50  ;;  %v14563_v52 = vpop.f32.mrb[156].mxu1  ;;  %v15579_v6 = vld [vmem:[#allocation27_spill] sm:$0xff]  ;;  %v15580_v18 = vld [vmem:[#allocation58_spill] sm:$0xff]  ;;  %v7564_v40 = vmul.f32 -1.442695, %v9385_v33 }
 0x909   :  { %v10354_v9 = vpop.eup %10353  ;;  %v5696_v54 = vadd.f32 %v5664_v51, %v4790_v16  ;;  %10373 = vpow2.f32 %v7593_v7  ;;  %v14565_v10 = vpop.f32.mrb[157].mxu1  ;;  %v5759_v16 = vsub.f32 1.0, %v10352_v30  ;;  %v15578_v7 = vld [vmem:[#allocation48_spill] sm:$0xff]  ;;  %v4798_v44 = vadd.f32 %v15579_v6, %v15549_v17  ;;  %v15586_v6 = vld [vmem:[#allocation54_spill] sm:$0xff] }
 0x90a   :  { %v10356_v49 = vpop.eup %10355  ;;  %v5877_v46 = vpack.c.bf16 %v5853_v57, %v5852_v8  ;;  %v5665_v55 = vmul.f32 %v10354_v9, %v5147_v24  ;;  %10375 = vpow2.f32 %v7562_v2  ;;  %v5854_v29 = vadd.f32 %v5822_v63, %v5790_v32  ;;  %v14567_v12 = vpop.f32.mrb[158].mxu1 }
 0x90b   :  { %v10358_v47 = vpop.eup %10357  ;;  %10377 = vtanh.f32 %v5696_v54  ;;  %v5571_v61 = vadd.f32 1.0, %v10356_v49  ;;  %v14571_v43 = vpop.f32.mrb[159].mxu1  ;;  %v5823_v2 = vmul.f32 %v10352_v30, %v15578_v7  ;;  %v4801_v50 = vadd.f32 %v15580_v18, %v15549_v17  ;;  %v15582_v49 = vld [vmem:[#allocation28_spill] sm:$0xff]  ;;  %v15585_v7 = vld [vmem:[#allocation47_spill] sm:$0xff]  ;;  %v15587_v18 = vld [vmem:[#allocation57_spill] sm:$0xff] }
 0x90c   :  { %v10360_v39 = vpop.eup %10359  ;;  %v5697_v35 = vadd.f32 %v5665_v55, %v4793_v36  ;;  %v5348_v8 = vadd.f32 1.0, %v10358_v47  ;;  %10379 = vpow2.f32 %v7594_v13  ;;  %8979 = vmatmul.mubr.bf16.gmra.mrb[172].mxu0 %v5877_v46  ;;  %9027 = vmatmul.mubr.bf16.gmra.mrb[172].mxu1 %v5877_v46  ;;  %v15581_v36 = vld [vmem:[#allocation78_spill] sm:$0xff]  ;;  %v9387_v30 = vadd.f32 %v15547_v38, %v14523_v27 }
 0x90d   :  { %v10362_v25 = vpop.eup %10361  ;;  %10381 = vrcp.f32 %v5570_v62  ;;  %v5155_v42 = vadd.f32 %v15581_v36, %v15548_v31  ;;  %v9389_v32 = vadd.f32 %v15546_v56, %v14526_v26  ;;  %v4806_v46 = vadd.f32 %v15582_v49, %v15549_v17 }
 0x90e   :  { %v10364_v15 = vpop.eup %10363  ;;  %10383 = vtanh.f32 %v5697_v35  ;;  %v5349_v0 = vadd.f32 1.0, %v10362_v25  ;;  %v5760_v55 = vsub.f32 1.0, %v10360_v39  ;;  %v9391_v59 = vadd.f32 %v15547_v38, %v14530_v1 }
 0x90f   :  { %v10366_v20 = vpop.eup %10365  ;;  %10385 = vrcp.f32 %v5348_v8  ;;  %v5791_v28 = vmul.f32 %v10364_v15, %v5759_v16  ;;  %v7596_v8 = vmul.f32 -1.442695, %v9387_v30  ;;  %v7565_v15 = vmul.f32 -1.442695, %v9389_v32 }
 0x910   :  { %v10368_v37 = vpop.eup %10367  ;;  %10387 = vrcp.f32 %v5571_v61  ;;  %v5572_v13 = vadd.f32 1.0, %v10366_v20  ;;  %v15583_v61 = vld [vmem:[#allocation31_spill] sm:$0xff]  ;;  %v5163_v1 = vadd.f32 %v15587_v18, %v15548_v31  ;;  %v5171_v18 = vadd.f32 %v14360_v34, %v15548_v31 }
 0x911   :  { %v10370_v3 = vpop.eup %10369  ;;  %v5666_v24 = vmul.f32 %v10368_v37, %v5152_v14  ;;  %10389 = vrcp.f32 %v5349_v0  ;;  %v5855_v51 = vadd.f32 %v5823_v2, %v5791_v28  ;;  %v15584_v14 = vld [vmem:[#allocation51_spill] sm:$0xff]  ;;  %v7566_v2 = vmul.f32 -1.442695, %v9393_v58 }
 0x912   :  { %v10372_v57 = vpop.eup %10371  ;;  %10391 = vpow2.f32 %v7563_v41  ;;  %v5761_v16 = vsub.f32 1.0, %v10370_v3  ;;  %v5160_v0 = vadd.f32 %v15584_v14, %v15548_v31  ;;  %v5176_v34 = vadd.f32 %v14344_v60, %v15548_v31 }
 0x913   :  { %v10374_v9 = vpop.eup %10373  ;;  %v5698_v54 = vadd.f32 %v5666_v24, %v4798_v44  ;;  %v5667_v62 = vmul.f32 %v10372_v57, %v5155_v42  ;;  %10393 = vpow2.f32 %v7595_v22  ;;  %v5878_v48 = vpack.c.bf16 %v5855_v51, %v5854_v29 }
 0x914   :  { %v10376_v63 = vpop.eup %10375  ;;  %10395 = vpow2.f32 %v7564_v40  ;;  %v5573_v4 = vadd.f32 1.0, %v10374_v9  ;;  %v5824_v29 = vmul.f32 %v10360_v39, %v15583_v61  ;;  %v5825_v39 = vmul.f32 %v10370_v3, %v15585_v7 }
 0x915   :  { %v10378_v47 = vpop.eup %10377  ;;  %10397 = vtanh.f32 %v5698_v54  ;;  %v5699_v27 = vadd.f32 %v5667_v62, %v4801_v50  ;;  %v5350_v33 = vadd.f32 1.0, %v10376_v63  ;;  %8982 = vmatprep.mubr.bf16.mxu0 %v5878_v48  ;;  %9030 = vmatprep.mubr.bf16.mxu1 %v5878_v48  ;;  %v4809_v44 = vadd.f32 %v15586_v6, %v15549_v17 }
 0x916   :  { %v10380_v26 = vpop.eup %10379  ;;  %v5792_v35 = vmul.f32 %v10378_v47, %v5760_v55  ;;  %10399 = vrcp.f32 %v5572_v13  ;;  %v7597_v42 = vmul.f32 -1.442695, %v9391_v59  ;;  %v9397_v24 = vadd.f32 %v15546_v56, %v14547_v23 }
 0x917   :  { %v10382_v25 = vpop.eup %10381  ;;  %10401 = vtanh.f32 %v5699_v27  ;;  %v5574_v20 = vadd.f32 1.0, %v10380_v26  ;;  %v9395_v13 = vadd.f32 %v15547_v38, %v14545_v5  ;;  %v9401_v54 = vadd.f32 %v15546_v56, %v14563_v52 }
 0x918   :  { %v10384_v45 = vpop.eup %10383  ;;  %v5856_v41 = vadd.f32 %v5824_v29, %v5792_v35  ;;  %10403 = vrcp.f32 %v5350_v33  ;;  %v9399_v23 = vadd.f32 %v15547_v38, %v14550_v19  ;;  %v5762_v63 = vsub.f32 1.0, %v10382_v25 }
 0x919   :  { %v10386_v22 = vpop.eup %10385  ;;  %v5793_v28 = vmul.f32 %v10384_v45, %v5761_v16  ;;  %10405 = vrcp.f32 %v5573_v4  ;;  %v7567_v58 = vmul.f32 -1.442695, %v9397_v24  ;;  %v15588_v4 = vld [vmem:[#allocation32_spill] sm:$0xff]  ;;  %v5168_v26 = vadd.f32 %v14349_v21, %v15548_v31 }
 0x91a   :  { %v10388_v37 = vpop.eup %10387  ;;  %v5668_v50 = vmul.f32 %v10386_v22, %v5160_v0  ;;  %10407 = vpow2.f32 %v7596_v8  ;;  %v5826_v52 = vmul.f32 %v10382_v25, %v15588_v4  ;;  %v7598_v19 = vmul.f32 -1.442695, %v9395_v13  ;;  %v15589_v8 = vld [vmem:[#allocation34_spill] sm:$0xff]  ;;  %v15590_v45 = vld [vmem:[#allocation64_spill] sm:$0xff] }
 0x91b   :  { %v10390_v40 = vpop.eup %10389  ;;  %v5857_v36 = vadd.f32 %v5825_v39, %v5793_v28  ;;  %10409 = vpow2.f32 %v7565_v15  ;;  %v5763_v47 = vsub.f32 1.0, %v10388_v37  ;;  %v7568_v35 = vmul.f32 -1.442695, %v9401_v54 }
 0x91c   :  { %v10392_v51 = vpop.eup %10391  ;;  %v5700_v3 = vadd.f32 %v5668_v50, %v4806_v46  ;;  %v5669_v57 = vmul.f32 %v10390_v40, %v5163_v1  ;;  %10411 = vrcp.f32 %v5574_v20  ;;  %v5827_v16 = vmul.f32 %v10388_v37, %v15589_v8 }
 0x91d   :  { %v10394_v30 = vpop.eup %10393  ;;  %v5879_v32 = vpack.c.bf16 %v5857_v36, %v5856_v41  ;;  %v5351_v9 = vadd.f32 1.0, %v10392_v51  ;;  %10413 = vpow2.f32 %v7566_v2  ;;  %v4814_v14 = vadd.f32 %v15590_v45, %v15549_v17  ;;  %v15596_v45 = vld [vmem:[#allocation36_spill] sm:$0xff] }
 0x91e   :  { %v10396_v62 = vpop.eup %10395  ;;  %10415 = vtanh.f32 %v5700_v3  ;;  %v5701_v48 = vadd.f32 %v5669_v57, %v4809_v44  ;;  %v5575_v46 = vadd.f32 1.0, %v10394_v30  ;;  %v7599_v25 = vmul.f32 -1.442695, %v9399_v23  ;;  %v15592_v57 = vld [vmem:[#allocation70_spill] sm:$0xff] }
 0x91f   :  { %v10398_v49 = vpop.eup %10397  ;;  %10417 = vrcp.f32 %v5351_v9  ;;  %v5352_v55 = vadd.f32 1.0, %v10396_v62  ;;  %8983 = vmatmul.mubr.bf16.gmra.mrb[176].mxu0 %v5879_v32  ;;  %9031 = vmatmul.mubr.bf16.gmra.mrb[176].mxu1 %v5879_v32  ;;  %v9403_v21 = vadd.f32 %v15547_v38, %v14565_v10  ;;  %v9405_v20 = vadd.f32 %v15546_v56, %v14567_v12  ;;  %v15593_v62 = vld [vmem:[#allocation33_spill] sm:$0xff] }
 0x920   :  { %v10400_v5 = vpop.eup %10399  ;;  %10419 = vtanh.f32 %v5701_v48  ;;  %v5794_v27 = vmul.f32 %v10398_v49, %v5762_v63  ;;  %v4817_v13 = vadd.f32 %v15592_v57, %v15549_v17  ;;  %v15594_v63 = vld [vmem:[#allocation61_spill] sm:$0xff]  ;;  %v9407_v60 = vadd.f32 %v15547_v38, %v14571_v43 }
 0x921   :  { %v10402_v33 = vpop.eup %10401  ;;  %10421 = vpow2.f32 %v7597_v42  ;;  %v5764_v1 = vsub.f32 1.0, %v10400_v5  ;;  %v7600_v40 = vmul.f32 -1.442695, %v9403_v21  ;;  %v7569_v56 = vmul.f32 -1.442695, %v9405_v20  ;;  %v15591_v42 = vld [vmem:[#allocation52_spill] sm:$0xff] }
 0x922   :  { %v10404_v61 = vpop.eup %10403  ;;  %10423 = vrcp.f32 %v5352_v55  ;;  %v5795_v29 = vmul.f32 %v10402_v33, %v5763_v47  ;;  %v5858_v15 = vadd.f32 %v5826_v52, %v5794_v27  ;;  %v5828_v24 = vmul.f32 %v10400_v5, %v15591_v42 }
 0x923   :  { %v10406_v59 = vpop.eup %10405  ;;  %v5670_v0 = vmul.f32 %v10404_v61, %v5168_v26  ;;  %10425 = vrcp.f32 %v5575_v46  ;;  %v4822_v49 = vadd.f32 %v15594_v63, %v15549_v17  ;;  %v5184_v20 = vadd.f32 %v14378_v53, %v15548_v31 }
 0x924   :  { %v10408_v41 = vpop.eup %10407  ;;  %10427 = vpow2.f32 %v7567_v58  ;;  %v5859_v22 = vadd.f32 %v5827_v16, %v5795_v29  ;;  %v5765_v51 = vsub.f32 1.0, %v10406_v59  ;;  %v5829_v48 = vmul.f32 %v10406_v59, %v15593_v62  ;;  %v15595_v29 = vld [vmem:[#allocation81_spill] sm:$0xff] }
 0x925   :  { %v10410_v28 = vpop.eup %10409  ;;  %v5702_v7 = vadd.f32 %v5670_v0, %v4814_v14  ;;  %10429 = vpow2.f32 %v7598_v19  ;;  %v5576_v2 = vadd.f32 1.0, %v10408_v41  ;;  %v5179_v8 = vadd.f32 %v15595_v29, %v15548_v31 }
 0x926   :  { %v10412_v39 = vpop.eup %10411  ;;  %v5353_v37 = vadd.f32 1.0, %v10410_v28  ;;  %10431 = vpow2.f32 %v7568_v35  ;;  %v5880_v6 = vpack.c.bf16 %v5859_v22, %v5858_v15  ;;  %v7601_v15 = vmul.f32 -1.442695, %v9407_v60 }
 0x927   :  { %v10414_v44 = vpop.eup %10413  ;;  %10433 = vtanh.f32 %v5702_v7  ;;  %v5766_v35 = vsub.f32 1.0, %v10412_v39  ;;  %v5830_v14 = vmul.f32 %v10412_v39, %v15596_v45  ;;  %v15606_v45 = vld [vmem:[#allocation39_spill] sm:$0xff] }
 0x928   :  { %v10416_v50 = vpop.eup %10415  ;;  %v5354_v10 = vadd.f32 1.0, %v10414_v44  ;;  %10435 = vpow2.f32 %v7599_v25  ;;  %8986 = vmatprep.mubr.bf16.mxu0 %v5880_v6  ;;  %9034 = vmatprep.mubr.bf16.mxu1 %v5880_v6  ;;  %v15597_v25 = vld [vmem:[#allocation67_spill] sm:$0xff] }
 0x929   :  { %v10418_v12 = vpop.eup %10417  ;;  %v5796_v36 = vmul.f32 %v10416_v50, %v5764_v1  ;;  %10437 = vrcp.f32 %v5353_v37  ;;  %v4825_v41 = vadd.f32 %v15597_v25, %v15549_v17  ;;  %v15598_v37 = vld [vmem:[#allocation46_spill] sm:$0xff] }
 0x92a   :  { %v10420_v3 = vpop.eup %10419  ;;  %v5671_v30 = vmul.f32 %v10418_v12, %v5171_v18  ;;  %10439 = vrcp.f32 %v5576_v2  ;;  %v4830_v6 = vadd.f32 %v15598_v37, %v15549_v17  ;;  %v15599_v12 = vld [vmem:[#allocation35_spill] sm:$0xff] }
 0x92b   :  { %v10422_v32 = vpop.eup %10421  ;;  %v5860_v9 = vadd.f32 %v5828_v24, %v5796_v36  ;;  %v5797_v54 = vmul.f32 %v10420_v3, %v5765_v51  ;;  %10441 = vrcp.f32 %v5354_v10  ;;  %v5187_v51 = vadd.f32 %v14384_v11, %v15548_v31 }
 0x92c   :  { %v10424_v23 = vpop.eup %10423  ;;  %v5703_v46 = vadd.f32 %v5671_v30, %v4817_v13  ;;  %10443 = vpow2.f32 %v7600_v40  ;;  %v5577_v33 = vadd.f32 1.0, %v10422_v32 }
 0x92d   :  { %v10426_v55 = vpop.eup %10425  ;;  %v5861_v58 = vadd.f32 %v5829_v48, %v5797_v54  ;;  %v5672_v5 = vmul.f32 %v10424_v23, %v5176_v34  ;;  %10445 = vpow2.f32 %v7569_v56  ;;  %v15600_v34 = vld [vmem:[#allocation42_spill] sm:$0xff]  ;;  %v15602_v48 = vld [vmem:[#allocation8_spill] sm:$0xff] }
 0x92e   :  { %v10428_v47 = vpop.eup %10427  ;;  %10447 = vtanh.f32 %v5703_v46  ;;  %v5767_v1 = vsub.f32 1.0, %v10426_v55  ;;  %v5831_v36 = vmul.f32 %v10426_v55, %v15599_v12  ;;  %v4833_v30 = vadd.f32 %v15600_v34, %v15549_v17 }
 0x92f   :  { %v10430_v27 = vpop.eup %10429  ;;  %v5881_v4 = vpack.c.bf16 %v5861_v58, %v5860_v9  ;;  %v5704_v52 = vadd.f32 %v5672_v5, %v4822_v49  ;;  %v5355_v26 = vadd.f32 1.0, %v10428_v47  ;;  %v15601_v9 = vld [vmem:[#allocation37_spill] sm:$0xff]  ;;  %v5192_v23 = vadd.f32 %v15602_v48, %v15548_v31 }
 0x930   :  { %v10432_v19 = vpop.eup %10431  ;;  %v5578_v38 = vadd.f32 1.0, %v10430_v27  ;;  %v15603_v58 = vld [vmem:[#allocation73_spill] sm:$0xff] }
 0x931   :  { %v10434_v61 = vpop.eup %10433  ;;  %10449 = vtanh.f32 %v5704_v52  ;;  %v5356_v16 = vadd.f32 1.0, %v10432_v19  ;;  %8987 = vmatmul.mubr.bf16.gmra.mrb[180].mxu0 %v5881_v4  ;;  %9035 = vmatmul.mubr.bf16.gmra.mrb[180].mxu1 %v5881_v4  ;;  %v4838_v5 = vadd.f32 %v15603_v58, %v15549_v17 }
 0x932   :  { %v10436_v59 = vpop.eup %10435  ;;  %10451 = vrcp.f32 %v5355_v26  ;;  %v5798_v43 = vmul.f32 %v10434_v61, %v5766_v35  ;;  %v15604_v35 = vld [vmem:[#allocation40_spill] sm:$0xff] }
 0x933   :  { %v10438_v0 = vpop.eup %10437  ;;  %10453 = vrcp.f32 %v5577_v33  ;;  %v5579_v56 = vadd.f32 1.0, %v10436_v59 }
 0x934   :  { %v10440_v21 = vpop.eup %10439  ;;  %v5673_v22 = vmul.f32 %v10438_v0, %v5179_v8  ;;  %10455 = vrcp.f32 %v5356_v16  ;;  %v5862_v28 = vadd.f32 %v5830_v14, %v5798_v43  ;;  %v15605_v16 = vld [vmem:[#allocation9_spill] sm:$0xff] }
 0x935   :  { %v10442_v7 = vpop.eup %10441  ;;  %10457 = vpow2.f32 %v7601_v15  ;;  %v5768_v42 = vsub.f32 1.0, %v10440_v21  ;;  %v5832_v54 = vmul.f32 %v10440_v21, %v15601_v9  ;;  %v5195_v15 = vadd.f32 %v15605_v16, %v15548_v31  ;;  %v15607_v0 = vld [vmem:[#allocation41_spill] sm:$0xff] }
 0x936   :  { %v10444_v2 = vpop.eup %10443  ;;  %v5705_v44 = vadd.f32 %v5673_v22, %v4825_v41  ;;  %v5674_v39 = vmul.f32 %v10442_v7, %v5184_v20  ;;  %10459 = vrcp.f32 %v5578_v38  ;;  %v4841_v25 = vadd.f32 %v15607_v0, %v15549_v17 }
 0x937   :  { %v10446_v18 = vpop.eup %10445  ;;  %v5580_v3 = vadd.f32 1.0, %v10444_v2 }
 0x938   :  { %v10448_v50 = vpop.eup %10447  ;;  %10461 = vtanh.f32 %v5705_v44  ;;  %v5706_v10 = vadd.f32 %v5674_v39, %v4830_v6  ;;  %v5357_v40 = vadd.f32 1.0, %v10446_v18  ;;  %v15608_v44 = vld [vmem:[#allocation77_spill] sm:$0xff] }
 0x939   :  { %v5799_v53 = vmul.f32 %v10448_v50, %v5767_v1  ;;  %v15609_v50 = vld [vmem:[#allocation79_spill] sm:$0xff] }
 0x93a   :  { %10463 = vtanh.f32 %v5706_v10 }
 0x93b   :  { %v10450_v24 = vpop.eup %10449  ;;  %10465 = vrcp.f32 %v5357_v40  ;;  %v5863_v57 = vadd.f32 %v5831_v36, %v5799_v53 }
 0x93c   :  { %v10452_v13 = vpop.eup %10451  ;;  %v5800_v32 = vmul.f32 %v10450_v24, %v5768_v42  ;;  %10467 = vrcp.f32 %v5579_v56  ;;  %v15610_v24 = vld [vmem:[#allocation80_spill] sm:$0xff] }
 0x93d   :  { %v10454_v62 = vpop.eup %10453  ;;  %v5675_v63 = vmul.f32 %v10452_v13, %v5187_v51  ;;  %v5882_v49 = vpack.c.bf16 %v5863_v57, %v5862_v28  ;;  %10469 = vrcp.f32 %v5580_v3  ;;  %v14659_v13 = vld [vmem:[%s15101_s12] ss:$0 sm:$0xff] }
 0x93e   :  { %v10456_v46 = vpop.eup %10455  ;;  %v5864_v55 = vadd.f32 %v5832_v54, %v5800_v32  ;;  %v5769_v4 = vsub.f32 1.0, %v10454_v62  ;;  %v5833_v61 = vmul.f32 %v10454_v62, %v15604_v35 }
 0x93f   :  { %v10458_v11 = vpop.eup %10457  ;;  %v5707_v60 = vadd.f32 %v5675_v63, %v4833_v30  ;;  %v5676_v47 = vmul.f32 %v10456_v46, %v5192_v23  ;;  %8990 = vmatprep.mubr.bf16.mxu0 %v5882_v49  ;;  %9038 = vmatprep.mubr.bf16.mxu1 %v5882_v49 }
 0x940   :  { %v10460_v27 = vpop.eup %10459  ;;  %v5581_v26 = vadd.f32 1.0, %v10458_v11 }
 0x941   :  { %10471 = vtanh.f32 %v5707_v60  ;;  %v5708_v52 = vadd.f32 %v5676_v47, %v4838_v5  ;;  %v5770_v29 = vsub.f32 1.0, %v10460_v27  ;;  %v5834_v14 = vmul.f32 %v10460_v27, %v15606_v45 }
 0x942   :  { %v10462_v33 = vpop.eup %10461 }
 0x943   :  { %v5801_v19 = vmul.f32 %v10462_v33, %v5769_v4  ;;  %10473 = vtanh.f32 %v5708_v52 }
 0x944   :  { %v10464_v8 = vpop.eup %10463  ;;  %10475 = vrcp.f32 %v5581_v26 }
 0x945   :  { %v10466_v59 = vpop.eup %10465  ;;  %v5865_v38 = vadd.f32 %v5833_v61, %v5801_v19  ;;  %v5802_v43 = vmul.f32 %v10464_v8, %v5770_v29 }
 0x946   :  { %v5677_v41 = vmul.f32 %v10466_v59, %v5195_v15  ;;  %v10468_v21 = vpop.eup %10467 }
 0x947   :  { %v5883_v20 = vpack.c.bf16 %v5865_v38, %v5864_v55  ;;  %v5866_v22 = vadd.f32 %v5834_v14, %v5802_v43  ;;  %v10470_v7 = vpop.eup %10469  ;;  %v5771_v2 = vsub.f32 1.0, %v10468_v21  ;;  %v5835_v39 = vmul.f32 %v10468_v21, %v15608_v44 }
 0x948   :  { %v5709_v28 = vadd.f32 %v5677_v41, %v4841_v25  ;;  %v5772_v37 = vsub.f32 1.0, %v10470_v7  ;;  %v5836_v17 = vmul.f32 %v10470_v7, %v15609_v50 }
 0x949   :  { %8991 = vmatmul.mubr.bf16.gmra.mrb[184].mxu0 %v5883_v20  ;;  %9039 = vmatmul.mubr.bf16.gmra.mrb[184].mxu1 %v5883_v20 }
 0x94a   :  { %10477 = vtanh.f32 %v5709_v28 }
 0x94b   :  { %v10472_v31 = vpop.eup %10471 }
 0x94c   :  { %v5803_v6 = vmul.f32 %v10472_v31, %v5771_v2 }
 0x94d   :  { %v10474_v18 = vpop.eup %10473 }
 0x94e   :  { %v5804_v1 = vmul.f32 %v10474_v18, %v5772_v37  ;;  %v5867_v10 = vadd.f32 %v5835_v39, %v5803_v6  ;;  %v10476_v40 = vpop.eup %10475 }
 0x94f   :  { %v5773_v12 = vsub.f32 1.0, %v10476_v40  ;;  %v5837_v51 = vmul.f32 %v10476_v40, %v15610_v24 }
 0x950   :  { %v5868_v56 = vadd.f32 %v5836_v17, %v5804_v1  ;;  %v5884_v53 = vpack.c.bf16 %v5867_v10, %v5866_v22  ;;  %v14678_v22 = vld [vmem:[%s15103_s14] ss:$0 sm:$0xff] }
 0x952   :  { %8994 = vmatprep.mubr.bf16.mxu0 %v5884_v53  ;;  %9042 = vmatprep.mubr.bf16.mxu1 %v5884_v53 }
 0x954   :  { %v10478_v36 = vpop.eup %10477 }
 0x955   :  { %v5805_v42 = vmul.f32 %v10478_v36, %v5773_v12 }
 0x957   :  { %v5869_v3 = vadd.f32 %v5837_v51, %v5805_v42 }
 0x959   :  { %v5885_v57 = vpack.c.bf16 %v5869_v3, %v5868_v56 }
 0x95b   :  { %8995 = vmatmul.mubr.bf16.gmra.mrb[188].mxu0 %v5885_v57  ;;  %9043 = vmatmul.mubr.bf16.gmra.mrb[188].mxu1 %v5885_v57 }
 0x9a2   :  { %v8968_v34 = vpop.f32.mrb[160].mxu0  ;;  %v9016_v30 = vpop.f32.mrb[160].mxu1 }
 0x9a3   :  { %v6345_v32 = vadd.f32 %v8968_v34, %v14659_v13  ;;  %v6209_v9 = vpop.f32.mrb[161].mxu0  ;;  %v6672_v54 = vpop.f32.mrb[161].mxu1  ;;  %v6681_v7 = vadd.f32 %v9016_v30, %v14678_v22 }
 0x9a4   :  { %v6343_v62 = vadd.f32 %v14659_v13, %v6209_v9  ;;  %v8969_v48 = vpop.f32.mrb[162].mxu0  ;;  %v9017_v23 = vpop.f32.mrb[162].mxu1  ;;  %v6673_v31 = vadd.f32 %v14678_v22, %v6672_v54 }
 0x9a5   :  { %v7621_v63 = vmul.f32 -1.442695, %v6345_v32  ;;  %v6346_v49 = vadd.f32 %v8969_v48, %v14659_v13  ;;  %v6212_v46 = vpop.f32.mrb[163].mxu0  ;;  %v6675_v55 = vpop.f32.mrb[163].mxu1  ;;  %v6684_v44 = vadd.f32 %v9017_v23, %v14678_v22 }
 0x9a6   :  { %v7619_v11 = vmul.f32 -1.442695, %v6343_v62  ;;  %v6344_v58 = vadd.f32 %v14659_v13, %v6212_v46  ;;  %v6676_v1 = vadd.f32 %v14678_v22, %v6675_v55 }
 0x9a7   :  { %10479 = vpow2.f32 %v7621_v63  ;;  %v7622_v5 = vmul.f32 -1.442695, %v6346_v49 }
 0x9a8   :  { %10481 = vpow2.f32 %v7619_v11  ;;  %v7620_v60 = vmul.f32 -1.442695, %v6344_v58 }
 0x9a9   :  { %10483 = vpow2.f32 %v7622_v5 }
 0x9aa   :  { %10485 = vpow2.f32 %v7620_v60 }
 0x9b1   :  { %v10480_v47 = vpop.eup %10479 }
 0x9b2   :  { %v10482_v27 = vpop.eup %10481  ;;  %v6473_v4 = vadd.f32 1.0, %v10480_v47 }
 0x9b3   :  { %v10484_v52 = vpop.eup %10483  ;;  %v6471_v33 = vadd.f32 1.0, %v10482_v27 }
 0x9b4   :  { %v10486_v26 = vpop.eup %10485  ;;  %10487 = vrcp.f32 %v6473_v4  ;;  %v6474_v19 = vadd.f32 1.0, %v10484_v52  ;;  %v8972_v35 = vpop.f32.mrb[164].mxu0 }
 0x9b5   :  { %v9020_v61 = vpop.f32.mrb[164].mxu1  ;;  %10489 = vrcp.f32 %v6471_v33  ;;  %v6472_v29 = vadd.f32 1.0, %v10486_v26  ;;  %v6349_v8 = vadd.f32 %v8972_v35, %v14659_v13  ;;  %v6225_v16 = vpop.f32.mrb[165].mxu0 }
 0x9b6   :  { %v14666_v15 = vpop.f32.mrb[165].mxu1  ;;  %10491 = vrcp.f32 %v6474_v19  ;;  %v6347_v59 = vadd.f32 %v14659_v13, %v6225_v16  ;;  %v8973_v38 = vpop.f32.mrb[166].mxu0  ;;  %v6697_v63 = vadd.f32 %v9020_v61, %v14678_v22 }
 0x9b7   :  { %v14669_v43 = vpop.f32.mrb[166].mxu1  ;;  %10493 = vrcp.f32 %v6472_v29  ;;  %v7625_v45 = vmul.f32 -1.442695, %v6349_v8  ;;  %v6350_v14 = vadd.f32 %v8973_v38, %v14659_v13  ;;  %v6228_v0 = vpop.f32.mrb[167].mxu0  ;;  %v6689_v5 = vadd.f32 %v14678_v22, %v14666_v15 }
 0x9b8   :  { %v14672_v25 = vpop.f32.mrb[167].mxu1  ;;  %v7623_v41 = vmul.f32 -1.442695, %v6347_v59  ;;  %v6348_v21 = vadd.f32 %v14659_v13, %v6228_v0  ;;  %v6700_v52 = vadd.f32 %v14669_v43, %v14678_v22  ;;  %v14756_v59 = vld [vmem:[%s15611_s23] sm:$0x3]  ;;  %v15612_v43 = vld [vmem:[#allocation26_spill] sm:$0xff] }
 0x9b9   :  { %10495 = vpow2.f32 %v7625_v45  ;;  %v7626_v20 = vmul.f32 -1.442695, %v6350_v14  ;;  %v6692_v35 = vadd.f32 %v14678_v22, %v14672_v25  ;;  %v6873_v45 = vrot.slane %v14756_v59, %v15612_v43  ;;  %v15613_v14 = vld [vmem:[#allocation24_spill] sm:$0xff] }
 0x9ba   :  { %10497 = vpow2.f32 %v7623_v41  ;;  %v7624_v28 = vmul.f32 -1.442695, %v6348_v21  ;;  %v10856_v0 = vmov 1.0  }
 0x9bb   :  { %10499 = vpow2.f32 %v7626_v20  ;;  %vm6875_vm0 = vcmp.eq.s32.totalorder %v6873_v45, %v15613_v14 }
 0x9bc   :  { %10501 = vpow2.f32 %v7624_v28  ;;  %7662 = vmatprep.mubr.msk.f32.mxu1 %vm6875_vm0, %v10856_v0 }
 0x9be   :  { %v10488_v2 = vpop.eup %10487 }
 0x9bf   :  { %v10490_v37 = vpop.eup %10489  ;;  %v14682_v6 = vmul.f32 %v10488_v2, %v6681_v7 }
 0x9c0   :  { %v10492_v39 = vpop.eup %10491  ;;  %v14685_v18 = vmul.f32 %v10490_v37, %v6673_v31 }
 0x9c1   :  { %v10494_v50 = vpop.eup %10493  ;;  %6833 = vst [vmem:[%s15109_s20 + $0x10] sm:$0xff] %v14682_v6  ;;  %v14692_v17 = vmul.f32 %v10492_v39, %v6684_v44 }
 0x9c2   :  { %6831 = vst [vmem:[%s15109_s20] sm:$0xff] %v14685_v18  ;;  %v14698_v10 = vmul.f32 %v10494_v50, %v6676_v1 }
 0x9c3   :  { %v10496_v40 = vpop.eup %10495  ;;  %6834 = vst [vmem:[%s15109_s20 + $0x18] sm:$0xff] %v14692_v17  ;;  %v9099_v56 = vpack.c.bf16 %v14692_v17, %v14682_v6 }
 0x9c4   :  { %v10498_v53 = vpop.eup %10497  ;;  %6832 = vst [vmem:[%s15109_s20 + $0x8] sm:$0xff] %v14698_v10  ;;  %v9095_v12 = vpack.c.bf16 %v14698_v10, %v14685_v18  ;;  %v6477_v36 = vadd.f32 1.0, %v10496_v40 }
 0x9c5   :  { %v10500_v42 = vpop.eup %10499  ;;  %v6475_v24 = vadd.f32 1.0, %v10498_v53 }
 0x9c6   :  { %v10502_v51 = vpop.eup %10501  ;;  %10503 = vrcp.f32 %v6477_v36  ;;  %v6478_v3 = vadd.f32 1.0, %v10500_v42 }
 0x9c7   :  { %10505 = vrcp.f32 %v6475_v24  ;;  %v6476_v57 = vadd.f32 1.0, %v10502_v51 }
 0x9c8   :  { %10507 = vrcp.f32 %v6478_v3 }
 0x9c9   :  { %10509 = vrcp.f32 %v6476_v57 }
 0x9cc   :  { %v8976_v34 = vpop.f32.mrb[168].mxu0  ;;  %v14712_v30 = vpop.f32.mrb[168].mxu1 }
 0x9cd   :  { %v6353_v32 = vadd.f32 %v8976_v34, %v14659_v13  ;;  %v6241_v9 = vpop.f32.mrb[169].mxu0  ;;  %v14715_v54 = vpop.f32.mrb[169].mxu1 }
 0x9ce   :  { %v6351_v62 = vadd.f32 %v14659_v13, %v6241_v9  ;;  %v8977_v48 = vpop.f32.mrb[170].mxu0  ;;  %v14718_v23 = vpop.f32.mrb[170].mxu1 }
 0x9cf   :  { %v7629_v49 = vmul.f32 -1.442695, %v6353_v32  ;;  %v6354_v46 = vadd.f32 %v8977_v48, %v14659_v13  ;;  %v6244_v55 = vpop.f32.mrb[171].mxu0  ;;  %v14722_v11 = vpop.f32.mrb[171].mxu1 }
 0x9d0   :  { %v10504_v58 = vpop.eup %10503  ;;  %v7627_v60 = vmul.f32 -1.442695, %v6351_v62  ;;  %v6352_v47 = vadd.f32 %v14659_v13, %v6244_v55  ;;  %v6713_v62 = vadd.f32 %v14712_v30, %v14678_v22  ;;  %v6716_v55 = vadd.f32 %v14718_v23, %v14678_v22 }
 0x9d1   :  { %v10506_v27 = vpop.eup %10505  ;;  %v14727_v4 = vmul.f32 %v10504_v58, %v6697_v63  ;;  %10511 = vpow2.f32 %v7629_v49  ;;  %v7630_v33 = vmul.f32 -1.442695, %v6354_v46  ;;  %v6705_v63 = vadd.f32 %v14678_v22, %v14715_v54 }
 0x9d2   :  { %v10508_v26 = vpop.eup %10507  ;;  %v14731_v19 = vmul.f32 %v10506_v27, %v6689_v5  ;;  %10513 = vpow2.f32 %v7627_v60  ;;  %v7628_v61 = vmul.f32 -1.442695, %v6352_v47  ;;  %v6708_v60 = vadd.f32 %v14678_v22, %v14722_v11 }
 0x9d3   :  { %v10510_v29 = vpop.eup %10509  ;;  %6837 = vst [vmem:[%s15109_s20 + $0x30] sm:$0xff] %v14727_v4  ;;  %v14739_v8 = vmul.f32 %v10508_v26, %v6700_v52  ;;  %10515 = vpow2.f32 %v7630_v33 }
 0x9d4   :  { %6835 = vst [vmem:[%s15109_s20 + $0x20] sm:$0xff] %v14731_v19  ;;  %v14745_v16 = vmul.f32 %v10510_v29, %v6692_v35  ;;  %10517 = vpow2.f32 %v7628_v61 }
 0x9d5   :  { %6838 = vst [vmem:[%s15109_s20 + $0x38] sm:$0xff] %v14739_v8  ;;  %v9107_v15 = vpack.c.bf16 %v14739_v8, %v14727_v4 }
 0x9d6   :  { %6836 = vst [vmem:[%s15109_s20 + $0x28] sm:$0xff] %v14745_v16  ;;  %v9103_v38 = vpack.c.bf16 %v14745_v16, %v14731_v19 }
 0x9db   :  { %v10512_v25 = vpop.eup %10511 }
 0x9dc   :  { %v10514_v41 = vpop.eup %10513  ;;  %v6481_v21 = vadd.f32 1.0, %v10512_v25 }
 0x9dd   :  { %v10516_v20 = vpop.eup %10515  ;;  %v6479_v28 = vadd.f32 1.0, %v10514_v41 }
 0x9de   :  { %v10518_v7 = vpop.eup %10517  ;;  %10519 = vrcp.f32 %v6481_v21  ;;  %v6482_v2 = vadd.f32 1.0, %v10516_v20 }
 0x9df   :  { %10521 = vrcp.f32 %v6479_v28  ;;  %v6480_v31 = vadd.f32 1.0, %v10518_v7  ;;  %v8980_v37 = vpop.f32.mrb[172].mxu0  ;;  %v14768_v44 = vpop.f32.mrb[172].mxu1 }
 0x9e0   :  { %10523 = vrcp.f32 %v6482_v2  ;;  %v6357_v39 = vadd.f32 %v8980_v37, %v14659_v13  ;;  %v6257_v1 = vpop.f32.mrb[173].mxu0  ;;  %v14771_v50 = vpop.f32.mrb[173].mxu1 }
 0x9e1   :  { %10525 = vrcp.f32 %v6480_v31  ;;  %v6355_v40 = vadd.f32 %v14659_v13, %v6257_v1  ;;  %v8981_v53 = vpop.f32.mrb[174].mxu0  ;;  %v14774_v36 = vpop.f32.mrb[174].mxu1 }
 0x9e2   :  { %v7633_v42 = vmul.f32 -1.442695, %v6357_v39  ;;  %v6358_v24 = vadd.f32 %v8981_v53, %v14659_v13  ;;  %v6260_v51 = vpop.f32.mrb[175].mxu0  ;;  %v14777_v3 = vpop.f32.mrb[175].mxu1 }
 0x9e3   :  { %v7631_v57 = vmul.f32 -1.442695, %v6355_v40  ;;  %v6356_v34 = vadd.f32 %v14659_v13, %v6260_v51  ;;  %v6729_v51 = vadd.f32 %v14768_v44, %v14678_v22 }
 0x9e4   :  { %10527 = vpow2.f32 %v7633_v42  ;;  %v7634_v32 = vmul.f32 -1.442695, %v6358_v24 }
 0x9e5   :  { %10529 = vpow2.f32 %v7631_v57  ;;  %v7632_v9 = vmul.f32 -1.442695, %v6356_v34  ;;  %v6721_v34 = vadd.f32 %v14678_v22, %v14771_v50 }
 0x9e6   :  { %10531 = vpow2.f32 %v7634_v32 }
 0x9e7   :  { %10533 = vpow2.f32 %v7632_v9 }
 0x9e8   :  { %v10520_v48 = vpop.eup %10519 }
 0x9e9   :  { %v10522_v49 = vpop.eup %10521  ;;  %v14784_v46 = vmul.f32 %v10520_v48, %v6713_v62  ;;  %v6732_v62 = vadd.f32 %v14774_v36, %v14678_v22 }
 0x9ea   :  { %v10524_v58 = vpop.eup %10523  ;;  %v14788_v5 = vmul.f32 %v10522_v49, %v6705_v63  ;;  %v6724_v49 = vadd.f32 %v14678_v22, %v14777_v3 }
 0x9eb   :  { %v10526_v47 = vpop.eup %10525  ;;  %6841 = vst [vmem:[%s15109_s20 + $0x50] sm:$0xff] %v14784_v46  ;;  %v14796_v30 = vmul.f32 %v10524_v58, %v6716_v55 }
 0x9ec   :  { %6839 = vst [vmem:[%s15109_s20 + $0x40] sm:$0xff] %v14788_v5  ;;  %v14802_v54 = vmul.f32 %v10526_v47, %v6708_v60 }
 0x9ed   :  { %6842 = vst [vmem:[%s15109_s20 + $0x58] sm:$0xff] %v14796_v30  ;;  %v9115_v23 = vpack.c.bf16 %v14796_v30, %v14784_v46 }
 0x9ee   :  { %v10528_v11 = vpop.eup %10527  ;;  %6840 = vst [vmem:[%s15109_s20 + $0x48] sm:$0xff] %v14802_v54  ;;  %v9111_v27 = vpack.c.bf16 %v14802_v54, %v14788_v5 }
 0x9ef   :  { %v10530_v52 = vpop.eup %10529  ;;  %v6485_v33 = vadd.f32 1.0, %v10528_v11 }
 0x9f0   :  { %v10532_v26 = vpop.eup %10531  ;;  %v6483_v35 = vadd.f32 1.0, %v10530_v52 }
 0x9f1   :  { %v10534_v61 = vpop.eup %10533  ;;  %10535 = vrcp.f32 %v6485_v33  ;;  %v6486_v29 = vadd.f32 1.0, %v10532_v26 }
 0x9f2   :  { %10537 = vrcp.f32 %v6483_v35  ;;  %v6484_v43 = vadd.f32 1.0, %v10534_v61  ;;  %v8984_v45 = vpop.f32.mrb[176].mxu0  ;;  %v14816_v25 = vpop.f32.mrb[176].mxu1 }
 0x9f3   :  { %10539 = vrcp.f32 %v6486_v29  ;;  %v6361_v41 = vadd.f32 %v8984_v45, %v14659_v13  ;;  %v6273_v21 = vpop.f32.mrb[177].mxu0  ;;  %v14819_v20 = vpop.f32.mrb[177].mxu1 }
 0x9f4   :  { %10541 = vrcp.f32 %v6484_v43  ;;  %v6359_v28 = vadd.f32 %v14659_v13, %v6273_v21  ;;  %v8985_v7 = vpop.f32.mrb[178].mxu0  ;;  %v14822_v2 = vpop.f32.mrb[178].mxu1 }
 0x9f5   :  { %v7637_v31 = vmul.f32 -1.442695, %v6361_v41  ;;  %v6362_v37 = vadd.f32 %v8985_v7, %v14659_v13  ;;  %v6276_v39 = vpop.f32.mrb[179].mxu0  ;;  %v14825_v1 = vpop.f32.mrb[179].mxu1 }
 0x9f6   :  { %v7635_v40 = vmul.f32 -1.442695, %v6359_v28  ;;  %v6360_v53 = vadd.f32 %v14659_v13, %v6276_v39 }
 0x9f7   :  { %10543 = vpow2.f32 %v7637_v31  ;;  %v7638_v42 = vmul.f32 -1.442695, %v6362_v37 }
 0x9f8   :  { %10545 = vpow2.f32 %v7635_v40  ;;  %v7636_v24 = vmul.f32 -1.442695, %v6360_v53 }
 0x9f9   :  { %10547 = vpow2.f32 %v7638_v42 }
 0x9fa   :  { %10549 = vpow2.f32 %v7636_v24 }
 0x9fb   :  { %v10536_v57 = vpop.eup %10535 }
 0x9fc   :  { %v10538_v32 = vpop.eup %10537  ;;  %v14832_v9 = vmul.f32 %v10536_v57, %v6729_v51  ;;  %v6745_v57 = vadd.f32 %v14816_v25, %v14678_v22 }
 0x9fd   :  { %v10540_v48 = vpop.eup %10539  ;;  %v14836_v63 = vmul.f32 %v10538_v32, %v6721_v34  ;;  %v6737_v32 = vadd.f32 %v14678_v22, %v14819_v20 }
 0x9fe   :  { %v10542_v55 = vpop.eup %10541  ;;  %6845 = vst [vmem:[%s15109_s20 + $0x70] sm:$0xff] %v14832_v9  ;;  %v14844_v44 = vmul.f32 %v10540_v48, %v6732_v62 }
 0x9ff   :  { %6843 = vst [vmem:[%s15109_s20 + $0x60] sm:$0xff] %v14836_v63  ;;  %v14850_v50 = vmul.f32 %v10542_v55, %v6724_v49  ;;  %v6748_v49 = vadd.f32 %v14822_v2, %v14678_v22 }
 0xa00   :  { %6846 = vst [vmem:[%s15109_s20 + $0x78] sm:$0xff] %v14844_v44  ;;  %v9123_v36 = vpack.c.bf16 %v14844_v44, %v14832_v9  ;;  %v10859_v44 = vmov 0.0|0.0  }
 0xa01   :  { %v10544_v3 = vpop.eup %10543  ;;  %6844 = vst [vmem:[%s15109_s20 + $0x68] sm:$0xff] %v14850_v50  ;;  %v9119_v58 = vpack.c.bf16 %v14850_v50, %v14836_v63  ;;  %v6951_v63 = vld [vmem:[%s15104_s15] sm:$0xff]  ;;  %v6953_v50 = vld [vmem:[%s15104_s15 + $0x10] sm:$0xff] }
 0xa02   :  { %v10546_v60 = vpop.eup %10545  ;;  %v6489_v47 = vadd.f32 1.0, %v10544_v3 }
 0xa03   :  { %v10548_v11 = vpop.eup %10547  ;;  %v6487_v52 = vadd.f32 1.0, %v10546_v60  ;;  %v6740_v60 = vadd.f32 %v14678_v22, %v14825_v1 }
 0xa04   :  { %v10550_v33 = vpop.eup %10549  ;;  %10551 = vrcp.f32 %v6489_v47  ;;  %v6490_v26 = vadd.f32 1.0, %v10548_v11  ;;  %v8988_v35 = vpop.f32.mrb[180].mxu0 }
 0xa05   :  { %v14864_v61 = vpop.f32.mrb[180].mxu1  ;;  %10553 = vrcp.f32 %v6487_v52  ;;  %v6488_v29 = vadd.f32 1.0, %v10550_v33  ;;  %v6365_v43 = vadd.f32 %v8988_v35, %v14659_v13  ;;  %v6289_v45 = vpop.f32.mrb[181].mxu0 }
 0xa06   :  { %v14867_v41 = vpop.f32.mrb[181].mxu1  ;;  %10555 = vrcp.f32 %v6490_v26  ;;  %v6363_v21 = vadd.f32 %v14659_v13, %v6289_v45  ;;  %v8989_v28 = vpop.f32.mrb[182].mxu0  ;;  %v6761_v10 = vadd.f32 %v14864_v61, %v14678_v22 }
 0xa07   :  { %v14870_v7 = vpop.f32.mrb[182].mxu1  ;;  %10557 = vrcp.f32 %v6488_v29  ;;  %v7641_v31 = vmul.f32 -1.442695, %v6365_v43  ;;  %v6366_v37 = vadd.f32 %v8989_v28, %v14659_v13  ;;  %v6292_v39 = vpop.f32.mrb[183].mxu0 }
 0xa08   :  { %v14873_v40 = vpop.f32.mrb[183].mxu1  ;;  %v7639_v53 = vmul.f32 -1.442695, %v6363_v21  ;;  %v6364_v42 = vadd.f32 %v14659_v13, %v6292_v39 }
 0xa09   :  { %10559 = vpow2.f32 %v7641_v31  ;;  %v7642_v24 = vmul.f32 -1.442695, %v6366_v37 }
 0xa0a   :  { %10561 = vpow2.f32 %v7639_v53  ;;  %v7640_v51 = vmul.f32 -1.442695, %v6364_v42 }
 0xa0b   :  { %10563 = vpow2.f32 %v7642_v24 }
 0xa0c   :  { %10565 = vpow2.f32 %v7640_v51  ;;  %v6753_v51 = vadd.f32 %v14678_v22, %v14867_v41 }
 0xa0e   :  { %v10552_v34 = vpop.eup %10551 }
 0xa0f   :  { %v10554_v62 = vpop.eup %10553  ;;  %v6817_v48 = vmul.f32 %v10552_v34, %v6745_v57 }
 0xa10   :  { %v10556_v55 = vpop.eup %10555  ;;  %v6815_v3 = vmul.f32 %v10554_v62, %v6737_v32 }
 0xa11   :  { %v10558_v47 = vpop.eup %10557  ;;  %6849 = vst [vmem:[%s15109_s20 + $0x90] sm:$0xff] %v6817_v48  ;;  %v6818_v25 = vmul.f32 %v10556_v55, %v6748_v49 }
 0xa12   :  { %6847 = vst [vmem:[%s15109_s20 + $0x80] sm:$0xff] %v6815_v3  ;;  %v6816_v20 = vmul.f32 %v10558_v47, %v6740_v60 }
 0xa13   :  { %v10560_v11 = vpop.eup %10559  ;;  %6850 = vst [vmem:[%s15109_s20 + $0x98] sm:$0xff] %v6818_v25  ;;  %v9097_v2 = vpack.c.bf16 %v6818_v25, %v6817_v48  ;;  %v6764_v48 = vadd.f32 %v14870_v7, %v14678_v22 }
 0xa14   :  { %v10562_v52 = vpop.eup %10561  ;;  %6848 = vst [vmem:[%s15109_s20 + $0x88] sm:$0xff] %v6816_v20  ;;  %v6493_v1 = vadd.f32 1.0, %v10560_v11  ;;  %v9093_v33 = vpack.c.bf16 %v6816_v20, %v6815_v3  ;;  %v6756_v3 = vadd.f32 %v14678_v22, %v14873_v40 }
 0xa15   :  { %v10564_v26 = vpop.eup %10563  ;;  %v6491_v35 = vadd.f32 1.0, %v10562_v52 }
 0xa16   :  { %v10566_v29 = vpop.eup %10565  ;;  %10567 = vrcp.f32 %v6493_v1  ;;  %v6494_v43 = vadd.f32 1.0, %v10564_v26  ;;  %9094 = vmatprep.subr.bf16.mxu1 %v9093_v33 }
 0xa17   :  { %10569 = vrcp.f32 %v6491_v35  ;;  %v6492_v45 = vadd.f32 1.0, %v10566_v29  ;;  %9096 = vmatpush3.bf16.msra.mxu1 %v9095_v12 }
 0xa18   :  { %10571 = vrcp.f32 %v6494_v43  ;;  %9098 = vmatprep.subr.bf16.mxu1 %v9097_v2 }
 0xa19   :  { %10573 = vrcp.f32 %v6492_v45 }
 0xa1b   :  { %9100 = vmatpush3.bf16.msra.mxu1 %v9099_v56 }
 0xa1c   :  { %v8992_v21 = vpop.f32.mrb[184].mxu0  ;;  %v14902_v28 = vpop.f32.mrb[184].mxu1 }
 0xa1d   :  { %v6369_v31 = vadd.f32 %v8992_v21, %v14659_v13  ;;  %v6305_v37 = vpop.f32.mrb[185].mxu0  ;;  %v14905_v39 = vpop.f32.mrb[185].mxu1 }
 0xa1e   :  { %v6367_v53 = vadd.f32 %v14659_v13, %v6305_v37  ;;  %v8993_v42 = vpop.f32.mrb[186].mxu0  ;;  %v14908_v18 = vpop.f32.mrb[186].mxu1 }
 0xa1f   :  { %v7645_v12 = vmul.f32 -1.442695, %v6369_v31  ;;  %v6370_v6 = vadd.f32 %v8993_v42, %v14659_v13  ;;  %v6308_v17 = vpop.f32.mrb[187].mxu0  ;;  %v14913_v56 = vpop.f32.mrb[187].mxu1 }
 0xa20   :  { %v10568_v24 = vpop.eup %10567  ;;  %v7643_v57 = vmul.f32 -1.442695, %v6367_v53  ;;  %v6368_v34 = vadd.f32 %v14659_v13, %v6308_v17 }
 0xa21   :  { %v10570_v32 = vpop.eup %10569  ;;  %v6821_v62 = vmul.f32 %v10568_v24, %v6761_v10  ;;  %10575 = vpow2.f32 %v7645_v12  ;;  %v7646_v61 = vmul.f32 -1.442695, %v6370_v6  ;;  %v6777_v6 = vadd.f32 %v14902_v28, %v14678_v22 }
 0xa22   :  { %v10572_v49 = vpop.eup %10571  ;;  %v6819_v55 = vmul.f32 %v10570_v32, %v6753_v51  ;;  %10577 = vpow2.f32 %v7643_v57  ;;  %v7644_v60 = vmul.f32 -1.442695, %v6368_v34  ;;  %v6769_v24 = vadd.f32 %v14678_v22, %v14905_v39 }
 0xa23   :  { %v10574_v47 = vpop.eup %10573  ;;  %6853 = vst [vmem:[%s15109_s20 + $0xb0] sm:$0xff] %v6821_v62  ;;  %v6822_v41 = vmul.f32 %v10572_v49, %v6764_v48  ;;  %10579 = vpow2.f32 %v7646_v61  ;;  %v6780_v34 = vadd.f32 %v14908_v18, %v14678_v22 }
 0xa24   :  { %6851 = vst [vmem:[%s15109_s20 + $0xa0] sm:$0xff] %v6819_v55  ;;  %v6820_v7 = vmul.f32 %v10574_v47, %v6756_v3  ;;  %10581 = vpow2.f32 %v7644_v60 }
 0xa25   :  { %6854 = vst [vmem:[%s15109_s20 + $0xb8] sm:$0xff] %v6822_v41  ;;  %v9105_v40 = vpack.c.bf16 %v6822_v41, %v6821_v62  ;;  %v6772_v62 = vadd.f32 %v14678_v22, %v14913_v56 }
 0xa26   :  { %6852 = vst [vmem:[%s15109_s20 + $0xa8] sm:$0xff] %v6820_v7  ;;  %v9101_v25 = vpack.c.bf16 %v6820_v7, %v6819_v55 }
 0xa28   :  { %9102 = vmatprep.subr.bf16.mxu1 %v9101_v25 }
 0xa29   :  { %9104 = vmatpush3.bf16.msra.mxu1 %v9103_v38 }
 0xa2a   :  { %9106 = vmatprep.subr.bf16.mxu1 %v9105_v40 }
 0xa2b   :  { %v10576_v20 = vpop.eup %10575 }
 0xa2c   :  { %v10578_v11 = vpop.eup %10577  ;;  %v6497_v2 = vadd.f32 1.0, %v10576_v20 }
 0xa2d   :  { %v10580_v52 = vpop.eup %10579  ;;  %v6495_v1 = vadd.f32 1.0, %v10578_v11  ;;  %9108 = vmatpush3.bf16.msra.mxu1 %v9107_v15 }
 0xa2e   :  { %v10582_v33 = vpop.eup %10581  ;;  %10583 = vrcp.f32 %v6497_v2  ;;  %v6498_v26 = vadd.f32 1.0, %v10580_v52  ;;  %v8996_v35 = vpop.f32.mrb[188].mxu0 }
 0xa2f   :  { %v9044_v29 = vpop.f32.mrb[188].mxu1  ;;  %10585 = vrcp.f32 %v6495_v1  ;;  %v6496_v43 = vadd.f32 1.0, %v10582_v33  ;;  %v6373_v19 = vadd.f32 %v8996_v35, %v14659_v13  ;;  %v6321_v16 = vpop.f32.mrb[189].mxu0  ;;  %v10857_v35 = vmov 0.0  }
 0xa30   :  { %v6784_v38 = vpop.f32.mrb[189].mxu1  ;;  %10587 = vrcp.f32 %v6498_v26  ;;  %v6371_v45 = vadd.f32 %v14659_v13, %v6321_v16  ;;  %v8997_v21 = vpop.f32.mrb[190].mxu0  ;;  %v6793_v40 = vadd.f32 %v9044_v29, %v14678_v22  ;;  %v6968_v29 = vld [vmem:[%s15105_s16] sm:$0xf]  ;;  %v6957_v16 = vld [vmem:[%s15104_s15 + $0x30] sm:$0xff] }
 0xa31   :  { %v9045_v31 = vpop.f32.mrb[190].mxu1  ;;  %10589 = vrcp.f32 %v6496_v43  ;;  %v7649_v37 = vmul.f32 -1.442695, %v6373_v19  ;;  %v6374_v4 = vadd.f32 %v8997_v21, %v14659_v13  ;;  %v6324_v8 = vpop.f32.mrb[191].mxu0  ;;  %v6785_v20 = vadd.f32 %v14678_v22, %v6784_v38  ;;  %v6956_v43 = vld [vmem:[%s15104_s15 + $0x28] sm:$0xff]  ;;  %v6958_v38 = vld [vmem:[%s15104_s15 + $0x38] sm:$0xff] }
 0xa32   :  { %v6787_v15 = vpop.f32.mrb[191].mxu1  ;;  %v7647_v53 = vmul.f32 -1.442695, %v6371_v45  ;;  %v6372_v42 = vadd.f32 %v14659_v13, %v6324_v8  ;;  %v6796_v52 = vadd.f32 %v9045_v31, %v14678_v22  ;;  %v9135_v45 = vpack.c.bf16 %v6958_v38, %v6957_v16  ;;  %v6959_v21 = vld [vmem:[%s15104_s15 + $0x40] sm:$0xff]  ;;  %v6960_v31 = vld [vmem:[%s15104_s15 + $0x48] sm:$0xff]  ;;  %v6962_v8 = vld [vmem:[%s15104_s15 + $0x58] sm:$0xff] }
 0xa33   :  { %10591 = vpow2.f32 %v7649_v37  ;;  %v7650_v10 = vmul.f32 -1.442695, %v6374_v4  ;;  %v6788_v5 = vadd.f32 %v14678_v22, %v6787_v15  ;;  %v9138_v37 = vpack.c.bf16 %v6960_v31, %v6959_v21  ;;  %v6961_v4 = vld [vmem:[%s15104_s15 + $0x50] sm:$0xff] }
 0xa34   :  { %10593 = vpow2.f32 %v7647_v53  ;;  %v7648_v12 = vmul.f32 -1.442695, %v6372_v42  ;;  %v9141_v15 = vpack.c.bf16 %v6962_v8, %v6961_v4  ;;  %v6963_v53 = vld [vmem:[%s15104_s15 + $0x60] sm:$0xff]  ;;  %v6964_v42 = vld [vmem:[%s15104_s15 + $0x68] sm:$0xff] }
 0xa35   :  { %10595 = vpow2.f32 %v7650_v10  ;;  %v9144_v10 = vpack.c.bf16 %v6964_v42, %v6963_v53 }
 0xa36   :  { %10597 = vpow2.f32 %v7648_v12  ;;  %v6965_v12 = vld [vmem:[%s15104_s15 + $0x70] sm:$0xff] }
 0xa38   :  { %v10584_v17 = vpop.eup %10583 }
 0xa39   :  { %v10586_v51 = vpop.eup %10585  ;;  %v6825_v57 = vmul.f32 %v10584_v17, %v6777_v6  ;;  %v6966_v6 = vld [vmem:[%s15104_s15 + $0x78] sm:$0xff] }
 0xa3a   :  { %v10588_v32 = vpop.eup %10587  ;;  %v6823_v13 = vmul.f32 %v10586_v51, %v6769_v24  ;;  %v9147_v17 = vpack.c.bf16 %v6966_v6, %v6965_v12 }
 0xa3b   :  { %v10590_v48 = vpop.eup %10589  ;;  %6857 = vst [vmem:[%s15109_s20 + $0xd0] sm:$0xff] %v6825_v57  ;;  %v6826_v28 = vmul.f32 %v10588_v32, %v6780_v34 }
 0xa3c   :  { %6855 = vst [vmem:[%s15109_s20 + $0xc0] sm:$0xff] %v6823_v13  ;;  %v6824_v39 = vmul.f32 %v10590_v48, %v6772_v62  ;;  %v7127_v62 = vld [vmem:[%s15107_s18 + $0x8] sm:$0xff] }
 0xa3d   :  { %v10592_v61 = vpop.eup %10591  ;;  %6858 = vst [vmem:[%s15109_s20 + $0xd8] sm:$0xff] %v6826_v28  ;;  %v9113_v18 = vpack.c.bf16 %v6826_v28, %v6825_v57 }
 0xa3e   :  { %v10594_v49 = vpop.eup %10593  ;;  %6856 = vst [vmem:[%s15109_s20 + $0xc8] sm:$0xff] %v6824_v39  ;;  %v6501_v56 = vadd.f32 1.0, %v10592_v61  ;;  %v9109_v55 = vpack.c.bf16 %v6824_v39, %v6823_v13  ;;  %v7126_v13 = vld [vmem:[%s15107_s18] sm:$0xff] }
 0xa3f   :  { %v10596_v3 = vpop.eup %10595  ;;  %v6499_v60 = vadd.f32 1.0, %v10594_v49  ;;  %v9150_v48 = vpack.c.bf16 %v7127_v62, %v7126_v13  ;;  %v7666_v39 = vld [vmem:[%s15106_s17] ss:$0 sm:$0xff] }
 0xa40   :  { %v10598_v47 = vpop.eup %10597  ;;  %10599 = vrcp.f32 %v6501_v56  ;;  %v6502_v41 = vadd.f32 1.0, %v10596_v3  ;;  %9110 = vmatprep.subr.bf16.mxu1 %v9109_v55 }
 0xa41   :  { %10601 = vrcp.f32 %v6499_v60  ;;  %v6500_v7 = vadd.f32 1.0, %v10598_v47  ;;  %9112 = vmatpush3.bf16.msra.mxu1 %v9111_v27  ;;  %v15614_v27 = vld [vmem:[#allocation25_spill] sm:$0xff] }
 0xa42   :  { %10603 = vrcp.f32 %v6502_v41  ;;  %9114 = vmatprep.subr.bf16.mxu1 %v9113_v18  ;;  %v6869_v26 = vrot.slane %v14756_v59, %v15614_v27  ;;  %v6952_v59 = vld [vmem:[%s15104_s15 + $0x8] sm:$0xff] }
 0xa43   :  { %10605 = vrcp.f32 %v6500_v7  ;;  %v9126_v9 = vpack.c.bf16 %v6952_v59, %v6951_v63 }
 0xa44   :  { %vm6874_vm1 = vcmp.eq.s32.totalorder %v6869_v26, %v15613_v14  ;;  %v6967_v14 = vld [vmem:[%s15615_s6] sm:$0x3] }
 0xa45   :  { %9116 = vmatpush3.bf16.msra.mxu1 %v9115_v23 }
 0xa4a   :  { %v10600_v25 = vpop.eup %10599 }
 0xa4b   :  { %v10602_v11 = vpop.eup %10601  ;;  %v6829_v2 = vmul.f32 %v10600_v25, %v6793_v40 }
 0xa4c   :  { %v10604_v1 = vpop.eup %10603  ;;  %v6827_v33 = vmul.f32 %v10602_v11, %v6785_v20 }
 0xa4d   :  { %v10606_v54 = vpop.eup %10605  ;;  %6861 = vst [vmem:[%s15109_s20 + $0xf0] sm:$0xff] %v6829_v2  ;;  %v6830_v46 = vmul.f32 %v10604_v1, %v6796_v52 }
 0xa4e   :  { %6859 = vst [vmem:[%s15109_s20 + $0xe0] sm:$0xff] %v6827_v33  ;;  %v6828_v30 = vmul.f32 %v10606_v54, %v6788_v5 }
 0xa4f   :  { %6862 = vst [vmem:[%s15109_s20 + $0xf8] sm:$0xff] %v6830_v46  ;;  %v9121_v23 = vpack.c.bf16 %v6830_v46, %v6829_v2 }
 0xa50   :  { %6860 = vst [vmem:[%s15109_s20 + $0xe8] sm:$0xff] %v6828_v30  ;;  %v9117_v22 = vpack.c.bf16 %v6828_v30, %v6827_v33 }
 0xa52   :  { %9118 = vmatprep.subr.bf16.mxu1 %v9117_v22 }
 0xa53   :  { %9120 = vmatpush3.bf16.msra.mxu1 %v9119_v58  ;;  %v6955_v58 = vld [vmem:[%s15104_s15 + $0x20] sm:$0xff] }
 0xa54   :  { %9122 = vmatprep.subr.bf16.mxu1 %v9121_v23  ;;  %v9132_v19 = vpack.c.bf16 %v6956_v43, %v6955_v58 }
 0xa57   :  { %9124 = vmatpush3.bf16.msra.mxu1 %v9123_v36 }
 0xa58   :  { %9046 = vmatprep.subr.mxu1 %v10857_v35 }
 0xa5a   :  { %7663 = vmatmul.mubr.msk.f32.vlgmr.msra.gmra.mrb[192].mxu1 %vm6874_vm1, %v10856_v0  ;;  %v6954_v0 = vld [vmem:[%s15104_s15 + $0x18] sm:$0xff] }
 0xa5b   :  { %9047 = vmatpush3.msk.msra.mxu1 %vm6973_vm2, %v6968_v29  ;;  %9048 = vmatprep.mubr.msk.f32.mxu1 %vm10858_vm3, %v10857_v35  ;;  %v9129_v36 = vpack.c.bf16 %v6954_v0, %v6953_v50 }
 0xa5c   :  { %9125 = vmatprep.subr.bf16.mxu1 %v10859_v44 }
 0xa5e   :  { %9049 = vmatmul.mubr.msk.f32.vlgmr.msra.gmra.mrb[194].mxu1 %vm6969_vm4, %v6967_v14 }
 0xa5f   :  { %9127 = vmatpush3.bf16.msra.mxu1 %v9126_v9  ;;  %9083 = vmatprep.mubr.msk.f32.mxu1 %vm10858_vm3, %v10857_v35 }
 0xa60   :  { %9128 = vmatprep.subr.bf16.mxu1 %v10859_v44 }
 0xa63   :  { %9130 = vmatpush3.bf16.msra.mxu1 %v9129_v36 }
 0xa64   :  { %9131 = vmatprep.subr.bf16.mxu1 %v10859_v44 }
 0xa67   :  { %9133 = vmatpush3.bf16.msra.mxu1 %v9132_v19 }
 0xa68   :  { %9134 = vmatprep.subr.bf16.mxu1 %v10859_v44 }
 0xa6b   :  { %9136 = vmatpush3.bf16.msra.mxu1 %v9135_v45 }
 0xa6c   :  { %9137 = vmatprep.subr.bf16.mxu1 %v10859_v44 }
 0xa6f   :  { %9139 = vmatpush3.bf16.msra.mxu1 %v9138_v37 }
 0xa70   :  { %9140 = vmatprep.subr.bf16.mxu1 %v10859_v44 }
 0xa73   :  { %9142 = vmatpush3.bf16.msra.mxu1 %v9141_v15 }
 0xa74   :  { %9143 = vmatprep.subr.bf16.mxu1 %v10859_v44 }
 0xa77   :  { %9145 = vmatpush3.bf16.msra.mxu1 %v9144_v10 }
 0xa78   :  { %9146 = vmatprep.subr.bf16.mxu1 %v10859_v44 }
 0xa7b   :  { %9148 = vmatpush3.bf16.msra.mxu1 %v9147_v17 }
 0xa7c   :  { %9149 = vmatprep.subr.bf16.mxu1 %v10859_v44 }
 0xb2d   :  { %v8589_v24 = vpop.f32.mrb[192].mxu1 }
 0xb2e   :  { %v8590_v51 = vpop.f32.mrb[193].mxu1 }
 0xb2f   :  { %v8591_v57 = vadd.f32 %v8590_v51, %v8589_v24 }
 0xb31   :  { %6950 = vst [vmem:[#allocation2] sm:$0x3] %v8591_v57  ;;  %9084 = vmatmul.mubr.f32.vlgmr.msra.gmra.mrb[196].mxu1 %v8591_v57  ;;  %v7043_v34 = vpop.f32.mrb[194].mxu1 }
 0xb32   :  { %v9050_v32 = vpop.f32.mrb[195].mxu1  ;;  %9090 = vmatprep.mubr.msk.f32.mxu1 %vm10858_vm3, %v10857_v35  ;;  %9151 = vmatpush3.bf16.msra.mxu1 %v9150_v48 }
 0xc04   :  { %v7113_v28 = vpop.f32.mrb[196].mxu1 }
 0xc05   :  { %v7114_v61 = vadd.f32 %v7113_v28, %v7043_v34  ;;  %v9085_v18 = vpop.f32.mrb[197].mxu1 }
 0xc07   :  { %v7124_v49 = vadd.f32 %v7666_v39, %v7114_v61 }
 0xc09   :  { %v7125_v56 = vmax.f32 %v7124_v49, 0.0 }
 0xc0b   :  { %9091 = vmatmul.mubr.msk.f32.vlgmr.msra.gmra.mrb[198].mxu1 %vm7135_vm5, %v7125_v56 }
 0xc0c   :  { %10818 = shalt.err (!%p10815_p4)
}
 0xc0d   :  { %s10819_s17 = scalar_lea.hbm %s15110_s21, 32 }
 0xc0e   :  { %p10820_p5 = scmp.ne.s32.totalorder %s15110_s21, %s10819_s17  ;;  %p10823_p6 = scmp.lt.u32.totalorder %s10819_s17, %s15110_s21 }
 0xc10   :  { %p10825_p7 = pnand %p10823_p6, %p10820_p5 }
 0xc12   :  { %10828 = shalt.err (!%p10825_p7)
}
 0xc13   :  { %7221 = dma.vmem_to_hbm [thread:$0]  %s7219_s4, 32, %s15110_s21, [#allocation3]   ;;  %v7667_v55 = vld [vmem:[%s15108_s19] ss:$0 sm:$0xff] }
 0xc14   :  { %s10861_s5 = smov [#allocation4]  }
 0xc15   :  { %s7228_s30 = sshll.u32 %s10861_s5, 4  ;;  %s7229_s30 = int_to_ptr.vmem [resolvable:$true] %s7228_s30 }
 0xc16   :  { %s10829_s24 = scalar_lea.vmem %s7229_s30, 32  ;;  %p10834_p9 = scmp.lt.s32.totalorder %s7229_s30, %s7229_s30 }
 0xc17   :  { %p10830_p8 = scmp.ne.s32.totalorder %s7229_s30, %s10829_s24  ;;  %p10835_p10 = scmp.lt.s32.totalorder %s10829_s24, %s10829_s24 }
 0xc19   :  { %p10836_p11 = por %p10835_p10, %p10834_p9 }
 0xc1b   :  { %p10837_p12 = pnand %p10836_p11, %p10830_p8 }
 0xcde   :  { %v7205_v3 = vpop.f32.mrb[198].mxu1 }
 0xcdf   :  { %v7206_v60 = vadd.f32 %v7667_v55, %v7205_v3  ;;  %v9092_v47 = vpop.f32.mrb[199].mxu1 }
 0xce1   :  { %7209 = vst [vmem:[#allocation4] sm:$0x3] %v7206_v60 }
 0xce2   :  { %10840 = shalt.err (!%p10837_p12)
}
 0xce3   :  { %s10841_s6 = scalar_lea.hbm %s15111_s22, 32 }
 0xce4   :  { %p10842_p13 = scmp.ne.s32.totalorder %s15111_s22, %s10841_s6  ;;  %p10845_p0 = scmp.lt.u32.totalorder %s10841_s6, %s15111_s22 }
 0xce6   :  { %p10847_p1 = pnand %p10845_p0, %p10842_p13 }
 0xce8   :  { %10850 = shalt.err (!%p10847_p1)
}
 0xce9   :  { %7231 = dma.vmem_to_hbm [thread:$0]  %s7229_s30, 32, %s15111_s22, [#allocation5]  }
 0xcea   :  { %10851 = dma.done.wait [#allocation3], 32  }
 0xceb   :  { %10852 = vsyncadd [#allocation3], 4294967264 }
 0xcec   :  { %10853 = dma.done.wait [#allocation5], 32  }
 0xced   :  { %10854 = vsyncadd [#allocation5], 4294967264 }
 0xcee   :  { %7240 = vsyncpa [#allocation3], 1 }
 0xcef   :  { %7241 = vsyncpa [#allocation5], 1 }

</bundles_post_ra>
